<compile_context>
chip_gen: v7x
topology: tpu7x:2x2x1
jax: 0.10.0
libtpu: 0.0.40
codegen_flags: <defaults>
</compile_context>

<pallas_src>
import functools

import numpy as np
import jax
import jax.numpy as jnp
from jax.experimental import pallas as pl
from jax.experimental.pallas import tpu as pltpu


def _gru_kernel(gx_ref, m_ref, s0_ref, uzr_ref, us_ref, y_ref, s_scr,
                *, hidden, time_chunk, backward):
    H = hidden
    w_dtype = uzr_ref.dtype

    # First time-chunk of this batch shard: initialize the carried state.
    # (Weights are pipelined inputs with a constant block index; Pallas
    # prefetches them once in the prologue — no manual DMA / wait here.)
    @pl.when(pl.program_id(1) == 0)
    def _init():
        s_scr[...] = s0_ref[...]

    s = s_scr[...]                                     # (TB, H) carried state

    steps = range(time_chunk - 1, -1, -1) if backward else range(time_chunk)
    for j in steps:                                    # static, fully unrolled
        m_j = m_ref[:, j, :]                           # (TB, 1) broadcasts over H

        # z/r gates: fused recurrent matmul against [Uz^T | Ur^T].
        zr = jax.nn.sigmoid(
            gx_ref[:, j, :2 * H]
            + jnp.dot(s.astype(w_dtype), uzr_ref[...],
                      preferred_element_type=jnp.float32))
        z = zr[:, :H]
        r = zr[:, H:]

        s_hat = jnp.maximum(
            gx_ref[:, j, 2 * H:]
            + jnp.dot((s * r).astype(w_dtype), us_ref[...],
                      preferred_element_type=jnp.float32),
            0.0)

        # (1-z)*s + z*s_hat blended with mask m == s + (m*z)*(s_hat - s).
        s = s + (m_j * z) * (s_hat - s)
        y_ref[:, j, :] = s.astype(y_ref.dtype)

    s_scr[...] = s


def _ceil_to(v, m):
    return ((v + m - 1) // m) * m


@functools.partial(jax.jit,
                   static_argnames=("backward", "time_chunk",
                                    "num_batch_shards", "param_dtype",
                                    "gx_dtype", "out_dtype"))
def gru_forward(x, mask, s0, params, backward=False, time_chunk=32,
                num_batch_shards=1, param_dtype=jnp.bfloat16,
                gx_dtype=jnp.float32, out_dtype=jnp.float32):
    """Pallas GRU. x:(B,T,D), mask:(B,T,1), s0:(B,H). Returns (B,T,H).

    num_batch_shards: keep 1 on v5e/v6e (single TensorCore); use 2 on v7x.
    param_dtype: recurrent-weight dtype (bf16 default, f32 accumulation).
    gx_dtype / out_dtype: HBM stream dtypes for the hoisted input projection
    and the output (bf16 halves those streams; biggest relative win on v5e).
    """
    B, T, D = x.shape
    H = s0.shape[-1]

    # Hoist input projections + biases: one big matmul outside the recurrence.
    # F.linear(x, W) == x @ W.T
    w_cat = jnp.concatenate([params["Wz"].T, params["Wr"].T, params["Ws"].T],
                            axis=1)                                   # (D, 3H)
    b_cat = jnp.concatenate([params["bz"], params["br"], params["bs"]], axis=0)
    gx = (jnp.dot(x, w_cat, preferred_element_type=jnp.float32)
          + b_cat).astype(gx_dtype)                                   # (B,T,3H)

    # Fuse the z/r recurrent weights into one (H, 2H) matrix; keep Us separate.
    uzr = jnp.concatenate([params["Uz"].T, params["Ur"].T],
                          axis=1).astype(param_dtype)
    us = params["Us"].T.astype(param_dtype)

    # Pad batch to a sublane multiple and time to a multiple of the chunk.
    tc = _ceil_to(max(int(time_chunk), 1), 8)
    Bp = _ceil_to(B, 8)
    Tp = _ceil_to(T, tc)
    nt = Tp // tc

    nb = int(num_batch_shards)
    if nb < 1 or Bp % (8 * nb) != 0:
        nb = 1
    tb = Bp // nb

    gx = jnp.pad(gx, ((0, Bp - B), (0, Tp - T), (0, 0)))
    mask_p = jnp.pad(mask.astype(jnp.float32), ((0, Bp - B), (0, Tp - T), (0, 0)))
    s0_p = jnp.pad(s0.astype(jnp.float32), ((0, Bp - B), (0, 0)))

    if backward:
        tmap = lambda b, t: (b, nt - 1 - t, 0)
    else:
        tmap = lambda b, t: (b, t, 0)

    grid_spec = pltpu.PrefetchScalarGridSpec(
        num_scalar_prefetch=0,
        grid=(nb, nt),
        in_specs=[
            pl.BlockSpec((tb, tc, 3 * H), tmap),                 # gx (x-proj + bias)
            pl.BlockSpec((tb, tc, 1), tmap),                     # mask
            pl.BlockSpec((tb, H), lambda b, t: (b, 0)),          # s0
            pl.BlockSpec((H, 2 * H), lambda b, t: (0, 0)),       # Uzr (fetched once)
            pl.BlockSpec((H, H), lambda b, t: (0, 0)),           # Us  (fetched once)
        ],
        out_specs=pl.BlockSpec((tb, tc, H), tmap),
        scratch_shapes=[
            pltpu.VMEM((tb, H), jnp.float32),                    # carried hidden state
        ],
    )

    # Generation-aware VMEM budget.
    wbytes = np.dtype(param_dtype).itemsize
    gxbytes = np.dtype(jnp.dtype(gx_dtype)).itemsize
    obytes = np.dtype(jnp.dtype(out_dtype)).itemsize
    vmem_est = (2 * (H * 2 * H + H * H) * wbytes         # weights, double-buffered
                + 2 * tb * tc * 3 * H * gxbytes          # gx tiles
                + 2 * tb * _ceil_to(tc, 8) * 128 * 4     # mask tiles (lane-padded)
                + 2 * tb * H * 4                         # s0 tiles
                + 2 * tb * tc * H * obytes               # output tiles
                + tb * H * 4)                            # state scratch
    try:
        vmem_cap = int(pltpu.get_tpu_info().vmem_capacity_bytes)
    except Exception:
        vmem_cap = 64 * 2 ** 20
    vmem_limit = int(min(max(2 * vmem_est, 32 * 2 ** 20), int(0.8 * vmem_cap)))

    kernel = functools.partial(_gru_kernel, hidden=H, time_chunk=tc,
                               backward=bool(backward))
    y = pl.pallas_call(
        kernel,
        out_shape=jax.ShapeDtypeStruct((Bp, Tp, H), out_dtype),
        grid_spec=grid_spec,
        compiler_params=pltpu.CompilerParams(
            dimension_semantics=("parallel", "arbitrary"),
            vmem_limit_bytes=vmem_limit),
    )(gx, mask_p, s0_p, uzr, us)

    # Dropout(p=0) in the reference module is the identity.
    return y[:B, :T, :]


def _init_params(key, input_size, hidden_size):
    stdv = 1.0 / jnp.sqrt(jnp.float32(hidden_size))
    names_shapes = [
        ("Ws", (hidden_size, input_size)),
        ("Wr", (hidden_size, input_size)),
        ("Wz", (hidden_size, input_size)),
        ("Us", (hidden_size, hidden_size)),
        ("Ur", (hidden_size, hidden_size)),
        ("Uz", (hidden_size, hidden_size)),
        ("bs", (hidden_size,)),
        ("br", (hidden_size,)),
        ("bz", (hidden_size,)),
    ]
    params = {}
    keys = jax.random.split(key, len(names_shapes))
    for k, (name, shape) in zip(keys, names_shapes):
        params[name] = jax.random.uniform(
            k, shape, jnp.float32, minval=-stdv, maxval=stdv)
    return params


def _gru_reference(x, mask, s0, params, backward=False):
    """Pure-JAX reference mirroring the PyTorch loop, for sanity checking."""
    B, T, D = x.shape
    s = s0
    outs = [None] * T
    order = range(T - 1, -1, -1) if backward else range(T)
    for t in order:
        xt = x[:, t, :]
        mt = mask[:, t, :]
        z = jax.nn.sigmoid(xt @ params["Wz"].T + s @ params["Uz"].T + params["bz"])
        r = jax.nn.sigmoid(xt @ params["Wr"].T + s @ params["Ur"].T + params["br"])
        s_hat = jnp.maximum(
            xt @ params["Ws"].T + (s * r) @ params["Us"].T + params["bs"], 0.0)
        s_new = (1 - z) * s + z * s_hat
        s = s * (1 - mt) + s_new * mt
        outs[t] = s
    return jnp.stack(outs, axis=1)


if __name__ == "__main__":
    # Small but vreg-friendly shapes: B multiple of 8, H multiple of 128.
    B, T, D, H = 16, 16, 16, 128
    key = jax.random.PRNGKey(0)
    kx, km, kp = jax.random.split(key, 3)

    x = jax.random.normal(kx, (B, T, D), jnp.float32)
    mask = (jax.random.uniform(km, (B, T, 1)) > 0.2).astype(jnp.float32)
    s0 = jnp.zeros((B, H), jnp.float32)   # PyTorch last_s=None case
    params = _init_params(kp, D, H)

    y_ref_f = _gru_reference(x, mask, s0, params, backward=False)
    y_ref_b = _gru_reference(x, mask, s0, params, backward=True)

    # 1) f32 recurrent weights: exact-semantics check (tight tolerance).
    y_f32 = gru_forward(x, mask, s0, params, backward=False,
                        time_chunk=8, param_dtype=jnp.float32)
    y_f32 = jax.block_until_ready(y_f32)
    assert y_f32.shape == (B, T, H)
    assert jnp.allclose(y_f32, y_ref_f, atol=2e-4, rtol=2e-4), (
        float(jnp.max(jnp.abs(y_f32 - y_ref_f))))

    # 2) Default config: bf16 recurrent weights, time_chunk=32 (looser tol).
    y_fwd = jax.block_until_ready(
        gru_forward(x, mask, s0, params, backward=False))
    assert y_fwd.shape == (B, T, H)
    assert jnp.allclose(y_fwd, y_ref_f, atol=3e-2, rtol=3e-2), (
        float(jnp.max(jnp.abs(y_fwd - y_ref_f))))

    # 3) Backward direction, default config.
    y_bwd = jax.block_until_ready(
        gru_forward(x, mask, s0, params, backward=True))
    assert jnp.allclose(y_bwd, y_ref_b, atol=3e-2, rtol=3e-2), (
        float(jnp.max(jnp.abs(y_bwd - y_ref_b))))

    print("KERNEL_OK")
</pallas_src>

<mosaic_0001>
module attributes {stable_mosaic.version = 11 : i64} {
  func.func @_gru_kernel(%arg0: i32, %arg1: i32, %arg2: memref<16x8x384xf32, #tpu.memory_space<vmem>>, %arg3: memref<16x8x1xf32, #tpu.memory_space<vmem>>, %arg4: memref<16x128xf32, #tpu.memory_space<vmem>>, %arg5: memref<128x256xf32, #tpu.memory_space<vmem>>, %arg6: memref<128x128xf32, #tpu.memory_space<vmem>>, %arg7: memref<16x8x128xf32, #tpu.memory_space<vmem>>, %arg8: memref<16x128xf32, #tpu.memory_space<vmem>>) attributes {dimension_semantics = [#tpu.dimension_semantics<parallel>, #tpu.dimension_semantics<arbitrary>], iteration_bounds = array<i64: 1, 2>, scalar_prefetch = 0 : i64, scratch_operands = 1 : i64, tpu.core_type = #tpu.core_type<tc>, window_params = [{transform_indices = @transform_0, window_bounds = array<i64: 16, 8, 384>}, {transform_indices = @transform_1, window_bounds = array<i64: 16, 8, 1>}, {transform_indices = @transform_2, window_bounds = array<i64: 16, 128>}, {pipeline_mode = #tpu.pipeline_mode<synchronous>, transform_indices = @transform_3, window_bounds = array<i64: 128, 256>}, {pipeline_mode = #tpu.pipeline_mode<synchronous>, transform_indices = @transform_4, window_bounds = array<i64: 128, 128>}, {transform_indices = @transform_5, window_bounds = array<i64: 16, 8, 128>}]} {
    %c0_i32 = arith.constant 0 : i32
    %0 = arith.cmpi eq, %arg1, %c0_i32 : i32
    %1 = arith.extui %0 : i1 to i32
    %c0_i32_0 = arith.constant 0 : i32
    %2 = arith.cmpi ne, %1, %c0_i32_0 : i32
    scf.if %2 {
      %c0_155 = arith.constant 0 : index
      %c0_156 = arith.constant 0 : index
      %245 = vector.load %arg4[%c0_155, %c0_156] : memref<16x128xf32, #tpu.memory_space<vmem>>, vector<16x128xf32>
      %c0_157 = arith.constant 0 : index
      %c0_158 = arith.constant 0 : index
      %246 = vector.load %arg8[%c0_157, %c0_158] : memref<16x128xf32, #tpu.memory_space<vmem>>, vector<16x128xf32>
      tpu.vector_store %arg8[%c0_157, %c0_158], %245 {strides = array<i32>} : memref<16x128xf32, #tpu.memory_space<vmem>>, vector<16x128xf32>,
    } else {
    }
    %c0 = arith.constant 0 : index
    %c0_1 = arith.constant 0 : index
    %3 = vector.load %arg8[%c0, %c0_1] : memref<16x128xf32, #tpu.memory_space<vmem>>, vector<16x128xf32>
    %c0_2 = arith.constant 0 : index
    %c0_3 = arith.constant 0 : index
    %c0_4 = arith.constant 0 : index
    %4 = vector.load %arg3[%c0_2, %c0_3, %c0_4] : memref<16x8x1xf32, #tpu.memory_space<vmem>>, vector<16x1x1xf32>
    %5 = vector.shape_cast %4 : vector<16x1x1xf32> to vector<16x1xf32>
    %c0_5 = arith.constant 0 : index
    %c0_6 = arith.constant 0 : index
    %c0_7 = arith.constant 0 : index
    %6 = vector.load %arg2[%c0_5, %c0_6, %c0_7] : memref<16x8x384xf32, #tpu.memory_space<vmem>>, vector<16x1x256xf32>
    %7 = vector.shape_cast %6 : vector<16x1x256xf32> to vector<16x256xf32>
    %c0_8 = arith.constant 0 : index
    %c0_9 = arith.constant 0 : index
    %8 = vector.load %arg5[%c0_8, %c0_9] : memref<128x256xf32, #tpu.memory_space<vmem>>, vector<128x256xf32>
    %cst = arith.constant dense<0.000000e+00> : vector<16x256xf32>
    %9 = tpu.matmul %3, %8, %cst {dimension_numbers = #tpu.dot_dimension_numbers<[1], [0], [0], [1], [0, 0, 1, 1], [], []>} : vector<16x128xf32>, vector<128x256xf32>, vector<16x256xf32> -> vector<16x256xf32>
    %10 = arith.addf %7, %9 : vector<16x256xf32>
    %11 = arith.negf %10 : vector<16x256xf32>
    %12 = math.exp %11 : vector<16x256xf32>
    %cst_10 = arith.constant 1.000000e+00 : f32
    %13 = vector.broadcast %cst_10 : f32 to vector<16x256xf32>
    %14 = arith.addf %13, %12 : vector<16x256xf32>
    %15 = arith.divf %13, %14 : vector<16x256xf32>
    %16 = vector.extract_strided_slice %15 {offsets = [0, 0], sizes = [16, 128], strides = [1, 1]} : vector<16x256xf32> to vector<16x128xf32>
    %17 = vector.extract_strided_slice %15 {offsets = [0, 128], sizes = [16, 128], strides = [1, 1]} : vector<16x256xf32> to vector<16x128xf32>
    %c0_11 = arith.constant 0 : index
    %c0_12 = arith.constant 0 : index
    %c256 = arith.constant 256 : index
    %18 = vector.load %arg2[%c0_11, %c0_12, %c256] : memref<16x8x384xf32, #tpu.memory_space<vmem>>, vector<16x1x128xf32>
    %19 = vector.shape_cast %18 : vector<16x1x128xf32> to vector<16x128xf32>
    %20 = arith.mulf %3, %17 : vector<16x128xf32>
    %c0_13 = arith.constant 0 : index
    %c0_14 = arith.constant 0 : index
    %21 = vector.load %arg6[%c0_13, %c0_14] : memref<128x128xf32, #tpu.memory_space<vmem>>, vector<128x128xf32>
    %cst_15 = arith.constant dense<0.000000e+00> : vector<16x128xf32>
    %22 = tpu.matmul %20, %21, %cst_15 {dimension_numbers = #tpu.dot_dimension_numbers<[1], [0], [0], [1], [0, 0, 1, 1], [], []>} : vector<16x128xf32>, vector<128x128xf32>, vector<16x128xf32> -> vector<16x128xf32>
    %23 = arith.addf %19, %22 : vector<16x128xf32>
    %cst_16 = arith.constant 0.000000e+00 : f32
    %24 = vector.broadcast %cst_16 : f32 to vector<16x128xf32>
    %25 = arith.maximumf %23, %24 : vector<16x128xf32>
    %26 = vector.broadcast %5 : vector<16x1xf32> to vector<16x128xf32>
    %27 = arith.mulf %26, %16 : vector<16x128xf32>
    %28 = arith.subf %25, %3 : vector<16x128xf32>
    %29 = arith.mulf %27, %28 : vector<16x128xf32>
    %30 = arith.addf %3, %29 : vector<16x128xf32>
    %c0_17 = arith.constant 0 : index
    %c0_18 = arith.constant 0 : index
    %c0_19 = arith.constant 0 : index
    %31 = vector.load %arg7[%c0_17, %c0_18, %c0_19] : memref<16x8x128xf32, #tpu.memory_space<vmem>>, vector<16x1x128xf32>
    %32 = vector.shape_cast %31 : vector<16x1x128xf32> to vector<16x128xf32>
    %33 = vector.shape_cast %30 : vector<16x128xf32> to vector<16x1x128xf32>
    tpu.vector_store %arg7[%c0_17, %c0_18, %c0_19], %33 {strides = array<i32>} : memref<16x8x128xf32, #tpu.memory_space<vmem>>, vector<16x1x128xf32>,
    %c0_20 = arith.constant 0 : index
    %c1 = arith.constant 1 : index
    %c0_21 = arith.constant 0 : index
    %34 = vector.load %arg3[%c0_20, %c1, %c0_21] : memref<16x8x1xf32, #tpu.memory_space<vmem>>, vector<16x1x1xf32>
    %35 = vector.shape_cast %34 : vector<16x1x1xf32> to vector<16x1xf32>
    %c0_22 = arith.constant 0 : index
    %c1_23 = arith.constant 1 : index
    %c0_24 = arith.constant 0 : index
    %36 = vector.load %arg2[%c0_22, %c1_23, %c0_24] : memref<16x8x384xf32, #tpu.memory_space<vmem>>, vector<16x1x256xf32>
    %37 = vector.shape_cast %36 : vector<16x1x256xf32> to vector<16x256xf32>
    %c0_25 = arith.constant 0 : index
    %c0_26 = arith.constant 0 : index
    %38 = vector.load %arg5[%c0_25, %c0_26] : memref<128x256xf32, #tpu.memory_space<vmem>>, vector<128x256xf32>
    %cst_27 = arith.constant dense<0.000000e+00> : vector<16x256xf32>
    %39 = tpu.matmul %30, %38, %cst_27 {dimension_numbers = #tpu.dot_dimension_numbers<[1], [0], [0], [1], [0, 0, 1, 1], [], []>} : vector<16x128xf32>, vector<128x256xf32>, vector<16x256xf32> -> vector<16x256xf32>
    %40 = arith.addf %37, %39 : vector<16x256xf32>
    %41 = arith.negf %40 : vector<16x256xf32>
    %42 = math.exp %41 : vector<16x256xf32>
    %cst_28 = arith.constant 1.000000e+00 : f32
    %43 = vector.broadcast %cst_28 : f32 to vector<16x256xf32>
    %44 = arith.addf %43, %42 : vector<16x256xf32>
    %45 = arith.divf %43, %44 : vector<16x256xf32>
    %46 = vector.extract_strided_slice %45 {offsets = [0, 0], sizes = [16, 128], strides = [1, 1]} : vector<16x256xf32> to vector<16x128xf32>
    %47 = vector.extract_strided_slice %45 {offsets = [0, 128], sizes = [16, 128], strides = [1, 1]} : vector<16x256xf32> to vector<16x128xf32>
    %c0_29 = arith.constant 0 : index
    %c1_30 = arith.constant 1 : index
    %c256_31 = arith.constant 256 : index
    %48 = vector.load %arg2[%c0_29, %c1_30, %c256_31] : memref<16x8x384xf32, #tpu.memory_space<vmem>>, vector<16x1x128xf32>
    %49 = vector.shape_cast %48 : vector<16x1x128xf32> to vector<16x128xf32>
    %50 = arith.mulf %30, %47 : vector<16x128xf32>
    %c0_32 = arith.constant 0 : index
    %c0_33 = arith.constant 0 : index
    %51 = vector.load %arg6[%c0_32, %c0_33] : memref<128x128xf32, #tpu.memory_space<vmem>>, vector<128x128xf32>
    %cst_34 = arith.constant dense<0.000000e+00> : vector<16x128xf32>
    %52 = tpu.matmul %50, %51, %cst_34 {dimension_numbers = #tpu.dot_dimension_numbers<[1], [0], [0], [1], [0, 0, 1, 1], [], []>} : vector<16x128xf32>, vector<128x128xf32>, vector<16x128xf32> -> vector<16x128xf32>
    %53 = arith.addf %49, %52 : vector<16x128xf32>
    %cst_35 = arith.constant 0.000000e+00 : f32
    %54 = vector.broadcast %cst_35 : f32 to vector<16x128xf32>
    %55 = arith.maximumf %53, %54 : vector<16x128xf32>
    %56 = vector.broadcast %35 : vector<16x1xf32> to vector<16x128xf32>
    %57 = arith.mulf %56, %46 : vector<16x128xf32>
    %58 = arith.subf %55, %30 : vector<16x128xf32>
    %59 = arith.mulf %57, %58 : vector<16x128xf32>
    %60 = arith.addf %30, %59 : vector<16x128xf32>
    %c0_36 = arith.constant 0 : index
    %c1_37 = arith.constant 1 : index
    %c0_38 = arith.constant 0 : index
    %61 = vector.load %arg7[%c0_36, %c1_37, %c0_38] : memref<16x8x128xf32, #tpu.memory_space<vmem>>, vector<16x1x128xf32>
    %62 = vector.shape_cast %61 : vector<16x1x128xf32> to vector<16x128xf32>
    %63 = vector.shape_cast %60 : vector<16x128xf32> to vector<16x1x128xf32>
    tpu.vector_store %arg7[%c0_36, %c1_37, %c0_38], %63 {strides = array<i32>} : memref<16x8x128xf32, #tpu.memory_space<vmem>>, vector<16x1x128xf32>,
    %c0_39 = arith.constant 0 : index
    %c2 = arith.constant 2 : index
    %c0_40 = arith.constant 0 : index
    %64 = vector.load %arg3[%c0_39, %c2, %c0_40] : memref<16x8x1xf32, #tpu.memory_space<vmem>>, vector<16x1x1xf32>
    %65 = vector.shape_cast %64 : vector<16x1x1xf32> to vector<16x1xf32>
    %c0_41 = arith.constant 0 : index
    %c2_42 = arith.constant 2 : index
    %c0_43 = arith.constant 0 : index
    %66 = vector.load %arg2[%c0_41, %c2_42, %c0_43] : memref<16x8x384xf32, #tpu.memory_space<vmem>>, vector<16x1x256xf32>
    %67 = vector.shape_cast %66 : vector<16x1x256xf32> to vector<16x256xf32>
    %c0_44 = arith.constant 0 : index
    %c0_45 = arith.constant 0 : index
    %68 = vector.load %arg5[%c0_44, %c0_45] : memref<128x256xf32, #tpu.memory_space<vmem>>, vector<128x256xf32>
    %cst_46 = arith.constant dense<0.000000e+00> : vector<16x256xf32>
    %69 = tpu.matmul %60, %68, %cst_46 {dimension_numbers = #tpu.dot_dimension_numbers<[1], [0], [0], [1], [0, 0, 1, 1], [], []>} : vector<16x128xf32>, vector<128x256xf32>, vector<16x256xf32> -> vector<16x256xf32>
    %70 = arith.addf %67, %69 : vector<16x256xf32>
    %71 = arith.negf %70 : vector<16x256xf32>
    %72 = math.exp %71 : vector<16x256xf32>
    %cst_47 = arith.constant 1.000000e+00 : f32
    %73 = vector.broadcast %cst_47 : f32 to vector<16x256xf32>
    %74 = arith.addf %73, %72 : vector<16x256xf32>
    %75 = arith.divf %73, %74 : vector<16x256xf32>
    %76 = vector.extract_strided_slice %75 {offsets = [0, 0], sizes = [16, 128], strides = [1, 1]} : vector<16x256xf32> to vector<16x128xf32>
    %77 = vector.extract_strided_slice %75 {offsets = [0, 128], sizes = [16, 128], strides = [1, 1]} : vector<16x256xf32> to vector<16x128xf32>
    %c0_48 = arith.constant 0 : index
    %c2_49 = arith.constant 2 : index
    %c256_50 = arith.constant 256 : index
    %78 = vector.load %arg2[%c0_48, %c2_49, %c256_50] : memref<16x8x384xf32, #tpu.memory_space<vmem>>, vector<16x1x128xf32>
    %79 = vector.shape_cast %78 : vector<16x1x128xf32> to vector<16x128xf32>
    %80 = arith.mulf %60, %77 : vector<16x128xf32>
    %c0_51 = arith.constant 0 : index
    %c0_52 = arith.constant 0 : index
    %81 = vector.load %arg6[%c0_51, %c0_52] : memref<128x128xf32, #tpu.memory_space<vmem>>, vector<128x128xf32>
    %cst_53 = arith.constant dense<0.000000e+00> : vector<16x128xf32>
    %82 = tpu.matmul %80, %81, %cst_53 {dimension_numbers = #tpu.dot_dimension_numbers<[1], [0], [0], [1], [0, 0, 1, 1], [], []>} : vector<16x128xf32>, vector<128x128xf32>, vector<16x128xf32> -> vector<16x128xf32>
    %83 = arith.addf %79, %82 : vector<16x128xf32>
    %cst_54 = arith.constant 0.000000e+00 : f32
    %84 = vector.broadcast %cst_54 : f32 to vector<16x128xf32>
    %85 = arith.maximumf %83, %84 : vector<16x128xf32>
    %86 = vector.broadcast %65 : vector<16x1xf32> to vector<16x128xf32>
    %87 = arith.mulf %86, %76 : vector<16x128xf32>
    %88 = arith.subf %85, %60 : vector<16x128xf32>
    %89 = arith.mulf %87, %88 : vector<16x128xf32>
    %90 = arith.addf %60, %89 : vector<16x128xf32>
    %c0_55 = arith.constant 0 : index
    %c2_56 = arith.constant 2 : index
    %c0_57 = arith.constant 0 : index
    %91 = vector.load %arg7[%c0_55, %c2_56, %c0_57] : memref<16x8x128xf32, #tpu.memory_space<vmem>>, vector<16x1x128xf32>
    %92 = vector.shape_cast %91 : vector<16x1x128xf32> to vector<16x128xf32>
    %93 = vector.shape_cast %90 : vector<16x128xf32> to vector<16x1x128xf32>
    tpu.vector_store %arg7[%c0_55, %c2_56, %c0_57], %93 {strides = array<i32>} : memref<16x8x128xf32, #tpu.memory_space<vmem>>, vector<16x1x128xf32>,
    %c0_58 = arith.constant 0 : index
    %c3 = arith.constant 3 : index
    %c0_59 = arith.constant 0 : index
    %94 = vector.load %arg3[%c0_58, %c3, %c0_59] : memref<16x8x1xf32, #tpu.memory_space<vmem>>, vector<16x1x1xf32>
    %95 = vector.shape_cast %94 : vector<16x1x1xf32> to vector<16x1xf32>
    %c0_60 = arith.constant 0 : index
    %c3_61 = arith.constant 3 : index
    %c0_62 = arith.constant 0 : index
    %96 = vector.load %arg2[%c0_60, %c3_61, %c0_62] : memref<16x8x384xf32, #tpu.memory_space<vmem>>, vector<16x1x256xf32>
    %97 = vector.shape_cast %96 : vector<16x1x256xf32> to vector<16x256xf32>
    %c0_63 = arith.constant 0 : index
    %c0_64 = arith.constant 0 : index
    %98 = vector.load %arg5[%c0_63, %c0_64] : memref<128x256xf32, #tpu.memory_space<vmem>>, vector<128x256xf32>
    %cst_65 = arith.constant dense<0.000000e+00> : vector<16x256xf32>
    %99 = tpu.matmul %90, %98, %cst_65 {dimension_numbers = #tpu.dot_dimension_numbers<[1], [0], [0], [1], [0, 0, 1, 1], [], []>} : vector<16x128xf32>, vector<128x256xf32>, vector<16x256xf32> -> vector<16x256xf32>
    %100 = arith.addf %97, %99 : vector<16x256xf32>
    %101 = arith.negf %100 : vector<16x256xf32>
    %102 = math.exp %101 : vector<16x256xf32>
    %cst_66 = arith.constant 1.000000e+00 : f32
    %103 = vector.broadcast %cst_66 : f32 to vector<16x256xf32>
    %104 = arith.addf %103, %102 : vector<16x256xf32>
    %105 = arith.divf %103, %104 : vector<16x256xf32>
    %106 = vector.extract_strided_slice %105 {offsets = [0, 0], sizes = [16, 128], strides = [1, 1]} : vector<16x256xf32> to vector<16x128xf32>
    %107 = vector.extract_strided_slice %105 {offsets = [0, 128], sizes = [16, 128], strides = [1, 1]} : vector<16x256xf32> to vector<16x128xf32>
    %c0_67 = arith.constant 0 : index
    %c3_68 = arith.constant 3 : index
    %c256_69 = arith.constant 256 : index
    %108 = vector.load %arg2[%c0_67, %c3_68, %c256_69] : memref<16x8x384xf32, #tpu.memory_space<vmem>>, vector<16x1x128xf32>
    %109 = vector.shape_cast %108 : vector<16x1x128xf32> to vector<16x128xf32>
    %110 = arith.mulf %90, %107 : vector<16x128xf32>
    %c0_70 = arith.constant 0 : index
    %c0_71 = arith.constant 0 : index
    %111 = vector.load %arg6[%c0_70, %c0_71] : memref<128x128xf32, #tpu.memory_space<vmem>>, vector<128x128xf32>
    %cst_72 = arith.constant dense<0.000000e+00> : vector<16x128xf32>
    %112 = tpu.matmul %110, %111, %cst_72 {dimension_numbers = #tpu.dot_dimension_numbers<[1], [0], [0], [1], [0, 0, 1, 1], [], []>} : vector<16x128xf32>, vector<128x128xf32>, vector<16x128xf32> -> vector<16x128xf32>
    %113 = arith.addf %109, %112 : vector<16x128xf32>
    %cst_73 = arith.constant 0.000000e+00 : f32
    %114 = vector.broadcast %cst_73 : f32 to vector<16x128xf32>
    %115 = arith.maximumf %113, %114 : vector<16x128xf32>
    %116 = vector.broadcast %95 : vector<16x1xf32> to vector<16x128xf32>
    %117 = arith.mulf %116, %106 : vector<16x128xf32>
    %118 = arith.subf %115, %90 : vector<16x128xf32>
    %119 = arith.mulf %117, %118 : vector<16x128xf32>
    %120 = arith.addf %90, %119 : vector<16x128xf32>
    %c0_74 = arith.constant 0 : index
    %c3_75 = arith.constant 3 : index
    %c0_76 = arith.constant 0 : index
    %121 = vector.load %arg7[%c0_74, %c3_75, %c0_76] : memref<16x8x128xf32, #tpu.memory_space<vmem>>, vector<16x1x128xf32>
    %122 = vector.shape_cast %121 : vector<16x1x128xf32> to vector<16x128xf32>
    %123 = vector.shape_cast %120 : vector<16x128xf32> to vector<16x1x128xf32>
    tpu.vector_store %arg7[%c0_74, %c3_75, %c0_76], %123 {strides = array<i32>} : memref<16x8x128xf32, #tpu.memory_space<vmem>>, vector<16x1x128xf32>,
    %c0_77 = arith.constant 0 : index
    %c4 = arith.constant 4 : index
    %c0_78 = arith.constant 0 : index
    %124 = vector.load %arg3[%c0_77, %c4, %c0_78] : memref<16x8x1xf32, #tpu.memory_space<vmem>>, vector<16x1x1xf32>
    %125 = vector.shape_cast %124 : vector<16x1x1xf32> to vector<16x1xf32>
    %c0_79 = arith.constant 0 : index
    %c4_80 = arith.constant 4 : index
    %c0_81 = arith.constant 0 : index
    %126 = vector.load %arg2[%c0_79, %c4_80, %c0_81] : memref<16x8x384xf32, #tpu.memory_space<vmem>>, vector<16x1x256xf32>
    %127 = vector.shape_cast %126 : vector<16x1x256xf32> to vector<16x256xf32>
    %c0_82 = arith.constant 0 : index
    %c0_83 = arith.constant 0 : index
    %128 = vector.load %arg5[%c0_82, %c0_83] : memref<128x256xf32, #tpu.memory_space<vmem>>, vector<128x256xf32>
    %cst_84 = arith.constant dense<0.000000e+00> : vector<16x256xf32>
    %129 = tpu.matmul %120, %128, %cst_84 {dimension_numbers = #tpu.dot_dimension_numbers<[1], [0], [0], [1], [0, 0, 1, 1], [], []>} : vector<16x128xf32>, vector<128x256xf32>, vector<16x256xf32> -> vector<16x256xf32>
    %130 = arith.addf %127, %129 : vector<16x256xf32>
    %131 = arith.negf %130 : vector<16x256xf32>
    %132 = math.exp %131 : vector<16x256xf32>
    %cst_85 = arith.constant 1.000000e+00 : f32
    %133 = vector.broadcast %cst_85 : f32 to vector<16x256xf32>
    %134 = arith.addf %133, %132 : vector<16x256xf32>
    %135 = arith.divf %133, %134 : vector<16x256xf32>
    %136 = vector.extract_strided_slice %135 {offsets = [0, 0], sizes = [16, 128], strides = [1, 1]} : vector<16x256xf32> to vector<16x128xf32>
    %137 = vector.extract_strided_slice %135 {offsets = [0, 128], sizes = [16, 128], strides = [1, 1]} : vector<16x256xf32> to vector<16x128xf32>
    %c0_86 = arith.constant 0 : index
    %c4_87 = arith.constant 4 : index
    %c256_88 = arith.constant 256 : index
    %138 = vector.load %arg2[%c0_86, %c4_87, %c256_88] : memref<16x8x384xf32, #tpu.memory_space<vmem>>, vector<16x1x128xf32>
    %139 = vector.shape_cast %138 : vector<16x1x128xf32> to vector<16x128xf32>
    %140 = arith.mulf %120, %137 : vector<16x128xf32>
    %c0_89 = arith.constant 0 : index
    %c0_90 = arith.constant 0 : index
    %141 = vector.load %arg6[%c0_89, %c0_90] : memref<128x128xf32, #tpu.memory_space<vmem>>, vector<128x128xf32>
    %cst_91 = arith.constant dense<0.000000e+00> : vector<16x128xf32>
    %142 = tpu.matmul %140, %141, %cst_91 {dimension_numbers = #tpu.dot_dimension_numbers<[1], [0], [0], [1], [0, 0, 1, 1], [], []>} : vector<16x128xf32>, vector<128x128xf32>, vector<16x128xf32> -> vector<16x128xf32>
    %143 = arith.addf %139, %142 : vector<16x128xf32>
    %cst_92 = arith.constant 0.000000e+00 : f32
    %144 = vector.broadcast %cst_92 : f32 to vector<16x128xf32>
    %145 = arith.maximumf %143, %144 : vector<16x128xf32>
    %146 = vector.broadcast %125 : vector<16x1xf32> to vector<16x128xf32>
    %147 = arith.mulf %146, %136 : vector<16x128xf32>
    %148 = arith.subf %145, %120 : vector<16x128xf32>
    %149 = arith.mulf %147, %148 : vector<16x128xf32>
    %150 = arith.addf %120, %149 : vector<16x128xf32>
    %c0_93 = arith.constant 0 : index
    %c4_94 = arith.constant 4 : index
    %c0_95 = arith.constant 0 : index
    %151 = vector.load %arg7[%c0_93, %c4_94, %c0_95] : memref<16x8x128xf32, #tpu.memory_space<vmem>>, vector<16x1x128xf32>
    %152 = vector.shape_cast %151 : vector<16x1x128xf32> to vector<16x128xf32>
    %153 = vector.shape_cast %150 : vector<16x128xf32> to vector<16x1x128xf32>
    tpu.vector_store %arg7[%c0_93, %c4_94, %c0_95], %153 {strides = array<i32>} : memref<16x8x128xf32, #tpu.memory_space<vmem>>, vector<16x1x128xf32>,
    %c0_96 = arith.constant 0 : index
    %c5 = arith.constant 5 : index
    %c0_97 = arith.constant 0 : index
    %154 = vector.load %arg3[%c0_96, %c5, %c0_97] : memref<16x8x1xf32, #tpu.memory_space<vmem>>, vector<16x1x1xf32>
    %155 = vector.shape_cast %154 : vector<16x1x1xf32> to vector<16x1xf32>
    %c0_98 = arith.constant 0 : index
    %c5_99 = arith.constant 5 : index
    %c0_100 = arith.constant 0 : index
    %156 = vector.load %arg2[%c0_98, %c5_99, %c0_100] : memref<16x8x384xf32, #tpu.memory_space<vmem>>, vector<16x1x256xf32>
    %157 = vector.shape_cast %156 : vector<16x1x256xf32> to vector<16x256xf32>
    %c0_101 = arith.constant 0 : index
    %c0_102 = arith.constant 0 : index
    %158 = vector.load %arg5[%c0_101, %c0_102] : memref<128x256xf32, #tpu.memory_space<vmem>>, vector<128x256xf32>
    %cst_103 = arith.constant dense<0.000000e+00> : vector<16x256xf32>
    %159 = tpu.matmul %150, %158, %cst_103 {dimension_numbers = #tpu.dot_dimension_numbers<[1], [0], [0], [1], [0, 0, 1, 1], [], []>} : vector<16x128xf32>, vector<128x256xf32>, vector<16x256xf32> -> vector<16x256xf32>
    %160 = arith.addf %157, %159 : vector<16x256xf32>
    %161 = arith.negf %160 : vector<16x256xf32>
    %162 = math.exp %161 : vector<16x256xf32>
    %cst_104 = arith.constant 1.000000e+00 : f32
    %163 = vector.broadcast %cst_104 : f32 to vector<16x256xf32>
    %164 = arith.addf %163, %162 : vector<16x256xf32>
    %165 = arith.divf %163, %164 : vector<16x256xf32>
    %166 = vector.extract_strided_slice %165 {offsets = [0, 0], sizes = [16, 128], strides = [1, 1]} : vector<16x256xf32> to vector<16x128xf32>
    %167 = vector.extract_strided_slice %165 {offsets = [0, 128], sizes = [16, 128], strides = [1, 1]} : vector<16x256xf32> to vector<16x128xf32>
    %c0_105 = arith.constant 0 : index
    %c5_106 = arith.constant 5 : index
    %c256_107 = arith.constant 256 : index
    %168 = vector.load %arg2[%c0_105, %c5_106, %c256_107] : memref<16x8x384xf32, #tpu.memory_space<vmem>>, vector<16x1x128xf32>
    %169 = vector.shape_cast %168 : vector<16x1x128xf32> to vector<16x128xf32>
    %170 = arith.mulf %150, %167 : vector<16x128xf32>
    %c0_108 = arith.constant 0 : index
    %c0_109 = arith.constant 0 : index
    %171 = vector.load %arg6[%c0_108, %c0_109] : memref<128x128xf32, #tpu.memory_space<vmem>>, vector<128x128xf32>
    %cst_110 = arith.constant dense<0.000000e+00> : vector<16x128xf32>
    %172 = tpu.matmul %170, %171, %cst_110 {dimension_numbers = #tpu.dot_dimension_numbers<[1], [0], [0], [1], [0, 0, 1, 1], [], []>} : vector<16x128xf32>, vector<128x128xf32>, vector<16x128xf32> -> vector<16x128xf32>
    %173 = arith.addf %169, %172 : vector<16x128xf32>
    %cst_111 = arith.constant 0.000000e+00 : f32
    %174 = vector.broadcast %cst_111 : f32 to vector<16x128xf32>
    %175 = arith.maximumf %173, %174 : vector<16x128xf32>
    %176 = vector.broadcast %155 : vector<16x1xf32> to vector<16x128xf32>
    %177 = arith.mulf %176, %166 : vector<16x128xf32>
    %178 = arith.subf %175, %150 : vector<16x128xf32>
    %179 = arith.mulf %177, %178 : vector<16x128xf32>
    %180 = arith.addf %150, %179 : vector<16x128xf32>
    %c0_112 = arith.constant 0 : index
    %c5_113 = arith.constant 5 : index
    %c0_114 = arith.constant 0 : index
    %181 = vector.load %arg7[%c0_112, %c5_113, %c0_114] : memref<16x8x128xf32, #tpu.memory_space<vmem>>, vector<16x1x128xf32>
    %182 = vector.shape_cast %181 : vector<16x1x128xf32> to vector<16x128xf32>
    %183 = vector.shape_cast %180 : vector<16x128xf32> to vector<16x1x128xf32>
    tpu.vector_store %arg7[%c0_112, %c5_113, %c0_114], %183 {strides = array<i32>} : memref<16x8x128xf32, #tpu.memory_space<vmem>>, vector<16x1x128xf32>,
    %c0_115 = arith.constant 0 : index
    %c6 = arith.constant 6 : index
    %c0_116 = arith.constant 0 : index
    %184 = vector.load %arg3[%c0_115, %c6, %c0_116] : memref<16x8x1xf32, #tpu.memory_space<vmem>>, vector<16x1x1xf32>
    %185 = vector.shape_cast %184 : vector<16x1x1xf32> to vector<16x1xf32>
    %c0_117 = arith.constant 0 : index
    %c6_118 = arith.constant 6 : index
    %c0_119 = arith.constant 0 : index
    %186 = vector.load %arg2[%c0_117, %c6_118, %c0_119] : memref<16x8x384xf32, #tpu.memory_space<vmem>>, vector<16x1x256xf32>
    %187 = vector.shape_cast %186 : vector<16x1x256xf32> to vector<16x256xf32>
    %c0_120 = arith.constant 0 : index
    %c0_121 = arith.constant 0 : index
    %188 = vector.load %arg5[%c0_120, %c0_121] : memref<128x256xf32, #tpu.memory_space<vmem>>, vector<128x256xf32>
    %cst_122 = arith.constant dense<0.000000e+00> : vector<16x256xf32>
    %189 = tpu.matmul %180, %188, %cst_122 {dimension_numbers = #tpu.dot_dimension_numbers<[1], [0], [0], [1], [0, 0, 1, 1], [], []>} : vector<16x128xf32>, vector<128x256xf32>, vector<16x256xf32> -> vector<16x256xf32>
    %190 = arith.addf %187, %189 : vector<16x256xf32>
    %191 = arith.negf %190 : vector<16x256xf32>
    %192 = math.exp %191 : vector<16x256xf32>
    %cst_123 = arith.constant 1.000000e+00 : f32
    %193 = vector.broadcast %cst_123 : f32 to vector<16x256xf32>
    %194 = arith.addf %193, %192 : vector<16x256xf32>
    %195 = arith.divf %193, %194 : vector<16x256xf32>
    %196 = vector.extract_strided_slice %195 {offsets = [0, 0], sizes = [16, 128], strides = [1, 1]} : vector<16x256xf32> to vector<16x128xf32>
    %197 = vector.extract_strided_slice %195 {offsets = [0, 128], sizes = [16, 128], strides = [1, 1]} : vector<16x256xf32> to vector<16x128xf32>
    %c0_124 = arith.constant 0 : index
    %c6_125 = arith.constant 6 : index
    %c256_126 = arith.constant 256 : index
    %198 = vector.load %arg2[%c0_124, %c6_125, %c256_126] : memref<16x8x384xf32, #tpu.memory_space<vmem>>, vector<16x1x128xf32>
    %199 = vector.shape_cast %198 : vector<16x1x128xf32> to vector<16x128xf32>
    %200 = arith.mulf %180, %197 : vector<16x128xf32>
    %c0_127 = arith.constant 0 : index
    %c0_128 = arith.constant 0 : index
    %201 = vector.load %arg6[%c0_127, %c0_128] : memref<128x128xf32, #tpu.memory_space<vmem>>, vector<128x128xf32>
    %cst_129 = arith.constant dense<0.000000e+00> : vector<16x128xf32>
    %202 = tpu.matmul %200, %201, %cst_129 {dimension_numbers = #tpu.dot_dimension_numbers<[1], [0], [0], [1], [0, 0, 1, 1], [], []>} : vector<16x128xf32>, vector<128x128xf32>, vector<16x128xf32> -> vector<16x128xf32>
    %203 = arith.addf %199, %202 : vector<16x128xf32>
    %cst_130 = arith.constant 0.000000e+00 : f32
    %204 = vector.broadcast %cst_130 : f32 to vector<16x128xf32>
    %205 = arith.maximumf %203, %204 : vector<16x128xf32>
    %206 = vector.broadcast %185 : vector<16x1xf32> to vector<16x128xf32>
    %207 = arith.mulf %206, %196 : vector<16x128xf32>
    %208 = arith.subf %205, %180 : vector<16x128xf32>
    %209 = arith.mulf %207, %208 : vector<16x128xf32>
    %210 = arith.addf %180, %209 : vector<16x128xf32>
    %c0_131 = arith.constant 0 : index
    %c6_132 = arith.constant 6 : index
    %c0_133 = arith.constant 0 : index
    %211 = vector.load %arg7[%c0_131, %c6_132, %c0_133] : memref<16x8x128xf32, #tpu.memory_space<vmem>>, vector<16x1x128xf32>
    %212 = vector.shape_cast %211 : vector<16x1x128xf32> to vector<16x128xf32>
    %213 = vector.shape_cast %210 : vector<16x128xf32> to vector<16x1x128xf32>
    tpu.vector_store %arg7[%c0_131, %c6_132, %c0_133], %213 {strides = array<i32>} : memref<16x8x128xf32, #tpu.memory_space<vmem>>, vector<16x1x128xf32>,
    %c0_134 = arith.constant 0 : index
    %c7 = arith.constant 7 : index
    %c0_135 = arith.constant 0 : index
    %214 = vector.load %arg3[%c0_134, %c7, %c0_135] : memref<16x8x1xf32, #tpu.memory_space<vmem>>, vector<16x1x1xf32>
    %215 = vector.shape_cast %214 : vector<16x1x1xf32> to vector<16x1xf32>
    %c0_136 = arith.constant 0 : index
    %c7_137 = arith.constant 7 : index
    %c0_138 = arith.constant 0 : index
    %216 = vector.load %arg2[%c0_136, %c7_137, %c0_138] : memref<16x8x384xf32, #tpu.memory_space<vmem>>, vector<16x1x256xf32>
    %217 = vector.shape_cast %216 : vector<16x1x256xf32> to vector<16x256xf32>
    %c0_139 = arith.constant 0 : index
    %c0_140 = arith.constant 0 : index
    %218 = vector.load %arg5[%c0_139, %c0_140] : memref<128x256xf32, #tpu.memory_space<vmem>>, vector<128x256xf32>
    %cst_141 = arith.constant dense<0.000000e+00> : vector<16x256xf32>
    %219 = tpu.matmul %210, %218, %cst_141 {dimension_numbers = #tpu.dot_dimension_numbers<[1], [0], [0], [1], [0, 0, 1, 1], [], []>} : vector<16x128xf32>, vector<128x256xf32>, vector<16x256xf32> -> vector<16x256xf32>
    %220 = arith.addf %217, %219 : vector<16x256xf32>
    %221 = arith.negf %220 : vector<16x256xf32>
    %222 = math.exp %221 : vector<16x256xf32>
    %cst_142 = arith.constant 1.000000e+00 : f32
    %223 = vector.broadcast %cst_142 : f32 to vector<16x256xf32>
    %224 = arith.addf %223, %222 : vector<16x256xf32>
    %225 = arith.divf %223, %224 : vector<16x256xf32>
    %226 = vector.extract_strided_slice %225 {offsets = [0, 0], sizes = [16, 128], strides = [1, 1]} : vector<16x256xf32> to vector<16x128xf32>
    %227 = vector.extract_strided_slice %225 {offsets = [0, 128], sizes = [16, 128], strides = [1, 1]} : vector<16x256xf32> to vector<16x128xf32>
    %c0_143 = arith.constant 0 : index
    %c7_144 = arith.constant 7 : index
    %c256_145 = arith.constant 256 : index
    %228 = vector.load %arg2[%c0_143, %c7_144, %c256_145] : memref<16x8x384xf32, #tpu.memory_space<vmem>>, vector<16x1x128xf32>
    %229 = vector.shape_cast %228 : vector<16x1x128xf32> to vector<16x128xf32>
    %230 = arith.mulf %210, %227 : vector<16x128xf32>
    %c0_146 = arith.constant 0 : index
    %c0_147 = arith.constant 0 : index
    %231 = vector.load %arg6[%c0_146, %c0_147] : memref<128x128xf32, #tpu.memory_space<vmem>>, vector<128x128xf32>
    %cst_148 = arith.constant dense<0.000000e+00> : vector<16x128xf32>
    %232 = tpu.matmul %230, %231, %cst_148 {dimension_numbers = #tpu.dot_dimension_numbers<[1], [0], [0], [1], [0, 0, 1, 1], [], []>} : vector<16x128xf32>, vector<128x128xf32>, vector<16x128xf32> -> vector<16x128xf32>
    %233 = arith.addf %229, %232 : vector<16x128xf32>
    %cst_149 = arith.constant 0.000000e+00 : f32
    %234 = vector.broadcast %cst_149 : f32 to vector<16x128xf32>
    %235 = arith.maximumf %233, %234 : vector<16x128xf32>
    %236 = vector.broadcast %215 : vector<16x1xf32> to vector<16x128xf32>
    %237 = arith.mulf %236, %226 : vector<16x128xf32>
    %238 = arith.subf %235, %210 : vector<16x128xf32>
    %239 = arith.mulf %237, %238 : vector<16x128xf32>
    %240 = arith.addf %210, %239 : vector<16x128xf32>
    %c0_150 = arith.constant 0 : index
    %c7_151 = arith.constant 7 : index
    %c0_152 = arith.constant 0 : index
    %241 = vector.load %arg7[%c0_150, %c7_151, %c0_152] : memref<16x8x128xf32, #tpu.memory_space<vmem>>, vector<16x1x128xf32>
    %242 = vector.shape_cast %241 : vector<16x1x128xf32> to vector<16x128xf32>
    %243 = vector.shape_cast %240 : vector<16x128xf32> to vector<16x1x128xf32>
    tpu.vector_store %arg7[%c0_150, %c7_151, %c0_152], %243 {strides = array<i32>} : memref<16x8x128xf32, #tpu.memory_space<vmem>>, vector<16x1x128xf32>,
    %c0_153 = arith.constant 0 : index
    %c0_154 = arith.constant 0 : index
    %244 = vector.load %arg8[%c0_153, %c0_154] : memref<16x128xf32, #tpu.memory_space<vmem>>, vector<16x128xf32>
    tpu.vector_store %arg8[%c0_153, %c0_154], %240 {strides = array<i32>} : memref<16x128xf32, #tpu.memory_space<vmem>>, vector<16x128xf32>,
    return
  }
  func.func @transform_0(%arg0: i32, %arg1: i32) -> (i32, i32, i32) {
    %c0_i32 = arith.constant 0 : i32
    %c0_i32_0 = arith.constant 0 : i32
    return %arg0, %arg1, %c0_i32 : i32, i32, i32
  }
  func.func @transform_1(%arg0: i32, %arg1: i32) -> (i32, i32, i32) {
    %c0_i32 = arith.constant 0 : i32
    %c0_i32_0 = arith.constant 0 : i32
    return %arg0, %arg1, %c0_i32 : i32, i32, i32
  }
  func.func @transform_2(%arg0: i32, %arg1: i32) -> (i32, i32) {
    %c0_i32 = arith.constant 0 : i32
    %c0_i32_0 = arith.constant 0 : i32
    return %arg0, %c0_i32 : i32, i32
  }
  func.func @transform_3(%arg0: i32, %arg1: i32) -> (i32, i32) {
    %c0_i32 = arith.constant 0 : i32
    %c0_i32_0 = arith.constant 0 : i32
    %c0_i32_1 = arith.constant 0 : i32
    return %c0_i32, %c0_i32_0 : i32, i32
  }
  func.func @transform_4(%arg0: i32, %arg1: i32) -> (i32, i32) {
    %c0_i32 = arith.constant 0 : i32
    %c0_i32_0 = arith.constant 0 : i32
    %c0_i32_1 = arith.constant 0 : i32
    return %c0_i32, %c0_i32_0 : i32, i32
  }
  func.func @transform_5(%arg0: i32, %arg1: i32) -> (i32, i32, i32) {
    %c0_i32 = arith.constant 0 : i32
    %c0_i32_0 = arith.constant 0 : i32
    return %arg0, %arg1, %c0_i32 : i32, i32, i32
  }
}

</mosaic_0001>

<bundles_post_ra>
// kernel: gru_forward.1
= control target key start
LH: loop header
LB: loop body
LE: loop exit
PB: predicated region body
PF: predicated region fallthrough
CT: control target
= control target key end

     0   :  { %10 = vsyncpa [#allocation6], 0  ;;  %s14355_s0 = inlined_call_operand.vmem [shape: f32[16,16,384], index: 0, kind: input, shape index: {}]   ;;  %s14356_s1 = inlined_call_operand.vmem [shape: f32[16,16,1], index: 1, kind: input, shape index: {}]   ;;  %s14357_s2 = inlined_call_operand.vmem [shape: f32[16,128], index: 2, kind: input, shape index: {}]   ;;  %s14358_s3 = inlined_call_operand.vmem [shape: f32[128,256], index: 3, kind: input, shape index: {}]   ;;  %s14359_s4 = inlined_call_operand.vmem [shape: f32[128,128], index: 4, kind: input, shape index: {}]   ;;  %s14360_s5 = inlined_call_operand.hbm [shape: f32[16,16,128], index: 5, kind: output, shape index: {}]  }
   0x1   :  { %12 = vsyncpa [#allocation6 + $0x1], 0  ;;  %s10748_s18 = smov 0   ;;  %s10750_s19 = smov 0  }
   0x2   :  { %s10752_s20 = smov 0   ;;  %s10754_s21 = smov 0  }
   0x3   :  { %s10756_s22 = smov 0   ;;  %s10758_s23 = smov 0  }
   0x4 LB: > { %s8780_s24 = sadd.s32 4294967295, %s10709_s23   ;;  %s8781_s25 = sadd.s32 4294967294, %s10709_s23   ;;  %s10709_s23 = sphi %s10758_s23, %s18_s23   ;;  %s10705_s22 = sphi %s10756_s22, %s14513_s22   ;;  %s10701_s21 = sphi %s10754_s21, %s14512_s21   ;;  %s10697_s20 = sphi %s10752_s20, %s14511_s20   ;;  %s10693_s19 = sphi %s10750_s19, %s14510_s19   ;;  %s10689_s18 = sphi %s10748_s18, %s14509_s18  }
   0x5   : > { %s27_s26 = sadd.s32 1, %s10705_s22  ;;  %s39_s27 = sadd.s32 1, %s10697_s20 }
   0x6   : > { %p28_p0 = scmp.ge.s32.totalorder %s27_s26, 2  ;;  %p46_p1 = scmp.ne.s32.totalorder %s10697_s20, %s10693_s19 }
   0x7   : > { %p47_p2 = scmp.eq.s32.totalorder %s10709_s23, 0  ;;  %p174_p3 = scmp.eq.s32.totalorder %s8780_s24, 1 }
   0x8   : > { %s14515_s26 = smov (%p28_p0, %s27_s26), 0  ;;  %p179_p6 = scmp.ne.s32.totalorder %s10693_s19, %s10689_s18 }
   0x9   : > { %p10787_p4 = por %p47_p2, %p46_p1  ;;  %p10791_p5 = por %p174_p3, %p46_p1 }
   0xa   : > { %s35_s30 = ssub.s32 %s10705_s22, %s14515_s26  ;;  %p180_p8 = scmp.eq.s32.totalorder %s8781_s25, 1 }
   0xb   : > { %p37_p7 = scmp.eq.s32.totalorder %s35_s30, 0  ;;  %p8784_p10 = scmp.ge.s32.totalorder %s10709_s23, 2 }
   0xc   : > { %p10802_p9 = por %p180_p8, %p179_p6 }
   0xd   : > { %s10800_s6 = scalar_select %p37_p7, %s10697_s20, %s39_s27  }
   0xe   : > { %211 = sbr.rel (%p8784_p10) target bundleno = 62 (0x3e), region = 28 }
  0x15   : > { %214 = sbr.rel (!%p10787_p4) target bundleno = 50 (0x32), region = 32  ;;  %s216_s8 = sand.u32 (%p10787_p4), 1, %s10697_s20  }
  0x16   : > { %s10052_s9 = smul.u32 (%p10787_p4), 24, %s10705_s22 }
  0x17   : > { %s10051_s10 = smul.u32 (%p10787_p4), 384, %s216_s8 }
  0x18   : > { %s10816_s13 = scalar_lea.vmem (%p10787_p4), %s14355_s0, %s10052_s9 }
  0x19   : > { %v237_v0 = vld [vmem:[%s10816_s13] sm:$0xff] (%p10787_p4)  ;;  %v239_v1 = vld [vmem:[%s10816_s13 + $0x8] sm:$0xff] (%p10787_p4)  ;;  %v241_v2 = vld [vmem:[%s10816_s13 + $0x10] sm:$0xff] (%p10787_p4)  ;;  %s10821_s14 = scalar_lea.vmem (%p10787_p4), [#allocation3], %s10051_s10 }
  0x1a   : > { %238 = vst [vmem:[%s10821_s14] sm:$0xff] (%p10787_p4), %v237_v0  ;;  %240 = vst [vmem:[%s10821_s14 + $0x8] sm:$0xff] (%p10787_p4), %v239_v1  ;;  %v243_v3 = vld [vmem:[%s10816_s13 + $0x30] sm:$0xff] (%p10787_p4)  ;;  %v245_v4 = vld [vmem:[%s10816_s13 + $0x38] sm:$0xff] (%p10787_p4) }
  0x1b   : > { %242 = vst [vmem:[%s10821_s14 + $0x10] sm:$0xff] (%p10787_p4), %v241_v2  ;;  %v247_v5 = vld [vmem:[%s10816_s13 + $0x40] sm:$0xff] (%p10787_p4)  ;;  %244 = vst [vmem:[%s10821_s14 + $0x18] sm:$0xff] (%p10787_p4), %v243_v3  ;;  %v251_v7 = vld [vmem:[%s10816_s13 + $0x68] sm:$0xff] (%p10787_p4) }
  0x1c   : > { %246 = vst [vmem:[%s10821_s14 + $0x20] sm:$0xff] %v245_v4  ;;  %248 = vst [vmem:[%s10821_s14 + $0x28] sm:$0xff] %v247_v5  ;;  %v249_v6 = vld [vmem:[%s10816_s13 + $0x60] sm:$0xff]  ;;  %v253_v8 = vld [vmem:[%s10816_s13 + $0x70] sm:$0xff] }
  0x1d   : > { %250 = vst [vmem:[%s10821_s14 + $0x30] sm:$0xff] %v249_v6  ;;  %252 = vst [vmem:[%s10821_s14 + $0x38] sm:$0xff] %v251_v7  ;;  %v255_v9 = vld [vmem:[%s10816_s13 + $0x90] sm:$0xff]  ;;  %v257_v10 = vld [vmem:[%s10816_s13 + $0x98] sm:$0xff] }
  0x1e   : > { %254 = vst [vmem:[%s10821_s14 + $0x40] sm:$0xff] %v253_v8  ;;  %v259_v11 = vld [vmem:[%s10816_s13 + $0xa0] sm:$0xff]  ;;  %256 = vst [vmem:[%s10821_s14 + $0x48] sm:$0xff] %v255_v9  ;;  %v263_v13 = vld [vmem:[%s10816_s13 + $0xc8] sm:$0xff] }
  0x1f   : > { %258 = vst [vmem:[%s10821_s14 + $0x50] sm:$0xff] %v257_v10  ;;  %260 = vst [vmem:[%s10821_s14 + $0x58] sm:$0xff] %v259_v11  ;;  %v261_v12 = vld [vmem:[%s10816_s13 + $0xc0] sm:$0xff]  ;;  %v265_v14 = vld [vmem:[%s10816_s13 + $0xd0] sm:$0xff] }
  0x20   : > { %262 = vst [vmem:[%s10821_s14 + $0x60] sm:$0xff] %v261_v12  ;;  %264 = vst [vmem:[%s10821_s14 + $0x68] sm:$0xff] %v263_v13  ;;  %v267_v15 = vld [vmem:[%s10816_s13 + $0xf0] sm:$0xff]  ;;  %v269_v16 = vld [vmem:[%s10816_s13 + $0xf8] sm:$0xff] }
  0x21   : > { %266 = vst [vmem:[%s10821_s14 + $0x70] sm:$0xff] %v265_v14  ;;  %v271_v17 = vld [vmem:[%s10816_s13 + $0x100] sm:$0xff]  ;;  %268 = vst [vmem:[%s10821_s14 + $0x78] sm:$0xff] %v267_v15  ;;  %v275_v19 = vld [vmem:[%s10816_s13 + $0x128] sm:$0xff] }
  0x22   : > { %270 = vst [vmem:[%s10821_s14 + $0x80] sm:$0xff] %v269_v16  ;;  %272 = vst [vmem:[%s10821_s14 + $0x88] sm:$0xff] %v271_v17  ;;  %v273_v18 = vld [vmem:[%s10816_s13 + $0x120] sm:$0xff]  ;;  %v277_v20 = vld [vmem:[%s10816_s13 + $0x130] sm:$0xff] }
  0x23   : > { %274 = vst [vmem:[%s10821_s14 + $0x90] sm:$0xff] %v273_v18  ;;  %276 = vst [vmem:[%s10821_s14 + $0x98] sm:$0xff] %v275_v19  ;;  %v279_v21 = vld [vmem:[%s10816_s13 + $0x150] sm:$0xff]  ;;  %v281_v22 = vld [vmem:[%s10816_s13 + $0x158] sm:$0xff] }
  0x24   : > { %278 = vst [vmem:[%s10821_s14 + $0xa0] sm:$0xff] %v277_v20  ;;  %v283_v23 = vld [vmem:[%s10816_s13 + $0x160] sm:$0xff]  ;;  %280 = vst [vmem:[%s10821_s14 + $0xa8] sm:$0xff] %v279_v21  ;;  %v287_v25 = vld [vmem:[%s10816_s13 + $0x188] sm:$0xff] }
  0x25   : > { %282 = vst [vmem:[%s10821_s14 + $0xb0] sm:$0xff] %v281_v22  ;;  %284 = vst [vmem:[%s10821_s14 + $0xb8] sm:$0xff] %v283_v23  ;;  %v285_v24 = vld [vmem:[%s10816_s13 + $0x180] sm:$0xff]  ;;  %v289_v26 = vld [vmem:[%s10816_s13 + $0x190] sm:$0xff] }
  0x26   : > { %286 = vst [vmem:[%s10821_s14 + $0xc0] sm:$0xff] %v285_v24  ;;  %288 = vst [vmem:[%s10821_s14 + $0xc8] sm:$0xff] %v287_v25  ;;  %v291_v27 = vld [vmem:[%s10816_s13 + $0x1b0] sm:$0xff]  ;;  %v293_v28 = vld [vmem:[%s10816_s13 + $0x1b8] sm:$0xff] }
  0x27   : > { %290 = vst [vmem:[%s10821_s14 + $0xd0] sm:$0xff] %v289_v26  ;;  %v295_v29 = vld [vmem:[%s10816_s13 + $0x1c0] sm:$0xff]  ;;  %292 = vst [vmem:[%s10821_s14 + $0xd8] sm:$0xff] %v291_v27  ;;  %v299_v31 = vld [vmem:[%s10816_s13 + $0x1e8] sm:$0xff] }
  0x28   : > { %294 = vst [vmem:[%s10821_s14 + $0xe0] sm:$0xff] %v293_v28  ;;  %296 = vst [vmem:[%s10821_s14 + $0xe8] sm:$0xff] %v295_v29  ;;  %v297_v30 = vld [vmem:[%s10816_s13 + $0x1e0] sm:$0xff]  ;;  %v301_v32 = vld [vmem:[%s10816_s13 + $0x1f0] sm:$0xff] }
  0x29   : > { %298 = vst [vmem:[%s10821_s14 + $0xf0] sm:$0xff] %v297_v30  ;;  %300 = vst [vmem:[%s10821_s14 + $0xf8] sm:$0xff] %v299_v31  ;;  %v303_v33 = vld [vmem:[%s10816_s13 + $0x210] sm:$0xff]  ;;  %v305_v34 = vld [vmem:[%s10816_s13 + $0x218] sm:$0xff] }
  0x2a   : > { %302 = vst [vmem:[%s10821_s14 + $0x100] sm:$0xff] %v301_v32  ;;  %v307_v35 = vld [vmem:[%s10816_s13 + $0x220] sm:$0xff]  ;;  %304 = vst [vmem:[%s10821_s14 + $0x108] sm:$0xff] %v303_v33  ;;  %v311_v37 = vld [vmem:[%s10816_s13 + $0x248] sm:$0xff] }
  0x2b   : > { %306 = vst [vmem:[%s10821_s14 + $0x110] sm:$0xff] %v305_v34  ;;  %308 = vst [vmem:[%s10821_s14 + $0x118] sm:$0xff] %v307_v35  ;;  %v309_v36 = vld [vmem:[%s10816_s13 + $0x240] sm:$0xff]  ;;  %v313_v38 = vld [vmem:[%s10816_s13 + $0x250] sm:$0xff] }
  0x2c   : > { %310 = vst [vmem:[%s10821_s14 + $0x120] sm:$0xff] %v309_v36  ;;  %312 = vst [vmem:[%s10821_s14 + $0x128] sm:$0xff] %v311_v37  ;;  %v315_v39 = vld [vmem:[%s10816_s13 + $0x270] sm:$0xff]  ;;  %v317_v40 = vld [vmem:[%s10816_s13 + $0x278] sm:$0xff] }
  0x2d   : > { %314 = vst [vmem:[%s10821_s14 + $0x130] sm:$0xff] %v313_v38  ;;  %v319_v41 = vld [vmem:[%s10816_s13 + $0x280] sm:$0xff]  ;;  %316 = vst [vmem:[%s10821_s14 + $0x138] sm:$0xff] %v315_v39  ;;  %v323_v43 = vld [vmem:[%s10816_s13 + $0x2a8] sm:$0xff] }
  0x2e   : > { %318 = vst [vmem:[%s10821_s14 + $0x140] sm:$0xff] %v317_v40  ;;  %320 = vst [vmem:[%s10821_s14 + $0x148] sm:$0xff] %v319_v41  ;;  %v321_v42 = vld [vmem:[%s10816_s13 + $0x2a0] sm:$0xff]  ;;  %v325_v44 = vld [vmem:[%s10816_s13 + $0x2b0] sm:$0xff] }
  0x2f   : > { %322 = vst [vmem:[%s10821_s14 + $0x150] sm:$0xff] %v321_v42  ;;  %324 = vst [vmem:[%s10821_s14 + $0x158] sm:$0xff] %v323_v43  ;;  %v327_v45 = vld [vmem:[%s10816_s13 + $0x2d0] sm:$0xff]  ;;  %v329_v46 = vld [vmem:[%s10816_s13 + $0x2d8] sm:$0xff] }
  0x30   : > { %326 = vst [vmem:[%s10821_s14 + $0x160] sm:$0xff] %v325_v44  ;;  %v331_v47 = vld [vmem:[%s10816_s13 + $0x2e0] sm:$0xff]  ;;  %328 = vst [vmem:[%s10821_s14 + $0x168] sm:$0xff] %v327_v45 }
  0x31   : > { %330 = vst [vmem:[%s10821_s14 + $0x170] sm:$0xff] %v329_v46  ;;  %332 = vst [vmem:[%s10821_s14 + $0x178] sm:$0xff] %v331_v47 }
  0x32 PF: > { %338 = sbr.rel (!%p10787_p4) target bundleno = 62 (0x3e), region = 55  ;;  %s340_s15 = sand.u32 (%p10787_p4), 1, %s10697_s20  }
  0x33   : > { %s8787_s16 = sshll.u32 (%p10787_p4), %s10705_s22, 3  ;;  %s8786_s17 = sshll.u32 (%p10787_p4), %s340_s15, 7 }
  0x34   : > { %s10923_s27 = scalar_lea.vmem (%p10787_p4), %s14356_s1, %s8787_s16  ;;  %s342_s28 = scalar_lea.vmem (%p10787_p4), [#allocation4], %s8786_s17 }
  0x35   : > { %v405_v48 = vld [vmem:[%s10923_s27] sm:$0xff] (%p10787_p4)  ;;  %v407_v49 = vld [vmem:[%s10923_s27 + $0x10] sm:$0xff] (%p10787_p4) }
  0x36   : > { %v409_v50 = vld [vmem:[%s10923_s27 + $0x20] sm:$0xff] (%p10787_p4)  ;;  %406 = vst [vmem:[%s342_s28] sm:$0xff] (%p10787_p4), %v405_v48  ;;  %408 = vst [vmem:[%s342_s28 + $0x8] sm:$0xff] (%p10787_p4), %v407_v49  ;;  %v411_v51 = vld [vmem:[%s10923_s27 + $0x30] sm:$0xff] (%p10787_p4) }
  0x37   : > { %410 = vst [vmem:[%s342_s28 + $0x10] sm:$0xff] (%p10787_p4), %v409_v50  ;;  %v413_v52 = vld [vmem:[%s10923_s27 + $0x40] sm:$0xff] (%p10787_p4)  ;;  %v415_v53 = vld [vmem:[%s10923_s27 + $0x50] sm:$0xff] (%p10787_p4)  ;;  %412 = vst [vmem:[%s342_s28 + $0x18] sm:$0xff] (%p10787_p4), %v411_v51 }
  0x38   : > { %414 = vst [vmem:[%s342_s28 + $0x20] sm:$0xff] (%p10787_p4), %v413_v52  ;;  %416 = vst [vmem:[%s342_s28 + $0x28] sm:$0xff] (%p10787_p4), %v415_v53  ;;  %v417_v54 = vld [vmem:[%s10923_s27 + $0x60] sm:$0xff] (%p10787_p4)  ;;  %v419_v55 = vld [vmem:[%s10923_s27 + $0x70] sm:$0xff] (%p10787_p4) }
  0x39   : > { %v421_v56 = vld [vmem:[%s10923_s27 + $0x80] sm:$0xff]  ;;  %418 = vst [vmem:[%s342_s28 + $0x30] sm:$0xff] %v417_v54  ;;  %420 = vst [vmem:[%s342_s28 + $0x38] sm:$0xff] %v419_v55  ;;  %v423_v57 = vld [vmem:[%s10923_s27 + $0x90] sm:$0xff] }
  0x3a   : > { %422 = vst [vmem:[%s342_s28 + $0x40] sm:$0xff] %v421_v56  ;;  %v425_v58 = vld [vmem:[%s10923_s27 + $0xa0] sm:$0xff]  ;;  %v427_v59 = vld [vmem:[%s10923_s27 + $0xb0] sm:$0xff]  ;;  %424 = vst [vmem:[%s342_s28 + $0x48] sm:$0xff] %v423_v57 }
  0x3b   : > { %426 = vst [vmem:[%s342_s28 + $0x50] sm:$0xff] %v425_v58  ;;  %428 = vst [vmem:[%s342_s28 + $0x58] sm:$0xff] %v427_v59  ;;  %v429_v60 = vld [vmem:[%s10923_s27 + $0xc0] sm:$0xff]  ;;  %v431_v61 = vld [vmem:[%s10923_s27 + $0xd0] sm:$0xff] }
  0x3c   : > { %v433_v62 = vld [vmem:[%s10923_s27 + $0xe0] sm:$0xff]  ;;  %430 = vst [vmem:[%s342_s28 + $0x60] sm:$0xff] %v429_v60  ;;  %432 = vst [vmem:[%s342_s28 + $0x68] sm:$0xff] %v431_v61  ;;  %v435_v63 = vld [vmem:[%s10923_s27 + $0xf0] sm:$0xff] }
  0x3d   : > { %434 = vst [vmem:[%s342_s28 + $0x70] sm:$0xff] %v433_v62  ;;  %436 = vst [vmem:[%s342_s28 + $0x78] sm:$0xff] %v435_v63 }
  0x3e PF: > { %p8788_p11 = scmp.ge.s32.totalorder %s10709_s23, 1  ;;  %p441_p12 = scmp.lt.s32.totalorder %s10709_s23, 3 }
  0x40   : > { %p442_p13 = pnand %p8788_p11, %p441_p12 }
  0x42   : > { %445 = sbr.rel (%p442_p13) target bundleno = 4414 (0x113e), region = 93 }
  0x49   : > { %s10944_s30 = sand.u32 1, %s10693_s19   ;;  %p8791_p0 = scmp.ne.s32.totalorder %s10701_s21, 0 }
  0x4a   : > { %s10053_s8 = smul.u32 384, %s10944_s30  ;;  %s8789_s9 = sshll.u32 %s10944_s30, 7  ;;  %v504_v0 = vld [vmem:[%s14357_s2] sm:$0xff] (!%p8791_p0)  ;;  %v505_v1 = vld [vmem:[%s14357_s2 + $0x8] sm:$0xff] (!%p8791_p0) }
  0x4b   : > { %s10950_s11 = scalar_lea.vmem [#allocation4], %s8789_s9  ;;  %s10952_s12 = scalar_lea.vmem [#allocation5], %s8789_s9  ;;  %506 = vst [vmem:[#allocation2] sm:$0xff] (!%p8791_p0), %v504_v0  ;;  %507 = vst [vmem:[#allocation2 + $0x8] sm:$0xff] (!%p8791_p0), %v505_v1 }
  0x4c   : > { %s10948_s10 = scalar_lea.vmem [#allocation3], %s10053_s8  ;;  %503 = sbr.rel (%p8791_p0) target bundleno = 83 (0x53), region = 105 }
  0x53 PF: > { %v558_v2 = vld [vmem:[%s14358_s3 + $0x8] sm:$0xff]  ;;  %v560_v3 = vld [vmem:[%s14358_s3 + $0x18] sm:$0xff]  ;;  %v557_v4 = vld [vmem:[%s14358_s3] sm:$0xff]  ;;  %v14361_v9 = vmov 0.0   ;;  %v10712_v10 = vmov 0   ;;  %vm1364_vm0 = vcmask 1041409  }
  0x54   : > { %v9539_v5 = vpack.c.bf16 %v560_v3, %v558_v2  ;;  %v559_v6 = vld [vmem:[%s14358_s3 + $0x10] sm:$0xff]  ;;  %v562_v7 = vld [vmem:[%s14358_s3 + $0x28] sm:$0xff]  ;;  %v564_v8 = vld [vmem:[%s14358_s3 + $0x38] sm:$0xff]  ;;  %653 = vmatprep.mubr.f32.mxu0 %v14361_v9  ;;  %10115 = vset.pattern.permute.xlu0 %v10712_v10  ;;  %vm1367_vm1 = vcmask 1042434   ;;  %vm1370_vm2 = vcmask 1043459   ;;  %vm1373_vm3 = vcmask 1044484  }
  0x55   : > { %v9541_v11 = vpack.c.bf16 %v559_v6, %v557_v4  ;;  %v9543_v12 = vpack.c.bf16 %v564_v8, %v562_v7  ;;  %v561_v13 = vld [vmem:[%s14358_s3 + $0x20] sm:$0xff]  ;;  %v563_v14 = vld [vmem:[%s14358_s3 + $0x30] sm:$0xff]  ;;  %v566_v15 = vld [vmem:[%s14358_s3 + $0x48] sm:$0xff]  ;;  %10116 = vset.pattern.permute.xlu1 %v10712_v10  ;;  %vm1376_vm4 = vcmask 1045509   ;;  %vm1379_vm5 = vcmask 1046534   ;;  %s8664_s14 = sshll.u32 %s10952_s12, 4  ;;  %s14303_s14 = int_to_ptr.vmem [resolvable:$true] %s8664_s14 }
  0x56   : > { %9540 = vmatprep.subr.bf16.mxu0 %v9539_v5  ;;  %v568_v16 = vld [vmem:[%s14358_s3 + $0x58] sm:$0xff]  ;;  %v9545_v17 = vpack.c.bf16 %v563_v14, %v561_v13  ;;  %v565_v19 = vld [vmem:[%s14358_s3 + $0x40] sm:$0xff]  ;;  %v567_v20 = vld [vmem:[%s14358_s3 + $0x50] sm:$0xff]  ;;  %vm1382_vm6 = vcmask 1047559   ;;  %s10631_s17 = scalar_lea.vmem %s14303_s14, 2048  ;;  %s10714_s24 = smov [#allocation5]  }
  0x57   : > { %9542 = vmatpush1.bf16.msra.mxu0 %v9541_v11  ;;  %v9547_v18 = vpack.c.bf16 %v568_v16, %v566_v15  ;;  %v570_v21 = vld [vmem:[%s14358_s3 + $0x68] sm:$0xff]  ;;  %v572_v22 = vld [vmem:[%s14358_s3 + $0x78] sm:$0xff]  ;;  %v9549_v23 = vpack.c.bf16 %v567_v20, %v565_v19  ;;  %v569_v25 = vld [vmem:[%s14358_s3 + $0x60] sm:$0xff]  ;;  %p10632_p1 = scmp.ne.s32.totalorder %s14303_s14, %s10631_s17  ;;  %s10635_s25 = sshll.u32 %s10714_s24, 4  ;;  %s10636_s25 = int_to_ptr.vmem [resolvable:$false] %s10635_s25 }
  0x58   : > { %9544 = vmatprep.subr.bf16.mxu0 %v9543_v12  ;;  %v9551_v24 = vpack.c.bf16 %v572_v22, %v570_v21  ;;  %v571_v26 = vld [vmem:[%s14358_s3 + $0x70] sm:$0xff]  ;;  %v574_v27 = vld [vmem:[%s14358_s3 + $0x88] sm:$0xff]  ;;  %v576_v28 = vld [vmem:[%s14358_s3 + $0x98] sm:$0xff]  ;;  %s10637_s27 = scalar_lea.vmem %s10636_s25, 4096  ;;  %p10638_p4 = scmp.lt.s32.totalorder %s14303_s14, %s10636_s25 }
  0x59   : > { %v511_v29 = vld [vmem:[%s10950_s11 + $0x8] sm:$0x1]  ;;  %v510_v30 = vld [vmem:[%s10950_s11] sm:$0x1]  ;;  %v9553_v31 = vpack.c.bf16 %v571_v26, %v569_v25  ;;  %v9555_v32 = vpack.c.bf16 %v576_v28, %v574_v27  ;;  %v573_v33 = vld [vmem:[%s14358_s3 + $0x80] sm:$0xff]  ;;  %p10633_p2 = pnand %p10632_p1, %p10791_p5  ;;  %p10639_p6 = scmp.lt.s32.totalorder %s10637_s27, %s10631_s17 }
  0x5a   : > { %1194 = vperm.xlu0 %10115, %v511_v29   ;;  %v575_v34 = vld [vmem:[%s14358_s3 + $0x90] sm:$0xff]  ;;  %1189 = vperm.xlu1 %10116, %v510_v30   ;;  %v512_v35 = vld [vmem:[%s10950_s11 + $0x10] sm:$0x1]  ;;  %v578_v36 = vld [vmem:[%s14358_s3 + $0xa8] sm:$0xff] }
  0x5b   : > { %9546 = vmatpush1.bf16.msra.mxu0 %v9545_v17  ;;  %v580_v37 = vld [vmem:[%s14358_s3 + $0xb8] sm:$0xff]  ;;  %v513_v38 = vld [vmem:[%s10950_s11 + $0x18] sm:$0x1]  ;;  %v9557_v39 = vpack.c.bf16 %v575_v34, %v573_v33  ;;  %v577_v41 = vld [vmem:[%s14358_s3 + $0xa0] sm:$0xff]  ;;  %p10634_p3 = pneg %p10633_p2  ;;  %p10640_p7 = por %p10639_p6, %p10638_p4 }
  0x5c   : > { %9548 = vmatprep.subr.bf16.mxu0 %v9547_v18  ;;  %v9559_v40 = vpack.c.bf16 %v580_v37, %v578_v36  ;;  %v579_v42 = vld [vmem:[%s14358_s3 + $0xb0] sm:$0xff]  ;;  %v582_v44 = vld [vmem:[%s14358_s3 + $0xc8] sm:$0xff]  ;;  %v584_v45 = vld [vmem:[%s14358_s3 + $0xd8] sm:$0xff] }
  0x5d   : > { %v514_v43 = vld [vmem:[%s10950_s11 + $0x20] sm:$0x1]  ;;  %v515_v46 = vld [vmem:[%s10950_s11 + $0x28] sm:$0x1]  ;;  %v9561_v47 = vpack.c.bf16 %v579_v42, %v577_v41  ;;  %v9563_v48 = vpack.c.bf16 %v584_v45, %v582_v44  ;;  %v581_v49 = vld [vmem:[%s14358_s3 + $0xc0] sm:$0xff]  ;;  %p10641_p8 = pnand %p10640_p7, %p10634_p3 }
  0x5e   : > { %1199 = vperm.xlu0 %10115, %v512_v35   ;;  %1204 = vperm.xlu1 %10116, %v513_v38   ;;  %v583_v50 = vld [vmem:[%s14358_s3 + $0xd0] sm:$0xff]  ;;  %v519_v51 = vld [vmem:[%s10950_s11 + $0x48] sm:$0x1]  ;;  %v586_v52 = vld [vmem:[%s14358_s3 + $0xe8] sm:$0xff] }
  0x5f   : > { %9550 = vmatpush1.bf16.msra.mxu0 %v9549_v23  ;;  %v588_v53 = vld [vmem:[%s14358_s3 + $0xf8] sm:$0xff]  ;;  %v516_v54 = vld [vmem:[%s10950_s11 + $0x30] sm:$0x1]  ;;  %v9565_v55 = vpack.c.bf16 %v583_v50, %v581_v49  ;;  %v587_v58 = vld [vmem:[%s14358_s3 + $0xf0] sm:$0xff] }
  0x60   : > { %9552 = vmatprep.subr.bf16.mxu0 %v9551_v24  ;;  %v9567_v56 = vpack.c.bf16 %v588_v53, %v586_v52  ;;  %v585_v57 = vld [vmem:[%s14358_s3 + $0xe0] sm:$0xff]  ;;  %v517_v60 = vld [vmem:[%s10950_s11 + $0x38] sm:$0x1]  ;;  %v518_v62 = vld [vmem:[%s10950_s11 + $0x40] sm:$0x1] }
  0x61   : > { %v520_v59 = vld [vmem:[%s10950_s11 + $0x50] sm:$0x1]  ;;  %v9569_v61 = vpack.c.bf16 %v587_v58, %v585_v57  ;;  %v521_v63 = vld [vmem:[%s10950_s11 + $0x58] sm:$0x1]  ;;  %v522_v1 = vld [vmem:[%s10950_s11 + $0x60] sm:$0x1] }
  0x62   : > { %1209 = vperm.xlu0 %10115, %v514_v43   ;;  %1214 = vperm.xlu1 %10116, %v515_v46   ;;  %v508_v0 = vld [vmem:[#allocation2] sm:$0xff]  ;;  %v523_v2 = vld [vmem:[%s10950_s11 + $0x68] sm:$0x1]  ;;  %v509_v3 = vld [vmem:[#allocation2 + $0x8] sm:$0xff] }
  0x63   : > { %9554 = vmatpush1.bf16.msra.mxu0 %v9553_v31  ;;  %v524_v4 = vld [vmem:[%s10950_s11 + $0x70] sm:$0x1]  ;;  %v525_v5 = vld [vmem:[%s10950_s11 + $0x78] sm:$0x1]  ;;  %v1535_v6 = vld [vmem:[%s10950_s11 + $0x9] sm:$0x1] }
  0x64   : > { %9556 = vmatprep.subr.bf16.mxu0 %v9555_v32  ;;  %v1536_v7 = vld [vmem:[%s10950_s11 + $0x11] sm:$0x1]  ;;  %v1534_v8 = vld [vmem:[%s10950_s11 + $0x1] sm:$0x1]  ;;  %v1537_v10 = vld [vmem:[%s10950_s11 + $0x19] sm:$0x1] }
  0x65   : > { %v1538_v11 = vld [vmem:[%s10950_s11 + $0x21] sm:$0x1]  ;;  %v1539_v12 = vld [vmem:[%s10950_s11 + $0x29] sm:$0x1]  ;;  %v1540_v14 = vld [vmem:[%s10950_s11 + $0x31] sm:$0x1] }
  0x66   : > { %1234 = vperm.xlu0 %10115, %v519_v51   ;;  %1219 = vperm.xlu1 %10116, %v516_v54   ;;  %v1543_v13 = vld [vmem:[%s10950_s11 + $0x49] sm:$0x1]  ;;  %v1544_v15 = vld [vmem:[%s10950_s11 + $0x51] sm:$0x1]  ;;  %v1541_v16 = vld [vmem:[%s10950_s11 + $0x39] sm:$0x1] }
  0x67   : > { %9558 = vmatpush1.bf16.msra.mxu0 %v9557_v39  ;;  %v1542_v17 = vld [vmem:[%s10950_s11 + $0x41] sm:$0x1]  ;;  %v1545_v18 = vld [vmem:[%s10950_s11 + $0x59] sm:$0x1]  ;;  %v1547_v20 = vld [vmem:[%s10950_s11 + $0x69] sm:$0x1] }
  0x68   : > { %9560 = vmatprep.subr.bf16.mxu0 %v9559_v40  ;;  %v1546_v19 = vld [vmem:[%s10950_s11 + $0x61] sm:$0x1]  ;;  %v1548_v21 = vld [vmem:[%s10950_s11 + $0x71] sm:$0x1]  ;;  %v1549_v22 = vld [vmem:[%s10950_s11 + $0x79] sm:$0x1] }
  0x69   : > { %v2551_v23 = vld [vmem:[%s10950_s11 + $0xa] sm:$0x1]  ;;  %v2552_v24 = vld [vmem:[%s10950_s11 + $0x12] sm:$0x1]  ;;  %v2550_v25 = vld [vmem:[%s10950_s11 + $0x2] sm:$0x1] }
  0x6a   : > { %1239 = vperm.xlu0 %10115, %v520_v59   ;;  %1224 = vperm.xlu1 %10116, %v517_v60   ;;  %v2553_v26 = vld [vmem:[%s10950_s11 + $0x1a] sm:$0x1]  ;;  %v2554_v27 = vld [vmem:[%s10950_s11 + $0x22] sm:$0x1]  ;;  %v2555_v28 = vld [vmem:[%s10950_s11 + $0x2a] sm:$0x1] }
  0x6b   : > { %9562 = vmatpush1.bf16.msra.mxu0 %v9561_v47  ;;  %v2559_v29 = vld [vmem:[%s10950_s11 + $0x4a] sm:$0x1]  ;;  %v2556_v30 = vld [vmem:[%s10950_s11 + $0x32] sm:$0x1]  ;;  %v2557_v32 = vld [vmem:[%s10950_s11 + $0x3a] sm:$0x1] }
  0x6c   : > { %9564 = vmatprep.subr.bf16.mxu0 %v9563_v48  ;;  %v2560_v31 = vld [vmem:[%s10950_s11 + $0x52] sm:$0x1]  ;;  %v2558_v33 = vld [vmem:[%s10950_s11 + $0x42] sm:$0x1]  ;;  %v2561_v34 = vld [vmem:[%s10950_s11 + $0x5a] sm:$0x1] }
  0x6d   : > { %v2562_v35 = vld [vmem:[%s10950_s11 + $0x62] sm:$0x1]  ;;  %v2563_v36 = vld [vmem:[%s10950_s11 + $0x6a] sm:$0x1]  ;;  %v2564_v37 = vld [vmem:[%s10950_s11 + $0x72] sm:$0x1] }
  0x6e   : > { %1229 = vperm.xlu0 %10115, %v518_v62   ;;  %1244 = vperm.xlu1 %10116, %v521_v63   ;;  %v2565_v38 = vld [vmem:[%s10950_s11 + $0x7a] sm:$0x1]  ;;  %v3567_v39 = vld [vmem:[%s10950_s11 + $0xb] sm:$0x1]  ;;  %v3568_v40 = vld [vmem:[%s10950_s11 + $0x13] sm:$0x1] }
  0x6f   : > { %9566 = vmatpush1.bf16.msra.mxu0 %v9565_v55  ;;  %v3566_v41 = vld [vmem:[%s10950_s11 + $0x3] sm:$0x1]  ;;  %v3569_v42 = vld [vmem:[%s10950_s11 + $0x1b] sm:$0x1]  ;;  %v3571_v44 = vld [vmem:[%s10950_s11 + $0x2b] sm:$0x1] }
  0x70   : > { %9568 = vmatprep.subr.bf16.mxu0 %v9567_v56  ;;  %v3570_v43 = vld [vmem:[%s10950_s11 + $0x23] sm:$0x1]  ;;  %v3575_v45 = vld [vmem:[%s10950_s11 + $0x4b] sm:$0x1]  ;;  %v3572_v46 = vld [vmem:[%s10950_s11 + $0x33] sm:$0x1] }
  0x71   : > { %v3576_v47 = vld [vmem:[%s10950_s11 + $0x53] sm:$0x1]  ;;  %v3573_v48 = vld [vmem:[%s10950_s11 + $0x3b] sm:$0x1]  ;;  %v3574_v49 = vld [vmem:[%s10950_s11 + $0x43] sm:$0x1] }
  0x72   : > { %1249 = vperm.xlu0 %10115, %v522_v1   ;;  %1254 = vperm.xlu1 %10116, %v523_v2   ;;  %v3577_v50 = vld [vmem:[%s10950_s11 + $0x5b] sm:$0x1]  ;;  %v3578_v51 = vld [vmem:[%s10950_s11 + $0x63] sm:$0x1]  ;;  %v3579_v52 = vld [vmem:[%s10950_s11 + $0x6b] sm:$0x1] }
  0x73   : > { %9570 = vmatpush1.bf16.msra.mxu0 %v9569_v61  ;;  %v3580_v53 = vld [vmem:[%s10950_s11 + $0x73] sm:$0x1]  ;;  %v3581_v54 = vld [vmem:[%s10950_s11 + $0x7b] sm:$0x1]  ;;  %v4583_v55 = vld [vmem:[%s10950_s11 + $0xc] sm:$0x1] }
  0x74   : > { %v4584_v56 = vld [vmem:[%s10950_s11 + $0x14] sm:$0x1]  ;;  %v4582_v57 = vld [vmem:[%s10950_s11 + $0x4] sm:$0x1]  ;;  %v4585_v58 = vld [vmem:[%s10950_s11 + $0x1c] sm:$0x1] }
  0x75   : > { %v4586_v59 = vld [vmem:[%s10950_s11 + $0x24] sm:$0x1]  ;;  %v4587_v60 = vld [vmem:[%s10950_s11 + $0x2c] sm:$0x1]  ;;  %v4588_v62 = vld [vmem:[%s10950_s11 + $0x34] sm:$0x1] }
  0x76   : > { %654 = vmatmul.mubr.f32.vlgmr.msra.gmra.mrb[0].mxu0 %v508_v0  ;;  %1259 = vperm.xlu0 %10115, %v524_v4   ;;  %v4591_v61 = vld [vmem:[%s10950_s11 + $0x4c] sm:$0x1]  ;;  %v4592_v63 = vld [vmem:[%s10950_s11 + $0x54] sm:$0x1]  ;;  %v1033_v1 = vld [vmem:[%s14359_s4 + $0x8] sm:$0xff] }
  0x77   : > { %659 = vmatprep.mubr.f32.mxu0 %v14361_v9  ;;  %1264 = vperm.xlu1 %10116, %v525_v5   ;;  %v1032_v0 = vld [vmem:[%s14359_s4] sm:$0xff]  ;;  %v4589_v2 = vld [vmem:[%s10950_s11 + $0x3c] sm:$0x1]  ;;  %v4590_v4 = vld [vmem:[%s10950_s11 + $0x44] sm:$0x1] }
  0x78   : > { %v1034_v5 = vld [vmem:[%s14359_s4 + $0x10] sm:$0xff] }
  0x7a   : > { %660 = vmatmul.mubr.f32.gmra.mrb[2].mxu0 %v509_v3  ;;  %2219 = vperm.xlu0 %10115, %v1535_v6   ;;  %v9571_v3 = vpack.c.bf16 %v1033_v1, %v1032_v0  ;;  %v1035_v6 = vld [vmem:[%s14359_s4 + $0x18] sm:$0xff] }
  0x7b   : > { %1678 = vmatprep.mubr.f32.mxu0 %v14361_v9  ;;  %2224 = vperm.xlu1 %10116, %v1536_v7   ;;  %v4593_v7 = vld [vmem:[%s10950_s11 + $0x5c] sm:$0x1]  ;;  %v6619_v0 = vld [vmem:[%s10950_s11 + $0x2e] sm:$0x1] }
  0x7c   : > { %9572 = vmatprep.subr.bf16.mxu1 %v9571_v3 }
  0x7d   : > { %9574 = vmatpush3.bf16.msra.mxu1 %v9571_v3  ;;  %v6620_v3 = vld [vmem:[%s10950_s11 + $0x36] sm:$0x1] }
  0x7e   : > { %2214 = vperm.xlu0 %10115, %v1534_v8   ;;  %v9575_v8 = vpack.c.bf16 %v1035_v6, %v1034_v5  ;;  %v6624_v6 = vld [vmem:[%s10950_s11 + $0x56] sm:$0x1] }
  0x7f   : > { %2229 = vperm.xlu1 %10116, %v1537_v10   ;;  %v4594_v10 = vld [vmem:[%s10950_s11 + $0x64] sm:$0x1] }
  0x80   : > { %9576 = vmatprep.subr.bf16.mxu1 %v9575_v8 }
  0x81   : > { %9578 = vmatpush3.bf16.msra.mxu1 %v9575_v8  ;;  %v6622_v8 = vld [vmem:[%s10950_s11 + $0x46] sm:$0x1] }
  0x82   : > { %2234 = vperm.xlu0 %10115, %v1538_v11   ;;  %v1036_v11 = vld [vmem:[%s14359_s4 + $0x20] sm:$0xff] }
  0x83   : > { %2239 = vperm.xlu1 %10116, %v1539_v12   ;;  %v1037_v12 = vld [vmem:[%s14359_s4 + $0x28] sm:$0xff] }
  0x86   : > { %2259 = vperm.xlu0 %10115, %v1543_v13   ;;  %v4595_v13 = vld [vmem:[%s10950_s11 + $0x6c] sm:$0x1] }
  0x87   : > { %2244 = vperm.xlu1 %10116, %v1540_v14   ;;  %v9579_v14 = vpack.c.bf16 %v1037_v12, %v1036_v11  ;;  %v6625_v11 = vld [vmem:[%s10950_s11 + $0x5e] sm:$0x1] }
  0x89   : > { %9580 = vmatprep.subr.bf16.mxu1 %v9579_v14 }
  0x8a   : > { %2264 = vperm.xlu0 %10115, %v1544_v15   ;;  %v4596_v15 = vld [vmem:[%s10950_s11 + $0x74] sm:$0x1]  ;;  %9582 = vmatpush3.bf16.msra.mxu1 %v9579_v14  ;;  %v6627_v14 = vld [vmem:[%s10950_s11 + $0x6e] sm:$0x1] }
  0x8b   : > { %2249 = vperm.xlu1 %10116, %v1541_v16   ;;  %v1038_v16 = vld [vmem:[%s14359_s4 + $0x30] sm:$0xff] }
  0x8e   : > { %2254 = vperm.xlu0 %10115, %v1542_v17   ;;  %v1039_v17 = vld [vmem:[%s14359_s4 + $0x38] sm:$0xff] }
  0x8f   : > { %2269 = vperm.xlu1 %10116, %v1545_v18   ;;  %v4597_v18 = vld [vmem:[%s10950_s11 + $0x7c] sm:$0x1] }
  0x92   : > { %2274 = vperm.xlu0 %10115, %v1546_v19   ;;  %v9583_v19 = vpack.c.bf16 %v1039_v17, %v1038_v16  ;;  %v6628_v17 = vld [vmem:[%s10950_s11 + $0x76] sm:$0x1] }
  0x93   : > { %2279 = vperm.xlu1 %10116, %v1547_v20   ;;  %v5599_v20 = vld [vmem:[%s10950_s11 + $0xd] sm:$0x1] }
  0x94   : > { %9584 = vmatprep.subr.bf16.mxu1 %v9583_v19 }
  0x95   : > { %9586 = vmatpush3.bf16.msra.mxu1 %v9583_v19  ;;  %v7631_v19 = vld [vmem:[%s10950_s11 + $0xf] sm:$0x1] }
  0x96   : > { %2284 = vperm.xlu0 %10115, %v1548_v21   ;;  %v1040_v21 = vld [vmem:[%s14359_s4 + $0x40] sm:$0xff] }
  0x97   : > { %2289 = vperm.xlu1 %10116, %v1549_v22   ;;  %v1041_v22 = vld [vmem:[%s14359_s4 + $0x48] sm:$0xff] }
  0x9a   : > { %3235 = vperm.xlu0 %10115, %v2551_v23   ;;  %v5600_v23 = vld [vmem:[%s10950_s11 + $0x15] sm:$0x1] }
  0x9b   : > { %3240 = vperm.xlu1 %10116, %v2552_v24   ;;  %v9587_v24 = vpack.c.bf16 %v1041_v22, %v1040_v21  ;;  %v7639_v21 = vld [vmem:[%s10950_s11 + $0x4f] sm:$0x1] }
  0x9d   : > { %9588 = vmatprep.subr.bf16.mxu1 %v9587_v24 }
  0x9e   : > { %3230 = vperm.xlu0 %10115, %v2550_v25   ;;  %v5598_v25 = vld [vmem:[%s10950_s11 + $0x5] sm:$0x1]  ;;  %9590 = vmatpush3.bf16.msra.mxu1 %v9587_v24  ;;  %v10713_v24 = vmov 1966171168  }
  0x9f   : > { %3245 = vperm.xlu1 %10116, %v2553_v26   ;;  %v1042_v26 = vld [vmem:[%s14359_s4 + $0x50] sm:$0xff] }
  0xa2   : > { %3250 = vperm.xlu0 %10115, %v2554_v27   ;;  %v1043_v27 = vld [vmem:[%s14359_s4 + $0x58] sm:$0xff] }
  0xa3   : > { %3255 = vperm.xlu1 %10116, %v2555_v28   ;;  %v5601_v28 = vld [vmem:[%s10950_s11 + $0x1d] sm:$0x1] }
  0xa6   : > { %3275 = vperm.xlu0 %10115, %v2559_v29   ;;  %v9591_v29 = vpack.c.bf16 %v1043_v27, %v1042_v26  ;;  %v675_v26 = vlaneseq  ;;  %v7640_v27 = vld [vmem:[%s10950_s11 + $0x57] sm:$0x1] }
  0xa7   : > { %3260 = vperm.xlu1 %10116, %v2556_v30   ;;  %v1044_v30 = vld [vmem:[%s14359_s4 + $0x60] sm:$0xff] }
  0xa8   : > { %9592 = vmatprep.subr.bf16.mxu1 %v9591_v29 }
  0xa9   : > { %9594 = vmatpush3.bf16.msra.mxu1 %v9591_v29 }
  0xaa   : > { %3280 = vperm.xlu0 %10115, %v2560_v31   ;;  %v1045_v31 = vld [vmem:[%s14359_s4 + $0x68] sm:$0xff] }
  0xab   : > { %3265 = vperm.xlu1 %10116, %v2557_v32   ;;  %v5602_v32 = vld [vmem:[%s10950_s11 + $0x25] sm:$0x1] }
  0xae   : > { %3270 = vperm.xlu0 %10115, %v2558_v33   ;;  %v9595_v33 = vpack.c.bf16 %v1045_v31, %v1044_v30  ;;  %v7630_v30 = vld [vmem:[%s10950_s11 + $0x7] sm:$0x1] }
  0xaf   : > { %3285 = vperm.xlu1 %10116, %v2561_v34   ;;  %v1046_v34 = vld [vmem:[%s14359_s4 + $0x70] sm:$0xff] }
  0xb0   : > { %9596 = vmatprep.subr.bf16.mxu1 %v9595_v33 }
  0xb1   : > { %9598 = vmatpush3.bf16.msra.mxu1 %v9595_v33  ;;  %v7633_v33 = vld [vmem:[%s10950_s11 + $0x1f] sm:$0x1] }
  0xb2   : > { %3290 = vperm.xlu0 %10115, %v2562_v35   ;;  %v1047_v35 = vld [vmem:[%s14359_s4 + $0x78] sm:$0xff] }
  0xb3   : > { %3295 = vperm.xlu1 %10116, %v2563_v36   ;;  %v5603_v36 = vld [vmem:[%s10950_s11 + $0x2d] sm:$0x1] }
  0xb6   : > { %3300 = vperm.xlu0 %10115, %v2564_v37   ;;  %v9599_v37 = vpack.c.bf16 %v1047_v35, %v1046_v34  ;;  %v7638_v34 = vld [vmem:[%s10950_s11 + $0x47] sm:$0x1] }
  0xb7   : > { %3305 = vperm.xlu1 %10116, %v2565_v38  }
  0xb8   : > { %9600 = vmatprep.subr.bf16.mxu1 %v9599_v37 }
  0xb9   : > { %9602 = vmatpush3.bf16.msra.mxu1 %v9599_v37 }
  0xba   : > { %4251 = vperm.xlu0 %10115, %v3567_v39  }
  0xbb   : > { %4256 = vperm.xlu1 %10116, %v3568_v40   ;;  %v5607_v40 = vld [vmem:[%s10950_s11 + $0x4d] sm:$0x1] }
  0xbe   : > { %4246 = vperm.xlu0 %10115, %v3566_v41   ;;  %v5604_v41 = vld [vmem:[%s10950_s11 + $0x35] sm:$0x1] }
  0xbf   : > { %4261 = vperm.xlu1 %10116, %v3569_v42   ;;  %v5608_v42 = vld [vmem:[%s10950_s11 + $0x55] sm:$0x1] }
  0xc2   : > { %4266 = vperm.xlu0 %10115, %v3570_v43  }
  0xc3   : > { %4271 = vperm.xlu1 %10116, %v3571_v44   ;;  %v5605_v44 = vld [vmem:[%s10950_s11 + $0x3d] sm:$0x1] }
  0xc6   : > { %4291 = vperm.xlu0 %10115, %v3575_v45  }
  0xc7   : > { %4276 = vperm.xlu1 %10116, %v3572_v46   ;;  %v5606_v46 = vld [vmem:[%s10950_s11 + $0x45] sm:$0x1] }
  0xca   : > { %4296 = vperm.xlu0 %10115, %v3576_v47   ;;  %v5609_v47 = vld [vmem:[%s10950_s11 + $0x5d] sm:$0x1] }
  0xcb   : > { %4281 = vperm.xlu1 %10116, %v3573_v48  }
  0xce   : > { %4286 = vperm.xlu0 %10115, %v3574_v49  }
  0xcf   : > { %4301 = vperm.xlu1 %10116, %v3577_v50   ;;  %v5610_v50 = vld [vmem:[%s10950_s11 + $0x65] sm:$0x1] }
  0xd2   : > { %4306 = vperm.xlu0 %10115, %v3578_v51   ;;  %v5611_v51 = vld [vmem:[%s10950_s11 + $0x6d] sm:$0x1] }
  0xd3   : > { %4311 = vperm.xlu1 %10116, %v3579_v52   ;;  %v5612_v52 = vld [vmem:[%s10950_s11 + $0x75] sm:$0x1] }
  0xd6   : > { %4316 = vperm.xlu0 %10115, %v3580_v53  }
  0xd7   : > { %4321 = vperm.xlu1 %10116, %v3581_v54   ;;  %v5613_v54 = vld [vmem:[%s10950_s11 + $0x7d] sm:$0x1] }
  0xd9   : > { %v11194_v38 = vpop.permute.xlu0 %1194  ;;  %v11196_v39 = vpop.permute.xlu1 %1189 }
  0xda   : > { %5267 = vperm.xlu0 %10115, %v4583_v55  }
  0xdb   : > { %5272 = vperm.xlu1 %10116, %v4584_v56   ;;  %v6615_v56 = vld [vmem:[%s10950_s11 + $0xe] sm:$0x1] }
  0xdd   : > { %v11201_v43 = vpop.permute.xlu0 %1199  ;;  %v11204_v45 = vpop.permute.xlu1 %1204 }
  0xde   : > { %5262 = vperm.xlu0 %10115, %v4582_v57   ;;  %v6616_v57 = vld [vmem:[%s10950_s11 + $0x16] sm:$0x1] }
  0xdf   : > { %5277 = vperm.xlu1 %10116, %v4585_v58  }
  0xe1   : > { %v11208_v48 = vpop.permute.xlu0 %1209  ;;  %v11210_v49 = vpop.permute.xlu1 %1214 }
  0xe2   : > { %5282 = vperm.xlu0 %10115, %v4586_v59  }
  0xe3   : > { %5287 = vperm.xlu1 %10116, %v4587_v60   ;;  %v6614_v60 = vld [vmem:[%s10950_s11 + $0x6] sm:$0x1] }
  0xe5   : > { %v11215_v53 = vpop.permute.xlu0 %1234  ;;  %v11218_v55 = vpop.permute.xlu1 %1219 }
  0xe6   : > { %5307 = vperm.xlu0 %10115, %v4591_v61   ;;  %v6617_v61 = vld [vmem:[%s10950_s11 + $0x1e] sm:$0x1] }
  0xe7   : > { %5292 = vperm.xlu1 %10116, %v4588_v62   ;;  %v6618_v62 = vld [vmem:[%s10950_s11 + $0x26] sm:$0x1] }
  0xe9   : > { %v11222_v58 = vpop.permute.xlu0 %1239  ;;  %v11224_v59 = vpop.permute.xlu1 %1224 }
  0xea   : > { %5312 = vperm.xlu0 %10115, %v4592_v63  }
  0xeb   : > { %5297 = vperm.xlu1 %10116, %v4589_v2   ;;  %v6623_v2 = vld [vmem:[%s10950_s11 + $0x4e] sm:$0x1] }
  0xed   : > { %v11229_v63 = vpop.permute.xlu0 %1229  ;;  %v11232_v1 = vpop.permute.xlu1 %1244 }
  0xee   : > { %5302 = vperm.xlu0 %10115, %v4590_v4  }
  0xef   : > { %5317 = vperm.xlu1 %10116, %v4593_v7   ;;  %v6621_v7 = vld [vmem:[%s10950_s11 + $0x3e] sm:$0x1] }
  0xf1   : > { %v11236_v4 = vpop.permute.xlu0 %1249  ;;  %v11238_v5 = vpop.permute.xlu1 %1254 }
  0xf2   : > { %5322 = vperm.xlu0 %10115, %v4594_v10  }
  0xf3   : > { %5327 = vperm.xlu1 %10116, %v4595_v13   ;;  %v6626_v13 = vld [vmem:[%s10950_s11 + $0x66] sm:$0x1] }
  0xf5   : > { %v11243_v10 = vpop.permute.xlu0 %1259 }
  0xf6   : > { %5332 = vperm.xlu0 %10115, %v4596_v15   ;;  %v11246_v12 = vpop.permute.xlu1 %1264 }
  0xf7   : > { %5337 = vperm.xlu1 %10116, %v4597_v18   ;;  %v6629_v18 = vld [vmem:[%s10950_s11 + $0x7e] sm:$0x1] }
  0xf9   : > { %v11250_v15 = vpop.permute.xlu0 %2219 }
  0xfa   : > { %6283 = vperm.xlu0 %10115, %v5599_v20   ;;  %14386 = vst [vmem:[#allocation8_spill] sm:$0xff] %v11250_v15  ;;  %v11252_v16 = vpop.permute.xlu1 %2224 }
  0xfb   : > { %6288 = vperm.xlu1 %10116, %v5600_v23   ;;  %14387 = vst [vmem:[#allocation9_spill] sm:$0xff] %v11252_v16  ;;  %v7632_v23 = vld [vmem:[%s10950_s11 + $0x17] sm:$0x1] }
  0xfd   : > { %v11257_v20 = vpop.permute.xlu0 %2214 }
  0xfe   : > { %6278 = vperm.xlu0 %10115, %v5598_v25   ;;  %14388 = vst [vmem:[#allocation10_spill] sm:$0xff] %v11257_v20  ;;  %v11260_v22 = vpop.permute.xlu1 %2229  ;;  %v673_v25 = vunpack.c.l.s4 %v10713_v24  ;;  %v7643_v24 = vld [vmem:[%s10950_s11 + $0x6f] sm:$0x1] }
  0xff   : > { %6293 = vperm.xlu1 %10116, %v5601_v28   ;;  %14389 = vst [vmem:[#allocation11_spill] sm:$0xff] %v11260_v22 }
 0x100   : > { %v674_v31 = vunpack.c.0.s8 %v673_v25  ;;  %v8794_v25 = vld [vmem:[%s10948_s10 + $0x48] ss:$8 sm:$0x3] }
 0x101   : > { %v11264_v28 = vpop.permute.xlu0 %2234 }
 0x102   : > { %6298 = vperm.xlu0 %10115, %v5602_v32   ;;  %14390 = vst [vmem:[#allocation12_spill] sm:$0xff] %v11264_v28  ;;  %v11266_v29 = vpop.permute.xlu1 %2239  ;;  %v676_v32 = vshrl.u32 %v675_v26, 7  ;;  %v8797_v26 = vld [vmem:[%s10948_s10 + $0x90] ss:$8 sm:$0x3] }
 0x103   : > { %6303 = vperm.xlu1 %10116, %v5603_v36   ;;  %14391 = vst [vmem:[#allocation13_spill] sm:$0xff] %v11266_v29 }
 0x104   : > { %v11271_v36 = vsub.s32 %v674_v31, %v676_v32 }
 0x105   : > { %v11273_v37 = vpop.permute.xlu0 %2259 }
 0x106   : > { %6323 = vperm.xlu0 %10115, %v5607_v40   ;;  %14392 = vst [vmem:[#allocation14_spill] sm:$0xff] %v11273_v37  ;;  %v7641_v40 = vld [vmem:[%s10950_s11 + $0x5f] sm:$0x1] }
 0x107   : > { %6308 = vperm.xlu1 %10116, %v5604_v41  }
 0x10a   : > { %6328 = vperm.xlu0 %10115, %v5608_v42   ;;  %v11276_v42 = vpop.permute.xlu1 %2244 }
 0x10b   : > { %6313 = vperm.xlu1 %10116, %v5605_v44   ;;  %14393 = vst [vmem:[#allocation15_spill] sm:$0xff] %v11276_v42 }
 0x10e   : > { %6318 = vperm.xlu0 %10115, %v5606_v46  }
 0x10f   : > { %6333 = vperm.xlu1 %10116, %v5609_v47   ;;  %v7634_v47 = vld [vmem:[%s10950_s11 + $0x27] sm:$0x1] }
 0x112   : > { %6338 = vperm.xlu0 %10115, %v5610_v50  }
 0x113   : > { %6343 = vperm.xlu1 %10116, %v5611_v51  }
 0x116   : > { %6348 = vperm.xlu0 %10115, %v5612_v52  }
 0x117   : > { %6353 = vperm.xlu1 %10116, %v5613_v54   ;;  %v7642_v54 = vld [vmem:[%s10950_s11 + $0x67] sm:$0x1] }
 0x11a   : > { %7299 = vperm.xlu0 %10115, %v6615_v56   ;;  %v526_v56 = vld [vmem:[%s10948_s10] ss:$8 sm:$0x3] }
 0x11b   : > { %7304 = vperm.xlu1 %10116, %v6616_v57  }
 0x11e   : > { %7294 = vperm.xlu0 %10115, %v6614_v60   ;;  %v8792_v60 = vld [vmem:[%s10948_s10 + $0x18] ss:$8 sm:$0x3] }
 0x11f   : > { %7309 = vperm.xlu1 %10116, %v6617_v61   ;;  %v8795_v61 = vld [vmem:[%s10948_s10 + $0x60] ss:$8 sm:$0x3] }
 0x122   : > { %7314 = vperm.xlu0 %10115, %v6618_v62  }
 0x123   : > { %7319 = vperm.xlu1 %10116, %v6619_v0  }
 0x126   : > { %7339 = vperm.xlu0 %10115, %v6623_v2  }
 0x127   : > { %7324 = vperm.xlu1 %10116, %v6620_v3  }
 0x12a   : > { %7344 = vperm.xlu0 %10115, %v6624_v6   ;;  %v11287_v6 = vpop.permute.xlu0 %2264 }
 0x12b   : > { %7329 = vperm.xlu1 %10116, %v6621_v7   ;;  %14394 = vst [vmem:[#allocation16_spill] sm:$0xff] %v11287_v6  ;;  %v8793_v7 = vld [vmem:[%s10948_s10 + $0x30] ss:$8 sm:$0x3] }
 0x12e   : > { %7334 = vperm.xlu0 %10115, %v6622_v8  }
 0x12f   : > { %7349 = vperm.xlu1 %10116, %v6625_v11  }
 0x132   : > { %7354 = vperm.xlu0 %10115, %v6626_v13   ;;  %v11290_v13 = vpop.permute.xlu1 %2249 }
 0x133   : > { %7359 = vperm.xlu1 %10116, %v6627_v14   ;;  %14395 = vst [vmem:[#allocation17_spill] sm:$0xff] %v11290_v13  ;;  %v7635_v14 = vld [vmem:[%s10950_s11 + $0x2f] sm:$0x1] }
 0x136   : > { %7364 = vperm.xlu0 %10115, %v6628_v17   ;;  %v8796_v17 = vld [vmem:[%s10948_s10 + $0x78] ss:$8 sm:$0x3] }
 0x137   : > { %7369 = vperm.xlu1 %10116, %v6629_v18  }
 0x13a   : > { %8315 = vperm.xlu0 %10115, %v7631_v19  }
 0x13b   : > { %8355 = vperm.xlu1 %10116, %v7639_v21  }
 0x13e   : > { %8320 = vperm.xlu0 %10115, %v7632_v23  }
 0x13f   : > { %8360 = vperm.xlu1 %10116, %v7640_v27  }
 0x142   : > { %8310 = vperm.xlu0 %10115, %v7630_v30  }
 0x143   : > { %8325 = vperm.xlu1 %10116, %v7633_v33   ;;  %v8798_v33 = vld [vmem:[%s10948_s10 + $0xa8] ss:$8 sm:$0x3] }
 0x146   : > { %8350 = vperm.xlu0 %10115, %v7638_v34  }
 0x147   : > { %8365 = vperm.xlu1 %10116, %v7641_v40  }
 0x149   : > { %v655_v35 = vpop.f32.mrb[0].mxu0 }
 0x14a   : > { %v657_v41 = vpop.f32.mrb[1].mxu0  ;;  %8330 = vperm.xlu0 %10115, %v7634_v47   ;;  %v7636_v47 = vld [vmem:[%s10950_s11 + $0x37] sm:$0x1] }
 0x14b   : > { %v670_v44 = vcombine.low %v655_v35, %v657_v41  ;;  %v671_v46 = vcombine.high %v655_v35, %v657_v41  ;;  %8370 = vperm.xlu1 %10116, %v7642_v54  }
 0x14d   : > { %v678_v50 = vrot.slane %v670_v44, %v11271_v36  ;;  %v685_v51 = vrot.slane %v671_v46, %v11271_v36  ;;  %v661_v52 = vpop.f32.mrb[2].mxu0 }
 0x14e   : > { %v663_v57 = vpop.f32.mrb[3].mxu0  ;;  %8335 = vperm.xlu0 %10115, %v7635_v14  }
 0x14f   : > { %v686_v62 = vcombine.high %v678_v50, %v678_v50  ;;  %v687_v0 = vcombine.high %v685_v51, %v685_v51  ;;  %v694_v2 = vrot.slane %v678_v50, %v11271_v36  ;;  %v701_v3 = vrot.slane %v685_v51, %v11271_v36  ;;  %8375 = vperm.xlu1 %10116, %v7643_v24  }
 0x150   : > { %v720_v8 = vcombine.low %v661_v52, %v663_v57  ;;  %v721_v11 = vcombine.high %v661_v52, %v663_v57  ;;  %v7644_v57 = vld [vmem:[%s10950_s11 + $0x77] sm:$0x1] }
 0x151   : > { %v708_v18 = vrot.slane %v686_v62, %v11271_v36  ;;  %v715_v19 = vrot.slane %v687_v0, %v11271_v36  ;;  %v716_v21 = vcombine.high %v694_v2, %v694_v2  ;;  %v717_v23 = vcombine.high %v701_v3, %v701_v3  ;;  %v8799_v62 = vld [vmem:[%s10948_s10 + $0xc0] ss:$8 sm:$0x3] }
 0x152   : > { %v786_v27 = vadd.f32 %v694_v2, %v526_v56  ;;  %v790_v30 = vadd.f32 %v8795_v61, %v701_v3  ;;  %v728_v31 = vrot.slane %v720_v8, %v11271_v36  ;;  %v735_v32 = vrot.slane %v721_v11, %v11271_v36  ;;  %v11303_v56 = vpop.permute.xlu0 %2254  ;;  %v11308_v2 = vpop.permute.xlu1 %2269  ;;  %v8801_v8 = vld [vmem:[%s10948_s10 + $0xf0] ss:$8 sm:$0x3]  ;;  %8340 = vperm.xlu0 %10115, %v7636_v47   ;;  %v1585_v47 = vld [vmem:[%s14358_s3 + $0x18] sm:$0xff] }
 0x153   : > { %v718_v34 = vcombine.high %v708_v18, %v708_v18  ;;  %v719_v35 = vcombine.high %v715_v19, %v715_v19  ;;  %v787_v40 = vadd.f32 %v8792_v60, %v708_v18  ;;  %v788_v41 = vadd.f32 %v8793_v7, %v716_v21  ;;  %14396 = vst [vmem:[#allocation18_spill] sm:$0xff] %v11303_v56  ;;  %v8800_v60 = vld [vmem:[%s10948_s10 + $0xd8] ss:$8 sm:$0x3] }
 0x154   : > { %v791_v44 = vadd.f32 %v8796_v17, %v715_v19  ;;  %v8807_v46 = vmul.f32 -1.442695, %v786_v27  ;;  %v792_v51 = vadd.f32 %v8797_v26, %v717_v23  ;;  %v8811_v61 = vmul.f32 -1.442695, %v790_v30  ;;  %14397 = vst [vmem:[#allocation19_spill] sm:$0xff] %v11308_v2  ;;  %8380 = vperm.xlu1 %10116, %v7644_v57   ;;  %v1582_v57 = vld [vmem:[%s14358_s3] sm:$0xff] }
 0x155   : > { %v789_v50 = vadd.f32 %v8794_v25, %v718_v34  ;;  %v8808_v52 = vmul.f32 -1.442695, %v787_v40  ;;  %v8809_v54 = vmul.f32 -1.442695, %v788_v41  ;;  %v736_v0 = vcombine.high %v728_v31, %v728_v31  ;;  %v7637_v23 = vld [vmem:[%s10950_s11 + $0x3f] sm:$0x1] }
 0x156   : > { %10117 = vpow2.f32 %v8807_v46  ;;  %v793_v3 = vadd.f32 %v8798_v33, %v719_v35  ;;  %v737_v11 = vcombine.high %v735_v32, %v735_v32  ;;  %v8812_v14 = vmul.f32 -1.442695, %v791_v44  ;;  %v8803_v17 = vld [vmem:[%s10948_s10 + $0x120] ss:$8 sm:$0x3]  ;;  %v11322_v44 = vpop.permute.xlu0 %2274  ;;  %8345 = vperm.xlu0 %10115, %v7637_v23   ;;  %v1583_v46 = vld [vmem:[%s14358_s3 + $0x8] sm:$0xff] }
 0x157   : > { %10119 = vpow2.f32 %v8808_v52  ;;  %v8810_v7 = vmul.f32 -1.442695, %v789_v50  ;;  %v744_v18 = vrot.slane %v728_v31, %v11271_v36  ;;  %v751_v19 = vrot.slane %v735_v32, %v11271_v36  ;;  %v7645_v26 = vld [vmem:[%s10950_s11 + $0x7f] sm:$0x1]  ;;  %14398 = vst [vmem:[#allocation20_spill] sm:$0xff] %v11322_v44  ;;  %s8649_s11 = scalar_lea.sflag [#allocation6], %s10944_s30 }
 0x158   : > { %v758_v21 = vrot.slane %v736_v0, %v11271_v36  ;;  %10121 = vpow2.f32 %v8809_v54  ;;  %v8813_v24 = vmul.f32 -1.442695, %v792_v51  ;;  %v765_v25 = vrot.slane %v737_v11, %v11271_v36  ;;  %v8802_v27 = vld [vmem:[%s10948_s10 + $0x108] ss:$8 sm:$0x3]  ;;  %v11330_v54 = vpop.permute.xlu1 %2279  ;;  %8385 = vperm.xlu1 %10116, %v7645_v26   ;;  %v11434_v56 = vld [vmem:[#allocation2 + $0x8] sm:$0xff] }
 0x159   : > { %10123 = vpow2.f32 %v8811_v61  ;;  %v8804_v30 = vld [vmem:[%s10948_s10 + $0x138] ss:$8 sm:$0x3]  ;;  %v766_v33 = vcombine.high %v744_v18, %v744_v18  ;;  %v8814_v31 = vmul.f32 -1.442695, %v793_v3  ;;  %v794_v32 = vadd.f32 %v8799_v62, %v744_v18  ;;  %14399 = vst [vmem:[#allocation21_spill] sm:$0xff] %v11330_v54 }
 0x15a   : > { %v768_v34 = vcombine.high %v758_v21, %v758_v21  ;;  %10125 = vpow2.f32 %v8810_v7  ;;  %v8805_v35 = vld [vmem:[%s10948_s10 + $0x150] ss:$8 sm:$0x3]  ;;  %v795_v41 = vadd.f32 %v8800_v60, %v758_v21  ;;  %v767_v50 = vcombine.high %v751_v19, %v751_v19  ;;  %v1584_v61 = vld [vmem:[%s14358_s3 + $0x10] sm:$0xff]  ;;  %v1589_v3 = vld [vmem:[%s14358_s3 + $0x38] sm:$0xff] }
 0x15b   : > { %v8806_v40 = vld [vmem:[%s10948_s10 + $0x168] ss:$8 sm:$0x3]  ;;  %10127 = vpow2.f32 %v8812_v14  ;;  %v769_v51 = vcombine.high %v765_v25, %v765_v25  ;;  %v796_v52 = vadd.f32 %v8801_v8, %v766_v33  ;;  %v1587_v62 = vld [vmem:[%s14358_s3 + $0x28] sm:$0xff]  ;;  %v798_v0 = vadd.f32 %v8803_v17, %v751_v19  ;;  %v1588_v8 = vld [vmem:[%s14358_s3 + $0x30] sm:$0xff] }
 0x15c   : > { %10129 = vpow2.f32 %v8813_v24  ;;  %v797_v60 = vadd.f32 %v8802_v27, %v768_v34  ;;  %v1586_v7 = vld [vmem:[%s14358_s3 + $0x20] sm:$0xff]  ;;  %v8815_v11 = vmul.f32 -1.442695, %v794_v32  ;;  %v8816_v14 = vmul.f32 -1.442695, %v795_v41  ;;  %v1591_v19 = vld [vmem:[%s14358_s3 + $0x48] sm:$0xff] }
 0x15d   : > { %v8817_v18 = vmul.f32 -1.442695, %v796_v52  ;;  %v11350_v21 = vpack.c.bf16 %v1585_v47, %v1583_v46  ;;  %10131 = vpow2.f32 %v8814_v31  ;;  %v799_v23 = vadd.f32 %v8804_v30, %v765_v25  ;;  %v1593_v34 = vld [vmem:[%s14358_s3 + $0x58] sm:$0xff] }
 0x15e   : > { %v11352_v17 = vpack.c.bf16 %v1584_v61, %v1582_v57  ;;  %v800_v26 = vadd.f32 %v8805_v35, %v767_v50  ;;  %v801_v27 = vadd.f32 %v8806_v40, %v769_v51  ;;  %10133 = vpow2.f32 %v8815_v11 }
 0x15f   : > { %9604 = vmatprep.subr.bf16.mxu0 %v11350_v21  ;;  %v11358_v33 = vpack.c.bf16 %v1589_v3, %v1587_v62  ;;  %10135 = vpow2.f32 %v8816_v14  ;;  %v8818_v30 = vmul.f32 -1.442695, %v797_v60  ;;  %v11364_v32 = vpack.c.bf16 %v1588_v8, %v1586_v7 }
 0x160   : > { %v10118_v24 = vpop.eup %10117  ;;  %9606 = vmatpush1.bf16.msra.mxu0 %v11352_v17  ;;  %10137 = vpow2.f32 %v8817_v18  ;;  %v8819_v35 = vmul.f32 -1.442695, %v798_v0  ;;  %v11367_v40 = vpack.c.bf16 %v1593_v34, %v1591_v19  ;;  %v8820_v50 = vmul.f32 -1.442695, %v799_v23 }
 0x161   : > { %v10120_v31 = vpop.eup %10119  ;;  %v850_v25 = vadd.f32 1.0, %v10118_v24  ;;  %9608 = vmatprep.subr.bf16.mxu0 %v11358_v33  ;;  %v8821_v57 = vmul.f32 -1.442695, %v800_v26  ;;  %v8822_v62 = vmul.f32 -1.442695, %v801_v27 }
 0x162   : > { %v851_v41 = vadd.f32 1.0, %v10120_v31  ;;  %v10122_v46 = vpop.eup %10121 }
 0x163   : > { %10139 = vrcp.f32 %v850_v25  ;;  %v10124_v47 = vpop.eup %10123  ;;  %v852_v0 = vadd.f32 1.0, %v10122_v46 }
 0x164   : > { %10141 = vrcp.f32 %v851_v41  ;;  %v10126_v51 = vpop.eup %10125  ;;  %v854_v52 = vadd.f32 1.0, %v10124_v47  ;;  %9610 = vmatpush1.bf16.msra.mxu0 %v11364_v32 }
 0x165   : > { %10143 = vpow2.f32 %v8818_v30  ;;  %v10128_v61 = vpop.eup %10127  ;;  %9612 = vmatprep.subr.bf16.mxu0 %v11367_v40  ;;  %v853_v3 = vadd.f32 1.0, %v10126_v51 }
 0x166   : > { %10145 = vpow2.f32 %v8819_v35  ;;  %v10130_v60 = vpop.eup %10129  ;;  %v855_v11 = vadd.f32 1.0, %v10128_v61 }
 0x167   : > { %10147 = vrcp.f32 %v854_v52  ;;  %v10132_v7 = vpop.eup %10131  ;;  %v856_v24 = vadd.f32 1.0, %v10130_v60 }
 0x168   : > { %10149 = vpow2.f32 %v8820_v50  ;;  %v10134_v8 = vpop.eup %10133  ;;  %v857_v31 = vadd.f32 1.0, %v10132_v7 }
 0x169   : > { %10151 = vpow2.f32 %v8821_v57  ;;  %v10136_v14 = vpop.eup %10135  ;;  %v858_v18 = vadd.f32 1.0, %v10134_v8 }
 0x16a   : > { %10153 = vpow2.f32 %v8822_v62  ;;  %v10138_v23 = vpop.eup %10137  ;;  %v859_v19 = vadd.f32 1.0, %v10136_v14 }
 0x16b   : > { %10155 = vrcp.f32 %v852_v0  ;;  %v860_v27 = vadd.f32 1.0, %v10138_v23 }
 0x16c   : > { %10157 = vrcp.f32 %v853_v3 }
 0x16d   : > { %v11371_v26 = vpop.eup %10139  ;;  %10159 = vrcp.f32 %v858_v18 }
 0x16e   : > { %v11373_v34 = vpop.eup %10141  ;;  %10161 = vrcp.f32 %v855_v11 }
 0x16f   : > { %v10144_v25 = vpop.eup %10143  ;;  %10163 = vrcp.f32 %v859_v19  ;;  %v930_v3 = vcombine.low %v11371_v26, %v11373_v34 }
 0x170   : > { %v10146_v30 = vpop.eup %10145  ;;  %10165 = vrcp.f32 %v856_v24  ;;  %v861_v41 = vadd.f32 1.0, %v10144_v25 }
 0x171   : > { %v11375_v35 = vpop.eup %10147  ;;  %v862_v46 = vadd.f32 1.0, %v10146_v30  ;;  %10167 = vrcp.f32 %v860_v27  ;;  %v940_v24 = vrot.slane %v930_v3, %v11271_v36 }
 0x172   : > { %v10150_v47 = vpop.eup %10149  ;;  %10169 = vrcp.f32 %v857_v31 }
 0x173   : > { %v10152_v50 = vpop.eup %10151  ;;  %10171 = vrcp.f32 %v862_v46  ;;  %v863_v51 = vadd.f32 1.0, %v10150_v47 }
 0x174   : > { %v10154_v52 = vpop.eup %10153  ;;  %10173 = vrcp.f32 %v861_v41  ;;  %v864_v57 = vadd.f32 1.0, %v10152_v50 }
 0x175   : > { %v11377_v61 = vpop.eup %10155  ;;  %10175 = vrcp.f32 %v863_v51  ;;  %v865_v62 = vadd.f32 1.0, %v10154_v52 }
 0x176   : > { %v11379_v60 = vpop.eup %10157  ;;  %10177 = vrcp.f32 %v864_v57 }
 0x177   : > { %v11381_v0 = vpop.eup %10159  ;;  %10179 = vrcp.f32 %v865_v62  ;;  %v931_v7 = vcombine.low %v11377_v61, %v11379_v60 }
 0x178   : > { %v11387_v8 = vpop.eup %10161 }
 0x179   : > { %v11389_v11 = vpop.eup %10163  ;;  %v947_v14 = vrot.slane %v931_v7, %v11271_v36  ;;  %v932_v19 = vcombine.low %v11375_v35, %v11387_v8 }
 0x17a   : > { %v11392_v18 = vpop.eup %10165  ;;  %v979_v41 = vcombine.low %v11381_v0, %v11389_v11 }
 0x17b   : > { %v11394_v23 = vpop.eup %10167  ;;  %v962_v30 = vcombine.high %v940_v24, %v947_v14  ;;  %v954_v50 = vrot.slane %v932_v19, %v11271_v36 }
 0x17c   : > { %v11399_v27 = vpop.eup %10169  ;;  %v989_v24 = vrot.slane %v979_v41, %v11271_v36 }
 0x17d   : > { %v11401_v31 = vpop.eup %10171  ;;  %v933_v25 = vcombine.low %v11392_v18, %v11399_v27  ;;  %v970_v14 = vrot.slane %v962_v30, %v11271_v36 }
 0x17e   : > { %v11407_v46 = vpop.eup %10173 }
 0x17f   : > { %v11409_v47 = vpop.eup %10175  ;;  %v961_v51 = vrot.slane %v933_v25, %v11271_v36  ;;  %v980_v52 = vcombine.low %v11394_v23, %v11407_v46 }
 0x180   : > { %v11415_v57 = vpop.eup %10177  ;;  %v981_v62 = vcombine.low %v11401_v31, %v11409_v47 }
 0x181   : > { %v11419_v3 = vpop.eup %10179  ;;  %v963_v7 = vcombine.high %v954_v50, %v961_v51  ;;  %v996_v9 = vrot.slane %v980_v52, %v11271_v36  ;;  %v11430_v51 = vld [vmem:[#allocation2] sm:$0xff] }
 0x182   : > { %v982_v19 = vcombine.low %v11415_v57, %v11419_v3  ;;  %v1003_v44 = vrot.slane %v981_v62, %v11271_v36  ;;  %v1590_v62 = vld [vmem:[%s14358_s3 + $0x40] sm:$0xff] }
 0x183   : > { %v977_v25 = vrot.slane %v963_v7, %v11271_v36  ;;  %v1011_v54 = vcombine.high %v989_v24, %v996_v9  ;;  %v1594_v7 = vld [vmem:[%s14358_s3 + $0x60] sm:$0xff] }
 0x184   : > { %v1010_v2 = vrot.slane %v982_v19, %v11271_v36  ;;  %v1599_v19 = vld [vmem:[%s14358_s3 + $0x88] sm:$0xff] }
 0x185   : > { %v978_v6 = vcombine.low %v970_v14, %v977_v25  ;;  %v1019_v50 = vrot.slane %v1011_v54, %v11271_v36  ;;  %v1596_v14 = vld [vmem:[%s14358_s3 + $0x70] sm:$0xff]  ;;  %v1601_v25 = vld [vmem:[%s14358_s3 + $0x98] sm:$0xff] }
 0x186   : > { %v1012_v37 = vcombine.high %v1003_v44, %v1010_v2  ;;  %v1592_v2 = vld [vmem:[%s14358_s3 + $0x50] sm:$0xff]  ;;  %v11461_v24 = vpack.c.bf16 %v1596_v14, %v1594_v7  ;;  %v1607_v14 = vld [vmem:[%s14358_s3 + $0xc8] sm:$0xff] }
 0x187   : > { %v1030_v30 = vmul.f32 %v11430_v51, %v978_v6  ;;  %v11443_v44 = vpack.c.bf16 %v1592_v2, %v1590_v62  ;;  %v1597_v6 = vld [vmem:[%s14358_s3 + $0x78] sm:$0xff] }
 0x188   : > { %v1026_v41 = vrot.slane %v1012_v37, %v11271_v36  ;;  %v1595_v37 = vld [vmem:[%s14358_s3 + $0x68] sm:$0xff]  ;;  %14401 = vst [vmem:[#allocation23_spill] sm:$0xff] %v11461_v24  ;;  %v1605_v62 = vld [vmem:[%s14358_s3 + $0xb8] sm:$0xff] }
 0x189   : > { %9291 = vmatprep.mubr.f32.mxu1 %v1030_v30  ;;  %9614 = vmatpush1.bf16.msra.mxu0 %v11443_v44  ;;  %v11452_v54 = vpack.c.bf16 %v1597_v6, %v1595_v37  ;;  %v1598_v30 = vld [vmem:[%s14358_s3 + $0x80] sm:$0xff]  ;;  %v1604_v6 = vld [vmem:[%s14358_s3 + $0xb0] sm:$0xff] }
 0x18a   : > { %v1027_v52 = vcombine.low %v1019_v50, %v1026_v41  ;;  %v11470_v50 = vpack.c.bf16 %v1601_v25, %v1599_v19  ;;  %v1600_v41 = vld [vmem:[%s14358_s3 + $0x90] sm:$0xff]  ;;  %v1602_v37 = vld [vmem:[%s14358_s3 + $0xa0] sm:$0xff]  ;;  %v1609_v19 = vld [vmem:[%s14358_s3 + $0xd8] sm:$0xff] }
 0x18b   : > { %14400 = vst [vmem:[#allocation22_spill] sm:$0xff] %v11452_v54  ;;  %9616 = vmatprep.subr.bf16.mxu0 %v11452_v54  ;;  %v11496_v7 = vpack.c.bf16 %v1604_v6, %v1602_v37  ;;  %v11506_v25 = vpack.c.bf16 %v1609_v19, %v1607_v14  ;;  %v1613_v37 = vld [vmem:[%s14358_s3 + $0xf8] sm:$0xff]  ;;  %v1610_v14 = vld [vmem:[%s14358_s3 + $0xe0] sm:$0xff]  ;;  %v1612_v19 = vld [vmem:[%s14358_s3 + $0xf0] sm:$0xff] }
 0x18c   : > { %v1031_v9 = vmul.f32 %v11434_v56, %v1027_v52  ;;  %14402 = vst [vmem:[#allocation24_spill] sm:$0xff] %v11470_v50  ;;  %v11478_v52 = vpack.c.bf16 %v1600_v41, %v1598_v30  ;;  %v1606_v30 = vld [vmem:[%s14358_s3 + $0xc0] sm:$0xff]  ;;  %v1608_v41 = vld [vmem:[%s14358_s3 + $0xd0] sm:$0xff] }
 0x18d   : > { %9618 = vmatpush1.bf16.msra.mxu0 %v11461_v24  ;;  %14405 = vst [vmem:[#allocation27_spill] sm:$0xff] %v11496_v7  ;;  %14406 = vst [vmem:[#allocation28_spill] sm:$0xff] %v11506_v25 }
 0x18e   : > { %9292 = vmatmul.mubr.f32.vlgmr.msra.gmra.mrb[0].mxu1 %v1031_v9  ;;  %14403 = vst [vmem:[#allocation25_spill] sm:$0xff] %v11478_v52  ;;  %9620 = vmatprep.subr.bf16.mxu0 %v11470_v50  ;;  %v1603_v9 = vld [vmem:[%s14358_s3 + $0xa8] sm:$0xff] }
 0x18f   : > { %v11488_v2 = vpack.c.bf16 %v1605_v62, %v1603_v9  ;;  %v11514_v9 = vpack.c.bf16 %v1608_v41, %v1606_v30  ;;  %v1611_v62 = vld [vmem:[%s14358_s3 + $0xe8] sm:$0xff]  ;;  %v11532_v30 = vpack.c.bf16 %v1612_v19, %v1610_v14  ;;  %v11539_v41 = vmul.f32 %v11373_v34, %v11194_v38  ;;  %v907_v34 = vld [vmem:[%s10948_s10 + $0xe8] ss:$0 sm:$0xff] }
 0x190   : > { %v11524_v6 = vpack.c.bf16 %v1613_v37, %v1611_v62  ;;  %v11543_v62 = vmul.f32 %v11371_v26, %v11196_v39  ;;  %v11547_v37 = vmul.f32 %v11377_v61, %v11201_v43  ;;  %v11551_v14 = vmul.f32 %v11379_v60, %v11204_v45  ;;  %v909_v61 = vld [vmem:[%s10948_s10 + $0x118] ss:$0 sm:$0xff]  ;;  %v910_v60 = vld [vmem:[%s10948_s10 + $0x130] ss:$0 sm:$0xff] }
 0x191   : > { %9622 = vmatpush1.bf16.msra.mxu0 %v11478_v52  ;;  %14404 = vst [vmem:[#allocation26_spill] sm:$0xff] %v11488_v2  ;;  %14407 = vst [vmem:[#allocation29_spill] sm:$0xff] %v11514_v9  ;;  %v11559_v38 = vmul.f32 %v11381_v0, %v11229_v63  ;;  %v11563_v39 = vmul.f32 %v11387_v8, %v11210_v49  ;;  %v11567_v43 = vmul.f32 %v11389_v11, %v11215_v53  ;;  %v911_v11 = vld [vmem:[%s10948_s10 + $0x148] ss:$0 sm:$0xff] }
 0x192   : > { %9624 = vmatprep.subr.bf16.mxu0 %v11488_v2  ;;  %14408 = vst [vmem:[#allocation30_spill] sm:$0xff] %v11524_v6  ;;  %14409 = vst [vmem:[#allocation31_spill] sm:$0xff] %v11532_v30  ;;  %v11571_v45 = vmul.f32 %v11392_v18, %v11218_v55  ;;  %v11579_v63 = vmul.f32 %v11399_v27, %v11224_v59  ;;  %v11583_v49 = vmul.f32 %v11407_v46, %v11232_v1  ;;  %v906_v1 = vld [vmem:[%s10948_s10 + $0xd0] ss:$0 sm:$0xff]  ;;  %v913_v18 = vld [vmem:[%s10948_s10 + $0x178] ss:$0 sm:$0xff] }
 0x193   : > { %v11587_v53 = vmul.f32 %v11401_v31, %v11236_v4  ;;  %v11591_v55 = vmul.f32 %v11409_v47, %v11238_v5  ;;  %v11599_v59 = vmul.f32 %v11419_v3, %v11246_v12  ;;  %v1292_v26 = vrot.slane %v11434_v56, 1  ;;  %v912_v12 = vld [vmem:[%s10948_s10 + $0x160] ss:$0 sm:$0xff] }
 0x194   : > { %v1293_v4 = vrot.slane %v11434_v56, 2  ;;  %v1294_v5 = vrot.slane %v11434_v56, 3  ;;  %v1295_v0 = vrot.slane %v11434_v56, 4  ;;  %v1297_v8 = vrot.slane %v11434_v56, 6 }
 0x195   : > { %9626 = vmatpush1.bf16.msra.mxu0 %v11496_v7 }
 0x196   : > { %9628 = vmatprep.subr.bf16.mxu0 %v11506_v25 }
 0x199   : > { %9630 = vmatpush1.bf16.msra.mxu0 %v11514_v9 }
 0x19a   : > { %9632 = vmatprep.subr.bf16.mxu0 %v11524_v6 }
 0x19d   : > { %9634 = vmatpush1.bf16.msra.mxu0 %v11532_v30 }
 0x19e   : > { %9668 = vmatprep.subr.bf16.mxu0 %v11350_v21  ;;  %v11555_v21 = vmul.f32 %v11375_v35, %v11208_v48  ;;  %v11575_v48 = vmul.f32 %v11394_v23, %v11222_v58  ;;  %v11595_v58 = vmul.f32 %v11415_v57, %v11243_v10  ;;  %v908_v35 = vld [vmem:[%s10948_s10 + $0x100] ss:$0 sm:$0xff]  ;;  %v1296_v10 = vrot.slane %v11434_v56, 5 }
 0x19f   : > { %v1298_v23 = vrot.slane %v11434_v56, 7 }
 0x261   : > { %v9293_v47 = vpop.f32.mrb[0].mxu1 }
 0x262   : > { %v1132_v42 = vrot.slane %v9293_v47, 1  ;;  %v1133_v29 = vrot.slane %v9293_v47, 2  ;;  %v1134_v28 = vrot.slane %v9293_v47, 3  ;;  %v1135_v22 = vrot.slane %v9293_v47, 4  ;;  %v11623_v16 = vpop.f32.mrb[1].mxu1 }
 0x263   : > { %v1136_v27 = vrot.slane %v9293_v47, 5  ;;  %v1137_v15 = vrot.slane %v9293_v47, 6  ;;  %v1138_v31 = vrot.slane %v9293_v47, 7  ;;  %v1163_v20 = vadd.f32 %v9293_v47, %v906_v1 }
 0x264   : > { %v1164_v46 = vadd.f32 %v1132_v42, %v907_v34  ;;  %v1165_v30 = vadd.f32 %v1133_v29, %v908_v35  ;;  %v1166_v57 = vadd.f32 %v1134_v28, %v909_v61  ;;  %v1167_v6 = vadd.f32 %v1135_v22, %v910_v60 }
 0x265   : > { %v1168_v3 = vadd.f32 %v1136_v27, %v911_v11  ;;  %v1169_v19 = vadd.f32 %v1137_v15, %v912_v12  ;;  %v1170_v9 = vadd.f32 %v1138_v31, %v913_v18  ;;  %v1179_v13 = vmax.f32 %v1163_v20, 0.0  ;;  %v905_v12 = vld [vmem:[%s10948_s10 + $0xb8] ss:$0 sm:$0xff] }
 0x266   : > { %v1180_v25 = vmax.f32 %v1164_v46, 0.0  ;;  %v1181_v7 = vmax.f32 %v1165_v30, 0.0  ;;  %v1182_v2 = vmax.f32 %v1166_v57, 0.0  ;;  %v1183_v52 = vmax.f32 %v1167_v6, 0.0 }
 0x267   : > { %v1184_v50 = vmax.f32 %v1168_v3, 0.0  ;;  %v1185_v24 = vmax.f32 %v1169_v19, 0.0  ;;  %v1186_v54 = vmax.f32 %v1170_v9, 0.0  ;;  %v1323_v1 = vsub.f32 %v1179_v13, %v11434_v56 }
 0x268   : > { %v1324_v28 = vsub.f32 %v1180_v25, %v1292_v26  ;;  %v1325_v22 = vsub.f32 %v1181_v7, %v1293_v4  ;;  %v1326_v29 = vsub.f32 %v1182_v2, %v1294_v5  ;;  %v1327_v15 = vsub.f32 %v1183_v52, %v1295_v0  ;;  %v898_v7 = vld [vmem:[%s10948_s10 + $0x10] ss:$0 sm:$0xff]  ;;  %v901_v26 = vld [vmem:[%s10948_s10 + $0x58] ss:$0 sm:$0xff]  ;;  %v904_v5 = vld [vmem:[%s10948_s10 + $0xa0] ss:$0 sm:$0xff] }
 0x269   : > { %v1328_v20 = vsub.f32 %v1184_v50, %v1296_v10  ;;  %v1329_v42 = vsub.f32 %v1185_v24, %v1297_v8  ;;  %v1330_v30 = vsub.f32 %v1186_v54, %v1298_v23  ;;  %v1339_v6 = vmul.f32 %v1323_v1, %v11559_v38  ;;  %v899_v24 = vld [vmem:[%s10948_s10 + $0x28] ss:$0 sm:$0xff]  ;;  %v900_v38 = vld [vmem:[%s10948_s10 + $0x40] ss:$0 sm:$0xff] }
 0x26a   : > { %v1340_v9 = vmul.f32 %v1324_v28, %v11567_v43  ;;  %v1341_v13 = vmul.f32 %v1325_v22, %v11575_v48  ;;  %v1342_v25 = vmul.f32 %v1326_v29, %v11583_v49  ;;  %v1343_v2 = vmul.f32 %v1327_v15, %v11587_v53  ;;  %v902_v53 = vld [vmem:[%s10948_s10 + $0x70] ss:$0 sm:$0xff] }
 0x26b   : > { %v1344_v52 = vmul.f32 %v1328_v20, %v11591_v55  ;;  %v1345_v50 = vmul.f32 %v1329_v42, %v11595_v58  ;;  %v1346_v54 = vmul.f32 %v1330_v30, %v11599_v59  ;;  %v1125_v43 = vrot.slane %v11623_v16, 1  ;;  %v903_v55 = vld [vmem:[%s10948_s10 + $0x88] ss:$0 sm:$0xff] }
 0x26c   : > { %v1384_v4 = vrot.slane %v1340_v9, 7  ;;  %v1386_v48 = vrot.slane %v1341_v13, 6  ;;  %v1388_v49 = vrot.slane %v1342_v25, 5  ;;  %v1390_v34 = vrot.slane %v1343_v2, 4 }
 0x26d   : > { %v1392_v35 = vrot.slane %v1344_v52, 3  ;;  %v1394_v61 = vrot.slane %v1345_v50, 2  ;;  %v1396_v60 = vrot.slane %v1346_v54, 1  ;;  %v1126_v58 = vrot.slane %v11623_v16, 2 }
 0x26e   : > { %v1385_v59 = vsel %vm1364_vm0, %v1384_v4, %v1339_v6  ;;  %v1127_v0 = vrot.slane %v11623_v16, 3  ;;  %v1128_v10 = vrot.slane %v11623_v16, 4  ;;  %v1129_v8 = vrot.slane %v11623_v16, 5 }
 0x26f   : > { %v1387_v11 = vsel %vm1367_vm1, %v1386_v48, %v1385_v59  ;;  %v1130_v18 = vrot.slane %v11623_v16, 6  ;;  %v1131_v23 = vrot.slane %v11623_v16, 7  ;;  %v1155_v27 = vadd.f32 %v11623_v16, %v898_v7 }
 0x270   : > { %v1389_v31 = vsel %vm1370_vm2, %v1388_v49, %v1387_v11  ;;  %v1156_v46 = vadd.f32 %v1125_v43, %v899_v24  ;;  %v1157_v47 = vadd.f32 %v1126_v58, %v900_v38  ;;  %v1158_v57 = vadd.f32 %v1127_v0, %v901_v26 }
 0x271   : > { %v1391_v3 = vsel %vm1373_vm3, %v1390_v34, %v1389_v31  ;;  %v1159_v19 = vadd.f32 %v1128_v10, %v902_v53  ;;  %v1160_v1 = vadd.f32 %v1129_v8, %v903_v55  ;;  %v1161_v28 = vadd.f32 %v1130_v18, %v904_v5 }
 0x272   : > { %v1393_v22 = vsel %vm1376_vm4, %v1392_v35, %v1391_v3  ;;  %v1162_v29 = vadd.f32 %v1131_v23, %v905_v12  ;;  %v1171_v15 = vmax.f32 %v1155_v27, 0.0  ;;  %v1172_v20 = vmax.f32 %v1156_v46, 0.0 }
 0x273   : > { %v1395_v42 = vsel %vm1379_vm5, %v1394_v61, %v1393_v22  ;;  %v1173_v30 = vmax.f32 %v1157_v47, 0.0  ;;  %v1174_v6 = vmax.f32 %v1158_v57, 0.0  ;;  %v1175_v16 = vmax.f32 %v1159_v19, 0.0 }
 0x274   : > { %v1397_v9 = vsel %vm1382_vm6, %v1396_v60, %v1395_v42  ;;  %v1176_v13 = vmax.f32 %v1160_v1, 0.0  ;;  %v1177_v25 = vmax.f32 %v1161_v28, 0.0  ;;  %v1178_v2 = vmax.f32 %v1162_v29, 0.0 }
 0x275   : > { %v11658_v7 = vadd.f32 %v11434_v56, %v1397_v9  ;;  %v1315_v52 = vsub.f32 %v1171_v15, %v11430_v51  ;;  %v14410_v50 = vrot.slane %v11430_v51, 1  ;;  %v14411_v24 = vrot.slane %v11430_v51, 2 }
 0x276   : > { %v14412_v26 = vrot.slane %v11430_v51, 3  ;;  %v14413_v4 = vrot.slane %v11430_v51, 4  ;;  %v14414_v49 = vrot.slane %v11430_v51, 5  ;;  %v14415_v56 = vrot.slane %v11430_v51, 6 }
 0x277   : > { %v1316_v54 = vsub.f32 %v1172_v20, %v14410_v50  ;;  %v1317_v38 = vsub.f32 %v1173_v30, %v14411_v24  ;;  %v1453_v35 = vcombine.high %v11658_v7, %v11658_v7  ;;  %v1460_v61 = vrot.slane %v11658_v7, %v11271_v36 }
 0x278   : > { %v1318_v43 = vsub.f32 %v1174_v6, %v14412_v26  ;;  %v1319_v48 = vsub.f32 %v1175_v16, %v14413_v4  ;;  %v1320_v34 = vsub.f32 %v1176_v13, %v14414_v49  ;;  %v1321_v53 = vsub.f32 %v1177_v25, %v14415_v56  ;;  %v14419_v4 = vld [vmem:[#allocation23_spill] sm:$0xff]  ;;  %v14422_v49 = vld [vmem:[#allocation26_spill] sm:$0xff]  ;;  %v14424_v56 = vld [vmem:[#allocation28_spill] sm:$0xff] }
 0x279   : > { %v14416_v60 = vrot.slane %v11430_v51, 7  ;;  %v1331_v58 = vmul.f32 %v1315_v52, %v11543_v62  ;;  %v1332_v59 = vmul.f32 %v1316_v54, %v11539_v41  ;;  %v1333_v5 = vmul.f32 %v1317_v38, %v11547_v37  ;;  %8827 = vst.sshfl [vmem:[%s10952_s12 + $0x40] sm:$0x1 pattern:$0x73625140] %v1460_v61 }
 0x27a   : > { %v1334_v0 = vmul.f32 %v1318_v43, %v11551_v14  ;;  %v1335_v10 = vmul.f32 %v1319_v48, %v11555_v21  ;;  %v1467_v8 = vrot.slane %v1453_v35, %v11271_v36  ;;  %v1468_v11 = vcombine.high %v1460_v61, %v1460_v61  ;;  %v14418_v43 = vld [vmem:[#allocation22_spill] sm:$0xff]  ;;  %v14421_v48 = vld [vmem:[#allocation25_spill] sm:$0xff] }
 0x27b   : > { %v1322_v55 = vsub.f32 %v1178_v2, %v14416_v60  ;;  %v1476_v12 = vrot.slane %v1460_v61, %v11271_v36  ;;  %v1336_v18 = vmul.f32 %v1320_v34, %v11563_v39  ;;  %v1337_v62 = vmul.f32 %v1321_v53, %v11571_v45  ;;  %v14423_v34 = vld [vmem:[#allocation27_spill] sm:$0xff]  ;;  %v14426_v53 = vld [vmem:[#allocation30_spill] sm:$0xff] }
 0x27c   : > { %v1363_v37 = vrot.slane %v1332_v59, 7  ;;  %v1366_v23 = vrot.slane %v1333_v5, 6  ;;  %v1469_v14 = vcombine.high %v1467_v8, %v1467_v8  ;;  %v1483_v27 = vrot.slane %v1467_v8, %v11271_v36  ;;  %8828 = vst.sshfl [vmem:[%s10952_s12 + $0x48] sm:$0x1 pattern:$0x73625140] %v1468_v11 }
 0x27d   : > { %v1338_v41 = vmul.f32 %v1322_v55, %v11579_v63  ;;  %v1490_v21 = vrot.slane %v1468_v11, %v11271_v36  ;;  %v1498_v31 = vcombine.high %v1476_v12, %v1476_v12  ;;  %8829 = vst.sshfl [vmem:[%s10952_s12 + $0x60] sm:$0x1 pattern:$0x73625140] %v1467_v8  ;;  %v1369_v46 = vrot.slane %v1334_v0, 5  ;;  %v2057_v35 = vld [vmem:[%s14359_s4] sm:$0xff] }
 0x27e   : > { %v1365_v39 = vsel %vm1364_vm0, %v1363_v37, %v1331_v58  ;;  %v1372_v45 = vrot.slane %v1335_v10, 4  ;;  %v1497_v63 = vrot.slane %v1469_v14, %v11271_v36  ;;  %v1499_v47 = vcombine.high %v1483_v27, %v1483_v27  ;;  %8830 = vst.sshfl [vmem:[%s10952_s12 + $0x68] sm:$0x1 pattern:$0x73625140] %v1469_v14  ;;  %v2058_v61 = vld [vmem:[%s14359_s4 + $0x8] sm:$0xff] }
 0x27f   : > { %v1500_v57 = vcombine.high %v1490_v21, %v1490_v21  ;;  %1528 = vst [vmem:[%s10952_s12 + $0x50] sm:$0x1] %v1498_v31  ;;  %v1368_v3 = vsel %vm1367_vm1, %v1366_v23, %v1365_v39  ;;  %v1375_v1 = vrot.slane %v1336_v18, 3  ;;  %v1378_v29 = vrot.slane %v1337_v62, 2  ;;  %v2059_v55 = vld [vmem:[%s14359_s4 + $0x10] sm:$0xff]  ;;  %v2060_v58 = vld [vmem:[%s14359_s4 + $0x18] sm:$0xff] }
 0x280   : > { %v1371_v19 = vsel %vm1370_vm2, %v1369_v46, %v1368_v3  ;;  %v1501_v28 = vcombine.high %v1497_v63, %v1497_v63  ;;  %1532 = vst [vmem:[%s10952_s12 + $0x70] sm:$0x1] %v1499_v47  ;;  %v1381_v20 = vrot.slane %v1338_v41, 1  ;;  %v14417_v13 = vmov 0.0   ;;  %v2061_v5 = vld [vmem:[%s14359_s4 + $0x20] sm:$0xff]  ;;  %v2062_v0 = vld [vmem:[%s14359_s4 + $0x28] sm:$0xff] }
 0x281   : > { %1529 = vst [vmem:[%s10952_s12 + $0x58] sm:$0x1] %v1500_v57  ;;  %v1374_v22 = vsel %vm1373_vm3, %v1372_v45, %v1371_v19  ;;  %v11752_v60 = vpack.c.bf16 %v2058_v61, %v2057_v35  ;;  %v11762_v59 = vpack.c.bf16 %v2060_v58, %v2059_v55  ;;  %v11772_v10 = vpack.c.bf16 %v2062_v0, %v2061_v5  ;;  %v2063_v8 = vld [vmem:[%s14359_s4 + $0x30] sm:$0xff]  ;;  %v2064_v11 = vld [vmem:[%s14359_s4 + $0x38] sm:$0xff]  ;;  %v2065_v18 = vld [vmem:[%s14359_s4 + $0x40] sm:$0xff] }
 0x282   : > { %v1377_v15 = vsel %vm1376_vm4, %v1375_v1, %v1374_v22  ;;  %1533 = vst [vmem:[%s10952_s12 + $0x78] sm:$0x1] %v1501_v28  ;;  %v11782_v12 = vpack.c.bf16 %v2064_v11, %v2063_v8  ;;  %v2066_v62 = vld [vmem:[%s14359_s4 + $0x48] sm:$0xff]  ;;  %v2067_v37 = vld [vmem:[%s14359_s4 + $0x50] sm:$0xff]  ;;  %v2068_v23 = vld [vmem:[%s14359_s4 + $0x58] sm:$0xff] }
 0x283   : > { %v1380_v42 = vsel %vm1379_vm5, %v1378_v29, %v1377_v15  ;;  %9636 = vmatprep.subr.bf16.mxu1 %v11752_v60  ;;  %v11792_v41 = vpack.c.bf16 %v2066_v62, %v2065_v18  ;;  %v11802_v14 = vpack.c.bf16 %v2068_v23, %v2067_v37  ;;  %v2069_v27 = vld [vmem:[%s14359_s4 + $0x60] sm:$0xff]  ;;  %v2070_v21 = vld [vmem:[%s14359_s4 + $0x68] sm:$0xff]  ;;  %v2071_v31 = vld [vmem:[%s14359_s4 + $0x70] sm:$0xff] }
 0x284   : > { %v1383_v30 = vsel %vm1382_vm6, %v1381_v20, %v1380_v42  ;;  %9638 = vmatpush3.bf16.msra.mxu1 %v11752_v60  ;;  %v11814_v39 = vpack.c.bf16 %v2070_v21, %v2069_v27  ;;  %v2072_v46 = vld [vmem:[%s14359_s4 + $0x78] sm:$0xff]  ;;  %v8840_v23 = vld [vmem:[%s10948_s10 + $0xd9] ss:$8 sm:$0x3] }
 0x285   : > { %v11708_v6 = vadd.f32 %v11430_v51, %v1383_v30  ;;  %9640 = vmatprep.subr.bf16.mxu1 %v11762_v59  ;;  %v11821_v45 = vpack.c.bf16 %v2072_v46, %v2071_v31  ;;  %v8831_v29 = vld [vmem:[%s10948_s10 + $0x1] ss:$8 sm:$0x3]  ;;  %v8841_v46 = vld [vmem:[%s10948_s10 + $0xf1] ss:$8 sm:$0x3] }
 0x286   : > { %v8835_v15 = vld [vmem:[%s10948_s10 + $0x61] ss:$8 sm:$0x3] }
 0x287   : > { %v1404_v16 = vcombine.high %v11708_v6, %v11708_v6  ;;  %v1411_v9 = vrot.slane %v11708_v6, %v11271_v36  ;;  %1679 = vmatmul.mubr.f32.vlgmr.msra.gmra.mrb[4].mxu0 %v11708_v6  ;;  %v8839_v0 = vld [vmem:[%s10948_s10 + $0xc1] ss:$8 sm:$0x3] }
 0x288   : > { %1684 = vmatprep.mubr.f32.mxu0 %v14417_v13  ;;  %9670 = vmatpush1.bf16.msra.mxu0 %v11352_v17 }
 0x289   : > { %v1418_v25 = vrot.slane %v1404_v16, %v11271_v36  ;;  %v1419_v2 = vcombine.high %v1411_v9, %v1411_v9  ;;  %v1427_v51 = vrot.slane %v1411_v9, %v11271_v36  ;;  %8823 = vst.sshfl [vmem:[%s10952_s12] sm:$0x1 pattern:$0x73625140] %v1411_v9  ;;  %9672 = vmatprep.subr.bf16.mxu0 %v11358_v33  ;;  %v8832_v9 = vld [vmem:[%s10948_s10 + $0x19] ss:$8 sm:$0x3] }
 0x28a   : > { %9642 = vmatpush3.bf16.msra.mxu1 %v11762_v59 }
 0x28b   : > { %v1420_v52 = vcombine.high %v1418_v25, %v1418_v25  ;;  %v1434_v50 = vrot.slane %v1418_v25, %v11271_v36  ;;  %v1441_v54 = vrot.slane %v1419_v2, %v11271_v36  ;;  %v1449_v24 = vcombine.high %v1427_v51, %v1427_v51  ;;  %8824 = vst.sshfl [vmem:[%s10952_s12 + $0x8] sm:$0x1 pattern:$0x73625140] %v1419_v2 }
 0x28c   : > { %8825 = vst.sshfl [vmem:[%s10952_s12 + $0x20] sm:$0x1 pattern:$0x73625140] %v1418_v25  ;;  %1685 = vmatmul.mubr.f32.gmra.mrb[6].mxu0 %v11658_v7  ;;  %9644 = vmatprep.subr.bf16.mxu1 %v11772_v10 }
 0x28d   : > { %9674 = vmatpush1.bf16.msra.mxu0 %v11364_v32  ;;  %2694 = vmatprep.mubr.f32.mxu0 %v14417_v13  ;;  %v1448_v17 = vrot.slane %v1420_v52, %v11271_v36  ;;  %v1450_v33 = vcombine.high %v1434_v50, %v1434_v50  ;;  %v1451_v38 = vcombine.high %v1441_v54, %v1441_v54  ;;  %v14420_v32 = vld [vmem:[#allocation24_spill] sm:$0xff]  ;;  %v8833_v25 = vld [vmem:[%s10948_s10 + $0x31] ss:$8 sm:$0x3] }
 0x28e   : > { %1520 = vst [vmem:[%s10952_s12 + $0x10] sm:$0x1] %v1449_v24  ;;  %8826 = vst.sshfl [vmem:[%s10952_s12 + $0x28] sm:$0x1 pattern:$0x73625140] %v1420_v52  ;;  %9676 = vmatprep.subr.bf16.mxu0 %v11367_v40  ;;  %9646 = vmatpush3.bf16.msra.mxu1 %v11772_v10 }
 0x28f   : > { %v1452_v26 = vcombine.high %v1448_v17, %v1448_v17  ;;  %1521 = vst [vmem:[%s10952_s12 + $0x18] sm:$0x1] %v1451_v38  ;;  %1524 = vst [vmem:[%s10952_s12 + $0x30] sm:$0x1] %v1450_v33  ;;  %v14425_v40 = vld [vmem:[#allocation29_spill] sm:$0xff]  ;;  %9648 = vmatprep.subr.bf16.mxu1 %v11782_v12 }
 0x290   : > { %v8836_v52 = vld [vmem:[%s10948_s10 + $0x79] ss:$8 sm:$0x3]  ;;  %v8834_v38 = vld [vmem:[%s10948_s10 + $0x49] ss:$8 sm:$0x3] }
 0x291   : > { %9678 = vmatpush1.bf16.msra.mxu0 %v11443_v44  ;;  %1525 = vst [vmem:[%s10952_s12 + $0x38] sm:$0x1] %v1452_v26  ;;  %v14427_v44 = vld [vmem:[#allocation31_spill] sm:$0xff]  ;;  %v8838_v26 = vld [vmem:[%s10948_s10 + $0xa9] ss:$8 sm:$0x3] }
 0x292   : > { %9680 = vmatprep.subr.bf16.mxu0 %v14418_v43  ;;  %9650 = vmatpush3.bf16.msra.mxu1 %v11782_v12  ;;  %v8837_v50 = vld [vmem:[%s10948_s10 + $0x91] ss:$8 sm:$0x3] }
 0x293   : > { %9652 = vmatprep.subr.bf16.mxu1 %v11792_v41 }
 0x295   : > { %9682 = vmatpush1.bf16.msra.mxu0 %v14419_v4 }
 0x296   : > { %9684 = vmatprep.subr.bf16.mxu0 %v14420_v32  ;;  %9654 = vmatpush3.bf16.msra.mxu1 %v11792_v41 }
 0x297   : > { %9656 = vmatprep.subr.bf16.mxu1 %v11802_v14 }
 0x299   : > { %9686 = vmatpush1.bf16.msra.mxu0 %v14421_v48 }
 0x29a   : > { %9688 = vmatprep.subr.bf16.mxu0 %v14422_v49  ;;  %9658 = vmatpush3.bf16.msra.mxu1 %v11802_v14 }
 0x29b   : > { %9660 = vmatprep.subr.bf16.mxu1 %v11814_v39 }
 0x29d   : > { %9690 = vmatpush1.bf16.msra.mxu0 %v14423_v34 }
 0x29e   : > { %9692 = vmatprep.subr.bf16.mxu0 %v14424_v56  ;;  %9662 = vmatpush3.bf16.msra.mxu1 %v11814_v39 }
 0x29f   : > { %9664 = vmatprep.subr.bf16.mxu1 %v11821_v45 }
 0x2a1   : > { %9694 = vmatpush1.bf16.msra.mxu0 %v14425_v40 }
 0x2a2   : > { %9696 = vmatprep.subr.bf16.mxu0 %v14426_v53  ;;  %9666 = vmatpush3.bf16.msra.mxu1 %v11821_v45 }
 0x2a3   : > { %9700 = vmatprep.subr.bf16.mxu1 %v11752_v60 }
 0x2a5   : > { %9698 = vmatpush1.bf16.msra.mxu0 %v14427_v44 }
 0x35a   : > { %v1680_v63 = vpop.f32.mrb[4].mxu0 }
 0x35b   : > { %v1682_v47 = vpop.f32.mrb[5].mxu0 }
 0x35c   : > { %v1695_v57 = vcombine.low %v1680_v63, %v1682_v47  ;;  %v1696_v3 = vcombine.high %v1680_v63, %v1682_v47 }
 0x35e   : > { %v1703_v19 = vrot.slane %v1695_v57, %v11271_v36  ;;  %v1710_v1 = vrot.slane %v1696_v3, %v11271_v36 }
 0x35f   : > { %v1686_v28 = vpop.f32.mrb[6].mxu0 }
 0x360   : > { %v1688_v22 = vpop.f32.mrb[7].mxu0  ;;  %v1711_v20 = vcombine.high %v1703_v19, %v1703_v19  ;;  %v1712_v42 = vcombine.high %v1710_v1, %v1710_v1  ;;  %v1719_v30 = vrot.slane %v1703_v19, %v11271_v36  ;;  %v1726_v16 = vrot.slane %v1710_v1, %v11271_v36 }
 0x361   : > { %v1745_v2 = vcombine.low %v1686_v28, %v1688_v22  ;;  %v1746_v51 = vcombine.high %v1686_v28, %v1688_v22 }
 0x362   : > { %v1733_v54 = vrot.slane %v1711_v20, %v11271_v36  ;;  %v1740_v24 = vrot.slane %v1712_v42, %v11271_v36  ;;  %v1741_v17 = vcombine.high %v1719_v30, %v1719_v30  ;;  %v1742_v33 = vcombine.high %v1726_v16, %v1726_v16 }
 0x363   : > { %v1811_v43 = vadd.f32 %v8831_v29, %v1719_v30  ;;  %v1815_v4 = vadd.f32 %v8835_v15, %v1726_v16  ;;  %v1753_v32 = vrot.slane %v1745_v2, %v11271_v36  ;;  %v1760_v62 = vrot.slane %v1746_v51, %v11271_v36  ;;  %v8842_v30 = vld [vmem:[%s10948_s10 + $0x109] ss:$8 sm:$0x3] }
 0x364   : > { %v1743_v48 = vcombine.high %v1733_v54, %v1733_v54  ;;  %v1744_v49 = vcombine.high %v1740_v24, %v1740_v24  ;;  %v1812_v34 = vadd.f32 %v8832_v9, %v1733_v54  ;;  %v1813_v56 = vadd.f32 %v8833_v25, %v1741_v17  ;;  %v8843_v25 = vld [vmem:[%s10948_s10 + $0x121] ss:$8 sm:$0x3]  ;;  %v8845_v17 = vld [vmem:[%s10948_s10 + $0x151] ss:$8 sm:$0x3] }
 0x365   : > { %v1816_v40 = vadd.f32 %v8836_v52, %v1740_v24  ;;  %v1817_v53 = vadd.f32 %v8837_v50, %v1742_v33  ;;  %v8847_v44 = vmul.f32 -1.442695, %v1811_v43  ;;  %v8851_v5 = vmul.f32 -1.442695, %v1815_v4 }
 0x366   : > { %v1814_v35 = vadd.f32 %v8834_v38, %v1743_v48  ;;  %v1818_v61 = vadd.f32 %v8838_v26, %v1744_v49  ;;  %v8848_v55 = vmul.f32 -1.442695, %v1812_v34  ;;  %v8849_v58 = vmul.f32 -1.442695, %v1813_v56 }
 0x367   : > { %10181 = vpow2.f32 %v8847_v44  ;;  %v1761_v8 = vcombine.high %v1753_v32, %v1753_v32  ;;  %v8852_v18 = vmul.f32 -1.442695, %v1816_v40  ;;  %v8853_v37 = vmul.f32 -1.442695, %v1817_v53 }
 0x368   : > { %10183 = vpow2.f32 %v8848_v55  ;;  %v8850_v11 = vmul.f32 -1.442695, %v1814_v35  ;;  %v1769_v27 = vrot.slane %v1753_v32, %v11271_v36  ;;  %v8854_v31 = vmul.f32 -1.442695, %v1818_v61 }
 0x369   : > { %10185 = vpow2.f32 %v8849_v58  ;;  %v1783_v21 = vrot.slane %v1761_v8, %v11271_v36  ;;  %v1762_v47 = vcombine.high %v1760_v62, %v1760_v62  ;;  %v1776_v1 = vrot.slane %v1760_v62, %v11271_v36  ;;  %v8844_v52 = vld [vmem:[%s10948_s10 + $0x139] ss:$8 sm:$0x3]  ;;  %v8846_v4 = vld [vmem:[%s10948_s10 + $0x169] ss:$8 sm:$0x3] }
 0x36a   : > { %10187 = vpow2.f32 %v8850_v11  ;;  %v1791_v63 = vcombine.high %v1769_v27, %v1769_v27  ;;  %v1819_v57 = vadd.f32 %v8839_v0, %v1769_v27 }
 0x36b   : > { %10189 = vpow2.f32 %v8851_v5  ;;  %v1820_v3 = vadd.f32 %v8840_v23, %v1783_v21  ;;  %v1790_v15 = vrot.slane %v1762_v47, %v11271_v36  ;;  %v1793_v20 = vcombine.high %v1783_v21, %v1783_v21 }
 0x36c   : > { %10191 = vpow2.f32 %v8852_v18  ;;  %v1821_v19 = vadd.f32 %v8841_v46, %v1791_v63  ;;  %v8855_v28 = vmul.f32 -1.442695, %v1819_v57  ;;  %v1792_v50 = vcombine.high %v1776_v1, %v1776_v1 }
 0x36d   : > { %10193 = vpow2.f32 %v8853_v37  ;;  %v8856_v22 = vmul.f32 -1.442695, %v1820_v3  ;;  %v1794_v33 = vcombine.high %v1790_v15, %v1790_v15  ;;  %v1822_v38 = vadd.f32 %v8842_v30, %v1793_v20 }
 0x36e   : > { %10195 = vpow2.f32 %v8854_v31  ;;  %v8857_v29 = vmul.f32 -1.442695, %v1821_v19  ;;  %v1823_v32 = vadd.f32 %v8843_v25, %v1776_v1  ;;  %v1824_v34 = vadd.f32 %v8844_v52, %v1790_v15 }
 0x36f   : > { %10197 = vpow2.f32 %v8855_v28  ;;  %v1825_v53 = vadd.f32 %v8845_v17, %v1792_v50  ;;  %v1826_v61 = vadd.f32 %v8846_v4, %v1794_v33  ;;  %v8858_v55 = vmul.f32 -1.442695, %v1822_v38 }
 0x370   : > { %10199 = vpow2.f32 %v8856_v22  ;;  %v8859_v5 = vmul.f32 -1.442695, %v1823_v32  ;;  %v8860_v0 = vmul.f32 -1.442695, %v1824_v34 }
 0x371   : > { %v10182_v42 = vpop.eup %10181  ;;  %10201 = vpow2.f32 %v8857_v29  ;;  %v8861_v11 = vmul.f32 -1.442695, %v1825_v53  ;;  %v8862_v62 = vmul.f32 -1.442695, %v1826_v61 }
 0x372   : > { %v10184_v16 = vpop.eup %10183  ;;  %v1875_v9 = vadd.f32 1.0, %v10182_v42 }
 0x373   : > { %v10186_v2 = vpop.eup %10185  ;;  %v1876_v51 = vadd.f32 1.0, %v10184_v16 }
 0x374   : > { %v10188_v54 = vpop.eup %10187  ;;  %v1877_v24 = vadd.f32 1.0, %v10186_v2  ;;  %10203 = vrcp.f32 %v1875_v9 }
 0x375   : > { %v10190_v26 = vpop.eup %10189  ;;  %v1878_v43 = vadd.f32 1.0, %v10188_v54  ;;  %10205 = vrcp.f32 %v1876_v51 }
 0x376   : > { %v10192_v48 = vpop.eup %10191  ;;  %v1879_v49 = vadd.f32 1.0, %v10190_v26  ;;  %10207 = vrcp.f32 %v1877_v24 }
 0x377   : > { %v10194_v56 = vpop.eup %10193  ;;  %v1880_v40 = vadd.f32 1.0, %v10192_v48  ;;  %10209 = vrcp.f32 %v1878_v43 }
 0x378   : > { %v10196_v44 = vpop.eup %10195  ;;  %v1881_v35 = vadd.f32 1.0, %v10194_v56  ;;  %10211 = vrcp.f32 %v1879_v49 }
 0x379   : > { %v1882_v58 = vadd.f32 1.0, %v10196_v44  ;;  %10213 = vrcp.f32 %v1880_v40  ;;  %v10198_v8 = vpop.eup %10197 }
 0x37a   : > { %10215 = vrcp.f32 %v1881_v35  ;;  %v10200_v18 = vpop.eup %10199  ;;  %v1883_v19 = vadd.f32 1.0, %v10198_v8 }
 0x37b   : > { %10217 = vrcp.f32 %v1882_v58  ;;  %v10202_v37 = vpop.eup %10201  ;;  %v1884_v63 = vadd.f32 1.0, %v10200_v18 }
 0x37c   : > { %10219 = vpow2.f32 %v8858_v55  ;;  %v1885_v28 = vadd.f32 1.0, %v10202_v37 }
 0x37d   : > { %10221 = vpow2.f32 %v8859_v5 }
 0x37e   : > { %v11855_v23 = vpop.eup %10203  ;;  %10223 = vpow2.f32 %v8860_v0 }
 0x37f   : > { %v11857_v27 = vpop.eup %10205  ;;  %10225 = vpow2.f32 %v8861_v11 }
 0x380   : > { %v11859_v21 = vpop.eup %10207  ;;  %10227 = vpow2.f32 %v8862_v62  ;;  %v1955_v31 = vcombine.low %v11855_v23, %v11857_v27 }
 0x381   : > { %v11863_v46 = vpop.eup %10209  ;;  %10229 = vrcp.f32 %v1884_v63 }
 0x382   : > { %v11865_v47 = vpop.eup %10211  ;;  %v1956_v57 = vcombine.low %v11859_v21, %v11863_v46  ;;  %v1965_v29 = vrot.slane %v1955_v31, %v11271_v36  ;;  %10231 = vrcp.f32 %v1883_v19 }
 0x383   : > { %v11869_v3 = vpop.eup %10213  ;;  %10233 = vrcp.f32 %v1885_v28 }
 0x384   : > { %v11871_v1 = vpop.eup %10215  ;;  %v1957_v22 = vcombine.low %v11865_v47, %v11869_v3  ;;  %v1972_v15 = vrot.slane %v1956_v57, %v11271_v36 }
 0x385   : > { %v11877_v20 = vpop.eup %10217 }
 0x386   : > { %v10220_v42 = vpop.eup %10219  ;;  %v1958_v30 = vcombine.low %v11871_v1, %v11877_v20  ;;  %v1987_v16 = vcombine.high %v1965_v29, %v1972_v15  ;;  %v1979_v52 = vrot.slane %v1957_v22, %v11271_v36  ;;  %v2321_v22 = vrot.slane %v11658_v7, 7 }
 0x387   : > { %v10222_v9 = vpop.eup %10221  ;;  %v1886_v25 = vadd.f32 1.0, %v10220_v42  ;;  %v2310_v29 = vrot.slane %v11708_v6, 3 }
 0x388   : > { %v10224_v2 = vpop.eup %10223  ;;  %v1887_v51 = vadd.f32 1.0, %v10222_v9  ;;  %v1986_v50 = vrot.slane %v1958_v30, %v11271_v36  ;;  %v1995_v26 = vrot.slane %v1987_v16, %v11271_v36  ;;  %v14428_v9 = vld [vmem:[#allocation10_spill] sm:$0xff] }
 0x389   : > { %v10226_v54 = vpop.eup %10225  ;;  %v1888_v24 = vadd.f32 1.0, %v10224_v2  ;;  %10235 = vrcp.f32 %v1886_v25  ;;  %v11948_v25 = vmul.f32 %v11855_v23, %v14428_v9  ;;  %v14429_v2 = vld [vmem:[#allocation8_spill] sm:$0xff]  ;;  %v14433_v23 = vld [vmem:[#allocation13_spill] sm:$0xff] }
 0x38a   : > { %v10228_v17 = vpop.eup %10227  ;;  %v1889_v33 = vadd.f32 1.0, %v10226_v54  ;;  %10237 = vrcp.f32 %v1887_v51  ;;  %v1988_v38 = vcombine.high %v1979_v52, %v1986_v50  ;;  %v11952_v51 = vmul.f32 %v11857_v27, %v14429_v2  ;;  %v14430_v52 = vld [vmem:[#allocation9_spill] sm:$0xff]  ;;  %v14431_v54 = vld [vmem:[#allocation11_spill] sm:$0xff] }
 0x38b   : > { %v1890_v43 = vadd.f32 1.0, %v10228_v17  ;;  %10239 = vrcp.f32 %v1888_v24  ;;  %v11885_v48 = vpop.eup %10229  ;;  %v11956_v50 = vmul.f32 %v11859_v21, %v14430_v52  ;;  %v11960_v24 = vmul.f32 %v11863_v46, %v14431_v54  ;;  %v14432_v17 = vld [vmem:[#allocation12_spill] sm:$0xff]  ;;  %v14434_v27 = vld [vmem:[#allocation15_spill] sm:$0xff]  ;;  %v14435_v21 = vld [vmem:[#allocation17_spill] sm:$0xff] }
 0x38c   : > { %10241 = vrcp.f32 %v1889_v33  ;;  %v2002_v4 = vrot.slane %v1988_v38, %v11271_v36  ;;  %v11888_v34 = vpop.eup %10231  ;;  %v11964_v33 = vmul.f32 %v11865_v47, %v14432_v17  ;;  %v11968_v38 = vmul.f32 %v11869_v3, %v14433_v23  ;;  %v1932_v46 = vld [vmem:[%s10948_s10 + $0xe9] ss:$0 sm:$0xff]  ;;  %v2290_v47 = vpop.permute.xlu1 %2289  ;;  %v14437_v3 = vld [vmem:[#allocation14_spill] sm:$0xff] }
 0x38d   : > { %10243 = vrcp.f32 %v1890_v43  ;;  %v11890_v56 = vpop.eup %10233  ;;  %v2004_v40 = vcombine.low %v11888_v34, %v11885_v48  ;;  %v11976_v43 = vmul.f32 %v11877_v20, %v14435_v21 }
 0x38e   : > { %v2003_v32 = vcombine.low %v1995_v26, %v2002_v4  ;;  %v11972_v26 = vmul.f32 %v11871_v1, %v14434_v27  ;;  %v1931_v4 = vld [vmem:[%s10948_s10 + $0xd1] ss:$0 sm:$0xff] }
 0x38f   : > { %v2014_v5 = vrot.slane %v2004_v40, %v11271_v36  ;;  %v14436_v40 = vld [vmem:[#allocation18_spill] sm:$0xff] }
 0x390   : > { %v2055_v49 = vmul.f32 %v2003_v32, %v11708_v6  ;;  %v1933_v32 = vld [vmem:[%s10948_s10 + $0x101] ss:$0 sm:$0xff] }
 0x392   : > { %9326 = vmatprep.mubr.f32.mxu1 %v2055_v49  ;;  %v2285_v49 = vpop.permute.xlu0 %2284 }
 0x393   : > { %v11894_v53 = vpop.eup %10235 }
 0x394   : > { %v11896_v44 = vpop.eup %10237  ;;  %v2005_v35 = vcombine.low %v11890_v56, %v11894_v53 }
 0x395   : > { %v11900_v61 = vpop.eup %10239 }
 0x396   : > { %v11902_v55 = vpop.eup %10241  ;;  %v2006_v58 = vcombine.low %v11896_v44, %v11900_v61  ;;  %v2021_v0 = vrot.slane %v2005_v35, %v11271_v36  ;;  %v2300_v35 = vmul.f32 %v11888_v34, %v14436_v40 }
 0x397   : > { %v11908_v8 = vpop.eup %10243  ;;  %v2306_v34 = vmul.f32 %v11902_v55, %v2285_v49 }
 0x398   : > { %v2007_v11 = vcombine.low %v11902_v55, %v11908_v8  ;;  %v2036_v18 = vcombine.high %v2014_v5, %v2021_v0  ;;  %v2028_v62 = vrot.slane %v2006_v58, %v11271_v36  ;;  %v2301_v58 = vmul.f32 %v11885_v48, %v14437_v3  ;;  %v14438_v5 = vld [vmem:[#allocation16_spill] sm:$0xff]  ;;  %v14439_v0 = vld [vmem:[#allocation19_spill] sm:$0xff] }
 0x399   : > { %v2302_v1 = vmul.f32 %v11890_v56, %v14438_v5  ;;  %v2303_v20 = vmul.f32 %v11894_v53, %v14439_v0  ;;  %v1937_v48 = vld [vmem:[%s10948_s10 + $0x161] ss:$0 sm:$0xff] }
 0x39a   : > { %v2035_v37 = vrot.slane %v2007_v11, %v11271_v36  ;;  %v2044_v63 = vrot.slane %v2036_v18, %v11271_v36  ;;  %v1934_v11 = vld [vmem:[%s10948_s10 + $0x119] ss:$0 sm:$0xff]  ;;  %v1935_v18 = vld [vmem:[%s10948_s10 + $0x131] ss:$0 sm:$0xff] }
 0x39c   : > { %v2037_v31 = vcombine.high %v2028_v62, %v2035_v37  ;;  %v1936_v62 = vld [vmem:[%s10948_s10 + $0x149] ss:$0 sm:$0xff]  ;;  %v14440_v37 = vld [vmem:[#allocation20_spill] sm:$0xff] }
 0x39e   : > { %v2051_v57 = vrot.slane %v2037_v31, %v11271_v36  ;;  %v2304_v31 = vmul.f32 %v11896_v44, %v14440_v37 }
 0x3a0   : > { %v2052_v19 = vcombine.low %v2044_v63, %v2051_v57  ;;  %v14441_v63 = vld [vmem:[#allocation21_spill] sm:$0xff] }
 0x3a1   : > { %v2305_v57 = vmul.f32 %v11900_v61, %v14441_v63 }
 0x3a2   : > { %v2056_v28 = vmul.f32 %v2052_v19, %v11658_v7  ;;  %v2307_v19 = vmul.f32 %v11908_v8, %v2290_v47 }
 0x3a4   : > { %9327 = vmatmul.mubr.f32.vlgmr.msra.gmra.mrb[2].mxu1 %v2056_v28  ;;  %v1938_v28 = vld [vmem:[%s10948_s10 + $0x179] ss:$0 sm:$0xff] }
 0x3a5   : > { %9702 = vmatpush3.bf16.msra.mxu1 %v11752_v60  ;;  %v2315_v60 = vrot.slane %v11658_v7, 1 }
 0x3a6   : > { %9704 = vmatprep.subr.bf16.mxu1 %v11762_v59 }
 0x3a9   : > { %9706 = vmatpush3.bf16.msra.mxu1 %v11762_v59  ;;  %v2316_v59 = vrot.slane %v11658_v7, 2 }
 0x3aa   : > { %9708 = vmatprep.subr.bf16.mxu1 %v11772_v10 }
 0x3ad   : > { %9710 = vmatpush3.bf16.msra.mxu1 %v11772_v10  ;;  %v2317_v10 = vrot.slane %v11658_v7, 3 }
 0x3ae   : > { %9712 = vmatprep.subr.bf16.mxu1 %v11782_v12 }
 0x3b1   : > { %9714 = vmatpush3.bf16.msra.mxu1 %v11782_v12  ;;  %v2318_v12 = vrot.slane %v11658_v7, 4 }
 0x3b2   : > { %9716 = vmatprep.subr.bf16.mxu1 %v11792_v41 }
 0x3b5   : > { %9718 = vmatpush3.bf16.msra.mxu1 %v11792_v41  ;;  %v2319_v41 = vrot.slane %v11658_v7, 5 }
 0x3b6   : > { %9720 = vmatprep.subr.bf16.mxu1 %v11802_v14 }
 0x3b9   : > { %9722 = vmatpush3.bf16.msra.mxu1 %v11802_v14  ;;  %v2320_v14 = vrot.slane %v11658_v7, 6 }
 0x3ba   : > { %9724 = vmatprep.subr.bf16.mxu1 %v11814_v39 }
 0x3bd   : > { %9726 = vmatpush3.bf16.msra.mxu1 %v11814_v39  ;;  %v2308_v39 = vrot.slane %v11708_v6, 1 }
 0x3be   : > { %9728 = vmatprep.subr.bf16.mxu1 %v11821_v45 }
 0x3c1   : > { %9730 = vmatpush3.bf16.msra.mxu1 %v11821_v45  ;;  %v2309_v45 = vrot.slane %v11708_v6, 2 }
 0x477   : > { %v9328_v9 = vpop.f32.mrb[2].mxu1 }
 0x478   : > { %v2157_v56 = vrot.slane %v9328_v9, 1  ;;  %v2158_v2 = vrot.slane %v9328_v9, 2  ;;  %v2159_v52 = vrot.slane %v9328_v9, 3  ;;  %v2160_v53 = vrot.slane %v9328_v9, 4  ;;  %v12000_v54 = vpop.f32.mrb[3].mxu1 }
 0x479   : > { %v2161_v17 = vrot.slane %v9328_v9, 5  ;;  %v2162_v23 = vrot.slane %v9328_v9, 6  ;;  %v2163_v27 = vrot.slane %v9328_v9, 7  ;;  %v2188_v44 = vadd.f32 %v9328_v9, %v1931_v4 }
 0x47a   : > { %v2189_v21 = vadd.f32 %v2157_v56, %v1932_v46  ;;  %v2190_v40 = vadd.f32 %v2158_v2, %v1933_v32  ;;  %v2191_v61 = vadd.f32 %v2159_v52, %v1934_v11  ;;  %v2192_v3 = vadd.f32 %v2160_v53, %v1935_v18  ;;  %v1924_v53 = vld [vmem:[%s10948_s10 + $0x29] ss:$0 sm:$0xff] }
 0x47b   : > { %v2193_v55 = vadd.f32 %v2161_v17, %v1936_v62  ;;  %v2194_v49 = vadd.f32 %v2162_v23, %v1937_v48  ;;  %v2195_v8 = vadd.f32 %v2163_v27, %v1938_v28  ;;  %v2204_v47 = vmax.f32 %v2188_v44, 0.0 }
 0x47c   : > { %v2205_v5 = vmax.f32 %v2189_v21, 0.0  ;;  %v2206_v0 = vmax.f32 %v2190_v40, 0.0  ;;  %v2207_v37 = vmax.f32 %v2191_v61, 0.0  ;;  %v2208_v63 = vmax.f32 %v2192_v3, 0.0  ;;  %v1930_v21 = vld [vmem:[%s10948_s10 + $0xb9] ss:$0 sm:$0xff] }
 0x47d   : > { %v2209_v16 = vmax.f32 %v2193_v55, 0.0  ;;  %v2210_v30 = vmax.f32 %v2194_v49, 0.0  ;;  %v2211_v42 = vmax.f32 %v2195_v8, 0.0  ;;  %v2346_v15 = vsub.f32 %v2204_v47, %v11658_v7 }
 0x47e   : > { %v2347_v4 = vsub.f32 %v2205_v5, %v2315_v60  ;;  %v2348_v46 = vsub.f32 %v2206_v0, %v2316_v59  ;;  %v2349_v32 = vsub.f32 %v2207_v37, %v2317_v10  ;;  %v2350_v11 = vsub.f32 %v2208_v63, %v2318_v12  ;;  %v1923_v10 = vld [vmem:[%s10948_s10 + $0x11] ss:$0 sm:$0xff] }
 0x47f   : > { %v2351_v18 = vsub.f32 %v2209_v16, %v2319_v41  ;;  %v2352_v62 = vsub.f32 %v2210_v30, %v2320_v14  ;;  %v2353_v60 = vsub.f32 %v2211_v42, %v2321_v22  ;;  %v2362_v48 = vmul.f32 %v2346_v15, %v2300_v35  ;;  %v1925_v41 = vld [vmem:[%s10948_s10 + $0x41] ss:$0 sm:$0xff]  ;;  %v1926_v16 = vld [vmem:[%s10948_s10 + $0x59] ss:$0 sm:$0xff]  ;;  %v1927_v35 = vld [vmem:[%s10948_s10 + $0x71] ss:$0 sm:$0xff] }
 0x480   : > { %v2363_v28 = vmul.f32 %v2347_v4, %v2301_v58  ;;  %v2364_v59 = vmul.f32 %v2348_v46, %v2302_v1  ;;  %v2365_v9 = vmul.f32 %v2349_v32, %v2303_v20  ;;  %v2366_v56 = vmul.f32 %v2350_v11, %v2304_v31  ;;  %v1928_v31 = vld [vmem:[%s10948_s10 + $0x89] ss:$0 sm:$0xff] }
 0x481   : > { %v2367_v2 = vmul.f32 %v2351_v18, %v2305_v57  ;;  %v2368_v52 = vmul.f32 %v2352_v62, %v2306_v34  ;;  %v2369_v12 = vmul.f32 %v2353_v60, %v2307_v19  ;;  %v2150_v14 = vrot.slane %v12000_v54, 1  ;;  %v1929_v19 = vld [vmem:[%s10948_s10 + $0xa1] ss:$0 sm:$0xff] }
 0x482   : > { %v2400_v30 = vrot.slane %v2363_v28, 7  ;;  %v2402_v22 = vrot.slane %v2364_v59, 6  ;;  %v2404_v15 = vrot.slane %v2365_v9, 5  ;;  %v2406_v42 = vrot.slane %v2366_v56, 4 }
 0x483   : > { %v2408_v58 = vrot.slane %v2367_v2, 3  ;;  %v2410_v1 = vrot.slane %v2368_v52, 2  ;;  %v2412_v20 = vrot.slane %v2369_v12, 1  ;;  %v2151_v57 = vrot.slane %v12000_v54, 2 }
 0x484   : > { %v2401_v34 = vsel %vm1364_vm0, %v2400_v30, %v2362_v48  ;;  %v2152_v17 = vrot.slane %v12000_v54, 3  ;;  %v2153_v23 = vrot.slane %v12000_v54, 4  ;;  %v2154_v27 = vrot.slane %v12000_v54, 5 }
 0x485   : > { %v2403_v44 = vsel %vm1367_vm1, %v2402_v22, %v2401_v34  ;;  %v2155_v40 = vrot.slane %v12000_v54, 6  ;;  %v2156_v61 = vrot.slane %v12000_v54, 7  ;;  %v2180_v3 = vadd.f32 %v12000_v54, %v1923_v10 }
 0x486   : > { %v2405_v55 = vsel %vm1370_vm2, %v2404_v15, %v2403_v44  ;;  %v2181_v49 = vadd.f32 %v2150_v14, %v1924_v53  ;;  %v2182_v8 = vadd.f32 %v2151_v57, %v1925_v41  ;;  %v2183_v47 = vadd.f32 %v2152_v17, %v1926_v16 }
 0x487   : > { %v2407_v5 = vsel %vm1373_vm3, %v2406_v42, %v2405_v55  ;;  %v2184_v0 = vadd.f32 %v2153_v23, %v1927_v35  ;;  %v2185_v37 = vadd.f32 %v2154_v27, %v1928_v31  ;;  %v2186_v63 = vadd.f32 %v2155_v40, %v1929_v19 }
 0x488   : > { %v2409_v4 = vsel %vm1376_vm4, %v2408_v58, %v2407_v5  ;;  %v2187_v46 = vadd.f32 %v2156_v61, %v1930_v21  ;;  %v2196_v32 = vmax.f32 %v2180_v3, 0.0  ;;  %v2197_v11 = vmax.f32 %v2181_v49, 0.0 }
 0x489   : > { %v2411_v18 = vsel %vm1379_vm5, %v2410_v1, %v2409_v4  ;;  %v2198_v62 = vmax.f32 %v2182_v8, 0.0  ;;  %v2199_v60 = vmax.f32 %v2183_v47, 0.0  ;;  %v2200_v54 = vmax.f32 %v2184_v0, 0.0 }
 0x48a   : > { %v2413_v48 = vsel %vm1382_vm6, %v2412_v20, %v2411_v18  ;;  %v2201_v28 = vmax.f32 %v2185_v37, 0.0  ;;  %v2202_v59 = vmax.f32 %v2186_v63, 0.0  ;;  %v2203_v9 = vmax.f32 %v2187_v46, 0.0 }
 0x48b   : > { %v12041_v56 = vadd.f32 %v2413_v48, %v11658_v7  ;;  %v2338_v10 = vsub.f32 %v2196_v32, %v11708_v6  ;;  %v2339_v2 = vsub.f32 %v2197_v11, %v2308_v39  ;;  %v2340_v52 = vsub.f32 %v2198_v62, %v2309_v45 }
 0x48c   : > { %v2341_v12 = vsub.f32 %v2199_v60, %v2310_v29  ;;  %v14442_v53 = vrot.slane %v11708_v6, 4  ;;  %v14443_v16 = vrot.slane %v11708_v6, 5  ;;  %v14444_v7 = vrot.slane %v11708_v6, 6 }
 0x48d   : > { %v2469_v22 = vcombine.high %v12041_v56, %v12041_v56  ;;  %v2476_v39 = vrot.slane %v12041_v56, %v11271_v36  ;;  %v14445_v45 = vrot.slane %v11708_v6, 7  ;;  %v2354_v29 = vmul.f32 %v2338_v10, %v11948_v25  ;;  %v3615_v10 = vld [vmem:[%s14358_s3 + $0x8] sm:$0xff] }
 0x48e   : > { %v2342_v41 = vsub.f32 %v2200_v54, %v14442_v53  ;;  %v2343_v14 = vsub.f32 %v2201_v28, %v14443_v16  ;;  %v2344_v30 = vsub.f32 %v2202_v59, %v14444_v7  ;;  %v2355_v42 = vmul.f32 %v2339_v2, %v11952_v51  ;;  %v3617_v2 = vld [vmem:[%s14358_s3 + $0x18] sm:$0xff]  ;;  %v3616_v53 = vld [vmem:[%s14358_s3 + $0x10] sm:$0xff] }
 0x48f   : > { %v2345_v15 = vsub.f32 %v2203_v9, %v14445_v45  ;;  %v2356_v35 = vmul.f32 %v2340_v52, %v11956_v50  ;;  %v2357_v58 = vmul.f32 %v2341_v12, %v11960_v24  ;;  %v2483_v20 = vrot.slane %v2469_v22, %v11271_v36  ;;  %8867 = vst.sshfl [vmem:[%s10952_s12 + $0x41] sm:$0x1 pattern:$0x73625140] %v2476_v39  ;;  %v3614_v52 = vld [vmem:[%s14358_s3] sm:$0xff]  ;;  %v3621_v16 = vld [vmem:[%s14358_s3 + $0x38] sm:$0xff] }
 0x490   : > { %v2358_v1 = vmul.f32 %v2342_v41, %v11964_v33  ;;  %v2484_v31 = vcombine.high %v2476_v39, %v2476_v39  ;;  %v2492_v57 = vrot.slane %v2476_v39, %v11271_v36  ;;  %v2359_v34 = vmul.f32 %v2343_v14, %v11968_v38  ;;  %v3619_v41 = vld [vmem:[%s14358_s3 + $0x28] sm:$0xff]  ;;  %v3620_v22 = vld [vmem:[%s14358_s3 + $0x30] sm:$0xff]  ;;  %v3625_v45 = vld [vmem:[%s14358_s3 + $0x58] sm:$0xff] }
 0x491   : > { %v2360_v25 = vmul.f32 %v2344_v30, %v11972_v26  ;;  %v2361_v51 = vmul.f32 %v2345_v15, %v11976_v43  ;;  %v2386_v50 = vrot.slane %v2355_v42, 7  ;;  %v2388_v19 = vrot.slane %v2356_v35, 6  ;;  %8869 = vst.sshfl [vmem:[%s10952_s12 + $0x61] sm:$0x1 pattern:$0x73625140] %v2483_v20 }
 0x492   : > { %v2485_v24 = vcombine.high %v2483_v20, %v2483_v20  ;;  %v2499_v17 = vrot.slane %v2483_v20, %v11271_v36  ;;  %v2506_v33 = vrot.slane %v2484_v31, %v11271_v36  ;;  %v2514_v23 = vcombine.high %v2492_v57, %v2492_v57  ;;  %8868 = vst.sshfl [vmem:[%s10952_s12 + $0x49] sm:$0x1 pattern:$0x73625140] %v2484_v31  ;;  %v3618_v30 = vld [vmem:[%s14358_s3 + $0x20] sm:$0xff]  ;;  %v3623_v39 = vld [vmem:[%s14358_s3 + $0x48] sm:$0xff] }
 0x493   : > { %v2387_v38 = vsel %vm1364_vm0, %v2386_v50, %v2354_v29  ;;  %v2390_v27 = vrot.slane %v2357_v58, 5  ;;  %v2392_v26 = vrot.slane %v2358_v1, 4  ;;  %v2394_v3 = vrot.slane %v2359_v34, 3 }
 0x494   : > { %v2513_v43 = vrot.slane %v2485_v24, %v11271_v36  ;;  %v2515_v44 = vcombine.high %v2499_v17, %v2499_v17  ;;  %v2516_v21 = vcombine.high %v2506_v33, %v2506_v33  ;;  %2544 = vst [vmem:[%s10952_s12 + $0x51] sm:$0x1] %v2514_v23  ;;  %8870 = vst.sshfl [vmem:[%s10952_s12 + $0x69] sm:$0x1 pattern:$0x73625140] %v2485_v24 }
 0x495   : > { %v2389_v40 = vsel %vm1367_vm1, %v2388_v19, %v2387_v38  ;;  %v2396_v8 = vrot.slane %v2360_v25, 2  ;;  %v2398_v5 = vrot.slane %v2361_v51, 1  ;;  %v12123_v12 = vpack.c.bf16 %v3617_v2, %v3615_v10  ;;  %v8871_v25 = vld [vmem:[%s10948_s10 + $0x2] ss:$8 sm:$0x3] }
 0x496   : > { %v2391_v61 = vsel %vm1370_vm2, %v2390_v27, %v2389_v40  ;;  %v2517_v55 = vcombine.high %v2513_v43, %v2513_v43  ;;  %2545 = vst [vmem:[%s10952_s12 + $0x59] sm:$0x1] %v2516_v21  ;;  %2548 = vst [vmem:[%s10952_s12 + $0x71] sm:$0x1] %v2515_v44  ;;  %v12134_v14 = vpack.c.bf16 %v3616_v53, %v3614_v52 }
 0x497   : > { %v2393_v49 = vsel %vm1373_vm3, %v2392_v26, %v2391_v61  ;;  %v12136_v7 = vpack.c.bf16 %v3621_v16, %v3619_v41  ;;  %9732 = vmatprep.subr.bf16.mxu0 %v12123_v12  ;;  %v12152_v15 = vpack.c.bf16 %v3620_v22, %v3618_v30  ;;  %v12155_v29 = vpack.c.bf16 %v3625_v45, %v3623_v39  ;;  %v8875_v51 = vld [vmem:[%s10948_s10 + $0x62] ss:$8 sm:$0x3]  ;;  %v8873_v23 = vld [vmem:[%s10948_s10 + $0x32] ss:$8 sm:$0x3] }
 0x498   : > { %v2395_v47 = vsel %vm1376_vm4, %v2394_v3, %v2393_v49  ;;  %2549 = vst [vmem:[%s10952_s12 + $0x79] sm:$0x1] %v2517_v55  ;;  %v8872_v33 = vld [vmem:[%s10948_s10 + $0x1a] ss:$8 sm:$0x3] }
 0x499   : > { %v2397_v0 = vsel %vm1379_vm5, %v2396_v8, %v2395_v47  ;;  %v8876_v26 = vld [vmem:[%s10948_s10 + $0x7a] ss:$8 sm:$0x3]  ;;  %v8874_v3 = vld [vmem:[%s10948_s10 + $0x4a] ss:$8 sm:$0x3] }
 0x49a   : > { %v2399_v37 = vsel %vm1382_vm6, %v2398_v5, %v2397_v0  ;;  %v8877_v43 = vld [vmem:[%s10948_s10 + $0x92] ss:$8 sm:$0x3] }
 0x49b   : > { %v12091_v63 = vadd.f32 %v2399_v37, %v11708_v6  ;;  %v8878_v55 = vld [vmem:[%s10948_s10 + $0xaa] ss:$8 sm:$0x3]  ;;  %v8880_v52 = vld [vmem:[%s10948_s10 + $0xda] ss:$8 sm:$0x3] }
 0x49c   : > { %v8881_v30 = vld [vmem:[%s10948_s10 + $0xf2] ss:$8 sm:$0x3] }
 0x49d   : > { %v2420_v4 = vcombine.high %v12091_v63, %v12091_v63  ;;  %v2427_v46 = vrot.slane %v12091_v63, %v11271_v36  ;;  %2695 = vmatmul.mubr.f32.vlgmr.msra.gmra.mrb[8].mxu0 %v12091_v63 }
 0x49e   : > { %2700 = vmatprep.mubr.f32.mxu0 %v14417_v13  ;;  %9734 = vmatpush1.bf16.msra.mxu0 %v12134_v14 }
 0x49f   : > { %v2434_v32 = vrot.slane %v2420_v4, %v11271_v36  ;;  %v2435_v11 = vcombine.high %v2427_v46, %v2427_v46  ;;  %v2443_v18 = vrot.slane %v2427_v46, %v11271_v36  ;;  %8863 = vst.sshfl [vmem:[%s10952_s12 + $0x1] sm:$0x1 pattern:$0x73625140] %v2427_v46  ;;  %9736 = vmatprep.subr.bf16.mxu0 %v12136_v7 }
 0x4a1   : > { %v2436_v6 = vcombine.high %v2434_v32, %v2434_v32  ;;  %v2450_v62 = vrot.slane %v2434_v32, %v11271_v36  ;;  %v2457_v60 = vrot.slane %v2435_v11, %v11271_v36  ;;  %v2465_v54 = vcombine.high %v2443_v18, %v2443_v18  ;;  %8864 = vst.sshfl [vmem:[%s10952_s12 + $0x9] sm:$0x1 pattern:$0x73625140] %v2435_v11 }
 0x4a2   : > { %8865 = vst.sshfl [vmem:[%s10952_s12 + $0x21] sm:$0x1 pattern:$0x73625140] %v2434_v32  ;;  %2701 = vmatmul.mubr.f32.gmra.mrb[10].mxu0 %v12041_v56 }
 0x4a3   : > { %3710 = vmatprep.mubr.f32.mxu0 %v14417_v13  ;;  %v2464_v48 = vrot.slane %v2436_v6, %v11271_v36  ;;  %v2466_v28 = vcombine.high %v2450_v62, %v2450_v62  ;;  %v2467_v59 = vcombine.high %v2457_v60, %v2457_v60  ;;  %2536 = vst [vmem:[%s10952_s12 + $0x11] sm:$0x1] %v2465_v54  ;;  %8866 = vst.sshfl [vmem:[%s10952_s12 + $0x29] sm:$0x1 pattern:$0x73625140] %v2436_v6 }
 0x4a4   : > { %9738 = vmatpush1.bf16.msra.mxu0 %v12152_v15 }
 0x4a5   : > { %v2468_v9 = vcombine.high %v2464_v48, %v2464_v48  ;;  %2537 = vst [vmem:[%s10952_s12 + $0x19] sm:$0x1] %v2467_v59  ;;  %2540 = vst [vmem:[%s10952_s12 + $0x31] sm:$0x1] %v2466_v28  ;;  %9740 = vmatprep.subr.bf16.mxu0 %v12155_v29 }
 0x4a6   : > { %v8879_v48 = vld [vmem:[%s10948_s10 + $0xc2] ss:$8 sm:$0x3] }
 0x4a7   : > { %2541 = vst [vmem:[%s10952_s12 + $0x39] sm:$0x1] %v2468_v9 }
 0x570   : > { %v2696_v42 = vpop.f32.mrb[8].mxu0 }
 0x571   : > { %v2698_v35 = vpop.f32.mrb[9].mxu0 }
 0x572   : > { %v2711_v58 = vcombine.low %v2696_v42, %v2698_v35  ;;  %v2712_v1 = vcombine.high %v2696_v42, %v2698_v35 }
 0x574   : > { %v2719_v20 = vrot.slane %v2711_v58, %v11271_v36  ;;  %v2726_v31 = vrot.slane %v2712_v1, %v11271_v36 }
 0x575   : > { %v2702_v57 = vpop.f32.mrb[10].mxu0 }
 0x576   : > { %v2704_v34 = vpop.f32.mrb[11].mxu0  ;;  %v2727_v50 = vcombine.high %v2719_v20, %v2719_v20  ;;  %v2728_v19 = vcombine.high %v2726_v31, %v2726_v31  ;;  %v2735_v24 = vrot.slane %v2719_v20, %v11271_v36  ;;  %v2742_v17 = vrot.slane %v2726_v31, %v11271_v36 }
 0x577   : > { %v2761_v38 = vcombine.low %v2702_v57, %v2704_v34  ;;  %v2762_v27 = vcombine.high %v2702_v57, %v2704_v34 }
 0x578   : > { %v2749_v44 = vrot.slane %v2727_v50, %v11271_v36  ;;  %v2756_v21 = vrot.slane %v2728_v19, %v11271_v36  ;;  %v2757_v40 = vcombine.high %v2735_v24, %v2735_v24  ;;  %v2758_v61 = vcombine.high %v2742_v17, %v2742_v17 }
 0x579   : > { %v2827_v49 = vadd.f32 %v8871_v25, %v2735_v24  ;;  %v2831_v8 = vadd.f32 %v8875_v51, %v2742_v17  ;;  %v2769_v47 = vrot.slane %v2761_v38, %v11271_v36  ;;  %v2776_v10 = vrot.slane %v2762_v27, %v11271_v36  ;;  %v8882_v51 = vld [vmem:[%s10948_s10 + $0x10a] ss:$8 sm:$0x3] }
 0x57a   : > { %v2759_v5 = vcombine.high %v2749_v44, %v2749_v44  ;;  %v2760_v0 = vcombine.high %v2756_v21, %v2756_v21  ;;  %v2828_v37 = vadd.f32 %v8872_v33, %v2749_v44  ;;  %v2829_v4 = vadd.f32 %v8873_v23, %v2757_v40  ;;  %v8883_v24 = vld [vmem:[%s10948_s10 + $0x122] ss:$8 sm:$0x3] }
 0x57b   : > { %v2832_v46 = vadd.f32 %v8876_v26, %v2756_v21  ;;  %v2833_v32 = vadd.f32 %v8877_v43, %v2758_v61  ;;  %v8887_v11 = vmul.f32 -1.442695, %v2827_v49  ;;  %v8891_v54 = vmul.f32 -1.442695, %v2831_v8 }
 0x57c   : > { %v2830_v18 = vadd.f32 %v8874_v3, %v2759_v5  ;;  %v2834_v6 = vadd.f32 %v8878_v55, %v2760_v0  ;;  %v8888_v62 = vmul.f32 -1.442695, %v2828_v37  ;;  %v8889_v60 = vmul.f32 -1.442695, %v2829_v4 }
 0x57d   : > { %10245 = vpow2.f32 %v8887_v11  ;;  %v2777_v28 = vcombine.high %v2769_v47, %v2769_v47  ;;  %v8892_v9 = vmul.f32 -1.442695, %v2832_v46  ;;  %v8893_v2 = vmul.f32 -1.442695, %v2833_v32 }
 0x57e   : > { %10247 = vpow2.f32 %v8888_v62  ;;  %v8890_v59 = vmul.f32 -1.442695, %v2830_v18  ;;  %v2785_v53 = vrot.slane %v2769_v47, %v11271_v36  ;;  %v8894_v16 = vmul.f32 -1.442695, %v2834_v6 }
 0x57f   : > { %10249 = vpow2.f32 %v8889_v60  ;;  %v2799_v41 = vrot.slane %v2777_v28, %v11271_v36  ;;  %v2778_v39 = vcombine.high %v2776_v10, %v2776_v10  ;;  %v2792_v58 = vrot.slane %v2776_v10, %v11271_v36  ;;  %v8884_v23 = vld [vmem:[%s10948_s10 + $0x13a] ss:$8 sm:$0x3]  ;;  %v8886_v3 = vld [vmem:[%s10948_s10 + $0x16a] ss:$8 sm:$0x3] }
 0x580   : > { %10251 = vpow2.f32 %v8890_v59  ;;  %v2807_v22 = vcombine.high %v2785_v53, %v2785_v53  ;;  %v2835_v45 = vadd.f32 %v8879_v48, %v2785_v53  ;;  %v8885_v43 = vld [vmem:[%s10948_s10 + $0x152] ss:$8 sm:$0x3] }
 0x581   : > { %10253 = vpow2.f32 %v8891_v54  ;;  %v2836_v42 = vadd.f32 %v8880_v52, %v2799_v41  ;;  %v2806_v57 = vrot.slane %v2778_v39, %v11271_v36  ;;  %v2809_v34 = vcombine.high %v2799_v41, %v2799_v41 }
 0x582   : > { %10255 = vpow2.f32 %v8892_v9  ;;  %v2837_v35 = vadd.f32 %v8881_v30, %v2807_v22  ;;  %v8895_v1 = vmul.f32 -1.442695, %v2835_v45  ;;  %v2808_v38 = vcombine.high %v2792_v58, %v2792_v58 }
 0x583   : > { %10257 = vpow2.f32 %v8893_v2  ;;  %v8896_v20 = vmul.f32 -1.442695, %v2836_v42  ;;  %v2810_v44 = vcombine.high %v2806_v57, %v2806_v57  ;;  %v2838_v21 = vadd.f32 %v8882_v51, %v2809_v34 }
 0x584   : > { %10259 = vpow2.f32 %v8894_v16  ;;  %v8897_v31 = vmul.f32 -1.442695, %v2837_v35  ;;  %v2839_v55 = vadd.f32 %v8883_v24, %v2792_v58  ;;  %v2840_v47 = vadd.f32 %v8884_v23, %v2806_v57 }
 0x585   : > { %10261 = vpow2.f32 %v8895_v1  ;;  %v2841_v37 = vadd.f32 %v8885_v43, %v2808_v38  ;;  %v2842_v32 = vadd.f32 %v8886_v3, %v2810_v44  ;;  %v8898_v11 = vmul.f32 -1.442695, %v2838_v21 }
 0x586   : > { %10263 = vpow2.f32 %v8896_v20  ;;  %v8899_v6 = vmul.f32 -1.442695, %v2839_v55  ;;  %v8900_v62 = vmul.f32 -1.442695, %v2840_v47 }
 0x587   : > { %v10246_v25 = vpop.eup %10245  ;;  %10265 = vpow2.f32 %v8897_v31  ;;  %v8901_v54 = vmul.f32 -1.442695, %v2841_v37  ;;  %v8902_v28 = vmul.f32 -1.442695, %v2842_v32 }
 0x588   : > { %v10248_v50 = vpop.eup %10247  ;;  %v2891_v19 = vadd.f32 1.0, %v10246_v25 }
 0x589   : > { %v10250_v17 = vpop.eup %10249  ;;  %v2892_v33 = vadd.f32 1.0, %v10248_v50 }
 0x58a   : > { %v10252_v27 = vpop.eup %10251  ;;  %v2893_v26 = vadd.f32 1.0, %v10250_v17  ;;  %10267 = vrcp.f32 %v2891_v19 }
 0x58b   : > { %v10254_v40 = vpop.eup %10253  ;;  %v2894_v61 = vadd.f32 1.0, %v10252_v27  ;;  %10269 = vrcp.f32 %v2892_v33 }
 0x58c   : > { %v10256_v49 = vpop.eup %10255  ;;  %v2895_v8 = vadd.f32 1.0, %v10254_v40  ;;  %10271 = vrcp.f32 %v2893_v26 }
 0x58d   : > { %v10258_v5 = vpop.eup %10257  ;;  %v2896_v0 = vadd.f32 1.0, %v10256_v49  ;;  %10273 = vrcp.f32 %v2894_v61 }
 0x58e   : > { %v10260_v4 = vpop.eup %10259  ;;  %v2897_v46 = vadd.f32 1.0, %v10258_v5  ;;  %10275 = vrcp.f32 %v2895_v8 }
 0x58f   : > { %v2898_v18 = vadd.f32 1.0, %v10260_v4  ;;  %10277 = vrcp.f32 %v2896_v0  ;;  %v10262_v60 = vpop.eup %10261 }
 0x590   : > { %10279 = vrcp.f32 %v2897_v46  ;;  %v10264_v48 = vpop.eup %10263  ;;  %v2899_v39 = vadd.f32 1.0, %v10262_v60 }
 0x591   : > { %10281 = vrcp.f32 %v2898_v18  ;;  %v10266_v59 = vpop.eup %10265  ;;  %v2900_v41 = vadd.f32 1.0, %v10264_v48 }
 0x592   : > { %10283 = vpow2.f32 %v8898_v11  ;;  %v2901_v42 = vadd.f32 1.0, %v10266_v59 }
 0x593   : > { %10285 = vpow2.f32 %v8899_v6 }
 0x594   : > { %v12187_v9 = vpop.eup %10267  ;;  %10287 = vpow2.f32 %v8900_v62 }
 0x595   : > { %v12189_v10 = vpop.eup %10269  ;;  %10289 = vpow2.f32 %v8901_v54 }
 0x596   : > { %v12191_v2 = vpop.eup %10271  ;;  %10291 = vpow2.f32 %v8902_v28  ;;  %v2971_v52 = vcombine.low %v12187_v9, %v12189_v10 }
 0x597   : > { %v12195_v53 = vpop.eup %10273  ;;  %10293 = vrcp.f32 %v2900_v41 }
 0x598   : > { %v12197_v16 = vpop.eup %10275  ;;  %v2972_v30 = vcombine.low %v12191_v2, %v12195_v53  ;;  %v2981_v58 = vrot.slane %v2971_v52, %v11271_v36  ;;  %10295 = vrcp.f32 %v2899_v39  ;;  %v3624_v39 = vld [vmem:[%s14358_s3 + $0x50] sm:$0xff] }
 0x599   : > { %v12201_v22 = vpop.eup %10277  ;;  %10297 = vrcp.f32 %v2901_v42 }
 0x59a   : > { %v12203_v45 = vpop.eup %10279  ;;  %v2973_v35 = vcombine.low %v12197_v16, %v12201_v22  ;;  %v2988_v1 = vrot.slane %v2972_v30, %v11271_v36  ;;  %v3622_v30 = vld [vmem:[%s14358_s3 + $0x40] sm:$0xff] }
 0x59b   : > { %v12209_v20 = vpop.eup %10281  ;;  %v12255_v42 = vpack.c.bf16 %v3624_v39, %v3622_v30 }
 0x59c   : > { %v10284_v31 = vpop.eup %10283  ;;  %v2974_v57 = vcombine.low %v12203_v45, %v12209_v20  ;;  %v3003_v34 = vcombine.high %v2981_v58, %v2988_v1  ;;  %v2995_v24 = vrot.slane %v2973_v35, %v11271_v36  ;;  %v3627_v35 = vld [vmem:[%s14358_s3 + $0x68] sm:$0xff]  ;;  %v3629_v58 = vld [vmem:[%s14358_s3 + $0x78] sm:$0xff] }
 0x59d   : > { %v10286_v25 = vpop.eup %10285  ;;  %v2902_v51 = vadd.f32 1.0, %v10284_v31  ;;  %9742 = vmatpush1.bf16.msra.mxu0 %v12255_v42  ;;  %v12264_v1 = vpack.c.bf16 %v3629_v58, %v3627_v35  ;;  %v3626_v31 = vld [vmem:[%s14358_s3 + $0x60] sm:$0xff] }
 0x59e   : > { %v10288_v50 = vpop.eup %10287  ;;  %v2903_v19 = vadd.f32 1.0, %v10286_v25  ;;  %v3002_v17 = vrot.slane %v2974_v57, %v11271_v36  ;;  %v3011_v43 = vrot.slane %v3003_v34, %v11271_v36  ;;  %v3628_v57 = vld [vmem:[%s14358_s3 + $0x70] sm:$0xff]  ;;  %v3631_v25 = vld [vmem:[%s14358_s3 + $0x88] sm:$0xff] }
 0x59f   : > { %v10290_v33 = vpop.eup %10289  ;;  %v2904_v23 = vadd.f32 1.0, %v10288_v50  ;;  %10299 = vrcp.f32 %v2902_v51  ;;  %v12272_v34 = vpack.c.bf16 %v3628_v57, %v3626_v31  ;;  %9744 = vmatprep.subr.bf16.mxu0 %v12264_v1  ;;  %v3633_v51 = vld [vmem:[%s14358_s3 + $0x98] sm:$0xff] }
 0x5a0   : > { %v10292_v38 = vpop.eup %10291  ;;  %v2905_v27 = vadd.f32 1.0, %v10290_v33  ;;  %10301 = vrcp.f32 %v2903_v19  ;;  %v3004_v26 = vcombine.high %v2995_v24, %v3002_v17  ;;  %v12282_v50 = vpack.c.bf16 %v3633_v51, %v3631_v25  ;;  %v3630_v19 = vld [vmem:[%s14358_s3 + $0x80] sm:$0xff]  ;;  %v3632_v24 = vld [vmem:[%s14358_s3 + $0x90] sm:$0xff]  ;;  %v3635_v33 = vld [vmem:[%s14358_s3 + $0xa8] sm:$0xff] }
 0x5a1   : > { %v2906_v44 = vadd.f32 1.0, %v10292_v38  ;;  %10303 = vrcp.f32 %v2904_v23  ;;  %v12217_v61 = vpop.eup %10293  ;;  %9746 = vmatpush1.bf16.msra.mxu0 %v12272_v34  ;;  %v12290_v17 = vpack.c.bf16 %v3632_v24, %v3630_v19  ;;  %v3637_v23 = vld [vmem:[%s14358_s3 + $0xb8] sm:$0xff] }
 0x5a2   : > { %10305 = vrcp.f32 %v2905_v27  ;;  %v3018_v21 = vrot.slane %v3004_v26, %v11271_v36  ;;  %v12220_v55 = vpop.eup %10295  ;;  %9748 = vmatprep.subr.bf16.mxu0 %v12282_v50  ;;  %v12300_v38 = vpack.c.bf16 %v3637_v23, %v3635_v33  ;;  %v3634_v27 = vld [vmem:[%s14358_s3 + $0xa0] sm:$0xff]  ;;  %v3636_v26 = vld [vmem:[%s14358_s3 + $0xb0] sm:$0xff] }
 0x5a3   : > { %10307 = vrcp.f32 %v2906_v44  ;;  %v12222_v49 = vpop.eup %10297  ;;  %v3020_v8 = vcombine.low %v12220_v55, %v12217_v61  ;;  %v3639_v44 = vld [vmem:[%s14358_s3 + $0xc8] sm:$0xff] }
 0x5a4   : > { %v3019_v40 = vcombine.low %v3011_v43, %v3018_v21  ;;  %v12308_v43 = vpack.c.bf16 %v3636_v26, %v3634_v27  ;;  %v3641_v21 = vld [vmem:[%s14358_s3 + $0xd8] sm:$0xff]  ;;  %v2954_v27 = vld [vmem:[%s10948_s10 + $0x17a] ss:$0 sm:$0xff] }
 0x5a5   : > { %v3030_v32 = vrot.slane %v3020_v8, %v11271_v36  ;;  %9750 = vmatpush1.bf16.msra.mxu0 %v12290_v17  ;;  %v3640_v8 = vld [vmem:[%s14358_s3 + $0xd0] sm:$0xff] }
 0x5a6   : > { %v3071_v3 = vmul.f32 %v3019_v40, %v12091_v63  ;;  %14446 = vst [vmem:[#allocation22_spill] sm:$0xff] %v12308_v43  ;;  %9752 = vmatprep.subr.bf16.mxu0 %v12300_v38  ;;  %v12318_v40 = vpack.c.bf16 %v3641_v21, %v3639_v44  ;;  %v2953_v44 = vld [vmem:[%s10948_s10 + $0x162] ss:$0 sm:$0xff] }
 0x5a8   : > { %9361 = vmatprep.mubr.f32.mxu1 %v3071_v3  ;;  %14447 = vst [vmem:[#allocation23_spill] sm:$0xff] %v12318_v40  ;;  %v3638_v3 = vld [vmem:[%s14358_s3 + $0xc0] sm:$0xff] }
 0x5a9   : > { %v12226_v47 = vpop.eup %10299  ;;  %9754 = vmatpush1.bf16.msra.mxu0 %v12308_v43 }
 0x5aa   : > { %v12228_v5 = vpop.eup %10301  ;;  %v3021_v0 = vcombine.low %v12222_v49, %v12226_v47  ;;  %9756 = vmatprep.subr.bf16.mxu0 %v12318_v40 }
 0x5ab   : > { %v12232_v37 = vpop.eup %10303 }
 0x5ac   : > { %v12234_v4 = vpop.eup %10305  ;;  %v3022_v46 = vcombine.low %v12228_v5, %v12232_v37  ;;  %v3037_v11 = vrot.slane %v3021_v0, %v11271_v36  ;;  %v12326_v0 = vpack.c.bf16 %v3640_v8, %v3638_v3 }
 0x5ad   : > { %v12240_v18 = vpop.eup %10307 }
 0x5ae   : > { %v3023_v6 = vcombine.low %v12234_v4, %v12240_v18  ;;  %v3052_v62 = vcombine.high %v3030_v32, %v3037_v11  ;;  %v3044_v60 = vrot.slane %v3022_v46, %v11271_v36  ;;  %14448 = vst [vmem:[#allocation24_spill] sm:$0xff] %v12326_v0  ;;  %9758 = vmatpush1.bf16.msra.mxu0 %v12326_v0  ;;  %v3643_v46 = vld [vmem:[%s14358_s3 + $0xe8] sm:$0xff]  ;;  %v3645_v32 = vld [vmem:[%s14358_s3 + $0xf8] sm:$0xff] }
 0x5af   : > { %v12336_v11 = vpack.c.bf16 %v3645_v32, %v3643_v46 }
 0x5b0   : > { %v3051_v54 = vrot.slane %v3023_v6, %v11271_v36  ;;  %v3060_v28 = vrot.slane %v3052_v62, %v11271_v36  ;;  %v3642_v6 = vld [vmem:[%s14358_s3 + $0xe0] sm:$0xff]  ;;  %v3644_v62 = vld [vmem:[%s14358_s3 + $0xf0] sm:$0xff] }
 0x5b1   : > { %14449 = vst [vmem:[#allocation25_spill] sm:$0xff] %v12336_v11  ;;  %9760 = vmatprep.subr.bf16.mxu0 %v12336_v11 }
 0x5b2   : > { %v3053_v48 = vcombine.high %v3044_v60, %v3051_v54  ;;  %v12344_v60 = vpack.c.bf16 %v3644_v62, %v3642_v6  ;;  %v3236_v54 = vpop.permute.xlu0 %3235 }
 0x5b3   : > { %v12367_v26 = vmul.f32 %v12189_v10, %v3236_v54  ;;  %v2947_v54 = vld [vmem:[%s10948_s10 + $0xd2] ss:$0 sm:$0xff] }
 0x5b4   : > { %v3067_v59 = vrot.slane %v3053_v48, %v11271_v36  ;;  %14450 = vst [vmem:[#allocation26_spill] sm:$0xff] %v12344_v60  ;;  %9762 = vmatpush1.bf16.msra.mxu0 %v12344_v60  ;;  %v3241_v48 = vpop.permute.xlu1 %3240 }
 0x5b5   : > { %9796 = vmatprep.subr.bf16.mxu0 %v12123_v12  ;;  %v12370_v21 = vmul.f32 %v12191_v2, %v3241_v48  ;;  %v2948_v2 = vld [vmem:[%s10948_s10 + $0xea] ss:$0 sm:$0xff]  ;;  %v2949_v48 = vld [vmem:[%s10948_s10 + $0x102] ss:$0 sm:$0xff] }
 0x5b6   : > { %v3068_v52 = vcombine.low %v3060_v28, %v3067_v59  ;;  %v3231_v28 = vpop.permute.xlu0 %3230 }
 0x5b7   : > { %v12364_v62 = vmul.f32 %v12187_v9, %v3231_v28 }
 0x5b8   : > { %v3072_v41 = vmul.f32 %v3068_v52, %v12041_v56  ;;  %v3246_v59 = vpop.permute.xlu1 %3245 }
 0x5b9   : > { %v12373_v3 = vmul.f32 %v12195_v53, %v3246_v59 }
 0x5ba   : > { %9362 = vmatmul.mubr.f32.vlgmr.msra.gmra.mrb[4].mxu1 %v3072_v41  ;;  %v3251_v52 = vpop.permute.xlu0 %3250 }
 0x5bb   : > { %v12376_v46 = vmul.f32 %v12197_v16, %v3251_v52 }
 0x5bc   : > { %v3256_v41 = vpop.permute.xlu1 %3255 }
 0x5bd   : > { %v12379_v6 = vmul.f32 %v12201_v22, %v3256_v41  ;;  %v2951_v41 = vld [vmem:[%s10948_s10 + $0x132] ss:$0 sm:$0xff] }
 0x5be   : > { %v3276_v30 = vpop.permute.xlu0 %3275 }
 0x5bf   : > { %v3317_v16 = vmul.f32 %v12217_v61, %v3276_v30 }
 0x5c0   : > { %v3261_v39 = vpop.permute.xlu1 %3260 }
 0x5c1   : > { %v12382_v9 = vmul.f32 %v12203_v45, %v3261_v39  ;;  %v2950_v45 = vld [vmem:[%s10948_s10 + $0x11a] ss:$0 sm:$0xff]  ;;  %v2952_v39 = vld [vmem:[%s10948_s10 + $0x14a] ss:$0 sm:$0xff] }
 0x5c2   : > { %v3281_v35 = vpop.permute.xlu0 %3280 }
 0x5c3   : > { %v3318_v22 = vmul.f32 %v12222_v49, %v3281_v35 }
 0x5c4   : > { %v3266_v58 = vpop.permute.xlu1 %3265 }
 0x5c5   : > { %v12385_v10 = vmul.f32 %v12209_v20, %v3266_v58 }
 0x5c6   : > { %v3271_v31 = vpop.permute.xlu0 %3270 }
 0x5c7   : > { %v3316_v59 = vmul.f32 %v12220_v55, %v3271_v31 }
 0x5c8   : > { %v3286_v57 = vpop.permute.xlu1 %3285 }
 0x5c9   : > { %v3319_v52 = vmul.f32 %v12226_v47, %v3286_v57 }
 0x5ca   : > { %v3291_v25 = vpop.permute.xlu0 %3290 }
 0x5cb   : > { %v3320_v20 = vmul.f32 %v12228_v5, %v3291_v25 }
 0x5cc   : > { %v3296_v51 = vpop.permute.xlu1 %3295 }
 0x5cd   : > { %v3321_v58 = vmul.f32 %v12232_v37, %v3296_v51 }
 0x5ce   : > { %v3301_v53 = vpop.permute.xlu0 %3300 }
 0x5cf   : > { %v3322_v32 = vmul.f32 %v12234_v4, %v3301_v53 }
 0x5d0   : > { %v3306_v28 = vpop.permute.xlu1 %3305 }
 0x5d1   : > { %v3323_v8 = vmul.f32 %v12240_v18, %v3306_v28 }
 0x68d   : > { %v9363_v55 = vpop.f32.mrb[4].mxu1 }
 0x68e   : > { %v3173_v31 = vrot.slane %v9363_v55, 1  ;;  %v3174_v61 = vrot.slane %v9363_v55, 2  ;;  %v3175_v30 = vrot.slane %v9363_v55, 3  ;;  %v3176_v49 = vrot.slane %v9363_v55, 4  ;;  %v12403_v35 = vpop.f32.mrb[5].mxu1 }
 0x68f   : > { %v3177_v47 = vrot.slane %v9363_v55, 5  ;;  %v3178_v57 = vrot.slane %v9363_v55, 6  ;;  %v3179_v23 = vrot.slane %v9363_v55, 7  ;;  %v3204_v33 = vadd.f32 %v9363_v55, %v2947_v54 }
 0x690   : > { %v3205_v5 = vadd.f32 %v3173_v31, %v2948_v2  ;;  %v3206_v25 = vadd.f32 %v3174_v61, %v2949_v48  ;;  %v3207_v37 = vadd.f32 %v3175_v30, %v2950_v45  ;;  %v3208_v51 = vadd.f32 %v3176_v49, %v2951_v41 }
 0x691   : > { %v3209_v4 = vadd.f32 %v3177_v47, %v2952_v39  ;;  %v3210_v53 = vadd.f32 %v3178_v57, %v2953_v44  ;;  %v3211_v18 = vadd.f32 %v3179_v23, %v2954_v27  ;;  %v3220_v28 = vmax.f32 %v3204_v33, 0.0 }
 0x692   : > { %v3221_v12 = vmax.f32 %v3205_v5, 0.0  ;;  %v3222_v24 = vmax.f32 %v3206_v25, 0.0  ;;  %v3223_v19 = vmax.f32 %v3207_v37, 0.0  ;;  %v3224_v60 = vmax.f32 %v3208_v51, 0.0  ;;  %v2940_v37 = vld [vmem:[%s10948_s10 + $0x2a] ss:$0 sm:$0xff] }
 0x693   : > { %v3225_v11 = vmax.f32 %v3209_v4, 0.0  ;;  %v3226_v0 = vmax.f32 %v3210_v53, 0.0  ;;  %v3227_v40 = vmax.f32 %v3211_v18, 0.0  ;;  %v3362_v43 = vsub.f32 %v3220_v28, %v12041_v56  ;;  %v2942_v51 = vld [vmem:[%s10948_s10 + $0x5a] ss:$0 sm:$0xff] }
 0x694   : > { %v14451_v54 = vrot.slane %v12041_v56, 1  ;;  %v14452_v48 = vrot.slane %v12041_v56, 2  ;;  %v14453_v23 = vrot.slane %v12041_v56, 3  ;;  %v14454_v27 = vrot.slane %v12041_v56, 4  ;;  %v2944_v53 = vld [vmem:[%s10948_s10 + $0x8a] ss:$0 sm:$0xff] }
 0x695   : > { %v14455_v41 = vrot.slane %v12041_v56, 5  ;;  %v14456_v55 = vrot.slane %v12041_v56, 6  ;;  %v3378_v30 = vmul.f32 %v3362_v43, %v3316_v59  ;;  %v3168_v18 = vrot.slane %v12403_v35, 3 }
 0x696   : > { %v3363_v2 = vsub.f32 %v3221_v12, %v14451_v54  ;;  %v3364_v45 = vsub.f32 %v3222_v24, %v14452_v48  ;;  %v3365_v33 = vsub.f32 %v3223_v19, %v14453_v23  ;;  %v3366_v44 = vsub.f32 %v3224_v60, %v14454_v27  ;;  %v2939_v19 = vld [vmem:[%s10948_s10 + $0x12] ss:$0 sm:$0xff]  ;;  %v2946_v48 = vld [vmem:[%s10948_s10 + $0xba] ss:$0 sm:$0xff] }
 0x697   : > { %v3367_v39 = vsub.f32 %v3225_v11, %v14455_v41  ;;  %v3368_v31 = vsub.f32 %v3226_v0, %v14456_v55  ;;  %v14457_v12 = vrot.slane %v12041_v56, 7  ;;  %v2941_v11 = vld [vmem:[%s10948_s10 + $0x42] ss:$0 sm:$0xff]  ;;  %v3166_v0 = vrot.slane %v12403_v35, 1 }
 0x698   : > { %v3379_v49 = vmul.f32 %v3363_v2, %v3317_v16  ;;  %v3380_v24 = vmul.f32 %v3364_v45, %v3318_v22  ;;  %v3381_v47 = vmul.f32 %v3365_v33, %v3319_v52  ;;  %v3382_v57 = vmul.f32 %v3366_v44, %v3320_v20  ;;  %v2943_v16 = vld [vmem:[%s10948_s10 + $0x72] ss:$0 sm:$0xff] }
 0x699   : > { %v3369_v61 = vsub.f32 %v3227_v40, %v14457_v12  ;;  %v3383_v5 = vmul.f32 %v3367_v39, %v3321_v58  ;;  %v3384_v25 = vmul.f32 %v3368_v31, %v3322_v32  ;;  %v3167_v58 = vrot.slane %v12403_v35, 2  ;;  %v2945_v32 = vld [vmem:[%s10948_s10 + $0xa2] ss:$0 sm:$0xff] }
 0x69a   : > { %v3416_v4 = vrot.slane %v3379_v49, 7  ;;  %v3418_v40 = vrot.slane %v3380_v24, 6  ;;  %v3420_v43 = vrot.slane %v3381_v47, 5  ;;  %v3422_v59 = vrot.slane %v3382_v57, 4 }
 0x69b   : > { %v3385_v60 = vmul.f32 %v3369_v61, %v3323_v8  ;;  %v3424_v22 = vrot.slane %v3383_v5, 3  ;;  %v3426_v52 = vrot.slane %v3384_v25, 2  ;;  %v3169_v28 = vrot.slane %v12403_v35, 4 }
 0x69c   : > { %v3417_v8 = vsel %vm1364_vm0, %v3416_v4, %v3378_v30  ;;  %v3170_v54 = vrot.slane %v12403_v35, 5  ;;  %v3171_v45 = vrot.slane %v12403_v35, 6  ;;  %v3172_v23 = vrot.slane %v12403_v35, 7 }
 0x69d   : > { %v3428_v20 = vrot.slane %v3385_v60, 1  ;;  %v3419_v2 = vsel %vm1367_vm1, %v3418_v40, %v3417_v8  ;;  %v3196_v33 = vadd.f32 %v12403_v35, %v2939_v19  ;;  %v3197_v44 = vadd.f32 %v3166_v0, %v2940_v37 }
 0x69e   : > { %v3421_v27 = vsel %vm1370_vm2, %v3420_v43, %v3419_v2  ;;  %v3198_v41 = vadd.f32 %v3167_v58, %v2941_v11  ;;  %v3199_v39 = vadd.f32 %v3168_v18, %v2942_v51  ;;  %v3200_v31 = vadd.f32 %v3169_v28, %v2943_v16 }
 0x69f   : > { %v3423_v55 = vsel %vm1373_vm3, %v3422_v59, %v3421_v27  ;;  %v3201_v12 = vadd.f32 %v3170_v54, %v2944_v53  ;;  %v3202_v61 = vadd.f32 %v3171_v45, %v2945_v32  ;;  %v3203_v49 = vadd.f32 %v3172_v23, %v2946_v48 }
 0x6a0   : > { %v3425_v30 = vsel %vm1376_vm4, %v3424_v22, %v3423_v55  ;;  %v3212_v24 = vmax.f32 %v3196_v33, 0.0  ;;  %v3213_v47 = vmax.f32 %v3197_v44, 0.0  ;;  %v3214_v5 = vmax.f32 %v3198_v41, 0.0 }
 0x6a1   : > { %v3427_v57 = vsel %vm1379_vm5, %v3426_v52, %v3425_v30  ;;  %v3215_v25 = vmax.f32 %v3199_v39, 0.0  ;;  %v3216_v35 = vmax.f32 %v3200_v31, 0.0  ;;  %v3217_v60 = vmax.f32 %v3201_v12, 0.0 }
 0x6a2   : > { %v3429_v19 = vsel %vm1382_vm6, %v3428_v20, %v3427_v57  ;;  %v3218_v37 = vmax.f32 %v3202_v61, 0.0  ;;  %v3219_v11 = vmax.f32 %v3203_v49, 0.0  ;;  %v3354_v0 = vsub.f32 %v3212_v24, %v12091_v63 }
 0x6a3   : > { %v12444_v51 = vadd.f32 %v3429_v19, %v12041_v56  ;;  %v14458_v4 = vrot.slane %v12091_v63, 1  ;;  %v14459_v43 = vrot.slane %v12091_v63, 2  ;;  %v14460_v16 = vrot.slane %v12091_v63, 3 }
 0x6a4   : > { %v14461_v52 = vrot.slane %v12091_v63, 4  ;;  %v14462_v53 = vrot.slane %v12091_v63, 5  ;;  %v14463_v56 = vrot.slane %v12091_v63, 6  ;;  %v14464_v28 = vrot.slane %v12091_v63, 7 }
 0x6a5   : > { %v3355_v40 = vsub.f32 %v3213_v47, %v14458_v4  ;;  %v3356_v59 = vsub.f32 %v3214_v5, %v14459_v43  ;;  %v3357_v22 = vsub.f32 %v3215_v25, %v14460_v16  ;;  %v3485_v32 = vcombine.high %v12444_v51, %v12444_v51 }
 0x6a6   : > { %v3358_v20 = vsub.f32 %v3216_v35, %v14461_v52  ;;  %v3359_v58 = vsub.f32 %v3217_v60, %v14462_v53  ;;  %v3360_v8 = vsub.f32 %v3218_v37, %v14463_v56  ;;  %v3492_v18 = vrot.slane %v12444_v51, %v11271_v36  ;;  %v14466_v56 = vld [vmem:[#allocation23_spill] sm:$0xff] }
 0x6a7   : > { %v3361_v54 = vsub.f32 %v3219_v11, %v14464_v28  ;;  %v3370_v2 = vmul.f32 %v3354_v0, %v12364_v62  ;;  %v3371_v48 = vmul.f32 %v3355_v40, %v12367_v26  ;;  %v3372_v45 = vmul.f32 %v3356_v59, %v12370_v21  ;;  %v4094_v28 = vld [vmem:[%s14359_s4 + $0x28] sm:$0xff] }
 0x6a8   : > { %v3373_v23 = vmul.f32 %v3357_v22, %v12373_v3  ;;  %v3374_v33 = vmul.f32 %v3358_v20, %v12376_v46  ;;  %v3499_v27 = vrot.slane %v3485_v32, %v11271_v36  ;;  %v3500_v44 = vcombine.high %v3492_v18, %v3492_v18  ;;  %8907 = vst.sshfl [vmem:[%s10952_s12 + $0x42] sm:$0x1 pattern:$0x73625140] %v3492_v18 }
 0x6a9   : > { %v3508_v41 = vrot.slane %v3492_v18, %v11271_v36  ;;  %v3375_v39 = vmul.f32 %v3359_v58, %v12379_v6  ;;  %v3376_v62 = vmul.f32 %v3360_v8, %v12382_v9  ;;  %v3377_v26 = vmul.f32 %v3361_v54, %v12385_v10  ;;  %v14468_v8 = vld [vmem:[#allocation25_spill] sm:$0xff]  ;;  %v4093_v18 = vld [vmem:[%s14359_s4 + $0x20] sm:$0xff] }
 0x6aa   : > { %v3402_v21 = vrot.slane %v3371_v48, 7  ;;  %v3404_v55 = vrot.slane %v3372_v45, 6  ;;  %v3501_v3 = vcombine.high %v3499_v27, %v3499_v27  ;;  %v3515_v31 = vrot.slane %v3499_v27, %v11271_v36  ;;  %8908 = vst.sshfl [vmem:[%s10952_s12 + $0x4a] sm:$0x1 pattern:$0x73625140] %v3500_v44 }
 0x6ab   : > { %v3522_v46 = vrot.slane %v3500_v44, %v11271_v36  ;;  %v3530_v12 = vcombine.high %v3508_v41, %v3508_v41  ;;  %8909 = vst.sshfl [vmem:[%s10952_s12 + $0x62] sm:$0x1 pattern:$0x73625140] %v3499_v27  ;;  %v3406_v61 = vrot.slane %v3373_v23, 5  ;;  %v3408_v9 = vrot.slane %v3374_v33, 4 }
 0x6ac   : > { %v3403_v6 = vsel %vm1364_vm0, %v3402_v21, %v3370_v2  ;;  %v3529_v10 = vrot.slane %v3501_v3, %v11271_v36  ;;  %v3531_v30 = vcombine.high %v3515_v31, %v3515_v31  ;;  %8910 = vst.sshfl [vmem:[%s10952_s12 + $0x6a] sm:$0x1 pattern:$0x73625140] %v3501_v3  ;;  %v3410_v57 = vrot.slane %v3375_v39, 3  ;;  %v4095_v2 = vld [vmem:[%s14359_s4 + $0x30] sm:$0xff] }
 0x6ad   : > { %v3532_v49 = vcombine.high %v3522_v46, %v3522_v46  ;;  %3560 = vst [vmem:[%s10952_s12 + $0x52] sm:$0x1] %v3530_v12  ;;  %v3405_v24 = vsel %vm1367_vm1, %v3404_v55, %v3403_v6  ;;  %v3412_v35 = vrot.slane %v3376_v62, 2  ;;  %v3414_v60 = vrot.slane %v3377_v26, 1  ;;  %v4096_v48 = vld [vmem:[%s14359_s4 + $0x38] sm:$0xff]  ;;  %v4097_v23 = vld [vmem:[%s14359_s4 + $0x40] sm:$0xff] }
 0x6ae   : > { %v3407_v47 = vsel %vm1370_vm2, %v3406_v61, %v3405_v24  ;;  %v3533_v5 = vcombine.high %v3529_v10, %v3529_v10  ;;  %3564 = vst [vmem:[%s10952_s12 + $0x72] sm:$0x1] %v3531_v30  ;;  %v12558_v54 = vpack.c.bf16 %v4094_v28, %v4093_v18  ;;  %v12568_v45 = vpack.c.bf16 %v4096_v48, %v4095_v2  ;;  %v4098_v33 = vld [vmem:[%s14359_s4 + $0x48] sm:$0xff]  ;;  %v4099_v44 = vld [vmem:[%s14359_s4 + $0x50] sm:$0xff]  ;;  %v4100_v41 = vld [vmem:[%s14359_s4 + $0x58] sm:$0xff] }
 0x6af   : > { %3561 = vst [vmem:[%s10952_s12 + $0x5a] sm:$0x1] %v3532_v49  ;;  %v3409_v25 = vsel %vm1373_vm3, %v3408_v9, %v3407_v47  ;;  %v12578_v27 = vpack.c.bf16 %v4098_v33, %v4097_v23  ;;  %v12588_v39 = vpack.c.bf16 %v4100_v41, %v4099_v44  ;;  %v4101_v62 = vld [vmem:[%s14359_s4 + $0x60] sm:$0xff]  ;;  %v4102_v26 = vld [vmem:[%s14359_s4 + $0x68] sm:$0xff]  ;;  %v4103_v21 = vld [vmem:[%s14359_s4 + $0x70] sm:$0xff] }
 0x6b0   : > { %v3411_v19 = vsel %vm1376_vm4, %v3410_v57, %v3409_v25  ;;  %3565 = vst [vmem:[%s10952_s12 + $0x7a] sm:$0x1] %v3533_v5  ;;  %v12600_v55 = vpack.c.bf16 %v4102_v26, %v4101_v62  ;;  %v4104_v3 = vld [vmem:[%s14359_s4 + $0x78] sm:$0xff]  ;;  %v8920_v41 = vld [vmem:[%s10948_s10 + $0xdb] ss:$8 sm:$0x3] }
 0x6b1   : > { %v3413_v37 = vsel %vm1379_vm5, %v3412_v35, %v3411_v19  ;;  %v12607_v31 = vpack.c.bf16 %v4104_v3, %v4103_v21  ;;  %v8911_v24 = vld [vmem:[%s10948_s10 + $0x3] ss:$8 sm:$0x3]  ;;  %v8921_v3 = vld [vmem:[%s10948_s10 + $0xf3] ss:$8 sm:$0x3] }
 0x6b2   : > { %v3415_v11 = vsel %vm1382_vm6, %v3414_v60, %v3413_v37  ;;  %v8915_v47 = vld [vmem:[%s10948_s10 + $0x63] ss:$8 sm:$0x3]  ;;  %v8913_v60 = vld [vmem:[%s10948_s10 + $0x33] ss:$8 sm:$0x3] }
 0x6b3   : > { %v12494_v0 = vadd.f32 %v3415_v11, %v12091_v63  ;;  %v8912_v19 = vld [vmem:[%s10948_s10 + $0x1b] ss:$8 sm:$0x3] }
 0x6b4   : > { %v8919_v28 = vld [vmem:[%s10948_s10 + $0xc3] ss:$8 sm:$0x3] }
 0x6b5   : > { %v3436_v4 = vcombine.high %v12494_v0, %v12494_v0  ;;  %v3443_v40 = vrot.slane %v12494_v0, %v11271_v36  ;;  %3711 = vmatmul.mubr.f32.vlgmr.msra.gmra.mrb[12].mxu0 %v12494_v0 }
 0x6b6   : > { %3716 = vmatprep.mubr.f32.mxu0 %v14417_v13  ;;  %9798 = vmatpush1.bf16.msra.mxu0 %v12134_v14 }
 0x6b7   : > { %v3450_v43 = vrot.slane %v3436_v4, %v11271_v36  ;;  %v3451_v59 = vcombine.high %v3443_v40, %v3443_v40  ;;  %v3459_v63 = vrot.slane %v3443_v40, %v11271_v36  ;;  %8903 = vst.sshfl [vmem:[%s10952_s12 + $0x2] sm:$0x1 pattern:$0x73625140] %v3443_v40  ;;  %9800 = vmatprep.subr.bf16.mxu0 %v12136_v7 }
 0x6b8   : > { %v8916_v4 = vld [vmem:[%s10948_s10 + $0x7b] ss:$8 sm:$0x3] }
 0x6b9   : > { %v3452_v16 = vcombine.high %v3450_v43, %v3450_v43  ;;  %v3466_v22 = vrot.slane %v3450_v43, %v11271_v36  ;;  %v3473_v52 = vrot.slane %v3451_v59, %v11271_v36  ;;  %v3481_v20 = vcombine.high %v3459_v63, %v3459_v63  ;;  %8904 = vst.sshfl [vmem:[%s10952_s12 + $0xa] sm:$0x1 pattern:$0x73625140] %v3451_v59 }
 0x6ba   : > { %8905 = vst.sshfl [vmem:[%s10952_s12 + $0x22] sm:$0x1 pattern:$0x73625140] %v3450_v43  ;;  %3717 = vmatmul.mubr.f32.gmra.mrb[14].mxu0 %v12444_v51 }
 0x6bb   : > { %9802 = vmatpush1.bf16.msra.mxu0 %v12152_v15  ;;  %4726 = vmatprep.mubr.f32.mxu0 %v14417_v13  ;;  %v3480_v14 = vrot.slane %v3452_v16, %v11271_v36  ;;  %v3482_v7 = vcombine.high %v3466_v22, %v3466_v22  ;;  %v3483_v53 = vcombine.high %v3473_v52, %v3473_v52  ;;  %v14465_v15 = vld [vmem:[#allocation22_spill] sm:$0xff] }
 0x6bc   : > { %3552 = vst [vmem:[%s10952_s12 + $0x12] sm:$0x1] %v3481_v20  ;;  %8906 = vst.sshfl [vmem:[%s10952_s12 + $0x2a] sm:$0x1 pattern:$0x73625140] %v3452_v16  ;;  %9804 = vmatprep.subr.bf16.mxu0 %v12155_v29 }
 0x6bd   : > { %v3484_v58 = vcombine.high %v3480_v14, %v3480_v14  ;;  %3553 = vst [vmem:[%s10952_s12 + $0x1a] sm:$0x1] %v3483_v53  ;;  %3556 = vst [vmem:[%s10952_s12 + $0x32] sm:$0x1] %v3482_v7  ;;  %v14467_v29 = vld [vmem:[#allocation24_spill] sm:$0xff] }
 0x6be   : > { %v8917_v40 = vld [vmem:[%s10948_s10 + $0x93] ss:$8 sm:$0x3] }
 0x6bf   : > { %9806 = vmatpush1.bf16.msra.mxu0 %v12255_v42  ;;  %3557 = vst [vmem:[%s10952_s12 + $0x3a] sm:$0x1] %v3484_v58  ;;  %v14469_v42 = vld [vmem:[#allocation26_spill] sm:$0xff] }
 0x6c0   : > { %9808 = vmatprep.subr.bf16.mxu0 %v12264_v1  ;;  %v4089_v1 = vld [vmem:[%s14359_s4] sm:$0xff] }
 0x6c1   : > { %v8914_v22 = vld [vmem:[%s10948_s10 + $0x4b] ss:$8 sm:$0x3] }
 0x6c2   : > { %v8918_v52 = vld [vmem:[%s10948_s10 + $0xab] ss:$8 sm:$0x3] }
 0x6c3   : > { %9810 = vmatpush1.bf16.msra.mxu0 %v12272_v34  ;;  %v4090_v34 = vld [vmem:[%s14359_s4 + $0x8] sm:$0xff] }
 0x6c4   : > { %9812 = vmatprep.subr.bf16.mxu0 %v12282_v50  ;;  %v12538_v50 = vpack.c.bf16 %v4090_v34, %v4089_v1 }
 0x6c6   : > { %9764 = vmatprep.subr.bf16.mxu1 %v12538_v50 }
 0x6c7   : > { %9814 = vmatpush1.bf16.msra.mxu0 %v12290_v17  ;;  %9766 = vmatpush3.bf16.msra.mxu1 %v12538_v50  ;;  %v4091_v17 = vld [vmem:[%s14359_s4 + $0x10] sm:$0xff] }
 0x6c8   : > { %9816 = vmatprep.subr.bf16.mxu0 %v12300_v38  ;;  %v4092_v38 = vld [vmem:[%s14359_s4 + $0x18] sm:$0xff] }
 0x6c9   : > { %v12548_v32 = vpack.c.bf16 %v4092_v38, %v4091_v17 }
 0x6cb   : > { %9818 = vmatpush1.bf16.msra.mxu0 %v14465_v15  ;;  %9768 = vmatprep.subr.bf16.mxu1 %v12548_v32 }
 0x6cc   : > { %9820 = vmatprep.subr.bf16.mxu0 %v14466_v56  ;;  %9770 = vmatpush3.bf16.msra.mxu1 %v12548_v32 }
 0x6cd   : > { %9772 = vmatprep.subr.bf16.mxu1 %v12558_v54 }
 0x6cf   : > { %9822 = vmatpush1.bf16.msra.mxu0 %v14467_v29 }
 0x6d0   : > { %9824 = vmatprep.subr.bf16.mxu0 %v14468_v8  ;;  %9774 = vmatpush3.bf16.msra.mxu1 %v12558_v54 }
 0x6d1   : > { %9776 = vmatprep.subr.bf16.mxu1 %v12568_v45 }
 0x6d3   : > { %9826 = vmatpush1.bf16.msra.mxu0 %v14469_v42 }
 0x6d4   : > { %9778 = vmatpush3.bf16.msra.mxu1 %v12568_v45 }
 0x6d5   : > { %9780 = vmatprep.subr.bf16.mxu1 %v12578_v27 }
 0x6d8   : > { %9782 = vmatpush3.bf16.msra.mxu1 %v12578_v27 }
 0x6d9   : > { %9784 = vmatprep.subr.bf16.mxu1 %v12588_v39 }
 0x6dc   : > { %9786 = vmatpush3.bf16.msra.mxu1 %v12588_v39 }
 0x6dd   : > { %9788 = vmatprep.subr.bf16.mxu1 %v12600_v55 }
 0x6e0   : > { %9790 = vmatpush3.bf16.msra.mxu1 %v12600_v55 }
 0x6e1   : > { %9792 = vmatprep.subr.bf16.mxu1 %v12607_v31 }
 0x6e4   : > { %9794 = vmatpush3.bf16.msra.mxu1 %v12607_v31 }
 0x6e5   : > { %9828 = vmatprep.subr.bf16.mxu1 %v12538_v50 }
 0x788   : > { %v3712_v46 = vpop.f32.mrb[12].mxu0 }
 0x789   : > { %v3714_v12 = vpop.f32.mrb[13].mxu0 }
 0x78a   : > { %v3727_v6 = vcombine.low %v3712_v46, %v3714_v12  ;;  %v3728_v61 = vcombine.high %v3712_v46, %v3714_v12 }
 0x78c   : > { %v3735_v9 = vrot.slane %v3727_v6, %v11271_v36  ;;  %v3742_v10 = vrot.slane %v3728_v61, %v11271_v36 }
 0x78d   : > { %v3718_v30 = vpop.f32.mrb[14].mxu0 }
 0x78e   : > { %v3720_v49 = vpop.f32.mrb[15].mxu0  ;;  %v3743_v57 = vcombine.high %v3735_v9, %v3735_v9  ;;  %v3744_v5 = vcombine.high %v3742_v10, %v3742_v10  ;;  %v3751_v25 = vrot.slane %v3735_v9, %v11271_v36  ;;  %v3758_v35 = vrot.slane %v3742_v10, %v11271_v36 }
 0x78f   : > { %v3777_v37 = vcombine.low %v3718_v30, %v3720_v49  ;;  %v3778_v11 = vcombine.high %v3718_v30, %v3720_v49 }
 0x790   : > { %v3765_v43 = vrot.slane %v3743_v57, %v11271_v36  ;;  %v3772_v59 = vrot.slane %v3744_v5, %v11271_v36  ;;  %v3773_v63 = vcombine.high %v3751_v25, %v3751_v25  ;;  %v3774_v16 = vcombine.high %v3758_v35, %v3758_v35 }
 0x791   : > { %v3843_v20 = vadd.f32 %v8911_v24, %v3751_v25  ;;  %v3847_v14 = vadd.f32 %v8915_v47, %v3758_v35  ;;  %v3785_v7 = vrot.slane %v3777_v37, %v11271_v36  ;;  %v3792_v33 = vrot.slane %v3778_v11, %v11271_v36  ;;  %v8922_v25 = vld [vmem:[%s10948_s10 + $0x10b] ss:$8 sm:$0x3] }
 0x792   : > { %v3775_v53 = vcombine.high %v3765_v43, %v3765_v43  ;;  %v3776_v58 = vcombine.high %v3772_v59, %v3772_v59  ;;  %v3844_v15 = vadd.f32 %v8912_v19, %v3765_v43  ;;  %v3845_v56 = vadd.f32 %v8913_v60, %v3773_v63  ;;  %v8923_v60 = vld [vmem:[%s10948_s10 + $0x123] ss:$8 sm:$0x3]  ;;  %v8925_v63 = vld [vmem:[%s10948_s10 + $0x153] ss:$8 sm:$0x3] }
 0x793   : > { %v3848_v29 = vadd.f32 %v8916_v4, %v3772_v59  ;;  %v3849_v8 = vadd.f32 %v8917_v40, %v3774_v16  ;;  %v8927_v42 = vmul.f32 -1.442695, %v3843_v20  ;;  %v8931_v18 = vmul.f32 -1.442695, %v3847_v14 }
 0x794   : > { %v3846_v1 = vadd.f32 %v8914_v22, %v3775_v53  ;;  %v3850_v34 = vadd.f32 %v8918_v52, %v3776_v58  ;;  %v8928_v17 = vmul.f32 -1.442695, %v3844_v15  ;;  %v8929_v38 = vmul.f32 -1.442695, %v3845_v56 }
 0x795   : > { %10309 = vpow2.f32 %v8927_v42  ;;  %v3793_v2 = vcombine.high %v3785_v7, %v3785_v7  ;;  %v8932_v23 = vmul.f32 -1.442695, %v3848_v29  ;;  %v8933_v44 = vmul.f32 -1.442695, %v3849_v8 }
 0x796   : > { %10311 = vpow2.f32 %v8928_v17  ;;  %v8930_v48 = vmul.f32 -1.442695, %v3846_v1  ;;  %v3801_v62 = vrot.slane %v3785_v7, %v11271_v36  ;;  %v8934_v21 = vmul.f32 -1.442695, %v3850_v34 }
 0x797   : > { %10313 = vpow2.f32 %v8929_v38  ;;  %v3815_v26 = vrot.slane %v3793_v2, %v11271_v36  ;;  %v3794_v12 = vcombine.high %v3792_v33, %v3792_v33  ;;  %v3808_v10 = vrot.slane %v3792_v33, %v11271_v36  ;;  %v8924_v4 = vld [vmem:[%s10948_s10 + $0x13b] ss:$8 sm:$0x3]  ;;  %v8926_v14 = vld [vmem:[%s10948_s10 + $0x16b] ss:$8 sm:$0x3] }
 0x798   : > { %10315 = vpow2.f32 %v8930_v48  ;;  %v3823_v46 = vcombine.high %v3801_v62, %v3801_v62  ;;  %v3851_v6 = vadd.f32 %v8919_v28, %v3801_v62 }
 0x799   : > { %10317 = vpow2.f32 %v8931_v18  ;;  %v3852_v61 = vadd.f32 %v8920_v41, %v3815_v26  ;;  %v3822_v47 = vrot.slane %v3794_v12, %v11271_v36  ;;  %v3825_v57 = vcombine.high %v3815_v26, %v3815_v26 }
 0x79a   : > { %10319 = vpow2.f32 %v8932_v23  ;;  %v3853_v9 = vadd.f32 %v8921_v3, %v3823_v46  ;;  %v8935_v30 = vmul.f32 -1.442695, %v3851_v6  ;;  %v3824_v40 = vcombine.high %v3808_v10, %v3808_v10 }
 0x79b   : > { %10321 = vpow2.f32 %v8933_v44  ;;  %v8936_v49 = vmul.f32 -1.442695, %v3852_v61  ;;  %v3826_v16 = vcombine.high %v3822_v47, %v3822_v47  ;;  %v3854_v22 = vadd.f32 %v8922_v25, %v3825_v57 }
 0x79c   : > { %10323 = vpow2.f32 %v8934_v21  ;;  %v8937_v24 = vmul.f32 -1.442695, %v3853_v9  ;;  %v3855_v7 = vadd.f32 %v8923_v60, %v3808_v10  ;;  %v3856_v15 = vadd.f32 %v8924_v4, %v3822_v47 }
 0x79d   : > { %10325 = vpow2.f32 %v8935_v30  ;;  %v3857_v8 = vadd.f32 %v8925_v63, %v3824_v40  ;;  %v3858_v34 = vadd.f32 %v8926_v14, %v3826_v16  ;;  %v8938_v17 = vmul.f32 -1.442695, %v3854_v22 }
 0x79e   : > { %10327 = vpow2.f32 %v8936_v49  ;;  %v8939_v18 = vmul.f32 -1.442695, %v3855_v7  ;;  %v8940_v28 = vmul.f32 -1.442695, %v3856_v15 }
 0x79f   : > { %v10310_v5 = vpop.eup %10309  ;;  %10329 = vpow2.f32 %v8937_v24  ;;  %v8941_v48 = vmul.f32 -1.442695, %v3857_v8  ;;  %v8942_v33 = vmul.f32 -1.442695, %v3858_v34 }
 0x7a0   : > { %v10312_v35 = vpop.eup %10311  ;;  %v3907_v19 = vadd.f32 1.0, %v10310_v5 }
 0x7a1   : > { %v10314_v37 = vpop.eup %10313  ;;  %v3908_v11 = vadd.f32 1.0, %v10312_v35 }
 0x7a2   : > { %v10316_v43 = vpop.eup %10315  ;;  %v3909_v59 = vadd.f32 1.0, %v10314_v37  ;;  %10331 = vrcp.f32 %v3907_v19 }
 0x7a3   : > { %v10318_v52 = vpop.eup %10317  ;;  %v3910_v20 = vadd.f32 1.0, %v10316_v43  ;;  %10333 = vrcp.f32 %v3908_v11 }
 0x7a4   : > { %v10320_v53 = vpop.eup %10319  ;;  %v3911_v58 = vadd.f32 1.0, %v10318_v52  ;;  %10335 = vrcp.f32 %v3909_v59 }
 0x7a5   : > { %v10322_v56 = vpop.eup %10321  ;;  %v3912_v29 = vadd.f32 1.0, %v10320_v53  ;;  %10337 = vrcp.f32 %v3910_v20 }
 0x7a6   : > { %v10324_v42 = vpop.eup %10323  ;;  %v3913_v1 = vadd.f32 1.0, %v10322_v56  ;;  %10339 = vrcp.f32 %v3911_v58 }
 0x7a7   : > { %v3914_v38 = vadd.f32 1.0, %v10324_v42  ;;  %10341 = vrcp.f32 %v3912_v29  ;;  %v10326_v2 = vpop.eup %10325 }
 0x7a8   : > { %10343 = vrcp.f32 %v3913_v1  ;;  %v10328_v23 = vpop.eup %10327  ;;  %v3915_v9 = vadd.f32 1.0, %v10326_v2 }
 0x7a9   : > { %10345 = vrcp.f32 %v3914_v38  ;;  %v10330_v44 = vpop.eup %10329  ;;  %v3916_v46 = vadd.f32 1.0, %v10328_v23 }
 0x7aa   : > { %10347 = vpow2.f32 %v8938_v17  ;;  %v3917_v30 = vadd.f32 1.0, %v10330_v44 }
 0x7ab   : > { %10349 = vpow2.f32 %v8939_v18 }
 0x7ac   : > { %v12641_v41 = vpop.eup %10331  ;;  %10351 = vpow2.f32 %v8940_v28 }
 0x7ad   : > { %v12643_v62 = vpop.eup %10333  ;;  %10353 = vpow2.f32 %v8941_v48 }
 0x7ae   : > { %v12645_v26 = vpop.eup %10335  ;;  %10355 = vpow2.f32 %v8942_v33  ;;  %v3987_v21 = vcombine.low %v12641_v41, %v12643_v62 }
 0x7af   : > { %v12649_v3 = vpop.eup %10337  ;;  %10357 = vrcp.f32 %v3916_v46 }
 0x7b0   : > { %v12651_v12 = vpop.eup %10339  ;;  %v3988_v6 = vcombine.low %v12645_v26, %v12649_v3  ;;  %v3997_v24 = vrot.slane %v3987_v21, %v11271_v36  ;;  %10359 = vrcp.f32 %v3915_v9 }
 0x7b1   : > { %v12655_v61 = vpop.eup %10341  ;;  %10361 = vrcp.f32 %v3917_v30 }
 0x7b2   : > { %v12657_v10 = vpop.eup %10343  ;;  %v3989_v49 = vcombine.low %v12651_v12, %v12655_v61  ;;  %v4004_v47 = vrot.slane %v3988_v6, %v11271_v36 }
 0x7b3   : > { %v12663_v57 = vpop.eup %10345 }
 0x7b4   : > { %v10348_v5 = vpop.eup %10347  ;;  %v3990_v25 = vcombine.low %v12657_v10, %v12663_v57  ;;  %v4019_v35 = vcombine.high %v3997_v24, %v4004_v47  ;;  %v4011_v4 = vrot.slane %v3989_v49, %v11271_v36 }
 0x7b5   : > { %v10350_v19 = vpop.eup %10349  ;;  %v3918_v60 = vadd.f32 1.0, %v10348_v5 }
 0x7b6   : > { %v10352_v37 = vpop.eup %10351  ;;  %v3919_v11 = vadd.f32 1.0, %v10350_v19  ;;  %v4018_v40 = vrot.slane %v3990_v25, %v11271_v36  ;;  %v4027_v52 = vrot.slane %v4019_v35, %v11271_v36 }
 0x7b7   : > { %v10354_v43 = vpop.eup %10353  ;;  %v3920_v59 = vadd.f32 1.0, %v10352_v37  ;;  %10363 = vrcp.f32 %v3918_v60  ;;  %v4348_v37 = vrot.slane %v12444_v51, 2 }
 0x7b8   : > { %v10356_v63 = vpop.eup %10355  ;;  %v3921_v16 = vadd.f32 1.0, %v10354_v43  ;;  %10365 = vrcp.f32 %v3919_v11  ;;  %v4020_v22 = vcombine.high %v4011_v4, %v4018_v40  ;;  %v4350_v11 = vrot.slane %v12444_v51, 4 }
 0x7b9   : > { %v3922_v20 = vadd.f32 1.0, %v10356_v63  ;;  %10367 = vrcp.f32 %v3920_v59  ;;  %v12671_v53 = vpop.eup %10357  ;;  %v4351_v4 = vrot.slane %v12444_v51, 5  ;;  %v4352_v40 = vrot.slane %v12444_v51, 6 }
 0x7ba   : > { %10369 = vrcp.f32 %v3921_v16  ;;  %v4034_v14 = vrot.slane %v4020_v22, %v11271_v36  ;;  %v12674_v15 = vpop.eup %10359  ;;  %v4353_v43 = vrot.slane %v12444_v51, 7  ;;  %v4340_v59 = vrot.slane %v12494_v0, 1 }
 0x7bb   : > { %10371 = vrcp.f32 %v3922_v20  ;;  %v12676_v56 = vpop.eup %10361  ;;  %v4036_v29 = vcombine.low %v12674_v15, %v12671_v53  ;;  %v4341_v63 = vrot.slane %v12494_v0, 2  ;;  %v4342_v16 = vrot.slane %v12494_v0, 3 }
 0x7bc   : > { %v4035_v7 = vcombine.low %v4027_v52, %v4034_v14 }
 0x7bd   : > { %v4046_v18 = vrot.slane %v4036_v29, %v11271_v36 }
 0x7be   : > { %v4087_v58 = vmul.f32 %v4035_v7, %v12494_v0 }
 0x7c0   : > { %9396 = vmatprep.mubr.f32.mxu1 %v4087_v58 }
 0x7c1   : > { %v12680_v8 = vpop.eup %10363 }
 0x7c2   : > { %v12682_v42 = vpop.eup %10365  ;;  %v4037_v1 = vcombine.low %v12676_v56, %v12680_v8 }
 0x7c3   : > { %v12686_v34 = vpop.eup %10367 }
 0x7c4   : > { %v12688_v17 = vpop.eup %10369  ;;  %v4038_v38 = vcombine.low %v12682_v42, %v12686_v34  ;;  %v4053_v28 = vrot.slane %v4037_v1, %v11271_v36 }
 0x7c5   : > { %v12694_v2 = vpop.eup %10371 }
 0x7c6   : > { %v4039_v48 = vcombine.low %v12688_v17, %v12694_v2  ;;  %v4068_v23 = vcombine.high %v4046_v18, %v4053_v28  ;;  %v4060_v33 = vrot.slane %v4038_v38, %v11271_v36  ;;  %v3963_v28 = vld [vmem:[%s10948_s10 + $0xd3] ss:$0 sm:$0xff] }
 0x7c8   : > { %v4067_v44 = vrot.slane %v4039_v48, %v11271_v36  ;;  %v4076_v46 = vrot.slane %v4068_v23, %v11271_v36  ;;  %v3965_v48 = vld [vmem:[%s10948_s10 + $0x103] ss:$0 sm:$0xff] }
 0x7ca   : > { %v4069_v21 = vcombine.high %v4060_v33, %v4067_v44 }
 0x7cc   : > { %v4083_v6 = vrot.slane %v4069_v21, %v11271_v36  ;;  %v3967_v21 = vld [vmem:[%s10948_s10 + $0x133] ss:$0 sm:$0xff] }
 0x7ce   : > { %v4084_v9 = vcombine.low %v4076_v46, %v4083_v6  ;;  %v3968_v46 = vld [vmem:[%s10948_s10 + $0x14b] ss:$0 sm:$0xff] }
 0x7d0   : > { %v4088_v30 = vmul.f32 %v4084_v9, %v12444_v51 }
 0x7d2   : > { %9397 = vmatmul.mubr.f32.vlgmr.msra.gmra.mrb[6].mxu1 %v4088_v30 }
 0x7d3   : > { %9830 = vmatpush3.bf16.msra.mxu1 %v12538_v50  ;;  %v4252_v50 = vpop.permute.xlu0 %4251 }
 0x7d4   : > { %9832 = vmatprep.subr.bf16.mxu1 %v12548_v32  ;;  %v12736_v58 = vmul.f32 %v12643_v62, %v4252_v50  ;;  %v3969_v50 = vld [vmem:[%s10948_s10 + $0x163] ss:$0 sm:$0xff] }
 0x7d7   : > { %9834 = vmatpush3.bf16.msra.mxu1 %v12548_v32  ;;  %v4257_v32 = vpop.permute.xlu1 %4256 }
 0x7d8   : > { %9836 = vmatprep.subr.bf16.mxu1 %v12558_v54  ;;  %v12739_v29 = vmul.f32 %v12645_v26, %v4257_v32  ;;  %v3964_v26 = vld [vmem:[%s10948_s10 + $0xeb] ss:$0 sm:$0xff]  ;;  %v3970_v32 = vld [vmem:[%s10948_s10 + $0x17b] ss:$0 sm:$0xff] }
 0x7db   : > { %9838 = vmatpush3.bf16.msra.mxu1 %v12558_v54  ;;  %v4247_v54 = vpop.permute.xlu0 %4246 }
 0x7dc   : > { %9840 = vmatprep.subr.bf16.mxu1 %v12568_v45  ;;  %v12733_v7 = vmul.f32 %v12641_v41, %v4247_v54 }
 0x7df   : > { %9842 = vmatpush3.bf16.msra.mxu1 %v12568_v45  ;;  %v4262_v45 = vpop.permute.xlu1 %4261  ;;  %v4267_v49 = vpop.permute.xlu0 %4266 }
 0x7e0   : > { %9844 = vmatprep.subr.bf16.mxu1 %v12578_v27  ;;  %v12742_v1 = vmul.f32 %v12649_v3, %v4262_v45  ;;  %v12745_v38 = vmul.f32 %v12651_v12, %v4267_v49 }
 0x7e3   : > { %9846 = vmatpush3.bf16.msra.mxu1 %v12578_v27  ;;  %v4272_v24 = vpop.permute.xlu1 %4271  ;;  %v4292_v47 = vpop.permute.xlu0 %4291 }
 0x7e4   : > { %9848 = vmatprep.subr.bf16.mxu1 %v12588_v39  ;;  %v12748_v18 = vmul.f32 %v12655_v61, %v4272_v24  ;;  %v4333_v12 = vmul.f32 %v12671_v53, %v4292_v47 }
 0x7e7   : > { %9850 = vmatpush3.bf16.msra.mxu1 %v12588_v39  ;;  %v4277_v27 = vpop.permute.xlu1 %4276  ;;  %v4297_v5 = vpop.permute.xlu0 %4296 }
 0x7e8   : > { %9852 = vmatprep.subr.bf16.mxu1 %v12600_v55  ;;  %v12751_v41 = vmul.f32 %v12657_v10, %v4277_v27  ;;  %v4334_v61 = vmul.f32 %v12676_v56, %v4297_v5  ;;  %v3966_v10 = vld [vmem:[%s10948_s10 + $0x11b] ss:$0 sm:$0xff] }
 0x7eb   : > { %9854 = vmatpush3.bf16.msra.mxu1 %v12600_v55  ;;  %v4282_v25 = vpop.permute.xlu1 %4281  ;;  %v4287_v35 = vpop.permute.xlu0 %4286  ;;  %v4347_v55 = vrot.slane %v12444_v51, 1 }
 0x7ec   : > { %9856 = vmatprep.subr.bf16.mxu1 %v12607_v31  ;;  %v12754_v62 = vmul.f32 %v12663_v57, %v4282_v25  ;;  %v4332_v33 = vmul.f32 %v12674_v15, %v4287_v35 }
 0x7ef   : > { %9858 = vmatpush3.bf16.msra.mxu1 %v12607_v31  ;;  %v4302_v39 = vpop.permute.xlu1 %4301  ;;  %v4307_v19 = vpop.permute.xlu0 %4306  ;;  %v4349_v31 = vrot.slane %v12444_v51, 3 }
 0x7f0   : > { %v4335_v44 = vmul.f32 %v12680_v8, %v4302_v39  ;;  %v4336_v57 = vmul.f32 %v12682_v42, %v4307_v19 }
 0x7f3   : > { %v4312_v60 = vpop.permute.xlu1 %4311  ;;  %v4317_v3 = vpop.permute.xlu0 %4316 }
 0x7f4   : > { %v4337_v6 = vmul.f32 %v12686_v34, %v4312_v60  ;;  %v4338_v9 = vmul.f32 %v12688_v17, %v4317_v3 }
 0x7f7   : > { %v4322_v23 = vpop.permute.xlu1 %4321 }
 0x7f8   : > { %v4339_v30 = vmul.f32 %v12694_v2, %v4322_v23 }
 0x8a5   : > { %v9398_v15 = vpop.f32.mrb[6].mxu1 }
 0x8a6   : > { %v4189_v54 = vrot.slane %v9398_v15, 1  ;;  %v4190_v53 = vrot.slane %v9398_v15, 2  ;;  %v4191_v45 = vrot.slane %v9398_v15, 3  ;;  %v4192_v56 = vrot.slane %v9398_v15, 4  ;;  %v12772_v49 = vpop.f32.mrb[7].mxu1 }
 0x8a7   : > { %v4193_v8 = vrot.slane %v9398_v15, 5  ;;  %v4194_v24 = vrot.slane %v9398_v15, 6  ;;  %v4195_v47 = vrot.slane %v9398_v15, 7  ;;  %v4220_v27 = vadd.f32 %v9398_v15, %v3963_v28 }
 0x8a8   : > { %v4221_v42 = vadd.f32 %v4189_v54, %v3964_v26  ;;  %v4222_v5 = vadd.f32 %v4190_v53, %v3965_v48  ;;  %v4223_v34 = vadd.f32 %v4191_v45, %v3966_v10  ;;  %v4224_v25 = vadd.f32 %v4192_v56, %v3967_v21  ;;  %v3956_v56 = vld [vmem:[%s10948_s10 + $0x2b] ss:$0 sm:$0xff] }
 0x8a9   : > { %v4225_v17 = vadd.f32 %v4193_v8, %v3968_v46  ;;  %v4226_v35 = vadd.f32 %v4194_v24, %v3969_v50  ;;  %v4227_v2 = vadd.f32 %v4195_v47, %v3970_v32  ;;  %v4236_v39 = vmax.f32 %v4220_v27, 0.0 }
 0x8aa   : > { %v4237_v19 = vmax.f32 %v4221_v42, 0.0  ;;  %v4238_v60 = vmax.f32 %v4222_v5, 0.0  ;;  %v4239_v3 = vmax.f32 %v4223_v34, 0.0  ;;  %v4240_v23 = vmax.f32 %v4224_v25, 0.0  ;;  %v3962_v42 = vld [vmem:[%s10948_s10 + $0xbb] ss:$0 sm:$0xff] }
 0x8ab   : > { %v4241_v14 = vmax.f32 %v4225_v17, 0.0  ;;  %v4242_v20 = vmax.f32 %v4226_v35, 0.0  ;;  %v4243_v52 = vmax.f32 %v4227_v2, 0.0  ;;  %v4378_v22 = vsub.f32 %v4236_v39, %v12444_v51 }
 0x8ac   : > { %v4379_v28 = vsub.f32 %v4237_v19, %v4347_v55  ;;  %v4380_v26 = vsub.f32 %v4238_v60, %v4348_v37  ;;  %v4381_v48 = vsub.f32 %v4239_v3, %v4349_v31  ;;  %v4382_v10 = vsub.f32 %v4240_v23, %v4350_v11  ;;  %v3955_v31 = vld [vmem:[%s10948_s10 + $0x13] ss:$0 sm:$0xff] }
 0x8ad   : > { %v4383_v21 = vsub.f32 %v4241_v14, %v4351_v4  ;;  %v4384_v46 = vsub.f32 %v4242_v20, %v4352_v40  ;;  %v4385_v55 = vsub.f32 %v4243_v52, %v4353_v43  ;;  %v4394_v50 = vmul.f32 %v4378_v22, %v4332_v33  ;;  %v3957_v4 = vld [vmem:[%s10948_s10 + $0x43] ss:$0 sm:$0xff]  ;;  %v3958_v14 = vld [vmem:[%s10948_s10 + $0x5b] ss:$0 sm:$0xff]  ;;  %v3959_v33 = vld [vmem:[%s10948_s10 + $0x73] ss:$0 sm:$0xff] }
 0x8ae   : > { %v4395_v32 = vmul.f32 %v4379_v28, %v4333_v12  ;;  %v4396_v37 = vmul.f32 %v4380_v26, %v4334_v61  ;;  %v4397_v15 = vmul.f32 %v4381_v48, %v4335_v44  ;;  %v4398_v54 = vmul.f32 %v4382_v10, %v4336_v57  ;;  %v3960_v57 = vld [vmem:[%s10948_s10 + $0x8b] ss:$0 sm:$0xff] }
 0x8af   : > { %v4399_v53 = vmul.f32 %v4383_v21, %v4337_v6  ;;  %v4400_v45 = vmul.f32 %v4384_v46, %v4338_v9  ;;  %v4401_v11 = vmul.f32 %v4385_v55, %v4339_v30  ;;  %v4182_v40 = vrot.slane %v12772_v49, 1  ;;  %v3961_v30 = vld [vmem:[%s10948_s10 + $0xa3] ss:$0 sm:$0xff] }
 0x8b0   : > { %v4432_v20 = vrot.slane %v4395_v32, 7  ;;  %v4434_v43 = vrot.slane %v4396_v37, 6  ;;  %v4436_v22 = vrot.slane %v4397_v15, 5  ;;  %v4438_v52 = vrot.slane %v4398_v54, 4 }
 0x8b1   : > { %v4440_v12 = vrot.slane %v4399_v53, 3  ;;  %v4442_v61 = vrot.slane %v4400_v45, 2  ;;  %v4444_v44 = vrot.slane %v4401_v11, 1  ;;  %v4183_v6 = vrot.slane %v12772_v49, 2 }
 0x8b2   : > { %v4433_v9 = vsel %vm1364_vm0, %v4432_v20, %v4394_v50  ;;  %v4184_v8 = vrot.slane %v12772_v49, 3  ;;  %v4185_v24 = vrot.slane %v12772_v49, 4  ;;  %v4186_v47 = vrot.slane %v12772_v49, 5 }
 0x8b3   : > { %v4435_v27 = vsel %vm1367_vm1, %v4434_v43, %v4433_v9  ;;  %v4187_v5 = vrot.slane %v12772_v49, 6  ;;  %v4188_v34 = vrot.slane %v12772_v49, 7  ;;  %v4212_v25 = vadd.f32 %v12772_v49, %v3955_v31 }
 0x8b4   : > { %v4437_v17 = vsel %vm1370_vm2, %v4436_v22, %v4435_v27  ;;  %v4213_v35 = vadd.f32 %v4182_v40, %v3956_v56  ;;  %v4214_v2 = vadd.f32 %v4183_v6, %v3957_v4  ;;  %v4215_v39 = vadd.f32 %v4184_v8, %v3958_v14 }
 0x8b5   : > { %v4439_v19 = vsel %vm1373_vm3, %v4438_v52, %v4437_v17  ;;  %v4216_v60 = vadd.f32 %v4185_v24, %v3959_v33  ;;  %v4217_v3 = vadd.f32 %v4186_v47, %v3960_v57  ;;  %v4218_v23 = vadd.f32 %v4187_v5, %v3961_v30 }
 0x8b6   : > { %v4441_v28 = vsel %vm1376_vm4, %v4440_v12, %v4439_v19  ;;  %v4219_v26 = vadd.f32 %v4188_v34, %v3962_v42  ;;  %v4228_v48 = vmax.f32 %v4212_v25, 0.0  ;;  %v4229_v10 = vmax.f32 %v4213_v35, 0.0 }
 0x8b7   : > { %v4443_v21 = vsel %vm1379_vm5, %v4442_v61, %v4441_v28  ;;  %v4230_v46 = vmax.f32 %v4214_v2, 0.0  ;;  %v4231_v55 = vmax.f32 %v4215_v39, 0.0  ;;  %v4232_v49 = vmax.f32 %v4216_v60, 0.0 }
 0x8b8   : > { %v4445_v50 = vsel %vm1382_vm6, %v4444_v44, %v4443_v21  ;;  %v4233_v32 = vmax.f32 %v4217_v3, 0.0  ;;  %v4234_v37 = vmax.f32 %v4218_v23, 0.0  ;;  %v4235_v15 = vmax.f32 %v4219_v26, 0.0 }
 0x8b9   : > { %v12813_v54 = vadd.f32 %v4445_v50, %v12444_v51  ;;  %v4370_v31 = vsub.f32 %v4228_v48, %v12494_v0  ;;  %v4371_v53 = vsub.f32 %v4229_v10, %v4340_v59  ;;  %v4372_v45 = vsub.f32 %v4230_v46, %v4341_v63 }
 0x8ba   : > { %v4373_v11 = vsub.f32 %v4231_v55, %v4342_v16  ;;  %v14470_v56 = vrot.slane %v12494_v0, 4  ;;  %v14471_v14 = vrot.slane %v12494_v0, 5  ;;  %v14472_v51 = vrot.slane %v12494_v0, 6 }
 0x8bb   : > { %v4501_v43 = vcombine.high %v12813_v54, %v12813_v54  ;;  %v4508_v59 = vrot.slane %v12813_v54, %v11271_v36  ;;  %v14473_v63 = vrot.slane %v12494_v0, 7  ;;  %v4386_v16 = vmul.f32 %v4370_v31, %v12733_v7  ;;  %v5647_v31 = vld [vmem:[%s14358_s3 + $0x8] sm:$0xff] }
 0x8bc   : > { %v4374_v4 = vsub.f32 %v4232_v49, %v14470_v56  ;;  %v4375_v40 = vsub.f32 %v4233_v32, %v14471_v14  ;;  %v4376_v20 = vsub.f32 %v4234_v37, %v14472_v51  ;;  %v4387_v52 = vmul.f32 %v4371_v53, %v12736_v58  ;;  %v5649_v53 = vld [vmem:[%s14358_s3 + $0x18] sm:$0xff]  ;;  %v5648_v56 = vld [vmem:[%s14358_s3 + $0x10] sm:$0xff] }
 0x8bd   : > { %v4377_v22 = vsub.f32 %v4235_v15, %v14473_v63  ;;  %v4388_v33 = vmul.f32 %v4372_v45, %v12739_v29  ;;  %v4389_v12 = vmul.f32 %v4373_v11, %v12742_v1  ;;  %v4515_v44 = vrot.slane %v4501_v43, %v11271_v36  ;;  %8947 = vst.sshfl [vmem:[%s10952_s12 + $0x43] sm:$0x1 pattern:$0x73625140] %v4508_v59  ;;  %v5646_v45 = vld [vmem:[%s14358_s3] sm:$0xff]  ;;  %v5653_v14 = vld [vmem:[%s14358_s3 + $0x38] sm:$0xff] }
 0x8be   : > { %v4390_v61 = vmul.f32 %v4374_v4, %v12745_v38  ;;  %v4516_v57 = vcombine.high %v4508_v59, %v4508_v59  ;;  %v4524_v6 = vrot.slane %v4508_v59, %v11271_v36  ;;  %v4391_v9 = vmul.f32 %v4375_v40, %v12748_v18  ;;  %v5651_v4 = vld [vmem:[%s14358_s3 + $0x28] sm:$0xff]  ;;  %v5652_v43 = vld [vmem:[%s14358_s3 + $0x30] sm:$0xff]  ;;  %v5657_v63 = vld [vmem:[%s14358_s3 + $0x58] sm:$0xff] }
 0x8bf   : > { %v4392_v7 = vmul.f32 %v4376_v20, %v12751_v41  ;;  %v4393_v58 = vmul.f32 %v4377_v22, %v12754_v62  ;;  %v4418_v29 = vrot.slane %v4387_v52, 7  ;;  %v4420_v30 = vrot.slane %v4388_v33, 6  ;;  %8949 = vst.sshfl [vmem:[%s10952_s12 + $0x63] sm:$0x1 pattern:$0x73625140] %v4515_v44 }
 0x8c0   : > { %v4517_v1 = vcombine.high %v4515_v44, %v4515_v44  ;;  %v4531_v8 = vrot.slane %v4515_v44, %v11271_v36  ;;  %v4538_v38 = vrot.slane %v4516_v57, %v11271_v36  ;;  %v4546_v24 = vcombine.high %v4524_v6, %v4524_v6  ;;  %8948 = vst.sshfl [vmem:[%s10952_s12 + $0x4b] sm:$0x1 pattern:$0x73625140] %v4516_v57  ;;  %v5650_v20 = vld [vmem:[%s14358_s3 + $0x20] sm:$0xff]  ;;  %v5655_v59 = vld [vmem:[%s14358_s3 + $0x48] sm:$0xff] }
 0x8c1   : > { %v4419_v18 = vsel %vm1364_vm0, %v4418_v29, %v4386_v16  ;;  %v4422_v47 = vrot.slane %v4389_v12, 5  ;;  %v4424_v41 = vrot.slane %v4390_v61, 4  ;;  %v4426_v25 = vrot.slane %v4391_v9, 3 }
 0x8c2   : > { %v4545_v62 = vrot.slane %v4517_v1, %v11271_v36  ;;  %v4547_v27 = vcombine.high %v4531_v8, %v4531_v8  ;;  %v4548_v42 = vcombine.high %v4538_v38, %v4538_v38  ;;  %4576 = vst [vmem:[%s10952_s12 + $0x53] sm:$0x1] %v4546_v24  ;;  %8950 = vst.sshfl [vmem:[%s10952_s12 + $0x6b] sm:$0x1 pattern:$0x73625140] %v4517_v1 }
 0x8c3   : > { %v4421_v5 = vsel %vm1367_vm1, %v4420_v30, %v4419_v18  ;;  %v4428_v2 = vrot.slane %v4392_v7, 2  ;;  %v4430_v19 = vrot.slane %v4393_v58, 1  ;;  %v12895_v11 = vpack.c.bf16 %v5649_v53, %v5647_v31  ;;  %v8951_v7 = vld [vmem:[%s10948_s10 + $0x4] ss:$8 sm:$0x3] }
 0x8c4   : > { %v4423_v34 = vsel %vm1370_vm2, %v4422_v47, %v4421_v5  ;;  %v4549_v17 = vcombine.high %v4545_v62, %v4545_v62  ;;  %4577 = vst [vmem:[%s10952_s12 + $0x5b] sm:$0x1] %v4548_v42  ;;  %4580 = vst [vmem:[%s10952_s12 + $0x73] sm:$0x1] %v4547_v27  ;;  %v12906_v40 = vpack.c.bf16 %v5648_v56, %v5646_v45 }
 0x8c5   : > { %v4425_v35 = vsel %vm1373_vm3, %v4424_v41, %v4423_v34  ;;  %v12908_v51 = vpack.c.bf16 %v5653_v14, %v5651_v4  ;;  %9860 = vmatprep.subr.bf16.mxu0 %v12895_v11  ;;  %v12924_v22 = vpack.c.bf16 %v5652_v43, %v5650_v20  ;;  %v12927_v16 = vpack.c.bf16 %v5657_v63, %v5655_v59  ;;  %v8955_v58 = vld [vmem:[%s10948_s10 + $0x64] ss:$8 sm:$0x3]  ;;  %v8953_v24 = vld [vmem:[%s10948_s10 + $0x34] ss:$8 sm:$0x3] }
 0x8c6   : > { %v4427_v39 = vsel %vm1376_vm4, %v4426_v25, %v4425_v35  ;;  %4581 = vst [vmem:[%s10952_s12 + $0x7b] sm:$0x1] %v4549_v17  ;;  %v8952_v38 = vld [vmem:[%s10948_s10 + $0x1c] ss:$8 sm:$0x3] }
 0x8c7   : > { %v4429_v60 = vsel %vm1379_vm5, %v4428_v2, %v4427_v39  ;;  %v8956_v41 = vld [vmem:[%s10948_s10 + $0x7c] ss:$8 sm:$0x3]  ;;  %v8954_v25 = vld [vmem:[%s10948_s10 + $0x4c] ss:$8 sm:$0x3] }
 0x8c8   : > { %v4431_v3 = vsel %vm1382_vm6, %v4430_v19, %v4429_v60  ;;  %v8957_v62 = vld [vmem:[%s10948_s10 + $0x94] ss:$8 sm:$0x3] }
 0x8c9   : > { %v12863_v23 = vadd.f32 %v4431_v3, %v12494_v0  ;;  %v8958_v17 = vld [vmem:[%s10948_s10 + $0xac] ss:$8 sm:$0x3]  ;;  %v8960_v45 = vld [vmem:[%s10948_s10 + $0xdc] ss:$8 sm:$0x3] }
 0x8ca   : > { %v8961_v20 = vld [vmem:[%s10948_s10 + $0xf4] ss:$8 sm:$0x3] }
 0x8cb   : > { %v4452_v28 = vcombine.high %v12863_v23, %v12863_v23  ;;  %v4459_v26 = vrot.slane %v12863_v23, %v11271_v36  ;;  %4727 = vmatmul.mubr.f32.vlgmr.msra.gmra.mrb[16].mxu0 %v12863_v23 }
 0x8cc   : > { %4732 = vmatprep.mubr.f32.mxu0 %v14417_v13  ;;  %9862 = vmatpush1.bf16.msra.mxu0 %v12906_v40 }
 0x8cd   : > { %v4466_v48 = vrot.slane %v4452_v28, %v11271_v36  ;;  %v4467_v10 = vcombine.high %v4459_v26, %v4459_v26  ;;  %v4475_v21 = vrot.slane %v4459_v26, %v11271_v36  ;;  %8943 = vst.sshfl [vmem:[%s10952_s12 + $0x3] sm:$0x1 pattern:$0x73625140] %v4459_v26  ;;  %9864 = vmatprep.subr.bf16.mxu0 %v12908_v51 }
 0x8cf   : > { %v4468_v0 = vcombine.high %v4466_v48, %v4466_v48  ;;  %v4482_v46 = vrot.slane %v4466_v48, %v11271_v36  ;;  %v4489_v55 = vrot.slane %v4467_v10, %v11271_v36  ;;  %v4497_v49 = vcombine.high %v4475_v21, %v4475_v21  ;;  %8944 = vst.sshfl [vmem:[%s10952_s12 + $0xb] sm:$0x1 pattern:$0x73625140] %v4467_v10 }
 0x8d0   : > { %8945 = vst.sshfl [vmem:[%s10952_s12 + $0x23] sm:$0x1 pattern:$0x73625140] %v4466_v48  ;;  %4733 = vmatmul.mubr.f32.gmra.mrb[18].mxu0 %v12813_v54 }
 0x8d1   : > { %5742 = vmatprep.mubr.f32.mxu0 %v14417_v13  ;;  %v4496_v50 = vrot.slane %v4468_v0, %v11271_v36  ;;  %v4498_v32 = vcombine.high %v4482_v46, %v4482_v46  ;;  %v4499_v37 = vcombine.high %v4489_v55, %v4489_v55  ;;  %4568 = vst [vmem:[%s10952_s12 + $0x13] sm:$0x1] %v4497_v49  ;;  %8946 = vst.sshfl [vmem:[%s10952_s12 + $0x2b] sm:$0x1 pattern:$0x73625140] %v4468_v0 }
 0x8d2   : > { %9866 = vmatpush1.bf16.msra.mxu0 %v12924_v22 }
 0x8d3   : > { %v4500_v15 = vcombine.high %v4496_v50, %v4496_v50  ;;  %4569 = vst [vmem:[%s10952_s12 + $0x1b] sm:$0x1] %v4499_v37  ;;  %4572 = vst [vmem:[%s10952_s12 + $0x33] sm:$0x1] %v4498_v32  ;;  %9868 = vmatprep.subr.bf16.mxu0 %v12927_v16 }
 0x8d4   : > { %v8959_v50 = vld [vmem:[%s10948_s10 + $0xc4] ss:$8 sm:$0x3] }
 0x8d5   : > { %4573 = vst [vmem:[%s10952_s12 + $0x3b] sm:$0x1] %v4500_v15 }
 0x99e   : > { %v4728_v52 = vpop.f32.mrb[16].mxu0 }
 0x99f   : > { %v4730_v33 = vpop.f32.mrb[17].mxu0 }
 0x9a0   : > { %v4743_v12 = vcombine.low %v4728_v52, %v4730_v33  ;;  %v4744_v61 = vcombine.high %v4728_v52, %v4730_v33 }
 0x9a2   : > { %v4751_v44 = vrot.slane %v4743_v12, %v11271_v36  ;;  %v4758_v57 = vrot.slane %v4744_v61, %v11271_v36 }
 0x9a3   : > { %v4734_v6 = vpop.f32.mrb[18].mxu0 }
 0x9a4   : > { %v4736_v9 = vpop.f32.mrb[19].mxu0  ;;  %v4759_v29 = vcombine.high %v4751_v44, %v4751_v44  ;;  %v4760_v30 = vcombine.high %v4758_v57, %v4758_v57  ;;  %v4767_v1 = vrot.slane %v4751_v44, %v11271_v36  ;;  %v4774_v8 = vrot.slane %v4758_v57, %v11271_v36 }
 0x9a5   : > { %v4793_v18 = vcombine.low %v4734_v6, %v4736_v9  ;;  %v4794_v47 = vcombine.high %v4734_v6, %v4736_v9 }
 0x9a6   : > { %v4781_v27 = vrot.slane %v4759_v29, %v11271_v36  ;;  %v4788_v42 = vrot.slane %v4760_v30, %v11271_v36  ;;  %v4789_v5 = vcombine.high %v4767_v1, %v4767_v1  ;;  %v4790_v34 = vcombine.high %v4774_v8, %v4774_v8 }
 0x9a7   : > { %v4859_v35 = vadd.f32 %v8951_v7, %v4767_v1  ;;  %v4863_v2 = vadd.f32 %v8955_v58, %v4774_v8  ;;  %v4801_v39 = vrot.slane %v4793_v18, %v11271_v36  ;;  %v4808_v31 = vrot.slane %v4794_v47, %v11271_v36  ;;  %v8962_v58 = vld [vmem:[%s10948_s10 + $0x10c] ss:$8 sm:$0x3] }
 0x9a8   : > { %v4791_v19 = vcombine.high %v4781_v27, %v4781_v27  ;;  %v4792_v60 = vcombine.high %v4788_v42, %v4788_v42  ;;  %v4860_v3 = vadd.f32 %v8952_v38, %v4781_v27  ;;  %v4861_v28 = vadd.f32 %v8953_v24, %v4789_v5  ;;  %v8963_v1 = vld [vmem:[%s10948_s10 + $0x124] ss:$8 sm:$0x3] }
 0x9a9   : > { %v4864_v26 = vadd.f32 %v8956_v41, %v4788_v42  ;;  %v4865_v48 = vadd.f32 %v8957_v62, %v4790_v34  ;;  %v8967_v10 = vmul.f32 -1.442695, %v4859_v35  ;;  %v8971_v49 = vmul.f32 -1.442695, %v4863_v2 }
 0x9aa   : > { %v4862_v21 = vadd.f32 %v8954_v25, %v4791_v19  ;;  %v4866_v0 = vadd.f32 %v8958_v17, %v4792_v60  ;;  %v8968_v46 = vmul.f32 -1.442695, %v4860_v3  ;;  %v8969_v55 = vmul.f32 -1.442695, %v4861_v28 }
 0x9ab   : > { %10373 = vpow2.f32 %v8967_v10  ;;  %v4809_v32 = vcombine.high %v4801_v39, %v4801_v39  ;;  %v8972_v15 = vmul.f32 -1.442695, %v4864_v26  ;;  %v8973_v53 = vmul.f32 -1.442695, %v4865_v48 }
 0x9ac   : > { %10375 = vpow2.f32 %v8968_v46  ;;  %v8970_v37 = vmul.f32 -1.442695, %v4862_v21  ;;  %v4817_v56 = vrot.slane %v4801_v39, %v11271_v36  ;;  %v8974_v14 = vmul.f32 -1.442695, %v4866_v0 }
 0x9ad   : > { %10377 = vpow2.f32 %v8969_v55  ;;  %v4831_v4 = vrot.slane %v4809_v32, %v11271_v36  ;;  %v4810_v59 = vcombine.high %v4808_v31, %v4808_v31  ;;  %v4824_v12 = vrot.slane %v4808_v31, %v11271_v36  ;;  %v8964_v24 = vld [vmem:[%s10948_s10 + $0x13c] ss:$8 sm:$0x3]  ;;  %v8966_v25 = vld [vmem:[%s10948_s10 + $0x16c] ss:$8 sm:$0x3] }
 0x9ae   : > { %10379 = vpow2.f32 %v8970_v37  ;;  %v4839_v43 = vcombine.high %v4817_v56, %v4817_v56  ;;  %v4867_v63 = vadd.f32 %v8959_v50, %v4817_v56  ;;  %v8965_v62 = vld [vmem:[%s10948_s10 + $0x154] ss:$8 sm:$0x3] }
 0x9af   : > { %10381 = vpow2.f32 %v8971_v49  ;;  %v4868_v52 = vadd.f32 %v8960_v45, %v4831_v4  ;;  %v4838_v6 = vrot.slane %v4810_v59, %v11271_v36  ;;  %v4841_v9 = vcombine.high %v4831_v4, %v4831_v4 }
 0x9b0   : > { %10383 = vpow2.f32 %v8972_v15  ;;  %v4869_v33 = vadd.f32 %v8961_v20, %v4839_v43  ;;  %v8975_v61 = vmul.f32 -1.442695, %v4867_v63  ;;  %v4840_v18 = vcombine.high %v4824_v12, %v4824_v12 }
 0x9b1   : > { %10385 = vpow2.f32 %v8973_v53  ;;  %v8976_v44 = vmul.f32 -1.442695, %v4868_v52  ;;  %v4842_v27 = vcombine.high %v4838_v6, %v4838_v6  ;;  %v4870_v42 = vadd.f32 %v8962_v58, %v4841_v9 }
 0x9b2   : > { %10387 = vpow2.f32 %v8974_v14  ;;  %v8977_v57 = vmul.f32 -1.442695, %v4869_v33  ;;  %v4871_v17 = vadd.f32 %v8963_v1, %v4824_v12  ;;  %v4872_v39 = vadd.f32 %v8964_v24, %v4838_v6 }
 0x9b3   : > { %10389 = vpow2.f32 %v8975_v61  ;;  %v4873_v3 = vadd.f32 %v8965_v62, %v4840_v18  ;;  %v4874_v48 = vadd.f32 %v8966_v25, %v4842_v27  ;;  %v8978_v10 = vmul.f32 -1.442695, %v4870_v42 }
 0x9b4   : > { %10391 = vpow2.f32 %v8976_v44  ;;  %v8979_v0 = vmul.f32 -1.442695, %v4871_v17  ;;  %v8980_v46 = vmul.f32 -1.442695, %v4872_v39 }
 0x9b5   : > { %v10374_v7 = vpop.eup %10373  ;;  %10393 = vpow2.f32 %v8977_v57  ;;  %v8981_v49 = vmul.f32 -1.442695, %v4873_v3  ;;  %v8982_v32 = vmul.f32 -1.442695, %v4874_v48 }
 0x9b6   : > { %v10376_v29 = vpop.eup %10375  ;;  %v4923_v30 = vadd.f32 1.0, %v10374_v7 }
 0x9b7   : > { %v10378_v8 = vpop.eup %10377  ;;  %v4924_v38 = vadd.f32 1.0, %v10376_v29 }
 0x9b8   : > { %v10380_v47 = vpop.eup %10379  ;;  %v4925_v41 = vadd.f32 1.0, %v10378_v8  ;;  %10395 = vrcp.f32 %v4923_v30 }
 0x9b9   : > { %v10382_v5 = vpop.eup %10381  ;;  %v4926_v34 = vadd.f32 1.0, %v10380_v47  ;;  %10397 = vrcp.f32 %v4924_v38 }
 0x9ba   : > { %v10384_v35 = vpop.eup %10383  ;;  %v4927_v2 = vadd.f32 1.0, %v10382_v5  ;;  %10399 = vrcp.f32 %v4925_v41 }
 0x9bb   : > { %v10386_v19 = vpop.eup %10385  ;;  %v4928_v60 = vadd.f32 1.0, %v10384_v35  ;;  %10401 = vrcp.f32 %v4926_v34 }
 0x9bc   : > { %v10388_v28 = vpop.eup %10387  ;;  %v4929_v26 = vadd.f32 1.0, %v10386_v19  ;;  %10403 = vrcp.f32 %v4927_v2 }
 0x9bd   : > { %v4930_v21 = vadd.f32 1.0, %v10388_v28  ;;  %10405 = vrcp.f32 %v4928_v60  ;;  %v10390_v55 = vpop.eup %10389 }
 0x9be   : > { %10407 = vrcp.f32 %v4929_v26  ;;  %v10392_v50 = vpop.eup %10391  ;;  %v4931_v59 = vadd.f32 1.0, %v10390_v55 }
 0x9bf   : > { %10409 = vrcp.f32 %v4930_v21  ;;  %v10394_v37 = vpop.eup %10393  ;;  %v4932_v4 = vadd.f32 1.0, %v10392_v50 }
 0x9c0   : > { %10411 = vpow2.f32 %v8978_v10  ;;  %v4933_v52 = vadd.f32 1.0, %v10394_v37 }
 0x9c1   : > { %10413 = vpow2.f32 %v8979_v0 }
 0x9c2   : > { %v12959_v15 = vpop.eup %10395  ;;  %10415 = vpow2.f32 %v8980_v46 }
 0x9c3   : > { %v12961_v31 = vpop.eup %10397  ;;  %10417 = vpow2.f32 %v8981_v49 }
 0x9c4   : > { %v12963_v53 = vpop.eup %10399  ;;  %10419 = vpow2.f32 %v8982_v32  ;;  %v5003_v45 = vcombine.low %v12959_v15, %v12961_v31 }
 0x9c5   : > { %v12967_v56 = vpop.eup %10401  ;;  %10421 = vrcp.f32 %v4932_v4 }
 0x9c6   : > { %v12969_v14 = vpop.eup %10403  ;;  %v5004_v20 = vcombine.low %v12963_v53, %v12967_v56  ;;  %v5013_v12 = vrot.slane %v5003_v45, %v11271_v36  ;;  %10423 = vrcp.f32 %v4931_v59  ;;  %v5656_v59 = vld [vmem:[%s14358_s3 + $0x50] sm:$0xff] }
 0x9c7   : > { %v12973_v43 = vpop.eup %10405  ;;  %10425 = vrcp.f32 %v4933_v52 }
 0x9c8   : > { %v12975_v63 = vpop.eup %10407  ;;  %v5005_v33 = vcombine.low %v12969_v14, %v12973_v43  ;;  %v5020_v61 = vrot.slane %v5004_v20, %v11271_v36  ;;  %v5654_v20 = vld [vmem:[%s14358_s3 + $0x40] sm:$0xff] }
 0x9c9   : > { %v12981_v44 = vpop.eup %10409  ;;  %v13027_v52 = vpack.c.bf16 %v5656_v59, %v5654_v20 }
 0x9ca   : > { %v10412_v57 = vpop.eup %10411  ;;  %v5006_v6 = vcombine.low %v12975_v63, %v12981_v44  ;;  %v5035_v9 = vcombine.high %v5013_v12, %v5020_v61  ;;  %v5027_v1 = vrot.slane %v5005_v33, %v11271_v36  ;;  %v5659_v33 = vld [vmem:[%s14358_s3 + $0x68] sm:$0xff]  ;;  %v5661_v12 = vld [vmem:[%s14358_s3 + $0x78] sm:$0xff] }
 0x9cb   : > { %v10414_v7 = vpop.eup %10413  ;;  %v4934_v58 = vadd.f32 1.0, %v10412_v57  ;;  %9870 = vmatpush1.bf16.msra.mxu0 %v13027_v52  ;;  %v13036_v61 = vpack.c.bf16 %v5661_v12, %v5659_v33  ;;  %v5658_v57 = vld [vmem:[%s14358_s3 + $0x60] sm:$0xff] }
 0x9cc   : > { %v10416_v29 = vpop.eup %10415  ;;  %v4935_v30 = vadd.f32 1.0, %v10414_v7  ;;  %v5034_v8 = vrot.slane %v5006_v6, %v11271_v36  ;;  %v5043_v62 = vrot.slane %v5035_v9, %v11271_v36  ;;  %v5660_v6 = vld [vmem:[%s14358_s3 + $0x70] sm:$0xff]  ;;  %v5663_v7 = vld [vmem:[%s14358_s3 + $0x88] sm:$0xff] }
 0x9cd   : > { %v10418_v38 = vpop.eup %10417  ;;  %v4936_v24 = vadd.f32 1.0, %v10416_v29  ;;  %10427 = vrcp.f32 %v4934_v58  ;;  %v13044_v9 = vpack.c.bf16 %v5660_v6, %v5658_v57  ;;  %9872 = vmatprep.subr.bf16.mxu0 %v13036_v61  ;;  %v5665_v58 = vld [vmem:[%s14358_s3 + $0x98] sm:$0xff] }
 0x9ce   : > { %v10420_v18 = vpop.eup %10419  ;;  %v4937_v47 = vadd.f32 1.0, %v10418_v38  ;;  %10429 = vrcp.f32 %v4935_v30  ;;  %v5036_v41 = vcombine.high %v5027_v1, %v5034_v8  ;;  %v13054_v29 = vpack.c.bf16 %v5665_v58, %v5663_v7  ;;  %v5662_v30 = vld [vmem:[%s14358_s3 + $0x80] sm:$0xff]  ;;  %v5664_v1 = vld [vmem:[%s14358_s3 + $0x90] sm:$0xff]  ;;  %v5667_v38 = vld [vmem:[%s14358_s3 + $0xa8] sm:$0xff] }
 0x9cf   : > { %v4938_v27 = vadd.f32 1.0, %v10420_v18  ;;  %10431 = vrcp.f32 %v4936_v24  ;;  %v12989_v34 = vpop.eup %10421  ;;  %9874 = vmatpush1.bf16.msra.mxu0 %v13044_v9  ;;  %v13062_v8 = vpack.c.bf16 %v5664_v1, %v5662_v30  ;;  %v5669_v24 = vld [vmem:[%s14358_s3 + $0xb8] sm:$0xff] }
 0x9d0   : > { %10433 = vrcp.f32 %v4937_v47  ;;  %v5050_v42 = vrot.slane %v5036_v41, %v11271_v36  ;;  %v12992_v17 = vpop.eup %10423  ;;  %9876 = vmatprep.subr.bf16.mxu0 %v13054_v29  ;;  %v13072_v18 = vpack.c.bf16 %v5669_v24, %v5667_v38  ;;  %v5666_v47 = vld [vmem:[%s14358_s3 + $0xa0] sm:$0xff]  ;;  %v5668_v41 = vld [vmem:[%s14358_s3 + $0xb0] sm:$0xff] }
 0x9d1   : > { %10435 = vrcp.f32 %v4938_v27  ;;  %v12994_v35 = vpop.eup %10425  ;;  %v5052_v2 = vcombine.low %v12992_v17, %v12989_v34  ;;  %v5671_v27 = vld [vmem:[%s14358_s3 + $0xc8] sm:$0xff] }
 0x9d2   : > { %v5051_v5 = vcombine.low %v5043_v62, %v5050_v42  ;;  %v13080_v62 = vpack.c.bf16 %v5668_v41, %v5666_v47  ;;  %v5673_v42 = vld [vmem:[%s14358_s3 + $0xd8] sm:$0xff]  ;;  %v4986_v47 = vld [vmem:[%s10948_s10 + $0x17c] ss:$0 sm:$0xff] }
 0x9d3   : > { %v5062_v48 = vrot.slane %v5052_v2, %v11271_v36  ;;  %9878 = vmatpush1.bf16.msra.mxu0 %v13062_v8  ;;  %v5672_v2 = vld [vmem:[%s14358_s3 + $0xd0] sm:$0xff] }
 0x9d4   : > { %v5103_v25 = vmul.f32 %v5051_v5, %v12863_v23  ;;  %14474 = vst [vmem:[#allocation27_spill] sm:$0xff] %v13080_v62  ;;  %9880 = vmatprep.subr.bf16.mxu0 %v13072_v18  ;;  %v13090_v5 = vpack.c.bf16 %v5673_v42, %v5671_v27  ;;  %v4985_v27 = vld [vmem:[%s10948_s10 + $0x164] ss:$0 sm:$0xff] }
 0x9d6   : > { %9431 = vmatprep.mubr.f32.mxu1 %v5103_v25  ;;  %14475 = vst [vmem:[#allocation28_spill] sm:$0xff] %v13090_v5  ;;  %v5670_v25 = vld [vmem:[%s14358_s3 + $0xc0] sm:$0xff] }
 0x9d7   : > { %v12998_v39 = vpop.eup %10427  ;;  %9882 = vmatpush1.bf16.msra.mxu0 %v13080_v62 }
 0x9d8   : > { %v13000_v19 = vpop.eup %10429  ;;  %v5053_v60 = vcombine.low %v12994_v35, %v12998_v39  ;;  %9884 = vmatprep.subr.bf16.mxu0 %v13090_v5 }
 0x9d9   : > { %v13004_v3 = vpop.eup %10431 }
 0x9da   : > { %v13006_v28 = vpop.eup %10433  ;;  %v5054_v26 = vcombine.low %v13000_v19, %v13004_v3  ;;  %v5069_v10 = vrot.slane %v5053_v60, %v11271_v36  ;;  %v13098_v60 = vpack.c.bf16 %v5672_v2, %v5670_v25 }
 0x9db   : > { %v13012_v21 = vpop.eup %10435 }
 0x9dc   : > { %v5055_v0 = vcombine.low %v13006_v28, %v13012_v21  ;;  %v5084_v46 = vcombine.high %v5062_v48, %v5069_v10  ;;  %v5076_v55 = vrot.slane %v5054_v26, %v11271_v36  ;;  %14476 = vst [vmem:[#allocation29_spill] sm:$0xff] %v13098_v60  ;;  %9886 = vmatpush1.bf16.msra.mxu0 %v13098_v60  ;;  %v5675_v26 = vld [vmem:[%s14358_s3 + $0xe8] sm:$0xff]  ;;  %v5677_v48 = vld [vmem:[%s14358_s3 + $0xf8] sm:$0xff] }
 0x9dd   : > { %v13108_v10 = vpack.c.bf16 %v5677_v48, %v5675_v26 }
 0x9de   : > { %v5083_v49 = vrot.slane %v5055_v0, %v11271_v36  ;;  %v5092_v32 = vrot.slane %v5084_v46, %v11271_v36  ;;  %v5674_v0 = vld [vmem:[%s14358_s3 + $0xe0] sm:$0xff]  ;;  %v5676_v46 = vld [vmem:[%s14358_s3 + $0xf0] sm:$0xff] }
 0x9df   : > { %14477 = vst [vmem:[#allocation30_spill] sm:$0xff] %v13108_v10  ;;  %9888 = vmatprep.subr.bf16.mxu0 %v13108_v10 }
 0x9e0   : > { %v5085_v50 = vcombine.high %v5076_v55, %v5083_v49  ;;  %v13116_v55 = vpack.c.bf16 %v5676_v46, %v5674_v0  ;;  %v5268_v49 = vpop.permute.xlu0 %5267 }
 0x9e1   : > { %v13139_v41 = vmul.f32 %v12961_v31, %v5268_v49  ;;  %v4979_v49 = vld [vmem:[%s10948_s10 + $0xd4] ss:$0 sm:$0xff] }
 0x9e2   : > { %v5099_v37 = vrot.slane %v5085_v50, %v11271_v36  ;;  %14478 = vst [vmem:[#allocation31_spill] sm:$0xff] %v13116_v55  ;;  %9890 = vmatpush1.bf16.msra.mxu0 %v13116_v55  ;;  %v5273_v50 = vpop.permute.xlu1 %5272 }
 0x9e3   : > { %9924 = vmatprep.subr.bf16.mxu0 %v12895_v11  ;;  %v13142_v42 = vmul.f32 %v12963_v53, %v5273_v50  ;;  %v4980_v53 = vld [vmem:[%s10948_s10 + $0xec] ss:$0 sm:$0xff]  ;;  %v4981_v50 = vld [vmem:[%s10948_s10 + $0x104] ss:$0 sm:$0xff] }
 0x9e4   : > { %v5100_v45 = vcombine.low %v5092_v32, %v5099_v37  ;;  %v5263_v32 = vpop.permute.xlu0 %5262 }
 0x9e5   : > { %v13136_v46 = vmul.f32 %v12959_v15, %v5263_v32 }
 0x9e6   : > { %v5104_v4 = vmul.f32 %v5100_v45, %v12813_v54  ;;  %v5278_v37 = vpop.permute.xlu1 %5277 }
 0x9e7   : > { %v13145_v25 = vmul.f32 %v12967_v56, %v5278_v37 }
 0x9e8   : > { %9432 = vmatmul.mubr.f32.vlgmr.msra.gmra.mrb[8].mxu1 %v5104_v4  ;;  %v5283_v45 = vpop.permute.xlu0 %5282 }
 0x9e9   : > { %v13148_v26 = vmul.f32 %v12969_v14, %v5283_v45 }
 0x9ea   : > { %v5288_v4 = vpop.permute.xlu1 %5287 }
 0x9eb   : > { %v13151_v0 = vmul.f32 %v12973_v43, %v5288_v4  ;;  %v4983_v4 = vld [vmem:[%s10948_s10 + $0x134] ss:$0 sm:$0xff] }
 0x9ec   : > { %v5308_v20 = vpop.permute.xlu0 %5307 }
 0x9ed   : > { %v5349_v14 = vmul.f32 %v12989_v34, %v5308_v20 }
 0x9ee   : > { %v5293_v59 = vpop.permute.xlu1 %5292 }
 0x9ef   : > { %v13154_v15 = vmul.f32 %v12975_v63, %v5293_v59  ;;  %v4982_v63 = vld [vmem:[%s10948_s10 + $0x11c] ss:$0 sm:$0xff]  ;;  %v4984_v59 = vld [vmem:[%s10948_s10 + $0x14c] ss:$0 sm:$0xff] }
 0x9f0   : > { %v5313_v33 = vpop.permute.xlu0 %5312 }
 0x9f1   : > { %v5350_v43 = vmul.f32 %v12994_v35, %v5313_v33 }
 0x9f2   : > { %v5298_v12 = vpop.permute.xlu1 %5297 }
 0x9f3   : > { %v13157_v31 = vmul.f32 %v12981_v44, %v5298_v12 }
 0x9f4   : > { %v5303_v57 = vpop.permute.xlu0 %5302 }
 0x9f5   : > { %v5348_v37 = vmul.f32 %v12992_v17, %v5303_v57 }
 0x9f6   : > { %v5318_v6 = vpop.permute.xlu1 %5317 }
 0x9f7   : > { %v5351_v45 = vmul.f32 %v12998_v39, %v5318_v6 }
 0x9f8   : > { %v5323_v7 = vpop.permute.xlu0 %5322 }
 0x9f9   : > { %v5352_v44 = vmul.f32 %v13000_v19, %v5323_v7 }
 0x9fa   : > { %v5328_v58 = vpop.permute.xlu1 %5327 }
 0x9fb   : > { %v5353_v12 = vmul.f32 %v13004_v3, %v5328_v58 }
 0x9fc   : > { %v5333_v56 = vpop.permute.xlu0 %5332 }
 0x9fd   : > { %v5354_v48 = vmul.f32 %v13006_v28, %v5333_v56 }
 0x9fe   : > { %v5338_v32 = vpop.permute.xlu1 %5337 }
 0x9ff   : > { %v5355_v2 = vmul.f32 %v13012_v21, %v5338_v32 }
 0xabb   : > { %v9433_v17 = vpop.f32.mrb[8].mxu1 }
 0xabc   : > { %v5205_v57 = vrot.slane %v9433_v17, 1  ;;  %v5206_v34 = vrot.slane %v9433_v17, 2  ;;  %v5207_v20 = vrot.slane %v9433_v17, 3  ;;  %v5208_v35 = vrot.slane %v9433_v17, 4  ;;  %v13175_v33 = vpop.f32.mrb[9].mxu1 }
 0xabd   : > { %v5209_v39 = vrot.slane %v9433_v17, 5  ;;  %v5210_v6 = vrot.slane %v9433_v17, 6  ;;  %v5211_v24 = vrot.slane %v9433_v17, 7  ;;  %v5236_v38 = vadd.f32 %v9433_v17, %v4979_v49 }
 0xabe   : > { %v5237_v19 = vadd.f32 %v5205_v57, %v4980_v53  ;;  %v5238_v7 = vadd.f32 %v5206_v34, %v4981_v50  ;;  %v5239_v3 = vadd.f32 %v5207_v20, %v4982_v63  ;;  %v5240_v58 = vadd.f32 %v5208_v35, %v4983_v4 }
 0xabf   : > { %v5241_v28 = vadd.f32 %v5209_v39, %v4984_v59  ;;  %v5242_v56 = vadd.f32 %v5210_v6, %v4985_v27  ;;  %v5243_v21 = vadd.f32 %v5211_v24, %v4986_v47  ;;  %v5252_v32 = vmax.f32 %v5236_v38, 0.0 }
 0xac0   : > { %v5253_v11 = vmax.f32 %v5237_v19, 0.0  ;;  %v5254_v1 = vmax.f32 %v5238_v7, 0.0  ;;  %v5255_v30 = vmax.f32 %v5239_v3, 0.0  ;;  %v5256_v55 = vmax.f32 %v5240_v58, 0.0  ;;  %v4972_v3 = vld [vmem:[%s10948_s10 + $0x2c] ss:$0 sm:$0xff] }
 0xac1   : > { %v5257_v10 = vmax.f32 %v5241_v28, 0.0  ;;  %v5258_v60 = vmax.f32 %v5242_v56, 0.0  ;;  %v5259_v5 = vmax.f32 %v5243_v21, 0.0  ;;  %v5394_v62 = vsub.f32 %v5252_v32, %v12813_v54  ;;  %v4974_v58 = vld [vmem:[%s10948_s10 + $0x5c] ss:$0 sm:$0xff] }
 0xac2   : > { %v14479_v49 = vrot.slane %v12813_v54, 1  ;;  %v14480_v50 = vrot.slane %v12813_v54, 2  ;;  %v14481_v24 = vrot.slane %v12813_v54, 3  ;;  %v14482_v47 = vrot.slane %v12813_v54, 4  ;;  %v4976_v56 = vld [vmem:[%s10948_s10 + $0x8c] ss:$0 sm:$0xff] }
 0xac3   : > { %v14483_v4 = vrot.slane %v12813_v54, 5  ;;  %v14484_v17 = vrot.slane %v12813_v54, 6  ;;  %v5410_v20 = vmul.f32 %v5394_v62, %v5348_v37  ;;  %v5200_v21 = vrot.slane %v13175_v33, 3 }
 0xac4   : > { %v5395_v53 = vsub.f32 %v5253_v11, %v14479_v49  ;;  %v5396_v63 = vsub.f32 %v5254_v1, %v14480_v50  ;;  %v5397_v38 = vsub.f32 %v5255_v30, %v14481_v24  ;;  %v5398_v27 = vsub.f32 %v5256_v55, %v14482_v47  ;;  %v4971_v30 = vld [vmem:[%s10948_s10 + $0x14] ss:$0 sm:$0xff]  ;;  %v4978_v50 = vld [vmem:[%s10948_s10 + $0xbc] ss:$0 sm:$0xff] }
 0xac5   : > { %v5399_v59 = vsub.f32 %v5257_v10, %v14483_v4  ;;  %v5400_v57 = vsub.f32 %v5258_v60, %v14484_v17  ;;  %v14485_v11 = vrot.slane %v12813_v54, 7  ;;  %v4973_v10 = vld [vmem:[%s10948_s10 + $0x44] ss:$0 sm:$0xff]  ;;  %v5198_v60 = vrot.slane %v13175_v33, 1 }
 0xac6   : > { %v5411_v35 = vmul.f32 %v5395_v53, %v5349_v14  ;;  %v5412_v1 = vmul.f32 %v5396_v63, %v5350_v43  ;;  %v5413_v39 = vmul.f32 %v5397_v38, %v5351_v45  ;;  %v5414_v6 = vmul.f32 %v5398_v27, %v5352_v44  ;;  %v4975_v14 = vld [vmem:[%s10948_s10 + $0x74] ss:$0 sm:$0xff] }
 0xac7   : > { %v5401_v34 = vsub.f32 %v5259_v5, %v14485_v11  ;;  %v5415_v19 = vmul.f32 %v5399_v59, %v5353_v12  ;;  %v5416_v7 = vmul.f32 %v5400_v57, %v5354_v48  ;;  %v5199_v12 = vrot.slane %v13175_v33, 2  ;;  %v4977_v48 = vld [vmem:[%s10948_s10 + $0xa4] ss:$0 sm:$0xff] }
 0xac8   : > { %v5448_v28 = vrot.slane %v5411_v35, 7  ;;  %v5450_v5 = vrot.slane %v5412_v1, 6  ;;  %v5452_v62 = vrot.slane %v5413_v39, 5  ;;  %v5454_v37 = vrot.slane %v5414_v6, 4 }
 0xac9   : > { %v5417_v55 = vmul.f32 %v5401_v34, %v5355_v2  ;;  %v5456_v43 = vrot.slane %v5415_v19, 3  ;;  %v5458_v45 = vrot.slane %v5416_v7, 2  ;;  %v5201_v32 = vrot.slane %v13175_v33, 4 }
 0xaca   : > { %v5449_v2 = vsel %vm1364_vm0, %v5448_v28, %v5410_v20  ;;  %v5202_v49 = vrot.slane %v13175_v33, 5  ;;  %v5203_v63 = vrot.slane %v13175_v33, 6  ;;  %v5204_v24 = vrot.slane %v13175_v33, 7 }
 0xacb   : > { %v5460_v44 = vrot.slane %v5417_v55, 1  ;;  %v5451_v53 = vsel %vm1367_vm1, %v5450_v5, %v5449_v2  ;;  %v5228_v38 = vadd.f32 %v13175_v33, %v4971_v30  ;;  %v5229_v27 = vadd.f32 %v5198_v60, %v4972_v3 }
 0xacc   : > { %v5453_v47 = vsel %vm1370_vm2, %v5452_v62, %v5451_v53  ;;  %v5230_v4 = vadd.f32 %v5199_v12, %v4973_v10  ;;  %v5231_v59 = vadd.f32 %v5200_v21, %v4974_v58  ;;  %v5232_v57 = vadd.f32 %v5201_v32, %v4975_v14 }
 0xacd   : > { %v5455_v17 = vsel %vm1373_vm3, %v5454_v37, %v5453_v47  ;;  %v5233_v11 = vadd.f32 %v5202_v49, %v4976_v56  ;;  %v5234_v34 = vadd.f32 %v5203_v63, %v4977_v48  ;;  %v5235_v35 = vadd.f32 %v5204_v24, %v4978_v50 }
 0xace   : > { %v5457_v20 = vsel %vm1376_vm4, %v5456_v43, %v5455_v17  ;;  %v5244_v1 = vmax.f32 %v5228_v38, 0.0  ;;  %v5245_v39 = vmax.f32 %v5229_v27, 0.0  ;;  %v5246_v19 = vmax.f32 %v5230_v4, 0.0 }
 0xacf   : > { %v5459_v6 = vsel %vm1379_vm5, %v5458_v45, %v5457_v20  ;;  %v5247_v7 = vmax.f32 %v5231_v59, 0.0  ;;  %v5248_v33 = vmax.f32 %v5232_v57, 0.0  ;;  %v5249_v55 = vmax.f32 %v5233_v11, 0.0 }
 0xad0   : > { %v5461_v30 = vsel %vm1382_vm6, %v5460_v44, %v5459_v6  ;;  %v5250_v3 = vmax.f32 %v5234_v34, 0.0  ;;  %v5251_v10 = vmax.f32 %v5235_v35, 0.0  ;;  %v5386_v60 = vsub.f32 %v5244_v1, %v12863_v23 }
 0xad1   : > { %v13216_v58 = vadd.f32 %v5461_v30, %v12813_v54  ;;  %v14486_v28 = vrot.slane %v12863_v23, 1  ;;  %v14487_v62 = vrot.slane %v12863_v23, 2  ;;  %v14488_v14 = vrot.slane %v12863_v23, 3 }
 0xad2   : > { %v14489_v45 = vrot.slane %v12863_v23, 4  ;;  %v14490_v56 = vrot.slane %v12863_v23, 5  ;;  %v14491_v54 = vrot.slane %v12863_v23, 6  ;;  %v14492_v32 = vrot.slane %v12863_v23, 7 }
 0xad3   : > { %v5387_v5 = vsub.f32 %v5245_v39, %v14486_v28  ;;  %v5388_v37 = vsub.f32 %v5246_v19, %v14487_v62  ;;  %v5389_v43 = vsub.f32 %v5247_v7, %v14488_v14  ;;  %v5517_v48 = vcombine.high %v13216_v58, %v13216_v58 }
 0xad4   : > { %v5390_v44 = vsub.f32 %v5248_v33, %v14489_v45  ;;  %v5391_v12 = vsub.f32 %v5249_v55, %v14490_v56  ;;  %v5392_v2 = vsub.f32 %v5250_v3, %v14491_v54  ;;  %v5524_v21 = vrot.slane %v13216_v58, %v11271_v36  ;;  %v14494_v54 = vld [vmem:[#allocation28_spill] sm:$0xff] }
 0xad5   : > { %v5393_v49 = vsub.f32 %v5251_v10, %v14492_v32  ;;  %v5402_v53 = vmul.f32 %v5386_v60, %v13136_v46  ;;  %v5403_v50 = vmul.f32 %v5387_v5, %v13139_v41  ;;  %v5404_v63 = vmul.f32 %v5388_v37, %v13142_v42  ;;  %v6126_v32 = vld [vmem:[%s14359_s4 + $0x28] sm:$0xff] }
 0xad6   : > { %v5405_v24 = vmul.f32 %v5389_v43, %v13145_v25  ;;  %v5406_v38 = vmul.f32 %v5390_v44, %v13148_v26  ;;  %v5531_v47 = vrot.slane %v5517_v48, %v11271_v36  ;;  %v5532_v27 = vcombine.high %v5524_v21, %v5524_v21  ;;  %8987 = vst.sshfl [vmem:[%s10952_s12 + $0x44] sm:$0x1 pattern:$0x73625140] %v5524_v21 }
 0xad7   : > { %v5540_v4 = vrot.slane %v5524_v21, %v11271_v36  ;;  %v5407_v59 = vmul.f32 %v5391_v12, %v13151_v0  ;;  %v5408_v46 = vmul.f32 %v5392_v2, %v13154_v15  ;;  %v5409_v41 = vmul.f32 %v5393_v49, %v13157_v31  ;;  %v14496_v2 = vld [vmem:[#allocation30_spill] sm:$0xff] }
 0xad8   : > { %v5434_v42 = vrot.slane %v5403_v50, 7  ;;  %v5436_v17 = vrot.slane %v5404_v63, 6  ;;  %v5533_v25 = vcombine.high %v5531_v47, %v5531_v47  ;;  %v5547_v57 = vrot.slane %v5531_v47, %v11271_v36  ;;  %8988 = vst.sshfl [vmem:[%s10952_s12 + $0x4c] sm:$0x1 pattern:$0x73625140] %v5532_v27 }
 0xad9   : > { %v5554_v26 = vrot.slane %v5532_v27, %v11271_v36  ;;  %v5562_v11 = vcombine.high %v5540_v4, %v5540_v4  ;;  %8989 = vst.sshfl [vmem:[%s10952_s12 + $0x64] sm:$0x1 pattern:$0x73625140] %v5531_v47  ;;  %v5438_v34 = vrot.slane %v5405_v24, 5  ;;  %v5440_v15 = vrot.slane %v5406_v38, 4 }
 0xada   : > { %v5435_v0 = vsel %vm1364_vm0, %v5434_v42, %v5402_v53  ;;  %v5561_v31 = vrot.slane %v5533_v25, %v11271_v36  ;;  %v5563_v20 = vcombine.high %v5547_v57, %v5547_v57  ;;  %8990 = vst.sshfl [vmem:[%s10952_s12 + $0x6c] sm:$0x1 pattern:$0x73625140] %v5533_v25  ;;  %v5442_v6 = vrot.slane %v5407_v59, 3  ;;  %v6125_v21 = vld [vmem:[%s14359_s4 + $0x20] sm:$0xff] }
 0xadb   : > { %v5564_v35 = vcombine.high %v5554_v26, %v5554_v26  ;;  %5592 = vst [vmem:[%s10952_s12 + $0x54] sm:$0x1] %v5562_v11  ;;  %v5437_v1 = vsel %vm1367_vm1, %v5436_v17, %v5435_v0  ;;  %v5444_v33 = vrot.slane %v5408_v46, 2  ;;  %v5446_v55 = vrot.slane %v5409_v41, 1  ;;  %v6127_v53 = vld [vmem:[%s14359_s4 + $0x30] sm:$0xff]  ;;  %v6128_v50 = vld [vmem:[%s14359_s4 + $0x38] sm:$0xff] }
 0xadc   : > { %v5439_v39 = vsel %vm1370_vm2, %v5438_v34, %v5437_v1  ;;  %v5565_v19 = vcombine.high %v5561_v31, %v5561_v31  ;;  %5596 = vst [vmem:[%s10952_s12 + $0x74] sm:$0x1] %v5563_v20  ;;  %v13330_v49 = vpack.c.bf16 %v6126_v32, %v6125_v21  ;;  %v13340_v63 = vpack.c.bf16 %v6128_v50, %v6127_v53  ;;  %v6129_v24 = vld [vmem:[%s14359_s4 + $0x40] sm:$0xff]  ;;  %v6130_v38 = vld [vmem:[%s14359_s4 + $0x48] sm:$0xff]  ;;  %v6131_v27 = vld [vmem:[%s14359_s4 + $0x50] sm:$0xff] }
 0xadd   : > { %5593 = vst [vmem:[%s10952_s12 + $0x5c] sm:$0x1] %v5564_v35  ;;  %v5441_v7 = vsel %vm1373_vm3, %v5440_v15, %v5439_v39  ;;  %v13350_v47 = vpack.c.bf16 %v6130_v38, %v6129_v24  ;;  %v6132_v4 = vld [vmem:[%s14359_s4 + $0x58] sm:$0xff]  ;;  %v6133_v46 = vld [vmem:[%s14359_s4 + $0x60] sm:$0xff]  ;;  %v6134_v41 = vld [vmem:[%s14359_s4 + $0x68] sm:$0xff] }
 0xade   : > { %v5443_v30 = vsel %vm1376_vm4, %v5442_v6, %v5441_v7  ;;  %5597 = vst [vmem:[%s10952_s12 + $0x7c] sm:$0x1] %v5565_v19  ;;  %v13360_v59 = vpack.c.bf16 %v6132_v4, %v6131_v27  ;;  %v6135_v42 = vld [vmem:[%s14359_s4 + $0x70] sm:$0xff]  ;;  %v13372_v17 = vpack.c.bf16 %v6134_v41, %v6133_v46  ;;  %v6136_v25 = vld [vmem:[%s14359_s4 + $0x78] sm:$0xff] }
 0xadf   : > { %v5445_v3 = vsel %vm1379_vm5, %v5444_v33, %v5443_v30  ;;  %v13379_v57 = vpack.c.bf16 %v6136_v25, %v6135_v42  ;;  %v8991_v1 = vld [vmem:[%s10948_s10 + $0x5] ss:$8 sm:$0x3]  ;;  %v9001_v25 = vld [vmem:[%s10948_s10 + $0xf5] ss:$8 sm:$0x3] }
 0xae0   : > { %v5447_v10 = vsel %vm1382_vm6, %v5446_v55, %v5445_v3  ;;  %v8995_v39 = vld [vmem:[%s10948_s10 + $0x65] ss:$8 sm:$0x3]  ;;  %v8993_v55 = vld [vmem:[%s10948_s10 + $0x35] ss:$8 sm:$0x3] }
 0xae1   : > { %v13266_v60 = vadd.f32 %v5447_v10, %v12863_v23  ;;  %v8992_v30 = vld [vmem:[%s10948_s10 + $0x1d] ss:$8 sm:$0x3] }
 0xae2   : > { %v8999_v32 = vld [vmem:[%s10948_s10 + $0xc5] ss:$8 sm:$0x3] }
 0xae3   : > { %v5468_v28 = vcombine.high %v13266_v60, %v13266_v60  ;;  %v5475_v5 = vrot.slane %v13266_v60, %v11271_v36  ;;  %5743 = vmatmul.mubr.f32.vlgmr.msra.gmra.mrb[20].mxu0 %v13266_v60  ;;  %v9000_v4 = vld [vmem:[%s10948_s10 + $0xdd] ss:$8 sm:$0x3] }
 0xae4   : > { %5748 = vmatprep.mubr.f32.mxu0 %v14417_v13  ;;  %9926 = vmatpush1.bf16.msra.mxu0 %v12906_v40 }
 0xae5   : > { %v5482_v62 = vrot.slane %v5468_v28, %v11271_v36  ;;  %v5483_v37 = vcombine.high %v5475_v5, %v5475_v5  ;;  %v5491_v23 = vrot.slane %v5475_v5, %v11271_v36  ;;  %8983 = vst.sshfl [vmem:[%s10952_s12 + $0x4] sm:$0x1 pattern:$0x73625140] %v5475_v5  ;;  %9928 = vmatprep.subr.bf16.mxu0 %v12908_v51 }
 0xae6   : > { %v8996_v28 = vld [vmem:[%s10948_s10 + $0x7d] ss:$8 sm:$0x3] }
 0xae7   : > { %v5484_v14 = vcombine.high %v5482_v62, %v5482_v62  ;;  %v5498_v43 = vrot.slane %v5482_v62, %v11271_v36  ;;  %v5505_v45 = vrot.slane %v5483_v37, %v11271_v36  ;;  %v5513_v44 = vcombine.high %v5491_v23, %v5491_v23  ;;  %8984 = vst.sshfl [vmem:[%s10952_s12 + $0xc] sm:$0x1 pattern:$0x73625140] %v5483_v37 }
 0xae8   : > { %8985 = vst.sshfl [vmem:[%s10952_s12 + $0x24] sm:$0x1 pattern:$0x73625140] %v5482_v62  ;;  %5749 = vmatmul.mubr.f32.gmra.mrb[22].mxu0 %v13216_v58 }
 0xae9   : > { %9930 = vmatpush1.bf16.msra.mxu0 %v12924_v22  ;;  %6758 = vmatprep.mubr.f32.mxu0 %v14417_v13  ;;  %v5512_v40 = vrot.slane %v5484_v14, %v11271_v36  ;;  %v5514_v51 = vcombine.high %v5498_v43, %v5498_v43  ;;  %v5515_v56 = vcombine.high %v5505_v45, %v5505_v45  ;;  %v14493_v22 = vld [vmem:[#allocation27_spill] sm:$0xff]  ;;  %v8994_v43 = vld [vmem:[%s10948_s10 + $0x4d] ss:$8 sm:$0x3] }
 0xaea   : > { %5584 = vst [vmem:[%s10952_s12 + $0x14] sm:$0x1] %v5513_v44  ;;  %8986 = vst.sshfl [vmem:[%s10952_s12 + $0x2c] sm:$0x1 pattern:$0x73625140] %v5484_v14  ;;  %9932 = vmatprep.subr.bf16.mxu0 %v12927_v16 }
 0xaeb   : > { %v5516_v12 = vcombine.high %v5512_v40, %v5512_v40  ;;  %5585 = vst [vmem:[%s10952_s12 + $0x1c] sm:$0x1] %v5515_v56  ;;  %5588 = vst [vmem:[%s10952_s12 + $0x34] sm:$0x1] %v5514_v51  ;;  %v14495_v16 = vld [vmem:[#allocation29_spill] sm:$0xff] }
 0xaec   : > { %v8997_v5 = vld [vmem:[%s10948_s10 + $0x95] ss:$8 sm:$0x3] }
 0xaed   : > { %9934 = vmatpush1.bf16.msra.mxu0 %v13027_v52  ;;  %5589 = vst [vmem:[%s10952_s12 + $0x3c] sm:$0x1] %v5516_v12  ;;  %v14497_v52 = vld [vmem:[#allocation31_spill] sm:$0xff]  ;;  %v8998_v45 = vld [vmem:[%s10948_s10 + $0xad] ss:$8 sm:$0x3] }
 0xaee   : > { %9936 = vmatprep.subr.bf16.mxu0 %v13036_v61  ;;  %v6121_v61 = vld [vmem:[%s14359_s4] sm:$0xff] }
 0xaf1   : > { %9938 = vmatpush1.bf16.msra.mxu0 %v13044_v9  ;;  %v6122_v9 = vld [vmem:[%s14359_s4 + $0x8] sm:$0xff] }
 0xaf2   : > { %9940 = vmatprep.subr.bf16.mxu0 %v13054_v29  ;;  %v13310_v29 = vpack.c.bf16 %v6122_v9, %v6121_v61 }
 0xaf4   : > { %9892 = vmatprep.subr.bf16.mxu1 %v13310_v29 }
 0xaf5   : > { %9942 = vmatpush1.bf16.msra.mxu0 %v13062_v8  ;;  %9894 = vmatpush3.bf16.msra.mxu1 %v13310_v29  ;;  %v6123_v8 = vld [vmem:[%s14359_s4 + $0x10] sm:$0xff] }
 0xaf6   : > { %9944 = vmatprep.subr.bf16.mxu0 %v13072_v18  ;;  %v6124_v18 = vld [vmem:[%s14359_s4 + $0x18] sm:$0xff] }
 0xaf7   : > { %v13320_v48 = vpack.c.bf16 %v6124_v18, %v6123_v8 }
 0xaf9   : > { %9946 = vmatpush1.bf16.msra.mxu0 %v14493_v22  ;;  %9896 = vmatprep.subr.bf16.mxu1 %v13320_v48 }
 0xafa   : > { %9948 = vmatprep.subr.bf16.mxu0 %v14494_v54  ;;  %9898 = vmatpush3.bf16.msra.mxu1 %v13320_v48 }
 0xafb   : > { %9900 = vmatprep.subr.bf16.mxu1 %v13330_v49 }
 0xafd   : > { %9950 = vmatpush1.bf16.msra.mxu0 %v14495_v16 }
 0xafe   : > { %9952 = vmatprep.subr.bf16.mxu0 %v14496_v2  ;;  %9902 = vmatpush3.bf16.msra.mxu1 %v13330_v49 }
 0xaff   : > { %9904 = vmatprep.subr.bf16.mxu1 %v13340_v63 }
 0xb01   : > { %9954 = vmatpush1.bf16.msra.mxu0 %v14497_v52 }
 0xb02   : > { %9906 = vmatpush3.bf16.msra.mxu1 %v13340_v63 }
 0xb03   : > { %9908 = vmatprep.subr.bf16.mxu1 %v13350_v47 }
 0xb06   : > { %9910 = vmatpush3.bf16.msra.mxu1 %v13350_v47 }
 0xb07   : > { %9912 = vmatprep.subr.bf16.mxu1 %v13360_v59 }
 0xb0a   : > { %9914 = vmatpush3.bf16.msra.mxu1 %v13360_v59 }
 0xb0b   : > { %9916 = vmatprep.subr.bf16.mxu1 %v13372_v17 }
 0xb0e   : > { %9918 = vmatpush3.bf16.msra.mxu1 %v13372_v17 }
 0xb0f   : > { %9920 = vmatprep.subr.bf16.mxu1 %v13379_v57 }
 0xb12   : > { %9922 = vmatpush3.bf16.msra.mxu1 %v13379_v57 }
 0xb13   : > { %9956 = vmatprep.subr.bf16.mxu1 %v13310_v29 }
 0xbb6   : > { %v5744_v26 = vpop.f32.mrb[20].mxu0 }
 0xbb7   : > { %v5746_v11 = vpop.f32.mrb[21].mxu0 }
 0xbb8   : > { %v5759_v0 = vcombine.low %v5744_v26, %v5746_v11  ;;  %v5760_v34 = vcombine.high %v5744_v26, %v5746_v11 }
 0xbba   : > { %v5767_v15 = vrot.slane %v5759_v0, %v11271_v36  ;;  %v5774_v31 = vrot.slane %v5760_v34, %v11271_v36 }
 0xbbb   : > { %v5750_v20 = vpop.f32.mrb[22].mxu0 }
 0xbbc   : > { %v5752_v35 = vpop.f32.mrb[23].mxu0  ;;  %v5775_v6 = vcombine.high %v5767_v15, %v5767_v15  ;;  %v5776_v19 = vcombine.high %v5774_v31, %v5774_v31  ;;  %v5783_v7 = vrot.slane %v5767_v15, %v11271_v36  ;;  %v5790_v33 = vrot.slane %v5774_v31, %v11271_v36 }
 0xbbd   : > { %v5809_v3 = vcombine.low %v5750_v20, %v5752_v35  ;;  %v5810_v10 = vcombine.high %v5750_v20, %v5752_v35 }
 0xbbe   : > { %v5797_v62 = vrot.slane %v5775_v6, %v11271_v36  ;;  %v5804_v37 = vrot.slane %v5776_v19, %v11271_v36  ;;  %v5805_v23 = vcombine.high %v5783_v7, %v5783_v7  ;;  %v5806_v14 = vcombine.high %v5790_v33, %v5790_v33 }
 0xbbf   : > { %v5875_v44 = vadd.f32 %v8991_v1, %v5783_v7  ;;  %v5879_v40 = vadd.f32 %v8995_v39, %v5790_v33  ;;  %v5817_v51 = vrot.slane %v5809_v3, %v11271_v36  ;;  %v5824_v38 = vrot.slane %v5810_v10, %v11271_v36  ;;  %v9002_v7 = vld [vmem:[%s10948_s10 + $0x10d] ss:$8 sm:$0x3] }
 0xbc0   : > { %v5807_v56 = vcombine.high %v5797_v62, %v5797_v62  ;;  %v5808_v12 = vcombine.high %v5804_v37, %v5804_v37  ;;  %v5876_v22 = vadd.f32 %v8992_v30, %v5797_v62  ;;  %v5877_v54 = vadd.f32 %v8993_v55, %v5805_v23  ;;  %v9003_v55 = vld [vmem:[%s10948_s10 + $0x125] ss:$8 sm:$0x3]  ;;  %v9005_v23 = vld [vmem:[%s10948_s10 + $0x155] ss:$8 sm:$0x3] }
 0xbc1   : > { %v5880_v16 = vadd.f32 %v8996_v28, %v5804_v37  ;;  %v5881_v2 = vadd.f32 %v8997_v5, %v5806_v14  ;;  %v9007_v52 = vmul.f32 -1.442695, %v5875_v44  ;;  %v9011_v21 = vmul.f32 -1.442695, %v5879_v40 }
 0xbc2   : > { %v5878_v61 = vadd.f32 %v8994_v43, %v5807_v56  ;;  %v5882_v9 = vadd.f32 %v8998_v45, %v5808_v12  ;;  %v9008_v8 = vmul.f32 -1.442695, %v5876_v22  ;;  %v9009_v18 = vmul.f32 -1.442695, %v5877_v54 }
 0xbc3   : > { %10437 = vpow2.f32 %v9007_v52  ;;  %v5825_v53 = vcombine.high %v5817_v51, %v5817_v51  ;;  %v9012_v24 = vmul.f32 -1.442695, %v5880_v16  ;;  %v9013_v27 = vmul.f32 -1.442695, %v5881_v2 }
 0xbc4   : > { %10439 = vpow2.f32 %v9008_v8  ;;  %v9010_v50 = vmul.f32 -1.442695, %v5878_v61  ;;  %v5833_v46 = vrot.slane %v5817_v51, %v11271_v36  ;;  %v9014_v42 = vmul.f32 -1.442695, %v5882_v9 }
 0xbc5   : > { %10441 = vpow2.f32 %v9009_v18  ;;  %v5847_v41 = vrot.slane %v5825_v53, %v11271_v36  ;;  %v5826_v11 = vcombine.high %v5824_v38, %v5824_v38  ;;  %v5840_v31 = vrot.slane %v5824_v38, %v11271_v36  ;;  %v9004_v28 = vld [vmem:[%s10948_s10 + $0x13d] ss:$8 sm:$0x3]  ;;  %v9006_v40 = vld [vmem:[%s10948_s10 + $0x16d] ss:$8 sm:$0x3] }
 0xbc6   : > { %10443 = vpow2.f32 %v9010_v50  ;;  %v5855_v26 = vcombine.high %v5833_v46, %v5833_v46  ;;  %v5883_v0 = vadd.f32 %v8999_v32, %v5833_v46 }
 0xbc7   : > { %10445 = vpow2.f32 %v9011_v21  ;;  %v5884_v34 = vadd.f32 %v9000_v4, %v5847_v41  ;;  %v5854_v39 = vrot.slane %v5826_v11, %v11271_v36  ;;  %v5857_v6 = vcombine.high %v5847_v41, %v5847_v41 }
 0xbc8   : > { %10447 = vpow2.f32 %v9012_v24  ;;  %v5885_v15 = vadd.f32 %v9001_v25, %v5855_v26  ;;  %v9015_v20 = vmul.f32 -1.442695, %v5883_v0  ;;  %v5856_v5 = vcombine.high %v5840_v31, %v5840_v31 }
 0xbc9   : > { %10449 = vpow2.f32 %v9013_v27  ;;  %v9016_v35 = vmul.f32 -1.442695, %v5884_v34  ;;  %v5858_v14 = vcombine.high %v5854_v39, %v5854_v39  ;;  %v5886_v43 = vadd.f32 %v9002_v7, %v5857_v6 }
 0xbca   : > { %10451 = vpow2.f32 %v9014_v42  ;;  %v9017_v1 = vmul.f32 -1.442695, %v5885_v15  ;;  %v5887_v51 = vadd.f32 %v9003_v55, %v5840_v31  ;;  %v5888_v22 = vadd.f32 %v9004_v28, %v5854_v39 }
 0xbcb   : > { %10453 = vpow2.f32 %v9015_v20  ;;  %v5889_v2 = vadd.f32 %v9005_v23, %v5856_v5  ;;  %v5890_v9 = vadd.f32 %v9006_v40, %v5858_v14  ;;  %v9018_v8 = vmul.f32 -1.442695, %v5886_v43 }
 0xbcc   : > { %10455 = vpow2.f32 %v9016_v35  ;;  %v9019_v21 = vmul.f32 -1.442695, %v5887_v51  ;;  %v9020_v32 = vmul.f32 -1.442695, %v5888_v22 }
 0xbcd   : > { %v10438_v19 = vpop.eup %10437  ;;  %10457 = vpow2.f32 %v9017_v1  ;;  %v9021_v50 = vmul.f32 -1.442695, %v5889_v2  ;;  %v9022_v38 = vmul.f32 -1.442695, %v5890_v9 }
 0xbce   : > { %v10440_v33 = vpop.eup %10439  ;;  %v5939_v30 = vadd.f32 1.0, %v10438_v19 }
 0xbcf   : > { %v10442_v3 = vpop.eup %10441  ;;  %v5940_v10 = vadd.f32 1.0, %v10440_v33 }
 0xbd0   : > { %v10444_v62 = vpop.eup %10443  ;;  %v5941_v37 = vadd.f32 1.0, %v10442_v3  ;;  %10459 = vrcp.f32 %v5939_v30 }
 0xbd1   : > { %v10446_v45 = vpop.eup %10445  ;;  %v5942_v44 = vadd.f32 1.0, %v10444_v62  ;;  %10461 = vrcp.f32 %v5940_v10 }
 0xbd2   : > { %v10448_v56 = vpop.eup %10447  ;;  %v5943_v12 = vadd.f32 1.0, %v10446_v45  ;;  %10463 = vrcp.f32 %v5941_v37 }
 0xbd3   : > { %v10450_v54 = vpop.eup %10449  ;;  %v5944_v16 = vadd.f32 1.0, %v10448_v56  ;;  %10465 = vrcp.f32 %v5942_v44 }
 0xbd4   : > { %v10452_v52 = vpop.eup %10451  ;;  %v5945_v61 = vadd.f32 1.0, %v10450_v54  ;;  %10467 = vrcp.f32 %v5943_v12 }
 0xbd5   : > { %v5946_v18 = vadd.f32 1.0, %v10452_v52  ;;  %10469 = vrcp.f32 %v5944_v16  ;;  %v10454_v53 = vpop.eup %10453 }
 0xbd6   : > { %10471 = vrcp.f32 %v5945_v61  ;;  %v10456_v24 = vpop.eup %10455  ;;  %v5947_v15 = vadd.f32 1.0, %v10454_v53 }
 0xbd7   : > { %10473 = vrcp.f32 %v5946_v18  ;;  %v10458_v27 = vpop.eup %10457  ;;  %v5948_v26 = vadd.f32 1.0, %v10456_v24 }
 0xbd8   : > { %10475 = vpow2.f32 %v9018_v8  ;;  %v5949_v20 = vadd.f32 1.0, %v10458_v27 }
 0xbd9   : > { %10477 = vpow2.f32 %v9019_v21 }
 0xbda   : > { %v13413_v4 = vpop.eup %10459  ;;  %10479 = vpow2.f32 %v9020_v32 }
 0xbdb   : > { %v13415_v46 = vpop.eup %10461  ;;  %10481 = vpow2.f32 %v9021_v50 }
 0xbdc   : > { %v13417_v41 = vpop.eup %10463  ;;  %10483 = vpow2.f32 %v9022_v38  ;;  %v6019_v42 = vcombine.low %v13413_v4, %v13415_v46 }
 0xbdd   : > { %v13421_v25 = vpop.eup %10465  ;;  %10485 = vrcp.f32 %v5948_v26 }
 0xbde   : > { %v13423_v11 = vpop.eup %10467  ;;  %v6020_v0 = vcombine.low %v13417_v41, %v13421_v25  ;;  %v6029_v1 = vrot.slane %v6019_v42, %v11271_v36  ;;  %10487 = vrcp.f32 %v5947_v15 }
 0xbdf   : > { %v13427_v34 = vpop.eup %10469  ;;  %10489 = vrcp.f32 %v5949_v20 }
 0xbe0   : > { %v13429_v31 = vpop.eup %10471  ;;  %v6021_v35 = vcombine.low %v13423_v11, %v13427_v34  ;;  %v6036_v39 = vrot.slane %v6020_v0, %v11271_v36 }
 0xbe1   : > { %v13435_v6 = vpop.eup %10473 }
 0xbe2   : > { %v10476_v19 = vpop.eup %10475  ;;  %v6022_v7 = vcombine.low %v13429_v31, %v13435_v6  ;;  %v6051_v33 = vcombine.high %v6029_v1, %v6036_v39  ;;  %v6043_v28 = vrot.slane %v6021_v35, %v11271_v36 }
 0xbe3   : > { %v10478_v30 = vpop.eup %10477  ;;  %v5950_v55 = vadd.f32 1.0, %v10476_v19 }
 0xbe4   : > { %v10480_v3 = vpop.eup %10479  ;;  %v5951_v10 = vadd.f32 1.0, %v10478_v30  ;;  %v6050_v5 = vrot.slane %v6022_v7, %v11271_v36  ;;  %v6059_v45 = vrot.slane %v6051_v33, %v11271_v36 }
 0xbe5   : > { %v10482_v62 = vpop.eup %10481  ;;  %v5952_v37 = vadd.f32 1.0, %v10480_v3  ;;  %10491 = vrcp.f32 %v5950_v55  ;;  %v6380_v3 = vrot.slane %v13216_v58, 2 }
 0xbe6   : > { %v10484_v23 = vpop.eup %10483  ;;  %v5953_v14 = vadd.f32 1.0, %v10482_v62  ;;  %10493 = vrcp.f32 %v5951_v10  ;;  %v6052_v43 = vcombine.high %v6043_v28, %v6050_v5  ;;  %v6382_v10 = vrot.slane %v13216_v58, 4 }
 0xbe7   : > { %v5954_v44 = vadd.f32 1.0, %v10484_v23  ;;  %10495 = vrcp.f32 %v5952_v37  ;;  %v13443_v56 = vpop.eup %10485  ;;  %v6383_v28 = vrot.slane %v13216_v58, 5  ;;  %v6384_v5 = vrot.slane %v13216_v58, 6 }
 0xbe8   : > { %10497 = vrcp.f32 %v5953_v14  ;;  %v6066_v40 = vrot.slane %v6052_v43, %v11271_v36  ;;  %v13446_v22 = vpop.eup %10487  ;;  %v6385_v62 = vrot.slane %v13216_v58, 7  ;;  %v6372_v37 = vrot.slane %v13266_v60, 1 }
 0xbe9   : > { %10499 = vrcp.f32 %v5954_v44  ;;  %v13448_v54 = vpop.eup %10489  ;;  %v6068_v16 = vcombine.low %v13446_v22, %v13443_v56  ;;  %v6373_v23 = vrot.slane %v13266_v60, 2  ;;  %v6374_v14 = vrot.slane %v13266_v60, 3 }
 0xbea   : > { %v6067_v51 = vcombine.low %v6059_v45, %v6066_v40 }
 0xbeb   : > { %v6078_v21 = vrot.slane %v6068_v16, %v11271_v36 }
 0xbec   : > { %v6119_v12 = vmul.f32 %v6067_v51, %v13266_v60 }
 0xbee   : > { %9466 = vmatprep.mubr.f32.mxu1 %v6119_v12 }
 0xbef   : > { %v13452_v2 = vpop.eup %10491 }
 0xbf0   : > { %v13454_v52 = vpop.eup %10493  ;;  %v6069_v61 = vcombine.low %v13448_v54, %v13452_v2 }
 0xbf1   : > { %v13458_v9 = vpop.eup %10495 }
 0xbf2   : > { %v13460_v8 = vpop.eup %10497  ;;  %v6070_v18 = vcombine.low %v13454_v52, %v13458_v9  ;;  %v6085_v32 = vrot.slane %v6069_v61, %v11271_v36 }
 0xbf3   : > { %v13466_v53 = vpop.eup %10499 }
 0xbf4   : > { %v6071_v50 = vcombine.low %v13460_v8, %v13466_v53  ;;  %v6100_v24 = vcombine.high %v6078_v21, %v6085_v32  ;;  %v6092_v38 = vrot.slane %v6070_v18, %v11271_v36  ;;  %v5995_v32 = vld [vmem:[%s10948_s10 + $0xd5] ss:$0 sm:$0xff] }
 0xbf6   : > { %v6099_v27 = vrot.slane %v6071_v50, %v11271_v36  ;;  %v6108_v26 = vrot.slane %v6100_v24, %v11271_v36  ;;  %v5997_v50 = vld [vmem:[%s10948_s10 + $0x105] ss:$0 sm:$0xff] }
 0xbf8   : > { %v6101_v42 = vcombine.high %v6092_v38, %v6099_v27 }
 0xbfa   : > { %v6115_v0 = vrot.slane %v6101_v42, %v11271_v36  ;;  %v5999_v42 = vld [vmem:[%s10948_s10 + $0x135] ss:$0 sm:$0xff] }
 0xbfc   : > { %v6116_v15 = vcombine.low %v6108_v26, %v6115_v0  ;;  %v6000_v26 = vld [vmem:[%s10948_s10 + $0x14d] ss:$0 sm:$0xff] }
 0xbfe   : > { %v6120_v20 = vmul.f32 %v6116_v15, %v13216_v58 }
 0xc00   : > { %9467 = vmatmul.mubr.f32.vlgmr.msra.gmra.mrb[10].mxu1 %v6120_v20 }
 0xc01   : > { %9958 = vmatpush3.bf16.msra.mxu1 %v13310_v29  ;;  %v6284_v29 = vpop.permute.xlu0 %6283 }
 0xc02   : > { %9960 = vmatprep.subr.bf16.mxu1 %v13320_v48  ;;  %v13508_v12 = vmul.f32 %v13415_v46, %v6284_v29  ;;  %v6001_v29 = vld [vmem:[%s10948_s10 + $0x165] ss:$0 sm:$0xff] }
 0xc05   : > { %9962 = vmatpush3.bf16.msra.mxu1 %v13320_v48  ;;  %v6289_v48 = vpop.permute.xlu1 %6288 }
 0xc06   : > { %9964 = vmatprep.subr.bf16.mxu1 %v13330_v49  ;;  %v13511_v16 = vmul.f32 %v13417_v41, %v6289_v48  ;;  %v5996_v41 = vld [vmem:[%s10948_s10 + $0xed] ss:$0 sm:$0xff]  ;;  %v6002_v48 = vld [vmem:[%s10948_s10 + $0x17d] ss:$0 sm:$0xff] }
 0xc09   : > { %9966 = vmatpush3.bf16.msra.mxu1 %v13330_v49  ;;  %v6279_v49 = vpop.permute.xlu0 %6278 }
 0xc0a   : > { %9968 = vmatprep.subr.bf16.mxu1 %v13340_v63  ;;  %v13505_v51 = vmul.f32 %v13413_v4, %v6279_v49 }
 0xc0d   : > { %9970 = vmatpush3.bf16.msra.mxu1 %v13340_v63  ;;  %v6294_v63 = vpop.permute.xlu1 %6293  ;;  %v6299_v35 = vpop.permute.xlu0 %6298 }
 0xc0e   : > { %9972 = vmatprep.subr.bf16.mxu1 %v13350_v47  ;;  %v13514_v61 = vmul.f32 %v13421_v25, %v6294_v63  ;;  %v13517_v18 = vmul.f32 %v13423_v11, %v6299_v35 }
 0xc11   : > { %9974 = vmatpush3.bf16.msra.mxu1 %v13350_v47  ;;  %v6304_v1 = vpop.permute.xlu1 %6303  ;;  %v6324_v39 = vpop.permute.xlu0 %6323 }
 0xc12   : > { %9976 = vmatprep.subr.bf16.mxu1 %v13360_v59  ;;  %v13520_v21 = vmul.f32 %v13427_v34, %v6304_v1  ;;  %v6365_v11 = vmul.f32 %v13443_v56, %v6324_v39 }
 0xc15   : > { %9978 = vmatpush3.bf16.msra.mxu1 %v13360_v59  ;;  %v6309_v47 = vpop.permute.xlu1 %6308  ;;  %v6329_v19 = vpop.permute.xlu0 %6328 }
 0xc16   : > { %9980 = vmatprep.subr.bf16.mxu1 %v13372_v17  ;;  %v13523_v4 = vmul.f32 %v13429_v31, %v6309_v47  ;;  %v6366_v34 = vmul.f32 %v13448_v54, %v6329_v19  ;;  %v5998_v31 = vld [vmem:[%s10948_s10 + $0x11d] ss:$0 sm:$0xff] }
 0xc19   : > { %9982 = vmatpush3.bf16.msra.mxu1 %v13372_v17  ;;  %v6314_v7 = vpop.permute.xlu1 %6313  ;;  %v6319_v33 = vpop.permute.xlu0 %6318  ;;  %v6379_v17 = vrot.slane %v13216_v58, 1 }
 0xc1a   : > { %9984 = vmatprep.subr.bf16.mxu1 %v13379_v57  ;;  %v13526_v46 = vmul.f32 %v13435_v6, %v6314_v7  ;;  %v6364_v38 = vmul.f32 %v13446_v22, %v6319_v33 }
 0xc1d   : > { %9986 = vmatpush3.bf16.msra.mxu1 %v13379_v57  ;;  %v6334_v59 = vpop.permute.xlu1 %6333  ;;  %v6339_v30 = vpop.permute.xlu0 %6338  ;;  %v6381_v57 = vrot.slane %v13216_v58, 3 }
 0xc1e   : > { %v6367_v27 = vmul.f32 %v13452_v2, %v6334_v59  ;;  %v6368_v6 = vmul.f32 %v13454_v52, %v6339_v30 }
 0xc21   : > { %v6344_v55 = vpop.permute.xlu1 %6343  ;;  %v6349_v25 = vpop.permute.xlu0 %6348 }
 0xc22   : > { %v6369_v0 = vmul.f32 %v13458_v9, %v6344_v55  ;;  %v6370_v15 = vmul.f32 %v13460_v8, %v6349_v25 }
 0xc25   : > { %v6354_v24 = vpop.permute.xlu1 %6353 }
 0xc26   : > { %v6371_v20 = vmul.f32 %v13466_v53, %v6354_v24 }
 0xcd3   : > { %v9468_v22 = vpop.f32.mrb[10].mxu1 }
 0xcd4   : > { %v6221_v49 = vrot.slane %v9468_v22, 1  ;;  %v6222_v56 = vrot.slane %v9468_v22, 2  ;;  %v6223_v63 = vrot.slane %v9468_v22, 3  ;;  %v6224_v54 = vrot.slane %v9468_v22, 4  ;;  %v13544_v35 = vpop.f32.mrb[11].mxu1 }
 0xcd5   : > { %v6225_v2 = vrot.slane %v9468_v22, 5  ;;  %v6226_v1 = vrot.slane %v9468_v22, 6  ;;  %v6227_v39 = vrot.slane %v9468_v22, 7  ;;  %v6252_v47 = vadd.f32 %v9468_v22, %v5995_v32 }
 0xcd6   : > { %v6253_v52 = vadd.f32 %v6221_v49, %v5996_v41  ;;  %v6254_v19 = vadd.f32 %v6222_v56, %v5997_v50  ;;  %v6255_v9 = vadd.f32 %v6223_v63, %v5998_v31  ;;  %v6256_v7 = vadd.f32 %v6224_v54, %v5999_v42  ;;  %v5988_v54 = vld [vmem:[%s10948_s10 + $0x2d] ss:$0 sm:$0xff] }
 0xcd7   : > { %v6257_v8 = vadd.f32 %v6225_v2, %v6000_v26  ;;  %v6258_v33 = vadd.f32 %v6226_v1, %v6001_v29  ;;  %v6259_v53 = vadd.f32 %v6227_v39, %v6002_v48  ;;  %v6268_v59 = vmax.f32 %v6252_v47, 0.0 }
 0xcd8   : > { %v6269_v30 = vmax.f32 %v6253_v52, 0.0  ;;  %v6270_v55 = vmax.f32 %v6254_v19, 0.0  ;;  %v6271_v25 = vmax.f32 %v6255_v9, 0.0  ;;  %v6272_v24 = vmax.f32 %v6256_v7, 0.0  ;;  %v5994_v52 = vld [vmem:[%s10948_s10 + $0xbd] ss:$0 sm:$0xff] }
 0xcd9   : > { %v6273_v40 = vmax.f32 %v6257_v8, 0.0  ;;  %v6274_v44 = vmax.f32 %v6258_v33, 0.0  ;;  %v6275_v45 = vmax.f32 %v6259_v53, 0.0  ;;  %v6410_v43 = vsub.f32 %v6268_v59, %v13216_v58 }
 0xcda   : > { %v6411_v32 = vsub.f32 %v6269_v30, %v6379_v17  ;;  %v6412_v41 = vsub.f32 %v6270_v55, %v6380_v3  ;;  %v6413_v50 = vsub.f32 %v6271_v25, %v6381_v57  ;;  %v6414_v31 = vsub.f32 %v6272_v24, %v6382_v10  ;;  %v5987_v57 = vld [vmem:[%s10948_s10 + $0x15] ss:$0 sm:$0xff] }
 0xcdb   : > { %v6415_v42 = vsub.f32 %v6273_v40, %v6383_v28  ;;  %v6416_v26 = vsub.f32 %v6274_v44, %v6384_v5  ;;  %v6417_v17 = vsub.f32 %v6275_v45, %v6385_v62  ;;  %v6426_v29 = vmul.f32 %v6410_v43, %v6364_v38  ;;  %v5989_v28 = vld [vmem:[%s10948_s10 + $0x45] ss:$0 sm:$0xff]  ;;  %v5990_v40 = vld [vmem:[%s10948_s10 + $0x5d] ss:$0 sm:$0xff]  ;;  %v5991_v38 = vld [vmem:[%s10948_s10 + $0x75] ss:$0 sm:$0xff] }
 0xcdc   : > { %v6427_v48 = vmul.f32 %v6411_v32, %v6365_v11  ;;  %v6428_v3 = vmul.f32 %v6412_v41, %v6366_v34  ;;  %v6429_v22 = vmul.f32 %v6413_v50, %v6367_v27  ;;  %v6430_v49 = vmul.f32 %v6414_v31, %v6368_v6  ;;  %v5992_v6 = vld [vmem:[%s10948_s10 + $0x8d] ss:$0 sm:$0xff] }
 0xcdd   : > { %v6431_v56 = vmul.f32 %v6415_v42, %v6369_v0  ;;  %v6432_v63 = vmul.f32 %v6416_v26, %v6370_v15  ;;  %v6433_v10 = vmul.f32 %v6417_v17, %v6371_v20  ;;  %v6214_v5 = vrot.slane %v13544_v35, 1  ;;  %v5993_v20 = vld [vmem:[%s10948_s10 + $0xa5] ss:$0 sm:$0xff] }
 0xcde   : > { %v6464_v44 = vrot.slane %v6427_v48, 7  ;;  %v6466_v62 = vrot.slane %v6428_v3, 6  ;;  %v6468_v43 = vrot.slane %v6429_v22, 5  ;;  %v6470_v45 = vrot.slane %v6430_v49, 4 }
 0xcdf   : > { %v6472_v11 = vrot.slane %v6431_v56, 3  ;;  %v6474_v34 = vrot.slane %v6432_v63, 2  ;;  %v6476_v27 = vrot.slane %v6433_v10, 1  ;;  %v6215_v0 = vrot.slane %v13544_v35, 2 }
 0xce0   : > { %v6465_v15 = vsel %vm1364_vm0, %v6464_v44, %v6426_v29  ;;  %v6216_v2 = vrot.slane %v13544_v35, 3  ;;  %v6217_v1 = vrot.slane %v13544_v35, 4  ;;  %v6218_v39 = vrot.slane %v13544_v35, 5 }
 0xce1   : > { %v6467_v47 = vsel %vm1367_vm1, %v6466_v62, %v6465_v15  ;;  %v6219_v19 = vrot.slane %v13544_v35, 6  ;;  %v6220_v9 = vrot.slane %v13544_v35, 7  ;;  %v6244_v7 = vadd.f32 %v13544_v35, %v5987_v57 }
 0xce2   : > { %v6469_v8 = vsel %vm1370_vm2, %v6468_v43, %v6467_v47  ;;  %v6245_v33 = vadd.f32 %v6214_v5, %v5988_v54  ;;  %v6246_v53 = vadd.f32 %v6215_v0, %v5989_v28  ;;  %v6247_v59 = vadd.f32 %v6216_v2, %v5990_v40 }
 0xce3   : > { %v6471_v30 = vsel %vm1373_vm3, %v6470_v45, %v6469_v8  ;;  %v6248_v55 = vadd.f32 %v6217_v1, %v5991_v38  ;;  %v6249_v25 = vadd.f32 %v6218_v39, %v5992_v6  ;;  %v6250_v24 = vadd.f32 %v6219_v19, %v5993_v20 }
 0xce4   : > { %v6473_v32 = vsel %vm1376_vm4, %v6472_v11, %v6471_v30  ;;  %v6251_v41 = vadd.f32 %v6220_v9, %v5994_v52  ;;  %v6260_v50 = vmax.f32 %v6244_v7, 0.0  ;;  %v6261_v31 = vmax.f32 %v6245_v33, 0.0 }
 0xce5   : > { %v6475_v42 = vsel %vm1379_vm5, %v6474_v34, %v6473_v32  ;;  %v6262_v26 = vmax.f32 %v6246_v53, 0.0  ;;  %v6263_v17 = vmax.f32 %v6247_v59, 0.0  ;;  %v6264_v35 = vmax.f32 %v6248_v55, 0.0 }
 0xce6   : > { %v6477_v29 = vsel %vm1382_vm6, %v6476_v27, %v6475_v42  ;;  %v6265_v48 = vmax.f32 %v6249_v25, 0.0  ;;  %v6266_v3 = vmax.f32 %v6250_v24, 0.0  ;;  %v6267_v22 = vmax.f32 %v6251_v41, 0.0 }
 0xce7   : > { %v13585_v49 = vadd.f32 %v6477_v29, %v13216_v58  ;;  %v6402_v57 = vsub.f32 %v6260_v50, %v13266_v60  ;;  %v6403_v56 = vsub.f32 %v6261_v31, %v6372_v37  ;;  %v6404_v63 = vsub.f32 %v6262_v26, %v6373_v23 }
 0xce8   : > { %v6405_v10 = vsub.f32 %v6263_v17, %v6374_v14  ;;  %v14498_v54 = vrot.slane %v13266_v60, 4  ;;  %v14499_v40 = vrot.slane %v13266_v60, 5  ;;  %v14500_v58 = vrot.slane %v13266_v60, 6 }
 0xce9   : > { %v6533_v62 = vcombine.high %v13585_v49, %v13585_v49  ;;  %v6540_v37 = vrot.slane %v13585_v49, %v11271_v36  ;;  %v14501_v23 = vrot.slane %v13266_v60, 7  ;;  %v6418_v14 = vmul.f32 %v6402_v57, %v13505_v51  ;;  %v7679_v57 = vld [vmem:[%s14358_s3 + $0x8] sm:$0xff] }
 0xcea   : > { %v6406_v28 = vsub.f32 %v6264_v35, %v14498_v54  ;;  %v6407_v5 = vsub.f32 %v6265_v48, %v14499_v40  ;;  %v6408_v44 = vsub.f32 %v6266_v3, %v14500_v58  ;;  %v6419_v45 = vmul.f32 %v6403_v56, %v13508_v12  ;;  %v7681_v56 = vld [vmem:[%s14358_s3 + $0x18] sm:$0xff]  ;;  %v7680_v54 = vld [vmem:[%s14358_s3 + $0x10] sm:$0xff] }
 0xceb   : > { %v6409_v43 = vsub.f32 %v6267_v22, %v14501_v23  ;;  %v6420_v38 = vmul.f32 %v6404_v63, %v13511_v16  ;;  %v6421_v11 = vmul.f32 %v6405_v10, %v13514_v61  ;;  %v6547_v27 = vrot.slane %v6533_v62, %v11271_v36  ;;  %9027 = vst.sshfl [vmem:[%s10952_s12 + $0x45] sm:$0x1 pattern:$0x73625140] %v6540_v37  ;;  %v7678_v63 = vld [vmem:[%s14358_s3] sm:$0xff]  ;;  %v7685_v40 = vld [vmem:[%s14358_s3 + $0x38] sm:$0xff] }
 0xcec   : > { %v6422_v34 = vmul.f32 %v6406_v28, %v13517_v18  ;;  %v6548_v6 = vcombine.high %v6540_v37, %v6540_v37  ;;  %v6556_v0 = vrot.slane %v6540_v37, %v11271_v36  ;;  %v6423_v15 = vmul.f32 %v6407_v5, %v13520_v21  ;;  %v7683_v28 = vld [vmem:[%s14358_s3 + $0x28] sm:$0xff]  ;;  %v7684_v62 = vld [vmem:[%s14358_s3 + $0x30] sm:$0xff]  ;;  %v7689_v23 = vld [vmem:[%s14358_s3 + $0x58] sm:$0xff] }
 0xced   : > { %v6424_v51 = vmul.f32 %v6408_v44, %v13523_v4  ;;  %v6425_v12 = vmul.f32 %v6409_v43, %v13526_v46  ;;  %v6450_v16 = vrot.slane %v6419_v45, 7  ;;  %v6452_v20 = vrot.slane %v6420_v38, 6  ;;  %9029 = vst.sshfl [vmem:[%s10952_s12 + $0x65] sm:$0x1 pattern:$0x73625140] %v6547_v27 }
 0xcee   : > { %v6549_v61 = vcombine.high %v6547_v27, %v6547_v27  ;;  %v6563_v2 = vrot.slane %v6547_v27, %v11271_v36  ;;  %v6570_v18 = vrot.slane %v6548_v6, %v11271_v36  ;;  %v6578_v1 = vcombine.high %v6556_v0, %v6556_v0  ;;  %9028 = vst.sshfl [vmem:[%s10952_s12 + $0x4d] sm:$0x1 pattern:$0x73625140] %v6548_v6  ;;  %v7682_v44 = vld [vmem:[%s14358_s3 + $0x20] sm:$0xff]  ;;  %v7687_v37 = vld [vmem:[%s14358_s3 + $0x48] sm:$0xff] }
 0xcef   : > { %v6451_v21 = vsel %vm1364_vm0, %v6450_v16, %v6418_v14  ;;  %v6454_v39 = vrot.slane %v6421_v11, 5  ;;  %v6456_v4 = vrot.slane %v6422_v34, 4  ;;  %v6458_v7 = vrot.slane %v6423_v15, 3 }
 0xcf0   : > { %v6577_v46 = vrot.slane %v6549_v61, %v11271_v36  ;;  %v6579_v47 = vcombine.high %v6563_v2, %v6563_v2  ;;  %v6580_v52 = vcombine.high %v6570_v18, %v6570_v18  ;;  %6608 = vst [vmem:[%s10952_s12 + $0x55] sm:$0x1] %v6578_v1  ;;  %9030 = vst.sshfl [vmem:[%s10952_s12 + $0x6d] sm:$0x1 pattern:$0x73625140] %v6549_v61 }
 0xcf1   : > { %v6453_v19 = vsel %vm1367_vm1, %v6452_v20, %v6451_v21  ;;  %v6460_v53 = vrot.slane %v6424_v51, 2  ;;  %v6462_v30 = vrot.slane %v6425_v12, 1  ;;  %v9987_v10 = vpack.c.bf16 %v7681_v56, %v7679_v57  ;;  %v9031_v51 = vld [vmem:[%s10948_s10 + $0x6] ss:$8 sm:$0x3] }
 0xcf2   : > { %v6455_v9 = vsel %vm1370_vm2, %v6454_v39, %v6453_v19  ;;  %v6581_v8 = vcombine.high %v6577_v46, %v6577_v46  ;;  %6609 = vst [vmem:[%s10952_s12 + $0x5d] sm:$0x1] %v6580_v52  ;;  %6612 = vst [vmem:[%s10952_s12 + $0x75] sm:$0x1] %v6579_v47  ;;  %v9989_v5 = vpack.c.bf16 %v7680_v54, %v7678_v63 }
 0xcf3   : > { %v6457_v33 = vsel %vm1373_vm3, %v6456_v4, %v6455_v9  ;;  %v9991_v58 = vpack.c.bf16 %v7685_v40, %v7683_v28  ;;  %9988 = vmatprep.subr.bf16.mxu0 %v9987_v10  ;;  %v9993_v43 = vpack.c.bf16 %v7684_v62, %v7682_v44  ;;  %v9995_v14 = vpack.c.bf16 %v7689_v23, %v7687_v37  ;;  %v9035_v12 = vld [vmem:[%s10948_s10 + $0x66] ss:$8 sm:$0x3]  ;;  %v9033_v1 = vld [vmem:[%s10948_s10 + $0x36] ss:$8 sm:$0x3] }
 0xcf4   : > { %v6459_v59 = vsel %vm1376_vm4, %v6458_v7, %v6457_v33  ;;  %6613 = vst [vmem:[%s10952_s12 + $0x7d] sm:$0x1] %v6581_v8  ;;  %v9032_v18 = vld [vmem:[%s10948_s10 + $0x1e] ss:$8 sm:$0x3] }
 0xcf5   : > { %v6461_v55 = vsel %vm1379_vm5, %v6460_v53, %v6459_v59  ;;  %v9036_v4 = vld [vmem:[%s10948_s10 + $0x7e] ss:$8 sm:$0x3]  ;;  %v9034_v7 = vld [vmem:[%s10948_s10 + $0x4e] ss:$8 sm:$0x3] }
 0xcf6   : > { %v6463_v25 = vsel %vm1382_vm6, %v6462_v30, %v6461_v55  ;;  %v9037_v46 = vld [vmem:[%s10948_s10 + $0x96] ss:$8 sm:$0x3] }
 0xcf7   : > { %v13635_v24 = vadd.f32 %v6463_v25, %v13266_v60  ;;  %v9038_v8 = vld [vmem:[%s10948_s10 + $0xae] ss:$8 sm:$0x3]  ;;  %v9040_v63 = vld [vmem:[%s10948_s10 + $0xde] ss:$8 sm:$0x3] }
 0xcf8   : > { %v9041_v40 = vld [vmem:[%s10948_s10 + $0xf6] ss:$8 sm:$0x3] }
 0xcf9   : > { %v6484_v32 = vcombine.high %v13635_v24, %v13635_v24  ;;  %v6491_v41 = vrot.slane %v13635_v24, %v11271_v36  ;;  %6759 = vmatmul.mubr.f32.vlgmr.msra.gmra.mrb[24].mxu0 %v13635_v24 }
 0xcfa   : > { %6764 = vmatprep.mubr.f32.mxu0 %v14417_v13  ;;  %9990 = vmatpush1.bf16.msra.mxu0 %v9989_v5 }
 0xcfb   : > { %v6498_v50 = vrot.slane %v6484_v32, %v11271_v36  ;;  %v6499_v31 = vcombine.high %v6491_v41, %v6491_v41  ;;  %v6507_v42 = vrot.slane %v6491_v41, %v11271_v36  ;;  %9023 = vst.sshfl [vmem:[%s10952_s12 + $0x5] sm:$0x1 pattern:$0x73625140] %v6491_v41  ;;  %9992 = vmatprep.subr.bf16.mxu0 %v9991_v58 }
 0xcfd   : > { %v6500_v60 = vcombine.high %v6498_v50, %v6498_v50  ;;  %v6514_v26 = vrot.slane %v6498_v50, %v11271_v36  ;;  %v6521_v17 = vrot.slane %v6499_v31, %v11271_v36  ;;  %v6529_v35 = vcombine.high %v6507_v42, %v6507_v42  ;;  %9024 = vst.sshfl [vmem:[%s10952_s12 + $0xd] sm:$0x1 pattern:$0x73625140] %v6499_v31 }
 0xcfe   : > { %9025 = vst.sshfl [vmem:[%s10952_s12 + $0x25] sm:$0x1 pattern:$0x73625140] %v6498_v50  ;;  %6765 = vmatmul.mubr.f32.gmra.mrb[26].mxu0 %v13585_v49 }
 0xcff   : > { %7774 = vmatprep.mubr.f32.mxu0 %v14417_v13  ;;  %v6528_v29 = vrot.slane %v6500_v60, %v11271_v36  ;;  %v6530_v48 = vcombine.high %v6514_v26, %v6514_v26  ;;  %v6531_v3 = vcombine.high %v6521_v17, %v6521_v17  ;;  %6600 = vst [vmem:[%s10952_s12 + $0x15] sm:$0x1] %v6529_v35  ;;  %9026 = vst.sshfl [vmem:[%s10952_s12 + $0x2d] sm:$0x1 pattern:$0x73625140] %v6500_v60 }
 0xd00   : > { %9994 = vmatpush1.bf16.msra.mxu0 %v9993_v43 }
 0xd01   : > { %v6532_v22 = vcombine.high %v6528_v29, %v6528_v29  ;;  %6601 = vst [vmem:[%s10952_s12 + $0x1d] sm:$0x1] %v6531_v3  ;;  %6604 = vst [vmem:[%s10952_s12 + $0x35] sm:$0x1] %v6530_v48  ;;  %9996 = vmatprep.subr.bf16.mxu0 %v9995_v14 }
 0xd02   : > { %v9039_v29 = vld [vmem:[%s10948_s10 + $0xc6] ss:$8 sm:$0x3] }
 0xd03   : > { %6605 = vst [vmem:[%s10952_s12 + $0x3d] sm:$0x1] %v6532_v22 }
 0xdcc   : > { %v6760_v45 = vpop.f32.mrb[24].mxu0 }
 0xdcd   : > { %v6762_v38 = vpop.f32.mrb[25].mxu0 }
 0xdce   : > { %v6775_v11 = vcombine.low %v6760_v45, %v6762_v38  ;;  %v6776_v34 = vcombine.high %v6760_v45, %v6762_v38 }
 0xdd0   : > { %v6783_v27 = vrot.slane %v6775_v11, %v11271_v36  ;;  %v6790_v6 = vrot.slane %v6776_v34, %v11271_v36 }
 0xdd1   : > { %v6766_v0 = vpop.f32.mrb[26].mxu0 }
 0xdd2   : > { %v6768_v15 = vpop.f32.mrb[27].mxu0  ;;  %v6791_v16 = vcombine.high %v6783_v27, %v6783_v27  ;;  %v6792_v20 = vcombine.high %v6790_v6, %v6790_v6  ;;  %v6799_v61 = vrot.slane %v6783_v27, %v11271_v36  ;;  %v6806_v2 = vrot.slane %v6790_v6, %v11271_v36  ;;  %v9042_v27 = vld [vmem:[%s10948_s10 + $0x10e] ss:$8 sm:$0x3] }
 0xdd3   : > { %v6825_v21 = vcombine.low %v6766_v0, %v6768_v15  ;;  %v6826_v39 = vcombine.high %v6766_v0, %v6768_v15  ;;  %v9043_v15 = vld [vmem:[%s10948_s10 + $0x126] ss:$8 sm:$0x3] }
 0xdd4   : > { %v6813_v47 = vrot.slane %v6791_v16, %v11271_v36  ;;  %v6820_v52 = vrot.slane %v6792_v20, %v11271_v36  ;;  %v6821_v19 = vcombine.high %v6799_v61, %v6799_v61  ;;  %v6822_v9 = vcombine.high %v6806_v2, %v6806_v2  ;;  %v9044_v16 = vld [vmem:[%s10948_s10 + $0x13e] ss:$8 sm:$0x3] }
 0xdd5   : > { %v6891_v33 = vadd.f32 %v9031_v51, %v6799_v61  ;;  %v6895_v53 = vadd.f32 %v9035_v12, %v6806_v2  ;;  %v6833_v59 = vrot.slane %v6825_v21, %v11271_v36  ;;  %v6840_v57 = vrot.slane %v6826_v39, %v11271_v36 }
 0xdd6   : > { %v6823_v30 = vcombine.high %v6813_v47, %v6813_v47  ;;  %v6824_v55 = vcombine.high %v6820_v52, %v6820_v52  ;;  %v6892_v25 = vadd.f32 %v9032_v18, %v6813_v47  ;;  %v6893_v32 = vadd.f32 %v9033_v1, %v6821_v19  ;;  %v9045_v18 = vld [vmem:[%s10948_s10 + $0x156] ss:$8 sm:$0x3] }
 0xdd7   : > { %v6896_v41 = vadd.f32 %v9036_v4, %v6820_v52  ;;  %v6897_v50 = vadd.f32 %v9037_v46, %v6822_v9  ;;  %v9047_v31 = vmul.f32 -1.442695, %v6891_v33  ;;  %v9051_v35 = vmul.f32 -1.442695, %v6895_v53 }
 0xdd8   : > { %v6894_v42 = vadd.f32 %v9034_v7, %v6823_v30  ;;  %v6898_v60 = vadd.f32 %v9038_v8, %v6824_v55  ;;  %v9048_v26 = vmul.f32 -1.442695, %v6892_v25  ;;  %v9049_v17 = vmul.f32 -1.442695, %v6893_v32 }
 0xdd9   : > { %10501 = vpow2.f32 %v9047_v31  ;;  %v6841_v48 = vcombine.high %v6833_v59, %v6833_v59  ;;  %v9052_v22 = vmul.f32 -1.442695, %v6896_v41  ;;  %v9053_v56 = vmul.f32 -1.442695, %v6897_v50 }
 0xdda   : > { %10503 = vpow2.f32 %v9048_v26  ;;  %v9050_v3 = vmul.f32 -1.442695, %v6894_v42  ;;  %v6849_v10 = vrot.slane %v6833_v59, %v11271_v36  ;;  %v9054_v28 = vmul.f32 -1.442695, %v6898_v60 }
 0xddb   : > { %10505 = vpow2.f32 %v9049_v17  ;;  %v6863_v54 = vrot.slane %v6841_v48, %v11271_v36  ;;  %v6842_v58 = vcombine.high %v6840_v57, %v6840_v57  ;;  %v6856_v23 = vrot.slane %v6840_v57, %v11271_v36  ;;  %v9046_v46 = vld [vmem:[%s10948_s10 + $0x16e] ss:$8 sm:$0x3] }
 0xddc   : > { %10507 = vpow2.f32 %v9050_v3  ;;  %v6871_v5 = vcombine.high %v6849_v10, %v6849_v10  ;;  %v6899_v44 = vadd.f32 %v9039_v29, %v6849_v10 }
 0xddd   : > { %10509 = vpow2.f32 %v9051_v35  ;;  %v6900_v62 = vadd.f32 %v9040_v63, %v6863_v54  ;;  %v6870_v38 = vrot.slane %v6842_v58, %v11271_v36  ;;  %v6873_v11 = vcombine.high %v6863_v54, %v6863_v54 }
 0xdde   : > { %10511 = vpow2.f32 %v9052_v22  ;;  %v6901_v37 = vadd.f32 %v9041_v40, %v6871_v5  ;;  %v9055_v43 = vmul.f32 -1.442695, %v6899_v44  ;;  %v6872_v20 = vcombine.high %v6856_v23, %v6856_v23 }
 0xddf   : > { %10513 = vpow2.f32 %v9053_v56  ;;  %v9056_v14 = vmul.f32 -1.442695, %v6900_v62  ;;  %v6874_v1 = vcombine.high %v6870_v38, %v6870_v38  ;;  %v6902_v21 = vadd.f32 %v9042_v27, %v6873_v11 }
 0xde0   : > { %10515 = vpow2.f32 %v9054_v28  ;;  %v9057_v45 = vmul.f32 -1.442695, %v6901_v37  ;;  %v6903_v47 = vadd.f32 %v9043_v15, %v6856_v23  ;;  %v6904_v9 = vadd.f32 %v9044_v16, %v6870_v38 }
 0xde1   : > { %10517 = vpow2.f32 %v9055_v43  ;;  %v6905_v33 = vadd.f32 %v9045_v18, %v6872_v20  ;;  %v6906_v30 = vadd.f32 %v9046_v46, %v6874_v1  ;;  %v9058_v55 = vmul.f32 -1.442695, %v6902_v21 }
 0xde2   : > { %10519 = vpow2.f32 %v9056_v14  ;;  %v9059_v32 = vmul.f32 -1.442695, %v6903_v47  ;;  %v9060_v41 = vmul.f32 -1.442695, %v6904_v9 }
 0xde3   : > { %v10502_v34 = vpop.eup %10501  ;;  %10521 = vpow2.f32 %v9057_v45  ;;  %v9061_v31 = vmul.f32 -1.442695, %v6905_v33  ;;  %v9062_v60 = vmul.f32 -1.442695, %v6906_v30 }
 0xde4   : > { %v10504_v6 = vpop.eup %10503  ;;  %v6955_v0 = vadd.f32 1.0, %v10502_v34 }
 0xde5   : > { %v10506_v51 = vpop.eup %10505  ;;  %v6956_v12 = vadd.f32 1.0, %v10504_v6 }
 0xde6   : > { %v10508_v61 = vpop.eup %10507  ;;  %v6957_v2 = vadd.f32 1.0, %v10506_v51  ;;  %10523 = vrcp.f32 %v6955_v0 }
 0xde7   : > { %v10510_v39 = vpop.eup %10509  ;;  %v6958_v4 = vadd.f32 1.0, %v10508_v61  ;;  %10525 = vrcp.f32 %v6956_v12 }
 0xde8   : > { %v10512_v52 = vpop.eup %10511  ;;  %v6959_v19 = vadd.f32 1.0, %v10510_v39  ;;  %10527 = vrcp.f32 %v6957_v2 }
 0xde9   : > { %v10514_v7 = vpop.eup %10513  ;;  %v6960_v8 = vadd.f32 1.0, %v10512_v52  ;;  %10529 = vrcp.f32 %v6958_v4 }
 0xdea   : > { %v10516_v53 = vpop.eup %10515  ;;  %v6961_v59 = vadd.f32 1.0, %v10514_v7  ;;  %10531 = vrcp.f32 %v6959_v19 }
 0xdeb   : > { %v6962_v25 = vadd.f32 1.0, %v10516_v53  ;;  %10533 = vrcp.f32 %v6960_v8  ;;  %v10518_v50 = vpop.eup %10517 }
 0xdec   : > { %10535 = vrcp.f32 %v6961_v59  ;;  %v10520_v42 = vpop.eup %10519  ;;  %v6963_v10 = vadd.f32 1.0, %v10518_v50 }
 0xded   : > { %10537 = vrcp.f32 %v6962_v25  ;;  %v10522_v26 = vpop.eup %10521  ;;  %v6964_v22 = vadd.f32 1.0, %v10520_v42  ;;  %v7686_v42 = vld [vmem:[%s14358_s3 + $0x40] sm:$0xff] }
 0xdee   : > { %10539 = vpow2.f32 %v9058_v55  ;;  %v6965_v28 = vadd.f32 1.0, %v10522_v26 }
 0xdef   : > { %10541 = vpow2.f32 %v9059_v32 }
 0xdf0   : > { %v13716_v17 = vpop.eup %10523  ;;  %10543 = vpow2.f32 %v9060_v41 }
 0xdf1   : > { %v13718_v35 = vpop.eup %10525  ;;  %10545 = vpow2.f32 %v9061_v31 }
 0xdf2   : > { %v13720_v29 = vpop.eup %10527  ;;  %10547 = vpow2.f32 %v9062_v60  ;;  %v7035_v48 = vcombine.low %v13716_v17, %v13718_v35  ;;  %v7688_v60 = vld [vmem:[%s14358_s3 + $0x50] sm:$0xff] }
 0xdf3   : > { %v13724_v3 = vpop.eup %10529  ;;  %10549 = vrcp.f32 %v6964_v22  ;;  %v9997_v26 = vpack.c.bf16 %v7688_v60, %v7686_v42  ;;  %v7693_v22 = vld [vmem:[%s14358_s3 + $0x78] sm:$0xff] }
 0xdf4   : > { %v13726_v57 = vpop.eup %10531  ;;  %v7036_v56 = vcombine.low %v13720_v29, %v13724_v3  ;;  %v7045_v5 = vrot.slane %v7035_v48, %v11271_v36  ;;  %10551 = vrcp.f32 %v6963_v10  ;;  %v7691_v48 = vld [vmem:[%s14358_s3 + $0x68] sm:$0xff]  ;;  %v7690_v10 = vld [vmem:[%s14358_s3 + $0x60] sm:$0xff] }
 0xdf5   : > { %v13730_v63 = vpop.eup %10533  ;;  %10553 = vrcp.f32 %v6965_v28  ;;  %9998 = vmatpush1.bf16.msra.mxu0 %v9997_v26  ;;  %v7692_v28 = vld [vmem:[%s14358_s3 + $0x70] sm:$0xff] }
 0xdf6   : > { %v13732_v54 = vpop.eup %10535  ;;  %v7037_v40 = vcombine.low %v13726_v57, %v13730_v63  ;;  %v7052_v58 = vrot.slane %v7036_v56, %v11271_v36  ;;  %v9999_v56 = vpack.c.bf16 %v7693_v22, %v7691_v48  ;;  %v7395_v48 = vrot.slane %v13585_v49, 1 }
 0xdf7   : > { %v13738_v44 = vpop.eup %10537  ;;  %v7396_v22 = vrot.slane %v13585_v49, 2 }
 0xdf8   : > { %v10540_v62 = vpop.eup %10539  ;;  %v7038_v37 = vcombine.low %v13732_v54, %v13738_v44  ;;  %v7067_v23 = vcombine.high %v7045_v5, %v7052_v58  ;;  %v7059_v11 = vrot.slane %v7037_v40, %v11271_v36  ;;  %v10001_v40 = vpack.c.bf16 %v7692_v28, %v7690_v10  ;;  %10000 = vmatprep.subr.bf16.mxu0 %v9999_v56  ;;  %v7695_v5 = vld [vmem:[%s14358_s3 + $0x88] sm:$0xff]  ;;  %v7697_v58 = vld [vmem:[%s14358_s3 + $0x98] sm:$0xff] }
 0xdf9   : > { %v10542_v43 = vpop.eup %10541  ;;  %v6966_v14 = vadd.f32 1.0, %v10540_v62  ;;  %v10003_v62 = vpack.c.bf16 %v7697_v58, %v7695_v5  ;;  %v7397_v56 = vrot.slane %v13585_v49, 3  ;;  %v7398_v10 = vrot.slane %v13585_v49, 4 }
 0xdfa   : > { %v10544_v45 = vpop.eup %10543  ;;  %v6967_v38 = vadd.f32 1.0, %v10542_v43  ;;  %v7066_v34 = vrot.slane %v7038_v37, %v11271_v36  ;;  %v7075_v12 = vrot.slane %v7067_v23, %v11271_v36  ;;  %10002 = vmatpush1.bf16.msra.mxu0 %v10001_v40  ;;  %v7694_v37 = vld [vmem:[%s14358_s3 + $0x80] sm:$0xff]  ;;  %v7696_v23 = vld [vmem:[%s14358_s3 + $0x90] sm:$0xff]  ;;  %v7399_v28 = vrot.slane %v13585_v49, 5 }
 0xdfb   : > { %v10546_v27 = vpop.eup %10545  ;;  %v6968_v6 = vadd.f32 1.0, %v10544_v45  ;;  %10555 = vrcp.f32 %v6966_v14  ;;  %v10005_v43 = vpack.c.bf16 %v7696_v23, %v7694_v37  ;;  %10004 = vmatprep.subr.bf16.mxu0 %v10003_v62  ;;  %v7699_v14 = vld [vmem:[%s14358_s3 + $0xa8] sm:$0xff]  ;;  %v7701_v45 = vld [vmem:[%s14358_s3 + $0xb8] sm:$0xff]  ;;  %v7400_v40 = vrot.slane %v13585_v49, 6 }
 0xdfc   : > { %v10548_v0 = vpop.eup %10547  ;;  %v6969_v15 = vadd.f32 1.0, %v10546_v27  ;;  %10557 = vrcp.f32 %v6967_v38  ;;  %v7068_v51 = vcombine.high %v7059_v11, %v7066_v34  ;;  %v10007_v38 = vpack.c.bf16 %v7701_v45, %v7699_v14  ;;  %v7698_v11 = vld [vmem:[%s14358_s3 + $0xa0] sm:$0xff]  ;;  %v7700_v34 = vld [vmem:[%s14358_s3 + $0xb0] sm:$0xff] }
 0xdfd   : > { %v6970_v16 = vadd.f32 1.0, %v10548_v0  ;;  %10559 = vrcp.f32 %v6968_v6  ;;  %v13746_v2 = vpop.eup %10549  ;;  %v10009_v27 = vpack.c.bf16 %v7700_v34, %v7698_v11  ;;  %v7703_v6 = vld [vmem:[%s14358_s3 + $0xc8] sm:$0xff]  ;;  %v7705_v0 = vld [vmem:[%s14358_s3 + $0xd8] sm:$0xff]  ;;  %v7401_v5 = vrot.slane %v13585_v49, 7 }
 0xdfe   : > { %10561 = vrcp.f32 %v6969_v15  ;;  %v7082_v20 = vrot.slane %v7068_v51, %v11271_v36  ;;  %v13749_v1 = vpop.eup %10551  ;;  %10006 = vmatpush1.bf16.msra.mxu0 %v10005_v43  ;;  %v10011_v15 = vpack.c.bf16 %v7705_v0, %v7703_v6  ;;  %v7702_v51 = vld [vmem:[%s14358_s3 + $0xc0] sm:$0xff]  ;;  %v7388_v58 = vrot.slane %v13635_v24, 1 }
 0xdff   : > { %10563 = vrcp.f32 %v6970_v16  ;;  %v13751_v21 = vpop.eup %10553  ;;  %v7084_v39 = vcombine.low %v13749_v1, %v13746_v2  ;;  %10008 = vmatprep.subr.bf16.mxu0 %v10007_v38  ;;  %v7389_v62 = vrot.slane %v13635_v24, 2  ;;  %v7390_v37 = vrot.slane %v13635_v24, 3 }
 0xe00   : > { %v7083_v61 = vcombine.low %v7075_v12, %v7082_v20  ;;  %v7704_v12 = vld [vmem:[%s14358_s3 + $0xd0] sm:$0xff]  ;;  %v7707_v20 = vld [vmem:[%s14358_s3 + $0xe8] sm:$0xff] }
 0xe01   : > { %v7094_v7 = vrot.slane %v7084_v39, %v11271_v36  ;;  %v10013_v16 = vpack.c.bf16 %v7704_v12, %v7702_v51  ;;  %v7706_v39 = vld [vmem:[%s14358_s3 + $0xe0] sm:$0xff]  ;;  %v7013_v51 = vld [vmem:[%s10948_s10 + $0x106] ss:$0 sm:$0xff] }
 0xe02   : > { %v7135_v18 = vmul.f32 %v7083_v61, %v13635_v24  ;;  %10010 = vmatpush1.bf16.msra.mxu0 %v10009_v27  ;;  %v7709_v61 = vld [vmem:[%s14358_s3 + $0xf8] sm:$0xff] }
 0xe03   : > { %10012 = vmatprep.subr.bf16.mxu0 %v10011_v15  ;;  %v7011_v15 = vld [vmem:[%s10948_s10 + $0xd6] ss:$0 sm:$0xff] }
 0xe04   : > { %9501 = vmatprep.mubr.f32.mxu1 %v7135_v18  ;;  %v10015_v18 = vpack.c.bf16 %v7709_v61, %v7707_v20  ;;  %v7015_v61 = vld [vmem:[%s10948_s10 + $0x136] ss:$0 sm:$0xff] }
 0xe05   : > { %v13755_v4 = vpop.eup %10555 }
 0xe06   : > { %v13757_v46 = vpop.eup %10557  ;;  %v7085_v47 = vcombine.low %v13751_v21, %v13755_v4  ;;  %10014 = vmatpush1.bf16.msra.mxu0 %v10013_v16 }
 0xe07   : > { %v13761_v52 = vpop.eup %10559  ;;  %10016 = vmatprep.subr.bf16.mxu0 %v10015_v18  ;;  %v7016_v18 = vld [vmem:[%s10948_s10 + $0x14e] ss:$0 sm:$0xff] }
 0xe08   : > { %v13763_v19 = vpop.eup %10561  ;;  %v7086_v9 = vcombine.low %v13757_v46, %v13761_v52  ;;  %v7101_v8 = vrot.slane %v7085_v47, %v11271_v36  ;;  %v7708_v47 = vld [vmem:[%s14358_s3 + $0xf0] sm:$0xff] }
 0xe09   : > { %v13769_v33 = vpop.eup %10563 }
 0xe0a   : > { %v7087_v53 = vcombine.low %v13763_v19, %v13769_v33  ;;  %v7116_v59 = vcombine.high %v7094_v7, %v7101_v8  ;;  %v7108_v30 = vrot.slane %v7086_v9, %v11271_v36  ;;  %v10017_v9 = vpack.c.bf16 %v7708_v47, %v7706_v39  ;;  %v7300_v7 = vpop.permute.xlu0 %7299  ;;  %v7305_v8 = vpop.permute.xlu1 %7304 }
 0xe0b   : > { %v13862_v11 = vmul.f32 %v13718_v35, %v7300_v7  ;;  %v13865_v34 = vmul.f32 %v13720_v29, %v7305_v8  ;;  %v7012_v29 = vld [vmem:[%s10948_s10 + $0xee] ss:$0 sm:$0xff]  ;;  %v7017_v7 = vld [vmem:[%s10948_s10 + $0x166] ss:$0 sm:$0xff]  ;;  %v7018_v8 = vld [vmem:[%s10948_s10 + $0x17e] ss:$0 sm:$0xff] }
 0xe0c   : > { %v7115_v55 = vrot.slane %v7087_v53, %v11271_v36  ;;  %v7124_v32 = vrot.slane %v7116_v59, %v11271_v36  ;;  %10018 = vmatpush1.bf16.msra.mxu0 %v10017_v9 }
 0xe0e   : > { %v7117_v25 = vcombine.high %v7108_v30, %v7115_v55  ;;  %v7295_v53 = vpop.permute.xlu0 %7294  ;;  %v7310_v59 = vpop.permute.xlu1 %7309 }
 0xe0f   : > { %v13859_v38 = vmul.f32 %v13716_v17, %v7295_v53  ;;  %v13868_v27 = vmul.f32 %v13724_v3, %v7310_v59 }
 0xe10   : > { %v7131_v41 = vrot.slane %v7117_v25, %v11271_v36 }
 0xe12   : > { %v7132_v50 = vcombine.low %v7124_v32, %v7131_v41  ;;  %v7315_v30 = vpop.permute.xlu0 %7314  ;;  %v7320_v55 = vpop.permute.xlu1 %7319 }
 0xe13   : > { %v13871_v6 = vmul.f32 %v13726_v57, %v7315_v30  ;;  %v13874_v0 = vmul.f32 %v13730_v63, %v7320_v55 }
 0xe14   : > { %v7136_v31 = vmul.f32 %v7132_v50, %v13585_v49 }
 0xe16   : > { %9502 = vmatmul.mubr.f32.vlgmr.msra.gmra.mrb[12].mxu1 %v7136_v31  ;;  %v7340_v25 = vpop.permute.xlu0 %7339  ;;  %v7325_v32 = vpop.permute.xlu1 %7324 }
 0xe17   : > { %v13877_v17 = vmul.f32 %v13732_v54, %v7325_v32  ;;  %v7381_v57 = vmul.f32 %v13746_v2, %v7340_v25  ;;  %v7014_v54 = vld [vmem:[%s10948_s10 + $0x11e] ss:$0 sm:$0xff] }
 0xe1a   : > { %v7345_v41 = vpop.permute.xlu0 %7344  ;;  %v7330_v50 = vpop.permute.xlu1 %7329 }
 0xe1b   : > { %v13880_v35 = vmul.f32 %v13738_v44, %v7330_v50  ;;  %v7382_v63 = vmul.f32 %v13751_v21, %v7345_v41 }
 0xe1e   : > { %v7335_v31 = vpop.permute.xlu0 %7334  ;;  %v7350_v42 = vpop.permute.xlu1 %7349 }
 0xe1f   : > { %v7380_v16 = vmul.f32 %v13749_v1, %v7335_v31  ;;  %v7383_v20 = vmul.f32 %v13755_v4, %v7350_v42 }
 0xe22   : > { %v7355_v60 = vpop.permute.xlu0 %7354  ;;  %v7360_v26 = vpop.permute.xlu1 %7359 }
 0xe23   : > { %v7384_v44 = vmul.f32 %v13757_v46, %v7355_v60  ;;  %v7385_v39 = vmul.f32 %v13761_v52, %v7360_v26 }
 0xe26   : > { %v7365_v3 = vpop.permute.xlu0 %7364  ;;  %v7370_v12 = vpop.permute.xlu1 %7369 }
 0xe27   : > { %v7386_v47 = vmul.f32 %v13763_v19, %v7365_v3  ;;  %v7387_v9 = vmul.f32 %v13769_v33, %v7370_v12 }
 0xee9   : > { %v9503_v1 = vpop.f32.mrb[12].mxu1 }
 0xeea   : > { %v7237_v53 = vrot.slane %v9503_v1, 1  ;;  %v7238_v2 = vrot.slane %v9503_v1, 2  ;;  %v7239_v59 = vrot.slane %v9503_v1, 3  ;;  %v7240_v21 = vrot.slane %v9503_v1, 4  ;;  %v13898_v30 = vpop.f32.mrb[13].mxu1 }
 0xeeb   : > { %v7241_v4 = vrot.slane %v9503_v1, 5  ;;  %v7242_v55 = vrot.slane %v9503_v1, 6  ;;  %v7243_v25 = vrot.slane %v9503_v1, 7  ;;  %v7268_v32 = vadd.f32 %v9503_v1, %v7011_v15 }
 0xeec   : > { %v7269_v46 = vadd.f32 %v7237_v53, %v7012_v29  ;;  %v7270_v41 = vadd.f32 %v7238_v2, %v7013_v51  ;;  %v7271_v52 = vadd.f32 %v7239_v59, %v7014_v54  ;;  %v7272_v50 = vadd.f32 %v7240_v21, %v7015_v61  ;;  %v7004_v21 = vld [vmem:[%s10948_s10 + $0x2e] ss:$0 sm:$0xff] }
 0xeed   : > { %v7273_v19 = vadd.f32 %v7241_v4, %v7016_v18  ;;  %v7274_v31 = vadd.f32 %v7242_v55, %v7017_v7  ;;  %v7275_v33 = vadd.f32 %v7243_v25, %v7018_v8  ;;  %v7284_v42 = vmax.f32 %v7268_v32, 0.0 }
 0xeee   : > { %v7285_v60 = vmax.f32 %v7269_v46, 0.0  ;;  %v7286_v26 = vmax.f32 %v7270_v41, 0.0  ;;  %v7287_v3 = vmax.f32 %v7271_v52, 0.0  ;;  %v7288_v12 = vmax.f32 %v7272_v50, 0.0  ;;  %v7010_v46 = vld [vmem:[%s10948_s10 + $0xbe] ss:$0 sm:$0xff] }
 0xeef   : > { %v7289_v45 = vmax.f32 %v7273_v19, 0.0  ;;  %v7290_v14 = vmax.f32 %v7274_v31, 0.0  ;;  %v7291_v43 = vmax.f32 %v7275_v33, 0.0  ;;  %v7426_v23 = vsub.f32 %v7284_v42, %v13585_v49 }
 0xef0   : > { %v7427_v15 = vsub.f32 %v7285_v60, %v7395_v48  ;;  %v7428_v29 = vsub.f32 %v7286_v26, %v7396_v22  ;;  %v7429_v51 = vsub.f32 %v7287_v3, %v7397_v56  ;;  %v7430_v54 = vsub.f32 %v7288_v12, %v7398_v10  ;;  %v7003_v56 = vld [vmem:[%s10948_s10 + $0x16] ss:$0 sm:$0xff] }
 0xef1   : > { %v7431_v61 = vsub.f32 %v7289_v45, %v7399_v28  ;;  %v7432_v18 = vsub.f32 %v7290_v14, %v7400_v40  ;;  %v7433_v48 = vsub.f32 %v7291_v43, %v7401_v5  ;;  %v7442_v7 = vmul.f32 %v7426_v23, %v7380_v16  ;;  %v7005_v28 = vld [vmem:[%s10948_s10 + $0x46] ss:$0 sm:$0xff]  ;;  %v7006_v45 = vld [vmem:[%s10948_s10 + $0x5e] ss:$0 sm:$0xff]  ;;  %v7007_v16 = vld [vmem:[%s10948_s10 + $0x76] ss:$0 sm:$0xff] }
 0xef2   : > { %v7443_v8 = vmul.f32 %v7427_v15, %v7381_v57  ;;  %v7444_v22 = vmul.f32 %v7428_v29, %v7382_v63  ;;  %v7445_v1 = vmul.f32 %v7429_v51, %v7383_v20  ;;  %v7446_v53 = vmul.f32 %v7430_v54, %v7384_v44  ;;  %v7008_v44 = vld [vmem:[%s10948_s10 + $0x8e] ss:$0 sm:$0xff] }
 0xef3   : > { %v7447_v2 = vmul.f32 %v7431_v61, %v7385_v39  ;;  %v7448_v59 = vmul.f32 %v7432_v18, %v7386_v47  ;;  %v7449_v10 = vmul.f32 %v7433_v48, %v7387_v9  ;;  %v7230_v40 = vrot.slane %v13898_v30, 1  ;;  %v7009_v9 = vld [vmem:[%s10948_s10 + $0xa6] ss:$0 sm:$0xff] }
 0xef4   : > { %v7480_v14 = vrot.slane %v7443_v8, 7  ;;  %v7482_v5 = vrot.slane %v7444_v22, 6  ;;  %v7484_v23 = vrot.slane %v7445_v1, 5  ;;  %v7486_v43 = vrot.slane %v7446_v53, 4 }
 0xef5   : > { %v7488_v57 = vrot.slane %v7447_v2, 3  ;;  %v7490_v63 = vrot.slane %v7448_v59, 2  ;;  %v7492_v20 = vrot.slane %v7449_v10, 1  ;;  %v7231_v39 = vrot.slane %v13898_v30, 2 }
 0xef6   : > { %v7481_v47 = vsel %vm1364_vm0, %v7480_v14, %v7442_v7  ;;  %v7232_v4 = vrot.slane %v13898_v30, 3  ;;  %v7233_v55 = vrot.slane %v13898_v30, 4  ;;  %v7234_v25 = vrot.slane %v13898_v30, 5 }
 0xef7   : > { %v7483_v32 = vsel %vm1367_vm1, %v7482_v5, %v7481_v47  ;;  %v7235_v41 = vrot.slane %v13898_v30, 6  ;;  %v7236_v52 = vrot.slane %v13898_v30, 7  ;;  %v7260_v50 = vadd.f32 %v13898_v30, %v7003_v56 }
 0xef8   : > { %v7485_v19 = vsel %vm1370_vm2, %v7484_v23, %v7483_v32  ;;  %v7261_v31 = vadd.f32 %v7230_v40, %v7004_v21  ;;  %v7262_v33 = vadd.f32 %v7231_v39, %v7005_v28  ;;  %v7263_v42 = vadd.f32 %v7232_v4, %v7006_v45 }
 0xef9   : > { %v7487_v60 = vsel %vm1373_vm3, %v7486_v43, %v7485_v19  ;;  %v7264_v26 = vadd.f32 %v7233_v55, %v7007_v16  ;;  %v7265_v3 = vadd.f32 %v7234_v25, %v7008_v44  ;;  %v7266_v12 = vadd.f32 %v7235_v41, %v7009_v9 }
 0xefa   : > { %v7489_v15 = vsel %vm1376_vm4, %v7488_v57, %v7487_v60  ;;  %v7267_v29 = vadd.f32 %v7236_v52, %v7010_v46  ;;  %v7276_v51 = vmax.f32 %v7260_v50, 0.0  ;;  %v7277_v54 = vmax.f32 %v7261_v31, 0.0 }
 0xefb   : > { %v7491_v61 = vsel %vm1379_vm5, %v7490_v63, %v7489_v15  ;;  %v7278_v18 = vmax.f32 %v7262_v33, 0.0  ;;  %v7279_v48 = vmax.f32 %v7263_v42, 0.0  ;;  %v7280_v30 = vmax.f32 %v7264_v26, 0.0 }
 0xefc   : > { %v7493_v7 = vsel %vm1382_vm6, %v7492_v20, %v7491_v61  ;;  %v7281_v8 = vmax.f32 %v7265_v3, 0.0  ;;  %v7282_v22 = vmax.f32 %v7266_v12, 0.0  ;;  %v7283_v1 = vmax.f32 %v7267_v29, 0.0 }
 0xefd   : > { %v13939_v53 = vadd.f32 %v7493_v7, %v13585_v49  ;;  %v7418_v56 = vsub.f32 %v7276_v51, %v13635_v24  ;;  %v7419_v2 = vsub.f32 %v7277_v54, %v7388_v58  ;;  %v7420_v59 = vsub.f32 %v7278_v18, %v7389_v62 }
 0xefe   : > { %v7421_v10 = vsub.f32 %v7279_v48, %v7390_v37  ;;  %v14502_v21 = vrot.slane %v13635_v24, 4  ;;  %v14503_v45 = vrot.slane %v13635_v24, 5  ;;  %v14504_v49 = vrot.slane %v13635_v24, 6 }
 0xeff   : > { %v7549_v5 = vcombine.high %v13939_v53, %v13939_v53  ;;  %v7556_v58 = vrot.slane %v13939_v53, %v11271_v36  ;;  %v14505_v62 = vrot.slane %v13635_v24, 7  ;;  %v7434_v37 = vmul.f32 %v7418_v56, %v13859_v38  ;;  %v8154_v56 = vld [vmem:[%s14359_s4 + $0x8] sm:$0xff] }
 0xf00   : > { %v7422_v28 = vsub.f32 %v7280_v30, %v14502_v21  ;;  %v7423_v40 = vsub.f32 %v7281_v8, %v14503_v45  ;;  %v7424_v14 = vsub.f32 %v7282_v22, %v14504_v49  ;;  %v7435_v43 = vmul.f32 %v7419_v2, %v13862_v11  ;;  %v8158_v45 = vld [vmem:[%s14359_s4 + $0x28] sm:$0xff]  ;;  %v8159_v49 = vld [vmem:[%s14359_s4 + $0x30] sm:$0xff] }
 0xf01   : > { %v7425_v23 = vsub.f32 %v7283_v1, %v14505_v62  ;;  %v7436_v16 = vmul.f32 %v7420_v59, %v13865_v34  ;;  %v7437_v57 = vmul.f32 %v7421_v10, %v13868_v27  ;;  %v7563_v20 = vrot.slane %v7549_v5, %v11271_v36  ;;  %9067 = vst.sshfl [vmem:[%s10952_s12 + $0x46] sm:$0x1 pattern:$0x73625140] %v7556_v58  ;;  %v8153_v1 = vld [vmem:[%s14359_s4] sm:$0xff]  ;;  %v8155_v59 = vld [vmem:[%s14359_s4 + $0x10] sm:$0xff] }
 0xf02   : > { %v7438_v63 = vmul.f32 %v7422_v28, %v13871_v6  ;;  %v7564_v44 = vcombine.high %v7556_v58, %v7556_v58  ;;  %v7572_v39 = vrot.slane %v7556_v58, %v11271_v36  ;;  %v7439_v47 = vmul.f32 %v7423_v40, %v13874_v0  ;;  %v8156_v10 = vld [vmem:[%s14359_s4 + $0x18] sm:$0xff]  ;;  %v8157_v28 = vld [vmem:[%s14359_s4 + $0x20] sm:$0xff]  ;;  %v8162_v62 = vld [vmem:[%s14359_s4 + $0x48] sm:$0xff] }
 0xf03   : > { %v7440_v38 = vmul.f32 %v7424_v14, %v13877_v17  ;;  %v7441_v11 = vmul.f32 %v7425_v23, %v13880_v35  ;;  %v7466_v34 = vrot.slane %v7435_v43, 7  ;;  %v7468_v9 = vrot.slane %v7436_v16, 6  ;;  %9069 = vst.sshfl [vmem:[%s10952_s12 + $0x66] sm:$0x1 pattern:$0x73625140] %v7563_v20 }
 0xf04   : > { %v7565_v27 = vcombine.high %v7563_v20, %v7563_v20  ;;  %v7579_v4 = vrot.slane %v7563_v20, %v11271_v36  ;;  %v7586_v6 = vrot.slane %v7564_v44, %v11271_v36  ;;  %v7594_v55 = vcombine.high %v7572_v39, %v7572_v39  ;;  %9068 = vst.sshfl [vmem:[%s10952_s12 + $0x4e] sm:$0x1 pattern:$0x73625140] %v7564_v44  ;;  %v8160_v14 = vld [vmem:[%s14359_s4 + $0x38] sm:$0xff]  ;;  %v8161_v58 = vld [vmem:[%s14359_s4 + $0x40] sm:$0xff] }
 0xf05   : > { %v7467_v0 = vsel %vm1364_vm0, %v7466_v34, %v7434_v37  ;;  %v7470_v25 = vrot.slane %v7437_v57, 5  ;;  %v7472_v17 = vrot.slane %v7438_v63, 4  ;;  %v7474_v50 = vrot.slane %v7439_v47, 3  ;;  %v8163_v37 = vld [vmem:[%s14359_s4 + $0x50] sm:$0xff]  ;;  %v8164_v43 = vld [vmem:[%s14359_s4 + $0x58] sm:$0xff]  ;;  %v8165_v57 = vld [vmem:[%s14359_s4 + $0x60] sm:$0xff] }
 0xf06   : > { %v7593_v35 = vrot.slane %v7565_v27, %v11271_v36  ;;  %v7595_v32 = vcombine.high %v7579_v4, %v7579_v4  ;;  %v7596_v46 = vcombine.high %v7586_v6, %v7586_v6  ;;  %7624 = vst [vmem:[%s10952_s12 + $0x56] sm:$0x1] %v7594_v55  ;;  %9070 = vst.sshfl [vmem:[%s10952_s12 + $0x6e] sm:$0x1 pattern:$0x73625140] %v7565_v27 }
 0xf07   : > { %v7469_v41 = vsel %vm1367_vm1, %v7468_v9, %v7467_v0  ;;  %v7476_v33 = vrot.slane %v7440_v38, 2  ;;  %v7478_v60 = vrot.slane %v7441_v11, 1  ;;  %v10019_v2 = vpack.c.bf16 %v8154_v56, %v8153_v1  ;;  %v8166_v63 = vld [vmem:[%s14359_s4 + $0x68] sm:$0xff]  ;;  %v8167_v20 = vld [vmem:[%s14359_s4 + $0x70] sm:$0xff]  ;;  %v8168_v39 = vld [vmem:[%s14359_s4 + $0x78] sm:$0xff] }
 0xf08   : > { %v7471_v52 = vsel %vm1370_vm2, %v7470_v25, %v7469_v41  ;;  %v7597_v19 = vcombine.high %v7593_v35, %v7593_v35  ;;  %7625 = vst [vmem:[%s10952_s12 + $0x5e] sm:$0x1] %v7596_v46  ;;  %7628 = vst [vmem:[%s10952_s12 + $0x76] sm:$0x1] %v7595_v32  ;;  %v10023_v21 = vpack.c.bf16 %v8156_v10, %v8155_v59 }
 0xf09   : > { %v7473_v31 = vsel %vm1373_vm3, %v7472_v17, %v7471_v52  ;;  %10020 = vmatprep.subr.bf16.mxu1 %v10019_v2  ;;  %v10027_v40 = vpack.c.bf16 %v8158_v45, %v8157_v28  ;;  %v10031_v5 = vpack.c.bf16 %v8160_v14, %v8159_v49  ;;  %v10035_v23 = vpack.c.bf16 %v8162_v62, %v8161_v58  ;;  %v9071_v0 = vld [vmem:[%s10948_s10 + $0x7] ss:$8 sm:$0x3]  ;;  %v9073_v52 = vld [vmem:[%s10948_s10 + $0x37] ss:$8 sm:$0x3] }
 0xf0a   : > { %v7475_v42 = vsel %vm1376_vm4, %v7474_v50, %v7473_v31  ;;  %7629 = vst [vmem:[%s10952_s12 + $0x7e] sm:$0x1] %v7597_v19  ;;  %10022 = vmatpush3.bf16.msra.mxu1 %v10019_v2  ;;  %v10039_v16 = vpack.c.bf16 %v8164_v43, %v8163_v37  ;;  %v10043_v44 = vpack.c.bf16 %v8166_v63, %v8165_v57  ;;  %v9075_v25 = vld [vmem:[%s10948_s10 + $0x67] ss:$8 sm:$0x3] }
 0xf0b   : > { %v7477_v26 = vsel %vm1379_vm5, %v7476_v33, %v7475_v42  ;;  %10024 = vmatprep.subr.bf16.mxu1 %v10023_v21  ;;  %v10047_v47 = vpack.c.bf16 %v8168_v39, %v8167_v20  ;;  %v9072_v41 = vld [vmem:[%s10948_s10 + $0x1f] ss:$8 sm:$0x3] }
 0xf0c   : > { %v7479_v3 = vsel %vm1382_vm6, %v7478_v60, %v7477_v26  ;;  %v9076_v31 = vld [vmem:[%s10948_s10 + $0x7f] ss:$8 sm:$0x3] }
 0xf0d   : > { %v13989_v12 = vadd.f32 %v7479_v3, %v13635_v24  ;;  %v9077_v33 = vld [vmem:[%s10948_s10 + $0x97] ss:$8 sm:$0x3]  ;;  %v9079_v10 = vld [vmem:[%s10948_s10 + $0xc7] ss:$8 sm:$0x3] }
 0xf0e   : > { %10026 = vmatpush3.bf16.msra.mxu1 %v10023_v21  ;;  %v9080_v14 = vld [vmem:[%s10948_s10 + $0xdf] ss:$8 sm:$0x3] }
 0xf0f   : > { %v7500_v15 = vcombine.high %v13989_v12, %v13989_v12  ;;  %v7507_v29 = vrot.slane %v13989_v12, %v11271_v36  ;;  %7775 = vmatmul.mubr.f32.vlgmr.msra.gmra.mrb[28].mxu0 %v13989_v12  ;;  %10028 = vmatprep.subr.bf16.mxu1 %v10027_v40 }
 0xf10   : > { %7780 = vmatprep.mubr.f32.mxu0 %v14417_v13 }
 0xf11   : > { %v7514_v51 = vrot.slane %v7500_v15, %v11271_v36  ;;  %v7515_v54 = vcombine.high %v7507_v29, %v7507_v29  ;;  %v7523_v61 = vrot.slane %v7507_v29, %v11271_v36  ;;  %9063 = vst.sshfl [vmem:[%s10952_s12 + $0x6] sm:$0x1 pattern:$0x73625140] %v7507_v29 }
 0xf12   : > { %10030 = vmatpush3.bf16.msra.mxu1 %v10027_v40  ;;  %v9074_v15 = vld [vmem:[%s10948_s10 + $0x4f] ss:$8 sm:$0x3] }
 0xf13   : > { %v7516_v24 = vcombine.high %v7514_v51, %v7514_v51  ;;  %v7530_v18 = vrot.slane %v7514_v51, %v11271_v36  ;;  %v7537_v48 = vrot.slane %v7515_v54, %v11271_v36  ;;  %v7545_v30 = vcombine.high %v7523_v61, %v7523_v61  ;;  %9064 = vst.sshfl [vmem:[%s10952_s12 + $0xe] sm:$0x1 pattern:$0x73625140] %v7515_v54 }
 0xf14   : > { %9065 = vst.sshfl [vmem:[%s10952_s12 + $0x26] sm:$0x1 pattern:$0x73625140] %v7514_v51  ;;  %7781 = vmatmul.mubr.f32.gmra.mrb[30].mxu0 %v13939_v53  ;;  %10032 = vmatprep.subr.bf16.mxu1 %v10031_v5 }
 0xf15   : > { %v7544_v13 = vrot.slane %v7516_v24, %v11271_v36  ;;  %v7546_v7 = vcombine.high %v7530_v18, %v7530_v18  ;;  %v7547_v8 = vcombine.high %v7537_v48, %v7537_v48  ;;  %7616 = vst [vmem:[%s10952_s12 + $0x16] sm:$0x1] %v7545_v30  ;;  %9066 = vst.sshfl [vmem:[%s10952_s12 + $0x2e] sm:$0x1 pattern:$0x73625140] %v7516_v24 }
 0xf16   : > { %10034 = vmatpush3.bf16.msra.mxu1 %v10031_v5  ;;  %v9078_v29 = vld [vmem:[%s10948_s10 + $0xaf] ss:$8 sm:$0x3] }
 0xf17   : > { %v7548_v22 = vcombine.high %v7544_v13, %v7544_v13  ;;  %7617 = vst [vmem:[%s10952_s12 + $0x1e] sm:$0x1] %v7547_v8  ;;  %7620 = vst [vmem:[%s10952_s12 + $0x36] sm:$0x1] %v7546_v7  ;;  %10036 = vmatprep.subr.bf16.mxu1 %v10035_v23 }
 0xf19   : > { %7621 = vst [vmem:[%s10952_s12 + $0x3e] sm:$0x1] %v7548_v22 }
 0xf1a   : > { %10038 = vmatpush3.bf16.msra.mxu1 %v10035_v23  ;;  %v9081_v23 = vld [vmem:[%s10948_s10 + $0xf7] ss:$8 sm:$0x3] }
 0xf1b   : > { %10040 = vmatprep.subr.bf16.mxu1 %v10039_v16 }
 0xf1e   : > { %10042 = vmatpush3.bf16.msra.mxu1 %v10039_v16 }
 0xf1f   : > { %10044 = vmatprep.subr.bf16.mxu1 %v10043_v44 }
 0xf22   : > { %10046 = vmatpush3.bf16.msra.mxu1 %v10043_v44 }
 0xf23   : > { %10048 = vmatprep.subr.bf16.mxu1 %v10047_v47 }
 0xf26   : > { %10050 = vmatpush3.bf16.msra.mxu1 %v10047_v47 }
 0xfe2   : > { %v7776_v38 = vpop.f32.mrb[28].mxu0 }
 0xfe3   : > { %v7778_v11 = vpop.f32.mrb[29].mxu0 }
 0xfe4   : > { %v7791_v34 = vcombine.low %v7776_v38, %v7778_v11  ;;  %v7792_v9 = vcombine.high %v7776_v38, %v7778_v11 }
 0xfe6   : > { %v7799_v27 = vrot.slane %v7791_v34, %v11271_v36  ;;  %v7806_v4 = vrot.slane %v7792_v9, %v11271_v36  ;;  %v9082_v9 = vld [vmem:[%s10948_s10 + $0x10f] ss:$8 sm:$0x3] }
 0xfe7   : > { %v7782_v6 = vpop.f32.mrb[30].mxu0 }
 0xfe8   : > { %v7784_v55 = vpop.f32.mrb[31].mxu0  ;;  %v7807_v17 = vcombine.high %v7799_v27, %v7799_v27  ;;  %v7808_v35 = vcombine.high %v7806_v4, %v7806_v4  ;;  %v7815_v32 = vrot.slane %v7799_v27, %v11271_v36  ;;  %v7822_v46 = vrot.slane %v7806_v4, %v11271_v36 }
 0xfe9   : > { %v7841_v50 = vcombine.low %v7782_v6, %v7784_v55  ;;  %v7842_v19 = vcombine.high %v7782_v6, %v7784_v55  ;;  %v9083_v6 = vld [vmem:[%s10948_s10 + $0x127] ss:$8 sm:$0x3] }
 0xfea   : > { %v7829_v42 = vrot.slane %v7807_v17, %v11271_v36  ;;  %v7836_v60 = vrot.slane %v7808_v35, %v11271_v36  ;;  %v7837_v26 = vcombine.high %v7815_v32, %v7815_v32  ;;  %v7838_v3 = vcombine.high %v7822_v46, %v7822_v46 }
 0xfeb   : > { %v7907_v51 = vadd.f32 %v9071_v0, %v7815_v32  ;;  %v7911_v54 = vadd.f32 %v9075_v25, %v7822_v46  ;;  %v7849_v61 = vrot.slane %v7841_v50, %v11271_v36  ;;  %v7856_v40 = vrot.slane %v7842_v19, %v11271_v36  ;;  %v9084_v25 = vld [vmem:[%s10948_s10 + $0x13f] ss:$8 sm:$0x3] }
 0xfec   : > { %v7839_v24 = vcombine.high %v7829_v42, %v7829_v42  ;;  %v7840_v18 = vcombine.high %v7836_v60, %v7836_v60  ;;  %v7908_v48 = vadd.f32 %v9072_v41, %v7829_v42  ;;  %v7909_v30 = vadd.f32 %v9073_v52, %v7837_v26  ;;  %v9085_v46 = vld [vmem:[%s10948_s10 + $0x157] ss:$8 sm:$0x3] }
 0xfed   : > { %v7912_v13 = vadd.f32 %v9076_v31, %v7836_v60  ;;  %v7913_v7 = vadd.f32 %v9077_v33, %v7838_v3  ;;  %v9087_v8 = vmul.f32 -1.442695, %v7907_v51  ;;  %v9091_v59 = vmul.f32 -1.442695, %v7911_v54 }
 0xfee   : > { %v7910_v22 = vadd.f32 %v9074_v15, %v7839_v24  ;;  %v7914_v1 = vadd.f32 %v9078_v29, %v7840_v18  ;;  %v9088_v56 = vmul.f32 -1.442695, %v7908_v48  ;;  %v9089_v2 = vmul.f32 -1.442695, %v7909_v30 }
 0xfef   : > { %10565 = vpow2.f32 %v9087_v8  ;;  %v7857_v21 = vcombine.high %v7849_v61, %v7849_v61  ;;  %v9092_v45 = vmul.f32 -1.442695, %v7912_v13  ;;  %v9093_v49 = vmul.f32 -1.442695, %v7913_v7 }
 0xff0   : > { %10567 = vpow2.f32 %v9088_v56  ;;  %v9090_v28 = vmul.f32 -1.442695, %v7910_v22  ;;  %v7865_v5 = vrot.slane %v7849_v61, %v11271_v36  ;;  %v9094_v62 = vmul.f32 -1.442695, %v7914_v1 }
 0xff1   : > { %10569 = vpow2.f32 %v9089_v2  ;;  %v7879_v58 = vrot.slane %v7857_v21, %v11271_v36  ;;  %v7858_v43 = vcombine.high %v7856_v40, %v7856_v40  ;;  %v7872_v20 = vrot.slane %v7856_v40, %v11271_v36  ;;  %v9086_v31 = vld [vmem:[%s10948_s10 + $0x16f] ss:$8 sm:$0x3] }
 0xff2   : > { %10571 = vpow2.f32 %v9090_v28  ;;  %v7887_v37 = vcombine.high %v7865_v5, %v7865_v5  ;;  %v7915_v16 = vadd.f32 %v9079_v10, %v7865_v5 }
 0xff3   : > { %10573 = vpow2.f32 %v9091_v59  ;;  %v7916_v57 = vadd.f32 %v9080_v14, %v7879_v58  ;;  %v7886_v38 = vrot.slane %v7858_v43, %v11271_v36  ;;  %v7889_v11 = vcombine.high %v7879_v58, %v7879_v58 }
 0xff4   : > { %10575 = vpow2.f32 %v9092_v45  ;;  %v7917_v63 = vadd.f32 %v9081_v23, %v7887_v37  ;;  %v9095_v44 = vmul.f32 -1.442695, %v7915_v16  ;;  %v7888_v17 = vcombine.high %v7872_v20, %v7872_v20 }
 0xff5   : > { %10577 = vpow2.f32 %v9093_v49  ;;  %v9096_v39 = vmul.f32 -1.442695, %v7916_v57  ;;  %v7890_v41 = vcombine.high %v7886_v38, %v7886_v38  ;;  %v7918_v52 = vadd.f32 %v9082_v9, %v7889_v11 }
 0xff6   : > { %10579 = vpow2.f32 %v9094_v62  ;;  %v9097_v47 = vmul.f32 -1.442695, %v7917_v63  ;;  %v7919_v33 = vadd.f32 %v9083_v6, %v7872_v20  ;;  %v7920_v26 = vadd.f32 %v9084_v25, %v7886_v38 }
 0xff7   : > { %10581 = vpow2.f32 %v9095_v44  ;;  %v7921_v29 = vadd.f32 %v9085_v46, %v7888_v17  ;;  %v7922_v61 = vadd.f32 %v9086_v31, %v7890_v41  ;;  %v9098_v24 = vmul.f32 -1.442695, %v7918_v52 }
 0xff8   : > { %10583 = vpow2.f32 %v9096_v39  ;;  %v9099_v48 = vmul.f32 -1.442695, %v7919_v33  ;;  %v9100_v30 = vmul.f32 -1.442695, %v7920_v26 }
 0xff9   : > { %v10566_v34 = vpop.eup %10565  ;;  %10585 = vpow2.f32 %v9097_v47  ;;  %v9101_v7 = vmul.f32 -1.442695, %v7921_v29  ;;  %v9102_v22 = vmul.f32 -1.442695, %v7922_v61 }
 0xffa   : > { %v10568_v27 = vpop.eup %10567  ;;  %v7971_v4 = vadd.f32 1.0, %v10566_v34 }
 0xffb   : > { %v10570_v55 = vpop.eup %10569  ;;  %v7972_v0 = vadd.f32 1.0, %v10568_v27 }
 0xffc   : > { %v10572_v35 = vpop.eup %10571  ;;  %v7973_v32 = vadd.f32 1.0, %v10570_v55  ;;  %10587 = vrcp.f32 %v7971_v4 }
 0xffd   : > { %v10574_v50 = vpop.eup %10573  ;;  %v7974_v19 = vadd.f32 1.0, %v10572_v35  ;;  %10589 = vrcp.f32 %v7972_v0 }
 0xffe   : > { %v10576_v42 = vpop.eup %10575  ;;  %v7975_v60 = vadd.f32 1.0, %v10574_v50  ;;  %10591 = vrcp.f32 %v7973_v32 }
 0xfff   : > { %v10578_v3 = vpop.eup %10577  ;;  %v7976_v15 = vadd.f32 1.0, %v10576_v42  ;;  %10593 = vrcp.f32 %v7974_v19 }
0x1000   : > { %v10580_v51 = vpop.eup %10579  ;;  %v7977_v54 = vadd.f32 1.0, %v10578_v3  ;;  %10595 = vrcp.f32 %v7975_v60 }
0x1001   : > { %v7978_v18 = vadd.f32 1.0, %v10580_v51  ;;  %10597 = vrcp.f32 %v7976_v15  ;;  %v10582_v13 = vpop.eup %10581 }
0x1002   : > { %10599 = vrcp.f32 %v7977_v54  ;;  %v10584_v8 = vpop.eup %10583  ;;  %v7979_v14 = vadd.f32 1.0, %v10582_v13 }
0x1003   : > { %10601 = vrcp.f32 %v7978_v18  ;;  %v10586_v1 = vpop.eup %10585  ;;  %v7980_v28 = vadd.f32 1.0, %v10584_v8  ;;  %v8356_v8 = vpop.permute.xlu1 %8355 }
0x1004   : > { %10603 = vpow2.f32 %v9098_v24  ;;  %v7981_v58 = vadd.f32 1.0, %v10586_v1 }
0x1005   : > { %10605 = vpow2.f32 %v9099_v48 }
0x1006   : > { %v14087_v56 = vpop.eup %10587  ;;  %10607 = vpow2.f32 %v9100_v30 }
0x1007   : > { %v14089_v2 = vpop.eup %10589  ;;  %10609 = vpow2.f32 %v9101_v7  ;;  %v8316_v7 = vpop.permute.xlu0 %8315 }
0x1008   : > { %v14091_v59 = vpop.eup %10591  ;;  %10611 = vpow2.f32 %v9102_v22  ;;  %v8051_v10 = vcombine.low %v14087_v56, %v14089_v2  ;;  %v8361_v1 = vpop.permute.xlu1 %8360 }
0x1009   : > { %v14095_v21 = vpop.eup %10593  ;;  %10613 = vrcp.f32 %v7980_v28 }
0x100a   : > { %v14097_v45 = vpop.eup %10595  ;;  %v8052_v40 = vcombine.low %v14091_v59, %v14095_v21  ;;  %v8061_v23 = vrot.slane %v8051_v10, %v11271_v36  ;;  %10615 = vrcp.f32 %v7979_v14 }
0x100b   : > { %v14101_v49 = vpop.eup %10597  ;;  %10617 = vrcp.f32 %v7981_v58  ;;  %v8321_v22 = vpop.permute.xlu0 %8320 }
0x100c   : > { %v14103_v5 = vpop.eup %10599  ;;  %v8053_v62 = vcombine.low %v14097_v45, %v14101_v49  ;;  %v8068_v37 = vrot.slane %v8052_v40, %v11271_v36  ;;  %v8326_v28 = vpop.permute.xlu1 %8325 }
0x100d   : > { %v14109_v43 = vpop.eup %10601 }
0x100e   : > { %v10604_v16 = vpop.eup %10603  ;;  %v8054_v57 = vcombine.low %v14103_v5, %v14109_v43  ;;  %v8083_v63 = vcombine.high %v8061_v23, %v8068_v37  ;;  %v8075_v38 = vrot.slane %v8053_v62, %v11271_v36 }
0x100f   : > { %v10606_v20 = vpop.eup %10605  ;;  %v7982_v44 = vadd.f32 1.0, %v10604_v16  ;;  %v8311_v10 = vpop.permute.xlu0 %8310 }
0x1010   : > { %v10608_v39 = vpop.eup %10607  ;;  %v7983_v47 = vadd.f32 1.0, %v10606_v20  ;;  %v8082_v11 = vrot.slane %v8054_v57, %v11271_v36  ;;  %v8091_v55 = vrot.slane %v8083_v63, %v11271_v36  ;;  %v8366_v14 = vpop.permute.xlu1 %8365  ;;  %v8411_v63 = vrot.slane %v13939_v53, 1 }
0x1011   : > { %v10610_v34 = vpop.eup %10609  ;;  %v7984_v9 = vadd.f32 1.0, %v10608_v39  ;;  %10619 = vrcp.f32 %v7982_v44  ;;  %v8412_v20 = vrot.slane %v13939_v53, 2  ;;  %v8413_v44 = vrot.slane %v13939_v53, 3 }
0x1012   : > { %v10612_v27 = vpop.eup %10611  ;;  %v7985_v4 = vadd.f32 1.0, %v10610_v34  ;;  %10621 = vrcp.f32 %v7983_v47  ;;  %v8084_v6 = vcombine.high %v8075_v38, %v8082_v11  ;;  %v8414_v39 = vrot.slane %v13939_v53, 4 }
0x1013   : > { %v7986_v0 = vadd.f32 1.0, %v10612_v27  ;;  %10623 = vrcp.f32 %v7984_v9  ;;  %v14117_v35 = vpop.eup %10613  ;;  %v8351_v40 = vpop.permute.xlu0 %8350  ;;  %v8415_v47 = vrot.slane %v13939_v53, 5  ;;  %v8416_v38 = vrot.slane %v13939_v53, 6 }
0x1014   : > { %10625 = vrcp.f32 %v7985_v4  ;;  %v8098_v25 = vrot.slane %v8084_v6, %v11271_v36  ;;  %v14120_v46 = vpop.eup %10615  ;;  %v8371_v62 = vpop.permute.xlu1 %8370  ;;  %v8417_v11 = vrot.slane %v13939_v53, 7  ;;  %v8404_v34 = vrot.slane %v13989_v12, 1 }
0x1015   : > { %10627 = vrcp.f32 %v7986_v0  ;;  %v14122_v41 = vpop.eup %10617  ;;  %v8100_v52 = vcombine.low %v14120_v46, %v14117_v35  ;;  %v8405_v9 = vrot.slane %v13989_v12, 2  ;;  %v8406_v27 = vrot.slane %v13989_v12, 3 }
0x1016   : > { %v8099_v17 = vcombine.low %v8091_v55, %v8098_v25  ;;  %v8407_v4 = vrot.slane %v13989_v12, 4 }
0x1017   : > { %v8110_v26 = vrot.slane %v8100_v52, %v11271_v36  ;;  %v8331_v58 = vpop.permute.xlu0 %8330  ;;  %v14167_v52 = vmul.f32 %v14091_v59, %v8321_v22 }
0x1018   : > { %v8151_v32 = vmul.f32 %v8099_v17, %v13989_v12  ;;  %v8376_v37 = vpop.permute.xlu1 %8375  ;;  %v14161_v17 = vmul.f32 %v14087_v56, %v8311_v10 }
0x101a   : > { %9536 = vmatprep.mubr.f32.mxu1 %v8151_v32  ;;  %v14164_v32 = vmul.f32 %v14089_v2, %v8316_v7  ;;  %v8034_v7 = vld [vmem:[%s10948_s10 + $0x17f] ss:$0 sm:$0xff] }
0x101b   : > { %v14126_v50 = vpop.eup %10619  ;;  %v8336_v23 = vpop.permute.xlu0 %8335 }
0x101c   : > { %v14128_v19 = vpop.eup %10621  ;;  %v8101_v31 = vcombine.low %v14122_v41, %v14126_v50  ;;  %v8381_v57 = vpop.permute.xlu1 %8380  ;;  %v14179_v56 = vmul.f32 %v14101_v49, %v8336_v23  ;;  %v8032_v49 = vld [vmem:[%s10948_s10 + $0x14f] ss:$0 sm:$0xff] }
0x101d   : > { %v14132_v33 = vpop.eup %10623 }
0x101e   : > { %v14134_v42 = vpop.eup %10625  ;;  %v8102_v60 = vcombine.low %v14128_v19, %v14132_v33  ;;  %v8117_v3 = vrot.slane %v8101_v31, %v11271_v36  ;;  %v14170_v31 = vmul.f32 %v14095_v21, %v8326_v28  ;;  %v8396_v21 = vmul.f32 %v14120_v46, %v8351_v40 }
0x101f   : > { %v10628_v15 = vpop.eup %10627  ;;  %v8341_v16 = vpop.permute.xlu0 %8340 }
0x1020   : > { %v8103_v29 = vcombine.low %v14134_v42, %v10628_v15  ;;  %v8132_v51 = vcombine.high %v8110_v26, %v8117_v3  ;;  %v8124_v54 = vrot.slane %v8102_v60, %v11271_v36  ;;  %v14173_v60 = vmul.f32 %v14097_v45, %v8331_v58  ;;  %v8027_v26 = vld [vmem:[%s10948_s10 + $0xd7] ss:$0 sm:$0xff]  ;;  %v8028_v3 = vld [vmem:[%s10948_s10 + $0xef] ss:$0 sm:$0xff] }
0x1021   : > { %v14182_v2 = vmul.f32 %v14103_v5, %v8341_v16  ;;  %v8397_v45 = vmul.f32 %v14117_v35, %v8356_v8  ;;  %v8401_v5 = vmul.f32 %v14132_v33, %v8376_v37 }
0x1022   : > { %v8131_v61 = vrot.slane %v8103_v29, %v11271_v36  ;;  %v8140_v18 = vrot.slane %v8132_v51, %v11271_v36  ;;  %v8029_v29 = vld [vmem:[%s10948_s10 + $0x107] ss:$0 sm:$0xff]  ;;  %v8386_v51 = vpop.permute.xlu1 %8385 }
0x1023   : > { %v8346_v25 = vpop.permute.xlu0 %8345 }
0x1024   : > { %v8133_v24 = vcombine.high %v8124_v54, %v8131_v61  ;;  %v14185_v59 = vmul.f32 %v14109_v43, %v8346_v25  ;;  %v8398_v54 = vmul.f32 %v14122_v41, %v8361_v1  ;;  %v8399_v61 = vmul.f32 %v14126_v50, %v8366_v14 }
0x1025   : > { %v8403_v43 = vmul.f32 %v10628_v15, %v8386_v51 }
0x1026   : > { %v8147_v48 = vrot.slane %v8133_v24, %v11271_v36  ;;  %v8030_v24 = vld [vmem:[%s10948_s10 + $0x11f] ss:$0 sm:$0xff] }
0x1028   : > { %v8148_v30 = vcombine.low %v8140_v18, %v8147_v48  ;;  %v8031_v18 = vld [vmem:[%s10948_s10 + $0x137] ss:$0 sm:$0xff]  ;;  %v8400_v48 = vmul.f32 %v14128_v19, %v8371_v62 }
0x102a   : > { %v8152_v13 = vmul.f32 %v8148_v30, %v13939_v53  ;;  %v8402_v30 = vmul.f32 %v14134_v42, %v8381_v57 }
0x102c   : > { %9537 = vmatmul.mubr.f32.vlgmr.msra.gmra.mrb[14].mxu1 %v8152_v13  ;;  %v8033_v13 = vld [vmem:[%s10948_s10 + $0x167] ss:$0 sm:$0xff] }
0x10ff   : > { %v9538_v22 = vpop.f32.mrb[14].mxu1 }
0x1100   : > { %v8253_v46 = vrot.slane %v9538_v22, 1  ;;  %v8254_v10 = vrot.slane %v9538_v22, 2  ;;  %v8255_v35 = vrot.slane %v9538_v22, 3  ;;  %v8256_v8 = vrot.slane %v9538_v22, 4  ;;  %v14199_v41 = vpop.f32.mrb[15].mxu1 }
0x1101   : > { %v8257_v50 = vrot.slane %v9538_v22, 5  ;;  %v8258_v1 = vrot.slane %v9538_v22, 6  ;;  %v8259_v28 = vrot.slane %v9538_v22, 7  ;;  %v8284_v40 = vadd.f32 %v9538_v22, %v8027_v26 }
0x1102   : > { %v8285_v14 = vadd.f32 %v8253_v46, %v8028_v3  ;;  %v8286_v19 = vadd.f32 %v8254_v10, %v8029_v29  ;;  %v8287_v58 = vadd.f32 %v8255_v35, %v8030_v24  ;;  %v8288_v33 = vadd.f32 %v8256_v8, %v8031_v18  ;;  %v8020_v8 = vld [vmem:[%s10948_s10 + $0x2f] ss:$0 sm:$0xff] }
0x1103   : > { %v8289_v62 = vadd.f32 %v8257_v50, %v8032_v49  ;;  %v8290_v42 = vadd.f32 %v8258_v1, %v8033_v13  ;;  %v8291_v15 = vadd.f32 %v8259_v28, %v8034_v7  ;;  %v8300_v23 = vmax.f32 %v8284_v40, 0.0  ;;  %v8022_v50 = vld [vmem:[%s10948_s10 + $0x5f] ss:$0 sm:$0xff] }
0x1104   : > { %v8301_v37 = vmax.f32 %v8285_v14, 0.0  ;;  %v8302_v16 = vmax.f32 %v8286_v19, 0.0  ;;  %v8303_v57 = vmax.f32 %v8287_v58, 0.0  ;;  %v8304_v25 = vmax.f32 %v8288_v33, 0.0  ;;  %v8026_v19 = vld [vmem:[%s10948_s10 + $0xbf] ss:$0 sm:$0xff] }
0x1105   : > { %v8305_v51 = vmax.f32 %v8289_v62, 0.0  ;;  %v8306_v0 = vmax.f32 %v8290_v42, 0.0  ;;  %v8307_v55 = vmax.f32 %v8291_v15, 0.0  ;;  %v8442_v6 = vsub.f32 %v8300_v23, %v13939_v53 }
0x1106   : > { %v8443_v26 = vsub.f32 %v8301_v37, %v8411_v63  ;;  %v8444_v3 = vsub.f32 %v8302_v16, %v8412_v20  ;;  %v8445_v29 = vsub.f32 %v8303_v57, %v8413_v44  ;;  %v8446_v24 = vsub.f32 %v8304_v25, %v8414_v39  ;;  %v8019_v44 = vld [vmem:[%s10948_s10 + $0x17] ss:$0 sm:$0xff] }
0x1107   : > { %v8447_v18 = vsub.f32 %v8305_v51, %v8415_v47  ;;  %v8448_v49 = vsub.f32 %v8306_v0, %v8416_v38  ;;  %v8449_v63 = vsub.f32 %v8307_v55, %v8417_v11  ;;  %v8458_v13 = vmul.f32 %v8442_v6, %v8396_v21  ;;  %v8021_v47 = vld [vmem:[%s10948_s10 + $0x47] ss:$0 sm:$0xff]  ;;  %v8023_v21 = vld [vmem:[%s10948_s10 + $0x77] ss:$0 sm:$0xff] }
0x1108   : > { %v8459_v7 = vmul.f32 %v8443_v26, %v8397_v45  ;;  %v8460_v20 = vmul.f32 %v8444_v3, %v8398_v54  ;;  %v8461_v22 = vmul.f32 %v8445_v29, %v8399_v61  ;;  %v8462_v46 = vmul.f32 %v8446_v24, %v8400_v48  ;;  %v8024_v48 = vld [vmem:[%s10948_s10 + $0x8f] ss:$0 sm:$0xff] }
0x1109   : > { %v8463_v10 = vmul.f32 %v8447_v18, %v8401_v5  ;;  %v8464_v35 = vmul.f32 %v8448_v49, %v8402_v30  ;;  %v8465_v39 = vmul.f32 %v8449_v63, %v8403_v43  ;;  %v8246_v38 = vrot.slane %v14199_v41, 1  ;;  %v8025_v43 = vld [vmem:[%s10948_s10 + $0xa7] ss:$0 sm:$0xff]  ;;  %s9112_s10 = sshll.u32 %s10701_s21, 7 }
0x110a   : > { %v8496_v0 = vrot.slane %v8459_v7, 7  ;;  %v8498_v11 = vrot.slane %v8460_v20, 6  ;;  %v8500_v6 = vrot.slane %v8461_v22, 5  ;;  %v8502_v55 = vrot.slane %v8462_v46, 4  ;;  %s14301_s16 = scalar_lea.hbm %s14360_s5, %s9112_s10 }
0x110b   : > { %v8504_v45 = vrot.slane %v8463_v10, 3  ;;  %v8506_v54 = vrot.slane %v8464_v35, 2  ;;  %v8508_v61 = vrot.slane %v8465_v39, 1  ;;  %v8247_v5 = vrot.slane %v14199_v41, 2 }
0x110c   : > { %v8497_v30 = vsel %vm1364_vm0, %v8496_v0, %v8458_v13  ;;  %v8248_v1 = vrot.slane %v14199_v41, 3  ;;  %v8249_v28 = vrot.slane %v14199_v41, 4  ;;  %v8250_v40 = vrot.slane %v14199_v41, 5 }
0x110d   : > { %v8499_v14 = vsel %vm1367_vm1, %v8498_v11, %v8497_v30  ;;  %v8251_v58 = vrot.slane %v14199_v41, 6  ;;  %v8252_v33 = vrot.slane %v14199_v41, 7  ;;  %v8276_v62 = vadd.f32 %v14199_v41, %v8019_v44 }
0x110e   : > { %v8501_v42 = vsel %vm1370_vm2, %v8500_v6, %v8499_v14  ;;  %v8277_v15 = vadd.f32 %v8246_v38, %v8020_v8  ;;  %v8278_v23 = vadd.f32 %v8247_v5, %v8021_v47  ;;  %v8279_v37 = vadd.f32 %v8248_v1, %v8022_v50 }
0x110f   : > { %v8503_v16 = vsel %vm1373_vm3, %v8502_v55, %v8501_v42  ;;  %v8280_v57 = vadd.f32 %v8249_v28, %v8023_v21  ;;  %v8281_v25 = vadd.f32 %v8250_v40, %v8024_v48  ;;  %v8282_v51 = vadd.f32 %v8251_v58, %v8025_v43 }
0x1110   : > { %v8505_v26 = vsel %vm1376_vm4, %v8504_v45, %v8503_v16  ;;  %v8283_v3 = vadd.f32 %v8252_v33, %v8026_v19  ;;  %v8292_v29 = vmax.f32 %v8276_v62, 0.0  ;;  %v8293_v24 = vmax.f32 %v8277_v15, 0.0 }
0x1111   : > { %v8507_v18 = vsel %vm1379_vm5, %v8506_v54, %v8505_v26  ;;  %v8294_v49 = vmax.f32 %v8278_v23, 0.0  ;;  %v8295_v63 = vmax.f32 %v8279_v37, 0.0  ;;  %v8296_v41 = vmax.f32 %v8280_v57, 0.0 }
0x1112   : > { %v8509_v13 = vsel %vm1382_vm6, %v8508_v61, %v8507_v18  ;;  %v8297_v7 = vmax.f32 %v8281_v25, 0.0  ;;  %v8298_v20 = vmax.f32 %v8282_v51, 0.0  ;;  %v8299_v22 = vmax.f32 %v8283_v3, 0.0 }
0x1113   : > { %v8513_v46 = vadd.f32 %v8509_v13, %v13939_v53  ;;  %v8434_v44 = vsub.f32 %v8292_v29, %v13989_v12  ;;  %v8435_v10 = vsub.f32 %v8293_v24, %v8404_v34  ;;  %v8436_v35 = vsub.f32 %v8294_v49, %v8405_v9 }
0x1114   : > { %v8437_v39 = vsub.f32 %v8295_v63, %v8406_v27  ;;  %v8438_v8 = vsub.f32 %v8296_v41, %v8407_v4  ;;  %v14506_v47 = vrot.slane %v13989_v12, 5  ;;  %v14507_v53 = vrot.slane %v13989_v12, 6 }
0x1115   : > { %v8565_v0 = vcombine.high %v8513_v46, %v8513_v46  ;;  %v8572_v11 = vrot.slane %v8513_v46, %v11271_v36  ;;  %8647 = vst [vmem:[#allocation2 + $0x8] sm:$0xff] %v8513_v46  ;;  %v14508_v34 = vrot.slane %v13989_v12, 7  ;;  %v8450_v6 = vmul.f32 %v8434_v44, %v14161_v17 }
0x1116   : > { %v8439_v50 = vsub.f32 %v8297_v7, %v14506_v47  ;;  %v8440_v38 = vsub.f32 %v8298_v20, %v14507_v53  ;;  %v8451_v27 = vmul.f32 %v8435_v10, %v14164_v32  ;;  %v8452_v55 = vmul.f32 %v8436_v35, %v14167_v52 }
0x1117   : > { %v8441_v9 = vsub.f32 %v8299_v22, %v14508_v34  ;;  %v8453_v4 = vmul.f32 %v8437_v39, %v14170_v31  ;;  %v8454_v21 = vmul.f32 %v8438_v8, %v14173_v60  ;;  %v8579_v45 = vrot.slane %v8565_v0, %v11271_v36  ;;  %9107 = vst.sshfl [vmem:[%s10952_s12 + $0x47] sm:$0x1 pattern:$0x73625140] %v8572_v11 }
0x1118   : > { %v8580_v54 = vcombine.high %v8572_v11, %v8572_v11  ;;  %v8588_v61 = vrot.slane %v8572_v11, %v11271_v36  ;;  %v8455_v48 = vmul.f32 %v8439_v50, %v14179_v56  ;;  %v8456_v17 = vmul.f32 %v8440_v38, %v14182_v2 }
0x1119   : > { %v8457_v32 = vmul.f32 %v8441_v9, %v14185_v59  ;;  %v8482_v52 = vrot.slane %v8451_v27, 7  ;;  %v8484_v5 = vrot.slane %v8452_v55, 6  ;;  %v8581_v31 = vcombine.high %v8579_v45, %v8579_v45  ;;  %9109 = vst.sshfl [vmem:[%s10952_s12 + $0x67] sm:$0x1 pattern:$0x73625140] %v8579_v45 }
0x111a   : > { %v8595_v30 = vrot.slane %v8579_v45, %v11271_v36  ;;  %v8602_v60 = vrot.slane %v8580_v54, %v11271_v36  ;;  %v8610_v43 = vcombine.high %v8588_v61, %v8588_v61  ;;  %9108 = vst.sshfl [vmem:[%s10952_s12 + $0x4f] sm:$0x1 pattern:$0x73625140] %v8580_v54  ;;  %v8486_v1 = vrot.slane %v8453_v4, 5 }
0x111b   : > { %v8483_v56 = vsel %vm1364_vm0, %v8482_v52, %v8450_v6  ;;  %v8488_v2 = vrot.slane %v8454_v21, 4  ;;  %v8609_v59 = vrot.slane %v8581_v31, %v11271_v36  ;;  %9110 = vst.sshfl [vmem:[%s10952_s12 + $0x6f] sm:$0x1 pattern:$0x73625140] %v8581_v31  ;;  %v8490_v58 = vrot.slane %v8455_v48, 3 }
0x111c   : > { %v8611_v28 = vcombine.high %v8595_v30, %v8595_v30  ;;  %v8612_v40 = vcombine.high %v8602_v60, %v8602_v60  ;;  %8640 = vst [vmem:[%s10952_s12 + $0x57] sm:$0x1] %v8610_v43  ;;  %v8485_v14 = vsel %vm1367_vm1, %v8484_v5, %v8483_v56  ;;  %v8492_v42 = vrot.slane %v8456_v17, 2 }
0x111d   : > { %v8487_v19 = vsel %vm1370_vm2, %v8486_v1, %v8485_v14  ;;  %v8613_v33 = vcombine.high %v8609_v59, %v8609_v59  ;;  %v8494_v23 = vrot.slane %v8457_v32, 1 }
0x111e   : > { %8641 = vst [vmem:[%s10952_s12 + $0x5f] sm:$0x1] %v8612_v40  ;;  %8644 = vst [vmem:[%s10952_s12 + $0x77] sm:$0x1] %v8611_v28  ;;  %v8489_v62 = vsel %vm1373_vm3, %v8488_v2, %v8487_v19 }
0x111f   : > { %v8491_v15 = vsel %vm1376_vm4, %v8490_v58, %v8489_v62  ;;  %8645 = vst [vmem:[%s10952_s12 + $0x7f] sm:$0x1] %v8613_v33 }
0x1120   : > { %v8493_v37 = vsel %vm1379_vm5, %v8492_v42, %v8491_v15 }
0x1121   : > { %v8495_v16 = vsel %vm1382_vm6, %v8494_v23, %v8493_v37 }
0x1122   : > { %v8512_v57 = vadd.f32 %v8495_v16, %v13989_v12 }
0x1124   : > { %v8516_v25 = vcombine.high %v8512_v57, %v8512_v57  ;;  %v8523_v51 = vrot.slane %v8512_v57, %v11271_v36  ;;  %8646 = vst [vmem:[#allocation2] sm:$0xff] %v8512_v57 }
0x1126   : > { %v8530_v26 = vrot.slane %v8516_v25, %v11271_v36  ;;  %v8531_v3 = vcombine.high %v8523_v51, %v8523_v51  ;;  %v8539_v29 = vrot.slane %v8523_v51, %v11271_v36  ;;  %9103 = vst.sshfl [vmem:[%s10952_s12 + $0x7] sm:$0x1 pattern:$0x73625140] %v8523_v51 }
0x1128   : > { %v8532_v24 = vcombine.high %v8530_v26, %v8530_v26  ;;  %v8546_v18 = vrot.slane %v8530_v26, %v11271_v36  ;;  %v8553_v12 = vrot.slane %v8531_v3, %v11271_v36  ;;  %v8561_v49 = vcombine.high %v8539_v29, %v8539_v29  ;;  %9104 = vst.sshfl [vmem:[%s10952_s12 + $0xf] sm:$0x1 pattern:$0x73625140] %v8531_v3 }
0x1129   : > { %9105 = vst.sshfl [vmem:[%s10952_s12 + $0x27] sm:$0x1 pattern:$0x73625140] %v8530_v26 }
0x112a   : > { %v8560_v63 = vrot.slane %v8532_v24, %v11271_v36  ;;  %v8562_v41 = vcombine.high %v8546_v18, %v8546_v18  ;;  %v8563_v13 = vcombine.high %v8553_v12, %v8553_v12  ;;  %8632 = vst [vmem:[%s10952_s12 + $0x17] sm:$0x1] %v8561_v49  ;;  %9106 = vst.sshfl [vmem:[%s10952_s12 + $0x2f] sm:$0x1 pattern:$0x73625140] %v8532_v24 }
0x112c   : > { %v8564_v7 = vcombine.high %v8560_v63, %v8560_v63  ;;  %8633 = vst [vmem:[%s10952_s12 + $0x1f] sm:$0x1] %v8563_v13  ;;  %8636 = vst [vmem:[%s10952_s12 + $0x37] sm:$0x1] %v8562_v41 }
0x112e   : > { %8637 = vst [vmem:[%s10952_s12 + $0x3f] sm:$0x1] %v8564_v7 }
0x112f   : > { %10644 = shalt.err (!%p10641_p8)
}
0x1130   : > { %s10645_s12 = scalar_lea.hbm %s14301_s16, 2048  ;;  %s10649_s9 = scalar_lea.hbm %s14360_s5, 4096 }
0x1131   : > { %p10646_p11 = scmp.ne.s32.totalorder %s14301_s16, %s10645_s12  ;;  %p10650_p0 = scmp.lt.u32.totalorder %s14301_s16, %s14360_s5 }
0x1132   : > { %p10651_p1 = scmp.lt.u32.totalorder %s10649_s9, %s10645_s12  ;;  %p10653_p3 = scmp.lt.u32.totalorder %s10645_s12, %s14301_s16 }
0x1133   : > { %p10647_p12 = pnand %p10646_p11, %p10791_p5 }
0x1134   : > { %p10652_p2 = por %p10651_p1, %p10650_p0 }
0x1135   : > { %p10648_p13 = pneg %p10647_p12 }
0x1136   : > { %p10654_p4 = por %p10653_p3, %p10652_p2 }
0x1138   : > { %p10655_p6 = pnand %p10654_p4, %p10648_p13 }
0x113a   : > { %10658 = shalt.err (!%p10655_p6)
}
0x113b   : > { %s10715_s21 = smov 128   ;;  %s10716_s15 = smov 256  }
0x113c   : > { %s10717_s17 = smov 8  }
0x113d   : > { %10054 = dma.vmem_to_hbm [thread:$0]  (%p10791_p5), %s14303_s14, 2048, %s14301_s16, %s8649_s11, %s10715_s21, %s10716_s15, %s10717_s17  }
0x113e PF: > { %s8679_s24 = sand.u32 1, %s10689_s18   ;;  %p10057_p7 = pnand %p8784_p10, %p10802_p9 }
0x113f   : > { %s8680_s25 = scalar_lea.sflag [#allocation6], %s8679_s24 }
0x1140   : > { %10684 = dma.done.wait (!%p10057_p7), %s8680_s25, 2048  }
0x1141   : > { %10686 = vsyncadd (!%p10057_p7), %s8680_s25, 4294965248  ;;  %s18_s23 = sadd.s32 1, %s10709_s23   ;;  %s14509_s18 = smov %s10693_s19 }
0x1142   : > { %p15_p8 = scmp.ge.s32.totalorder %s18_s23, 4   ;;  %s14510_s19 = smov %s10697_s20 }
0x1143   : > { %s14511_s20 = smov %s10800_s6  ;;  %s14512_s21 = smov %s10705_s22 }
0x1144   : > { %s14513_s22 = smov %s14515_s26  ;;  %17 = sbr.rel (!%p15_p8) target bundleno = 4 (0x4), region = 283 }
0x114b   :  { %8685 = vsyncpa [#allocation6], 1 }
0x114c   :  { %8687 = vsyncpa [#allocation6 + $0x1], 1 }

</bundles_post_ra>
